<compile_context>
chip_gen: v7x
topology: tpu7x:2x2x1
jax: 0.10.0
libtpu: 0.0.40
codegen_flags: <defaults>
</compile_context>

<pallas_src>
import math
import numpy as np
import jax
import jax.numpy as jnp
from jax.experimental import pallas as pl
from jax.experimental.pallas import tpu as pltpu

V_JOINTS = 17
BN_EPS = 1e-5


# ----------------------------------------------------------------------------
# Pallas kernel.
#   x_ref  : (TILE, V*Cin)   activation rows (one row per (n, t) position)
#   w1_ref : (V*Cin, V*Cout) fused Shift_gcn (shift_in.mask.linear.shift_out.bn1 + down)
#   wt_ref : (Cout, Cout)    fused Shift_tcn temporal 1x1 conv (pre-BN folded in)
#   wr_ref : (Cin, Cout)     residual 1x1 conv + BN (only in "conv" mode)
#   vec_ref: (V+4, Cout)     rows 0..V-1 = per-joint gcn bias, V = tcn bias,
#                            V+1 = bn2 scale (unused if folded), V+2 = bn2 shift,
#                            V+3 = residual bias
#   o_ref  : (TILE, V*Cout)
# ----------------------------------------------------------------------------
def _make_kernel(mode, fold_s2, v, c_in, c_out):
    def kernel(*refs):
        if mode == "conv":
            x_ref, w1_ref, wt_ref, wr_ref, vec_ref, o_ref = refs
        else:
            x_ref, w1_ref, wt_ref, vec_ref, o_ref = refs

        x = x_ref[...]                               # (TILE, V*Cin), compute dtype
        wt = wt_ref[...]                             # (Cout, Cout)
        bt = vec_ref[v:v + 1, :]                     # (1, Cout) f32
        c2 = vec_ref[v + 2:v + 3, :]
        if not fold_s2:
            s2 = vec_ref[v + 1:v + 2, :]
        if mode == "conv":
            wr = wr_ref[...]
            br = vec_ref[v + 3:v + 4, :]

        for j in range(v):                           # static unroll over 17 joints
            # --- Shift_gcn (dense fused shift_in.mask.linear.shift_out.bn1 + down) ---
            w1_j = w1_ref[:, j * c_out:(j + 1) * c_out]        # (V*Cin, Cout)
            g = jnp.dot(x, w1_j, preferred_element_type=jnp.float32)
            g = jnp.maximum(g + vec_ref[j:j + 1, :], 0.0)      # (TILE, Cout), f32

            # --- Shift_tcn: per-joint temporal 1x1 conv (pre/post BN folded) ---
            h = jnp.dot(g.astype(x.dtype), wt, preferred_element_type=jnp.float32)
            h = jnp.maximum(h + bt, 0.0)
            if not fold_s2:
                h = h * s2
            h = h + c2

            # --- unit residual + final ReLU ---
            if mode == "identity":
                r = x_ref[:, j * c_in:(j + 1) * c_in].astype(jnp.float32)
                o = jnp.maximum(h + r, 0.0)
            elif mode == "conv":
                xj = x_ref[:, j * c_in:(j + 1) * c_in]
                r = jnp.dot(xj, wr, preferred_element_type=jnp.float32) + br
                o = jnp.maximum(h + r, 0.0)
            else:                                    # no residual
                o = jnp.maximum(h, 0.0)
            o_ref[:, j * c_out:(j + 1) * c_out] = o.astype(o_ref.dtype)

    return kernel


# ----------------------------------------------------------------------------
# Parameter folding (eval-mode BatchNorms, running stats).  Call ONCE per
# parameter set and reuse the result for every forward pass.
# ----------------------------------------------------------------------------
def _bn_fold(gamma, beta, mean, var):
    s = gamma / jnp.sqrt(var + BN_EPS)
    return s, beta - mean * s


def fold_unit_params(p, c_in, c_out, residual=True, compute_dtype=jnp.float32):
    """Fold the whole unit into: dense W1 (gcn), per-joint Wt (tcn), per-joint Wr
    (residual) and packed bias/BN vectors.

    TODO(synk): for c_in/c_out >= 256 (v7x, 64 MiB VMEM) W1 should itself be
    decomposed (wrapper-side shift gathers + shared per-joint W_g matmul).
    """
    f32 = jnp.float32
    V = V_JOINTS

    # spatial shift index arrays, exactly as built in the PyTorch module
    shift_in = jnp.asarray(
        [(i * c_in + j + j * c_in) % (c_in * V) for i in range(V) for j in range(c_in)])
    shift_out = jnp.asarray(
        [(i * c_out + j - j * c_out) % (c_out * V) for i in range(V) for j in range(c_out)])

    gate = jnp.tanh(p["fmask"]) + 1.0                          # (V, Cin)
    bn1s, bn1b = _bn_fold(p["bn1_gamma"], p["bn1_beta"], p["bn1_mean"], p["bn1_var"])

    if c_in != c_out:
        ds, db = _bn_fold(p["dbn_gamma"], p["dbn_beta"], p["dbn_mean"], p["dbn_var"])
        Wd = p["W_down"] * ds[None, :]
        bd = p["b_down"] * ds + db
    else:
        Wd = bd = None

    def gcn_affine(xf):                                        # (B, V*Cin) -> (B, V*Cout)
        B = xf.shape[0]
        xs = jnp.take(xf, shift_in, axis=1).reshape(B, V, c_in) * gate[None]
        y = jnp.einsum("bvc,cd->bvd", xs, p["W_g"]) + p["b_g"][None, None, :]
        yf = jnp.take(y.reshape(B, V * c_out), shift_out, axis=1)
        yf = yf * bn1s[None, :] + bn1b[None, :]
        if c_in != c_out:
            down = jnp.einsum("bvc,cd->bvd", xf.reshape(B, V, c_in), Wd) + bd[None, None, :]
            yf = yf + down.reshape(B, V * c_out)
        else:
            yf = yf + xf                                       # identity down branch
        return yf

    # The gcn branch is affine in x; extract (W1, b1) by probing it.
    b1_flat = gcn_affine(jnp.zeros((1, V * c_in), f32))        # (1, V*Cout)
    W1 = gcn_affine(jnp.eye(V * c_in, dtype=f32)) - b1_flat    # (V*Cin, V*Cout)
    b1 = b1_flat.reshape(V, c_out)                             # per-joint gcn bias

    # ---- Shift_tcn ----
    # TODO(synk): the CUDA adaptive temporal `Shift` ops are identity at their
    # zero init and are omitted here (not valid for trained non-zero shifts).
    tbns, tbnb = _bn_fold(p["tbn_gamma"], p["tbn_beta"], p["tbn_mean"], p["tbn_var"])
    Wt_eff = tbns[:, None] * p["W_t"]                          # (Cout, Cout)
    bt_eff = tbnb @ p["W_t"] + p["b_t"]                        # (Cout,)
    bn2s, bn2b = _bn_fold(p["bn2_gamma"], p["bn2_beta"], p["bn2_mean"], p["bn2_var"])

    # relu(y) * s == relu(y * s) only if s > 0; fold bn2 scale into Wt when safe.
    try:
        fold_s2 = bool(np.all(np.asarray(bn2s) > 0.0))
    except Exception:                                          # tracers -> keep general path
        fold_s2 = False
    if fold_s2:
        Wt_eff = Wt_eff * bn2s[None, :]
        bt_eff = bt_eff * bn2s
        s2_row = jnp.ones((c_out,), f32)
    else:
        s2_row = bn2s
    c2_row = bn2b

    # ---- residual branch ----
    if not residual:
        mode, Wr, br_row = "none", None, jnp.zeros((c_out,), f32)
    elif c_in == c_out:
        mode, Wr, br_row = "identity", None, jnp.zeros((c_out,), f32)
    else:
        rs, rb = _bn_fold(p["rbn_gamma"], p["rbn_beta"], p["rbn_mean"], p["rbn_var"])
        Wr = p["W_res"] * rs[None, :]                          # (Cin, Cout)
        br_row = p["b_res"] * rs + rb
        mode = "conv"

    vecs = jnp.concatenate(
        [b1, bt_eff[None, :], s2_row[None, :], c2_row[None, :], br_row[None, :]],
        axis=0).astype(f32)                                    # (V+4, Cout)

    return dict(mode=mode, fold_s2=fold_s2, c_in=c_in, c_out=c_out,
                W1=W1.astype(compute_dtype), Wt=Wt_eff.astype(compute_dtype),
                Wr=None if Wr is None else Wr.astype(compute_dtype),
                vecs=vecs)


# ----------------------------------------------------------------------------
# Forward pass.
# ----------------------------------------------------------------------------
def _choose_tile(nt, tile_rows):
    if nt <= 16:
        return nt                                   # single full block
    half = -(-nt // 2)                              # cap so grid >= 2 steps (v7x megacore)
    cap = ((half + 15) // 16) * 16
    tile = min(tile_rows, cap, (nt // 8) * 8)
    return max(tile, 8)


def tcn_gcn_unit_apply_rows(x_rows, folded, *, tile_rows=512, out_dtype=jnp.float32,
                            vmem_limit_bytes=None):
    """Rows-level entry point: x_rows is (N*T, V*Cin), returns (N*T, V*Cout).

    Stacked units should call this directly (keeping the rows layout) to avoid
    an NCHW<->rows transpose (a full HBM round trip) between every unit.
    """
    assert tile_rows >= 8 and tile_rows % 8 == 0
    V = V_JOINTS
    c_in, c_out, mode = folded["c_in"], folded["c_out"], folded["mode"]
    W1, Wt, Wr, vecs = folded["W1"], folded["Wt"], folded["Wr"], folded["vecs"]

    NT, F = x_rows.shape
    assert F == V * c_in
    x_rows = x_rows.astype(W1.dtype)

    TILE = _choose_tile(NT, tile_rows)
    grid = (pl.cdiv(NT, TILE),)

    args = [x_rows, W1, Wt] + ([Wr] if mode == "conv" else []) + [vecs]
    kernel = _make_kernel(mode, folded["fold_s2"], V, c_in, c_out)

    # VMEM budget: double-buffered activation/output tiles + (at most double-
    # buffered) constant weights, with slack for compiler scratch.
    weight_bytes = sum(int(a.size) * a.dtype.itemsize for a in args[1:])
    act_bytes = 2 * TILE * (V * c_in * x_rows.dtype.itemsize +
                            V * c_out * jnp.dtype(out_dtype).itemsize)
    need = act_bytes + 2 * weight_bytes + (4 << 20)
    vmem_limit = vmem_limit_bytes or int(min(max(need, 8 << 20), 60 << 20))

    last_err = None
    for single_buffer in (True, False):          # prefer single-buffered constants
        try:
            extra = dict(pipeline_mode=pl.Buffered(1)) if single_buffer else {}

            def const(shape):
                return pl.BlockSpec(shape, lambda i: (0, 0), **extra)

            in_specs = [pl.BlockSpec((TILE, V * c_in), lambda i: (i, 0)),
                        const((V * c_in, V * c_out)),
                        const((c_out, c_out))]
            if mode == "conv":
                in_specs.append(const((c_in, c_out)))
            in_specs.append(const((V + 4, c_out)))

            return pl.pallas_call(
                kernel,
                out_shape=jax.ShapeDtypeStruct((NT, V * c_out), out_dtype),
                grid=grid,
                in_specs=in_specs,
                out_specs=pl.BlockSpec((TILE, V * c_out), lambda i: (i, 0)),
                compiler_params=pltpu.CompilerParams(
                    dimension_semantics=("parallel",),
                    vmem_limit_bytes=vmem_limit),
            )(*args)
        except Exception as e:                   # fall back to default double buffering
            last_err = e
    raise last_err


def tcn_gcn_unit_forward(x_nchw, folded, *, stride=1, tile_rows=512,
                         out_dtype=jnp.float32, vmem_limit_bytes=None):
    """NCHW-compatible wrapper (matches the PyTorch module's (N, C, T, V) API)."""
    if stride != 1:
        # TODO(synk): stride>1 subsamples time inside the CUDA Shift op; unsupported here.
        raise NotImplementedError("kernel supports stride=1 only")
    N, C, T, V = x_nchw.shape
    assert V == V_JOINTS and C == folded["c_in"]
    x_rows = jnp.transpose(x_nchw, (0, 2, 3, 1)).reshape(N * T, V * C)
    out_rows = tcn_gcn_unit_apply_rows(x_rows, folded, tile_rows=tile_rows,
                                       out_dtype=out_dtype,
                                       vmem_limit_bytes=vmem_limit_bytes)
    return out_rows.reshape(N, T, V, folded["c_out"]).transpose(0, 3, 1, 2)


# ----------------------------------------------------------------------------
# Deterministic synthetic parameters (shapes per the module __init__).
# ----------------------------------------------------------------------------
def init_params(key, c_in, c_out, v=V_JOINTS):
    keys = iter(jax.random.split(key, 40))
    f32 = jnp.float32

    def nrm(shape, scale=1.0):
        return scale * jax.random.normal(next(keys), shape, dtype=f32)

    p = {}

    def add_bn(prefix, n):
        p[prefix + "_gamma"] = 1.0 + nrm((n,), 0.1)
        p[prefix + "_beta"] = nrm((n,), 0.1)
        p[prefix + "_mean"] = nrm((n,), 0.1)
        p[prefix + "_var"] = 1.0 + 0.25 * jnp.abs(nrm((n,)))

    # Shift_gcn
    p["W_g"] = nrm((c_in, c_out), math.sqrt(1.0 / c_out))      # Linear_weight (in, out)
    p["b_g"] = nrm((c_out,), 0.1)                              # Linear_bias
    p["fmask"] = nrm((v, c_in), 0.5)                           # Feature_Mask
    add_bn("bn1", v * c_out)                                   # BatchNorm1d(17*out)
    p["W_down"] = nrm((c_in, c_out), math.sqrt(2.0 / c_out))   # down 1x1 conv
    p["b_down"] = nrm((c_out,), 0.1)
    add_bn("dbn", c_out)
    # Shift_tcn
    add_bn("tbn", c_out)                                       # bn (pre)
    p["W_t"] = nrm((c_out, c_out), math.sqrt(2.0 / c_out))     # temporal_linear 1x1 conv
    p["b_t"] = nrm((c_out,), 0.1)
    add_bn("bn2", c_out)                                       # bn2 (post)
    # residual tcn branch
    p["W_res"] = nrm((c_in, c_out), math.sqrt(2.0 / c_out))
    p["b_res"] = nrm((c_out,), 0.1)
    add_bn("rbn", c_out)
    return p


# ----------------------------------------------------------------------------
# Pure-JAX reference following the PyTorch forward (eval-mode BN, identity
# temporal Shift) — used to validate the Pallas kernel.
# ----------------------------------------------------------------------------
def reference_forward(x0, p, *, residual=True):
    n, c, t, v = x0.shape
    d = p["W_g"].shape[1]

    def bn2d(x, g, b, m, vv):
        return (x - m[None, :, None, None]) / jnp.sqrt(vv[None, :, None, None] + BN_EPS) \
            * g[None, :, None, None] + b[None, :, None, None]

    shift_in = np.array([(i * c + j + j * c) % (c * v) for i in range(v) for j in range(c)])
    shift_out = np.array([(i * d + j - j * d) % (d * v) for i in range(v) for j in range(d)])

    # ---- Shift_gcn ----
    x = jnp.transpose(x0, (0, 2, 3, 1)).reshape(n * t, v * c)
    x = x[:, shift_in]
    x = x.reshape(n * t, v, c)
    x = x * (jnp.tanh(p["fmask"])[None] + 1.0)
    x = jnp.einsum("nwc,cd->nwd", x, p["W_g"]) + p["b_g"][None, None, :]
    x = x.reshape(n * t, v * d)
    x = x[:, shift_out]
    x = (x - p["bn1_mean"]) / jnp.sqrt(p["bn1_var"] + BN_EPS) * p["bn1_gamma"] + p["bn1_beta"]
    x = x.reshape(n, t, v, d).transpose(0, 3, 1, 2)
    if c != d:
        down = jnp.einsum("nctv,cd->ndtv", x0, p["W_down"]) + p["b_down"][None, :, None, None]
        down = bn2d(down, p["dbn_gamma"], p["dbn_beta"], p["dbn_mean"], p["dbn_var"])
    else:
        down = x0
    gcn = jax.nn.relu(x + down)

    # ---- Shift_tcn (temporal Shift ops are identity at zero init) ----
    h = bn2d(gcn, p["tbn_gamma"], p["tbn_beta"], p["tbn_mean"], p["tbn_var"])
    h = jnp.einsum("nctv,cd->ndtv", h, p["W_t"]) + p["b_t"][None, :, None, None]
    h = jax.nn.relu(h)
    h = bn2d(h, p["bn2_gamma"], p["bn2_beta"], p["bn2_mean"], p["bn2_var"])

    # ---- residual ----
    if not residual:
        r = 0.0
    elif c == d:
        r = x0
    else:
        r = jnp.einsum("nctv,cd->ndtv", x0, p["W_res"]) + p["b_res"][None, :, None, None]
        r = bn2d(r, p["rbn_gamma"], p["rbn_beta"], p["rbn_mean"], p["rbn_var"])
    return jax.nn.relu(h + r)


if __name__ == "__main__":
    N, Cin, Cout, T, V = 2, 4, 8, 16, V_JOINTS
    key = jax.random.PRNGKey(0)
    kx, kp, kp2 = jax.random.split(key, 3)
    x = jax.random.normal(kx, (N, Cin, T, V), dtype=jnp.float32)
    params = init_params(kp, Cin, Cout)
    ref = reference_forward(x, params, residual=True)

    # fold once, reuse (hoisted out of the per-forward path)
    folded = fold_unit_params(params, Cin, Cout, residual=True)

    # conv-residual unit, default tiling (>=2 grid steps)
    out = jax.block_until_ready(tcn_gcn_unit_forward(x, folded))
    assert out.shape == (N, Cout, T, V)
    np.testing.assert_allclose(np.asarray(out), np.asarray(ref), rtol=1e-2, atol=1e-2)

    # multi-step grid path (exercises the pipelined block indexing)
    out2 = jax.block_until_ready(tcn_gcn_unit_forward(x, folded, tile_rows=8))
    np.testing.assert_allclose(np.asarray(out2), np.asarray(ref), rtol=1e-2, atol=1e-2)

    # bf16 MXU-input path (v6e/v7x): f32 accumulation, f32 epilogue
    folded_bf16 = fold_unit_params(params, Cin, Cout, residual=True,
                                   compute_dtype=jnp.bfloat16)
    out_bf = jax.block_until_ready(tcn_gcn_unit_forward(x, folded_bf16))
    np.testing.assert_allclose(np.asarray(out_bf), np.asarray(ref), rtol=1e-1, atol=1e-1)

    # identity-residual unit (Cin == Cout)
    params_id = init_params(kp2, Cout, Cout)
    x_id = jax.random.normal(jax.random.PRNGKey(1), (N, Cout, T, V), dtype=jnp.float32)
    ref_id = reference_forward(x_id, params_id, residual=True)
    folded_id = fold_unit_params(params_id, Cout, Cout, residual=True)
    out_id = jax.block_until_ready(tcn_gcn_unit_forward(x_id, folded_id))
    np.testing.assert_allclose(np.asarray(out_id), np.asarray(ref_id), rtol=1e-2, atol=1e-2)

    print("KERNEL_OK")
</pallas_src>

<mosaic_0001>
module attributes {stable_mosaic.version = 11 : i64} {
  func.func @kernel(%arg0: i32, %arg1: memref<16x68xf32, #tpu.memory_space<vmem>>, %arg2: memref<68x136xf32, #tpu.memory_space<vmem>>, %arg3: memref<8x8xf32, #tpu.memory_space<vmem>>, %arg4: memref<4x8xf32, #tpu.memory_space<vmem>>, %arg5: memref<21x8xf32, #tpu.memory_space<vmem>>, %arg6: memref<16x136xf32, #tpu.memory_space<vmem>>) attributes {dimension_semantics = [#tpu.dimension_semantics<parallel>], iteration_bounds = array<i64: 2>, scalar_prefetch = 0 : i64, scratch_operands = 0 : i64, tpu.core_type = #tpu.core_type<tc>, window_params = [{transform_indices = @transform_0, window_bounds = array<i64: 16, 68>}, {pipeline_mode = #tpu.pipeline_mode<synchronous>, transform_indices = @transform_1, window_bounds = array<i64: 68, 136>}, {pipeline_mode = #tpu.pipeline_mode<synchronous>, transform_indices = @transform_2, window_bounds = array<i64: 8, 8>}, {pipeline_mode = #tpu.pipeline_mode<synchronous>, transform_indices = @transform_3, window_bounds = array<i64: 4, 8>}, {pipeline_mode = #tpu.pipeline_mode<synchronous>, transform_indices = @transform_4, window_bounds = array<i64: 21, 8>}, {transform_indices = @transform_5, window_bounds = array<i64: 16, 136>}]} {
    %c0 = arith.constant 0 : index
    %c0_0 = arith.constant 0 : index
    %0 = vector.load %arg1[%c0, %c0_0] : memref<16x68xf32, #tpu.memory_space<vmem>>, vector<16x68xf32>
    %c0_1 = arith.constant 0 : index
    %c0_2 = arith.constant 0 : index
    %1 = vector.load %arg3[%c0_1, %c0_2] : memref<8x8xf32, #tpu.memory_space<vmem>>, vector<8x8xf32>
    %c17 = arith.constant 17 : index
    %c0_3 = arith.constant 0 : index
    %2 = vector.load %arg5[%c17, %c0_3] : memref<21x8xf32, #tpu.memory_space<vmem>>, vector<1x8xf32>
    %c19 = arith.constant 19 : index
    %c0_4 = arith.constant 0 : index
    %3 = vector.load %arg5[%c19, %c0_4] : memref<21x8xf32, #tpu.memory_space<vmem>>, vector<1x8xf32>
    %c0_5 = arith.constant 0 : index
    %c0_6 = arith.constant 0 : index
    %4 = vector.load %arg4[%c0_5, %c0_6] : memref<4x8xf32, #tpu.memory_space<vmem>>, vector<4x8xf32>
    %c20 = arith.constant 20 : index
    %c0_7 = arith.constant 0 : index
    %5 = vector.load %arg5[%c20, %c0_7] : memref<21x8xf32, #tpu.memory_space<vmem>>, vector<1x8xf32>
    %c0_8 = arith.constant 0 : index
    %c0_9 = arith.constant 0 : index
    %6 = vector.load %arg2[%c0_8, %c0_9] : memref<68x136xf32, #tpu.memory_space<vmem>>, vector<68x8xf32>
    %cst = arith.constant dense<0.000000e+00> : vector<16x8xf32>
    %7 = tpu.matmul %0, %6, %cst {dimension_numbers = #tpu.dot_dimension_numbers<[1], [0], [0], [1], [0, 0, 1, 1], [], []>} : vector<16x68xf32>, vector<68x8xf32>, vector<16x8xf32> -> vector<16x8xf32>
    %c0_10 = arith.constant 0 : index
    %c0_11 = arith.constant 0 : index
    %8 = vector.load %arg5[%c0_10, %c0_11] : memref<21x8xf32, #tpu.memory_space<vmem>>, vector<1x8xf32>
    %9 = vector.broadcast %8 : vector<1x8xf32> to vector<16x8xf32>
    %10 = arith.addf %7, %9 : vector<16x8xf32>
    %cst_12 = arith.constant 0.000000e+00 : f32
    %11 = vector.broadcast %cst_12 : f32 to vector<16x8xf32>
    %12 = arith.maximumf %10, %11 : vector<16x8xf32>
    %cst_13 = arith.constant dense<0.000000e+00> : vector<16x8xf32>
    %13 = tpu.matmul %12, %1, %cst_13 {dimension_numbers = #tpu.dot_dimension_numbers<[1], [0], [0], [1], [0, 0, 1, 1], [], []>} : vector<16x8xf32>, vector<8x8xf32>, vector<16x8xf32> -> vector<16x8xf32>
    %14 = vector.broadcast %2 : vector<1x8xf32> to vector<16x8xf32>
    %15 = arith.addf %13, %14 : vector<16x8xf32>
    %cst_14 = arith.constant 0.000000e+00 : f32
    %16 = vector.broadcast %cst_14 : f32 to vector<16x8xf32>
    %17 = arith.maximumf %15, %16 : vector<16x8xf32>
    %18 = vector.broadcast %3 : vector<1x8xf32> to vector<16x8xf32>
    %19 = arith.addf %17, %18 : vector<16x8xf32>
    %c0_15 = arith.constant 0 : index
    %c0_16 = arith.constant 0 : index
    %20 = vector.load %arg1[%c0_15, %c0_16] : memref<16x68xf32, #tpu.memory_space<vmem>>, vector<16x4xf32>
    %cst_17 = arith.constant dense<0.000000e+00> : vector<16x8xf32>
    %21 = tpu.matmul %20, %4, %cst_17 {dimension_numbers = #tpu.dot_dimension_numbers<[1], [0], [0], [1], [0, 0, 1, 1], [], []>} : vector<16x4xf32>, vector<4x8xf32>, vector<16x8xf32> -> vector<16x8xf32>
    %22 = vector.broadcast %5 : vector<1x8xf32> to vector<16x8xf32>
    %23 = arith.addf %21, %22 : vector<16x8xf32>
    %24 = arith.addf %19, %23 : vector<16x8xf32>
    %cst_18 = arith.constant 0.000000e+00 : f32
    %25 = vector.broadcast %cst_18 : f32 to vector<16x8xf32>
    %26 = arith.maximumf %24, %25 : vector<16x8xf32>
    %c0_19 = arith.constant 0 : index
    %c0_20 = arith.constant 0 : index
    %27 = vector.load %arg6[%c0_19, %c0_20] : memref<16x136xf32, #tpu.memory_space<vmem>>, vector<16x8xf32>
    tpu.vector_store %arg6[%c0_19, %c0_20], %26 {strides = array<i32>} : memref<16x136xf32, #tpu.memory_space<vmem>>, vector<16x8xf32>,
    %c0_21 = arith.constant 0 : index
    %c8 = arith.constant 8 : index
    %28 = vector.load %arg2[%c0_21, %c8] : memref<68x136xf32, #tpu.memory_space<vmem>>, vector<68x8xf32>
    %cst_22 = arith.constant dense<0.000000e+00> : vector<16x8xf32>
    %29 = tpu.matmul %0, %28, %cst_22 {dimension_numbers = #tpu.dot_dimension_numbers<[1], [0], [0], [1], [0, 0, 1, 1], [], []>} : vector<16x68xf32>, vector<68x8xf32>, vector<16x8xf32> -> vector<16x8xf32>
    %c1 = arith.constant 1 : index
    %c0_23 = arith.constant 0 : index
    %30 = vector.load %arg5[%c1, %c0_23] : memref<21x8xf32, #tpu.memory_space<vmem>>, vector<1x8xf32>
    %31 = vector.broadcast %30 : vector<1x8xf32> to vector<16x8xf32>
    %32 = arith.addf %29, %31 : vector<16x8xf32>
    %cst_24 = arith.constant 0.000000e+00 : f32
    %33 = vector.broadcast %cst_24 : f32 to vector<16x8xf32>
    %34 = arith.maximumf %32, %33 : vector<16x8xf32>
    %cst_25 = arith.constant dense<0.000000e+00> : vector<16x8xf32>
    %35 = tpu.matmul %34, %1, %cst_25 {dimension_numbers = #tpu.dot_dimension_numbers<[1], [0], [0], [1], [0, 0, 1, 1], [], []>} : vector<16x8xf32>, vector<8x8xf32>, vector<16x8xf32> -> vector<16x8xf32>
    %36 = vector.broadcast %2 : vector<1x8xf32> to vector<16x8xf32>
    %37 = arith.addf %35, %36 : vector<16x8xf32>
    %cst_26 = arith.constant 0.000000e+00 : f32
    %38 = vector.broadcast %cst_26 : f32 to vector<16x8xf32>
    %39 = arith.maximumf %37, %38 : vector<16x8xf32>
    %40 = vector.broadcast %3 : vector<1x8xf32> to vector<16x8xf32>
    %41 = arith.addf %39, %40 : vector<16x8xf32>
    %c0_27 = arith.constant 0 : index
    %c4 = arith.constant 4 : index
    %42 = vector.load %arg1[%c0_27, %c4] : memref<16x68xf32, #tpu.memory_space<vmem>>, vector<16x4xf32>
    %cst_28 = arith.constant dense<0.000000e+00> : vector<16x8xf32>
    %43 = tpu.matmul %42, %4, %cst_28 {dimension_numbers = #tpu.dot_dimension_numbers<[1], [0], [0], [1], [0, 0, 1, 1], [], []>} : vector<16x4xf32>, vector<4x8xf32>, vector<16x8xf32> -> vector<16x8xf32>
    %44 = vector.broadcast %5 : vector<1x8xf32> to vector<16x8xf32>
    %45 = arith.addf %43, %44 : vector<16x8xf32>
    %46 = arith.addf %41, %45 : vector<16x8xf32>
    %cst_29 = arith.constant 0.000000e+00 : f32
    %47 = vector.broadcast %cst_29 : f32 to vector<16x8xf32>
    %48 = arith.maximumf %46, %47 : vector<16x8xf32>
    %c0_30 = arith.constant 0 : index
    %c8_31 = arith.constant 8 : index
    %49 = vector.load %arg6[%c0_30, %c8_31] : memref<16x136xf32, #tpu.memory_space<vmem>>, vector<16x8xf32>
    tpu.vector_store %arg6[%c0_30, %c8_31], %48 {strides = array<i32>} : memref<16x136xf32, #tpu.memory_space<vmem>>, vector<16x8xf32>,
    %c0_32 = arith.constant 0 : index
    %c16 = arith.constant 16 : index
    %50 = vector.load %arg2[%c0_32, %c16] : memref<68x136xf32, #tpu.memory_space<vmem>>, vector<68x8xf32>
    %cst_33 = arith.constant dense<0.000000e+00> : vector<16x8xf32>
    %51 = tpu.matmul %0, %50, %cst_33 {dimension_numbers = #tpu.dot_dimension_numbers<[1], [0], [0], [1], [0, 0, 1, 1], [], []>} : vector<16x68xf32>, vector<68x8xf32>, vector<16x8xf32> -> vector<16x8xf32>
    %c2 = arith.constant 2 : index
    %c0_34 = arith.constant 0 : index
    %52 = vector.load %arg5[%c2, %c0_34] : memref<21x8xf32, #tpu.memory_space<vmem>>, vector<1x8xf32>
    %53 = vector.broadcast %52 : vector<1x8xf32> to vector<16x8xf32>
    %54 = arith.addf %51, %53 : vector<16x8xf32>
    %cst_35 = arith.constant 0.000000e+00 : f32
    %55 = vector.broadcast %cst_35 : f32 to vector<16x8xf32>
    %56 = arith.maximumf %54, %55 : vector<16x8xf32>
    %cst_36 = arith.constant dense<0.000000e+00> : vector<16x8xf32>
    %57 = tpu.matmul %56, %1, %cst_36 {dimension_numbers = #tpu.dot_dimension_numbers<[1], [0], [0], [1], [0, 0, 1, 1], [], []>} : vector<16x8xf32>, vector<8x8xf32>, vector<16x8xf32> -> vector<16x8xf32>
    %58 = vector.broadcast %2 : vector<1x8xf32> to vector<16x8xf32>
    %59 = arith.addf %57, %58 : vector<16x8xf32>
    %cst_37 = arith.constant 0.000000e+00 : f32
    %60 = vector.broadcast %cst_37 : f32 to vector<16x8xf32>
    %61 = arith.maximumf %59, %60 : vector<16x8xf32>
    %62 = vector.broadcast %3 : vector<1x8xf32> to vector<16x8xf32>
    %63 = arith.addf %61, %62 : vector<16x8xf32>
    %c0_38 = arith.constant 0 : index
    %c8_39 = arith.constant 8 : index
    %64 = vector.load %arg1[%c0_38, %c8_39] : memref<16x68xf32, #tpu.memory_space<vmem>>, vector<16x4xf32>
    %cst_40 = arith.constant dense<0.000000e+00> : vector<16x8xf32>
    %65 = tpu.matmul %64, %4, %cst_40 {dimension_numbers = #tpu.dot_dimension_numbers<[1], [0], [0], [1], [0, 0, 1, 1], [], []>} : vector<16x4xf32>, vector<4x8xf32>, vector<16x8xf32> -> vector<16x8xf32>
    %66 = vector.broadcast %5 : vector<1x8xf32> to vector<16x8xf32>
    %67 = arith.addf %65, %66 : vector<16x8xf32>
    %68 = arith.addf %63, %67 : vector<16x8xf32>
    %cst_41 = arith.constant 0.000000e+00 : f32
    %69 = vector.broadcast %cst_41 : f32 to vector<16x8xf32>
    %70 = arith.maximumf %68, %69 : vector<16x8xf32>
    %c0_42 = arith.constant 0 : index
    %c16_43 = arith.constant 16 : index
    %71 = vector.load %arg6[%c0_42, %c16_43] : memref<16x136xf32, #tpu.memory_space<vmem>>, vector<16x8xf32>
    tpu.vector_store %arg6[%c0_42, %c16_43], %70 {strides = array<i32>} : memref<16x136xf32, #tpu.memory_space<vmem>>, vector<16x8xf32>,
    %c0_44 = arith.constant 0 : index
    %c24 = arith.constant 24 : index
    %72 = vector.load %arg2[%c0_44, %c24] : memref<68x136xf32, #tpu.memory_space<vmem>>, vector<68x8xf32>
    %cst_45 = arith.constant dense<0.000000e+00> : vector<16x8xf32>
    %73 = tpu.matmul %0, %72, %cst_45 {dimension_numbers = #tpu.dot_dimension_numbers<[1], [0], [0], [1], [0, 0, 1, 1], [], []>} : vector<16x68xf32>, vector<68x8xf32>, vector<16x8xf32> -> vector<16x8xf32>
    %c3 = arith.constant 3 : index
    %c0_46 = arith.constant 0 : index
    %74 = vector.load %arg5[%c3, %c0_46] : memref<21x8xf32, #tpu.memory_space<vmem>>, vector<1x8xf32>
    %75 = vector.broadcast %74 : vector<1x8xf32> to vector<16x8xf32>
    %76 = arith.addf %73, %75 : vector<16x8xf32>
    %cst_47 = arith.constant 0.000000e+00 : f32
    %77 = vector.broadcast %cst_47 : f32 to vector<16x8xf32>
    %78 = arith.maximumf %76, %77 : vector<16x8xf32>
    %cst_48 = arith.constant dense<0.000000e+00> : vector<16x8xf32>
    %79 = tpu.matmul %78, %1, %cst_48 {dimension_numbers = #tpu.dot_dimension_numbers<[1], [0], [0], [1], [0, 0, 1, 1], [], []>} : vector<16x8xf32>, vector<8x8xf32>, vector<16x8xf32> -> vector<16x8xf32>
    %80 = vector.broadcast %2 : vector<1x8xf32> to vector<16x8xf32>
    %81 = arith.addf %79, %80 : vector<16x8xf32>
    %cst_49 = arith.constant 0.000000e+00 : f32
    %82 = vector.broadcast %cst_49 : f32 to vector<16x8xf32>
    %83 = arith.maximumf %81, %82 : vector<16x8xf32>
    %84 = vector.broadcast %3 : vector<1x8xf32> to vector<16x8xf32>
    %85 = arith.addf %83, %84 : vector<16x8xf32>
    %c0_50 = arith.constant 0 : index
    %c12 = arith.constant 12 : index
    %86 = vector.load %arg1[%c0_50, %c12] : memref<16x68xf32, #tpu.memory_space<vmem>>, vector<16x4xf32>
    %cst_51 = arith.constant dense<0.000000e+00> : vector<16x8xf32>
    %87 = tpu.matmul %86, %4, %cst_51 {dimension_numbers = #tpu.dot_dimension_numbers<[1], [0], [0], [1], [0, 0, 1, 1], [], []>} : vector<16x4xf32>, vector<4x8xf32>, vector<16x8xf32> -> vector<16x8xf32>
    %88 = vector.broadcast %5 : vector<1x8xf32> to vector<16x8xf32>
    %89 = arith.addf %87, %88 : vector<16x8xf32>
    %90 = arith.addf %85, %89 : vector<16x8xf32>
    %cst_52 = arith.constant 0.000000e+00 : f32
    %91 = vector.broadcast %cst_52 : f32 to vector<16x8xf32>
    %92 = arith.maximumf %90, %91 : vector<16x8xf32>
    %c0_53 = arith.constant 0 : index
    %c24_54 = arith.constant 24 : index
    %93 = vector.load %arg6[%c0_53, %c24_54] : memref<16x136xf32, #tpu.memory_space<vmem>>, vector<16x8xf32>
    tpu.vector_store %arg6[%c0_53, %c24_54], %92 {strides = array<i32>} : memref<16x136xf32, #tpu.memory_space<vmem>>, vector<16x8xf32>,
    %c0_55 = arith.constant 0 : index
    %c32 = arith.constant 32 : index
    %94 = vector.load %arg2[%c0_55, %c32] : memref<68x136xf32, #tpu.memory_space<vmem>>, vector<68x8xf32>
    %cst_56 = arith.constant dense<0.000000e+00> : vector<16x8xf32>
    %95 = tpu.matmul %0, %94, %cst_56 {dimension_numbers = #tpu.dot_dimension_numbers<[1], [0], [0], [1], [0, 0, 1, 1], [], []>} : vector<16x68xf32>, vector<68x8xf32>, vector<16x8xf32> -> vector<16x8xf32>
    %c4_57 = arith.constant 4 : index
    %c0_58 = arith.constant 0 : index
    %96 = vector.load %arg5[%c4_57, %c0_58] : memref<21x8xf32, #tpu.memory_space<vmem>>, vector<1x8xf32>
    %97 = vector.broadcast %96 : vector<1x8xf32> to vector<16x8xf32>
    %98 = arith.addf %95, %97 : vector<16x8xf32>
    %cst_59 = arith.constant 0.000000e+00 : f32
    %99 = vector.broadcast %cst_59 : f32 to vector<16x8xf32>
    %100 = arith.maximumf %98, %99 : vector<16x8xf32>
    %cst_60 = arith.constant dense<0.000000e+00> : vector<16x8xf32>
    %101 = tpu.matmul %100, %1, %cst_60 {dimension_numbers = #tpu.dot_dimension_numbers<[1], [0], [0], [1], [0, 0, 1, 1], [], []>} : vector<16x8xf32>, vector<8x8xf32>, vector<16x8xf32> -> vector<16x8xf32>
    %102 = vector.broadcast %2 : vector<1x8xf32> to vector<16x8xf32>
    %103 = arith.addf %101, %102 : vector<16x8xf32>
    %cst_61 = arith.constant 0.000000e+00 : f32
    %104 = vector.broadcast %cst_61 : f32 to vector<16x8xf32>
    %105 = arith.maximumf %103, %104 : vector<16x8xf32>
    %106 = vector.broadcast %3 : vector<1x8xf32> to vector<16x8xf32>
    %107 = arith.addf %105, %106 : vector<16x8xf32>
    %c0_62 = arith.constant 0 : index
    %c16_63 = arith.constant 16 : index
    %108 = vector.load %arg1[%c0_62, %c16_63] : memref<16x68xf32, #tpu.memory_space<vmem>>, vector<16x4xf32>
    %cst_64 = arith.constant dense<0.000000e+00> : vector<16x8xf32>
    %109 = tpu.matmul %108, %4, %cst_64 {dimension_numbers = #tpu.dot_dimension_numbers<[1], [0], [0], [1], [0, 0, 1, 1], [], []>} : vector<16x4xf32>, vector<4x8xf32>, vector<16x8xf32> -> vector<16x8xf32>
    %110 = vector.broadcast %5 : vector<1x8xf32> to vector<16x8xf32>
    %111 = arith.addf %109, %110 : vector<16x8xf32>
    %112 = arith.addf %107, %111 : vector<16x8xf32>
    %cst_65 = arith.constant 0.000000e+00 : f32
    %113 = vector.broadcast %cst_65 : f32 to vector<16x8xf32>
    %114 = arith.maximumf %112, %113 : vector<16x8xf32>
    %c0_66 = arith.constant 0 : index
    %c32_67 = arith.constant 32 : index
    %115 = vector.load %arg6[%c0_66, %c32_67] : memref<16x136xf32, #tpu.memory_space<vmem>>, vector<16x8xf32>
    tpu.vector_store %arg6[%c0_66, %c32_67], %114 {strides = array<i32>} : memref<16x136xf32, #tpu.memory_space<vmem>>, vector<16x8xf32>,
    %c0_68 = arith.constant 0 : index
    %c40 = arith.constant 40 : index
    %116 = vector.load %arg2[%c0_68, %c40] : memref<68x136xf32, #tpu.memory_space<vmem>>, vector<68x8xf32>
    %cst_69 = arith.constant dense<0.000000e+00> : vector<16x8xf32>
    %117 = tpu.matmul %0, %116, %cst_69 {dimension_numbers = #tpu.dot_dimension_numbers<[1], [0], [0], [1], [0, 0, 1, 1], [], []>} : vector<16x68xf32>, vector<68x8xf32>, vector<16x8xf32> -> vector<16x8xf32>
    %c5 = arith.constant 5 : index
    %c0_70 = arith.constant 0 : index
    %118 = vector.load %arg5[%c5, %c0_70] : memref<21x8xf32, #tpu.memory_space<vmem>>, vector<1x8xf32>
    %119 = vector.broadcast %118 : vector<1x8xf32> to vector<16x8xf32>
    %120 = arith.addf %117, %119 : vector<16x8xf32>
    %cst_71 = arith.constant 0.000000e+00 : f32
    %121 = vector.broadcast %cst_71 : f32 to vector<16x8xf32>
    %122 = arith.maximumf %120, %121 : vector<16x8xf32>
    %cst_72 = arith.constant dense<0.000000e+00> : vector<16x8xf32>
    %123 = tpu.matmul %122, %1, %cst_72 {dimension_numbers = #tpu.dot_dimension_numbers<[1], [0], [0], [1], [0, 0, 1, 1], [], []>} : vector<16x8xf32>, vector<8x8xf32>, vector<16x8xf32> -> vector<16x8xf32>
    %124 = vector.broadcast %2 : vector<1x8xf32> to vector<16x8xf32>
    %125 = arith.addf %123, %124 : vector<16x8xf32>
    %cst_73 = arith.constant 0.000000e+00 : f32
    %126 = vector.broadcast %cst_73 : f32 to vector<16x8xf32>
    %127 = arith.maximumf %125, %126 : vector<16x8xf32>
    %128 = vector.broadcast %3 : vector<1x8xf32> to vector<16x8xf32>
    %129 = arith.addf %127, %128 : vector<16x8xf32>
    %c0_74 = arith.constant 0 : index
    %c20_75 = arith.constant 20 : index
    %130 = vector.load %arg1[%c0_74, %c20_75] : memref<16x68xf32, #tpu.memory_space<vmem>>, vector<16x4xf32>
    %cst_76 = arith.constant dense<0.000000e+00> : vector<16x8xf32>
    %131 = tpu.matmul %130, %4, %cst_76 {dimension_numbers = #tpu.dot_dimension_numbers<[1], [0], [0], [1], [0, 0, 1, 1], [], []>} : vector<16x4xf32>, vector<4x8xf32>, vector<16x8xf32> -> vector<16x8xf32>
    %132 = vector.broadcast %5 : vector<1x8xf32> to vector<16x8xf32>
    %133 = arith.addf %131, %132 : vector<16x8xf32>
    %134 = arith.addf %129, %133 : vector<16x8xf32>
    %cst_77 = arith.constant 0.000000e+00 : f32
    %135 = vector.broadcast %cst_77 : f32 to vector<16x8xf32>
    %136 = arith.maximumf %134, %135 : vector<16x8xf32>
    %c0_78 = arith.constant 0 : index
    %c40_79 = arith.constant 40 : index
    %137 = vector.load %arg6[%c0_78, %c40_79] : memref<16x136xf32, #tpu.memory_space<vmem>>, vector<16x8xf32>
    tpu.vector_store %arg6[%c0_78, %c40_79], %136 {strides = array<i32>} : memref<16x136xf32, #tpu.memory_space<vmem>>, vector<16x8xf32>,
    %c0_80 = arith.constant 0 : index
    %c48 = arith.constant 48 : index
    %138 = vector.load %arg2[%c0_80, %c48] : memref<68x136xf32, #tpu.memory_space<vmem>>, vector<68x8xf32>
    %cst_81 = arith.constant dense<0.000000e+00> : vector<16x8xf32>
    %139 = tpu.matmul %0, %138, %cst_81 {dimension_numbers = #tpu.dot_dimension_numbers<[1], [0], [0], [1], [0, 0, 1, 1], [], []>} : vector<16x68xf32>, vector<68x8xf32>, vector<16x8xf32> -> vector<16x8xf32>
    %c6 = arith.constant 6 : index
    %c0_82 = arith.constant 0 : index
    %140 = vector.load %arg5[%c6, %c0_82] : memref<21x8xf32, #tpu.memory_space<vmem>>, vector<1x8xf32>
    %141 = vector.broadcast %140 : vector<1x8xf32> to vector<16x8xf32>
    %142 = arith.addf %139, %141 : vector<16x8xf32>
    %cst_83 = arith.constant 0.000000e+00 : f32
    %143 = vector.broadcast %cst_83 : f32 to vector<16x8xf32>
    %144 = arith.maximumf %142, %143 : vector<16x8xf32>
    %cst_84 = arith.constant dense<0.000000e+00> : vector<16x8xf32>
    %145 = tpu.matmul %144, %1, %cst_84 {dimension_numbers = #tpu.dot_dimension_numbers<[1], [0], [0], [1], [0, 0, 1, 1], [], []>} : vector<16x8xf32>, vector<8x8xf32>, vector<16x8xf32> -> vector<16x8xf32>
    %146 = vector.broadcast %2 : vector<1x8xf32> to vector<16x8xf32>
    %147 = arith.addf %145, %146 : vector<16x8xf32>
    %cst_85 = arith.constant 0.000000e+00 : f32
    %148 = vector.broadcast %cst_85 : f32 to vector<16x8xf32>
    %149 = arith.maximumf %147, %148 : vector<16x8xf32>
    %150 = vector.broadcast %3 : vector<1x8xf32> to vector<16x8xf32>
    %151 = arith.addf %149, %150 : vector<16x8xf32>
    %c0_86 = arith.constant 0 : index
    %c24_87 = arith.constant 24 : index
    %152 = vector.load %arg1[%c0_86, %c24_87] : memref<16x68xf32, #tpu.memory_space<vmem>>, vector<16x4xf32>
    %cst_88 = arith.constant dense<0.000000e+00> : vector<16x8xf32>
    %153 = tpu.matmul %152, %4, %cst_88 {dimension_numbers = #tpu.dot_dimension_numbers<[1], [0], [0], [1], [0, 0, 1, 1], [], []>} : vector<16x4xf32>, vector<4x8xf32>, vector<16x8xf32> -> vector<16x8xf32>
    %154 = vector.broadcast %5 : vector<1x8xf32> to vector<16x8xf32>
    %155 = arith.addf %153, %154 : vector<16x8xf32>
    %156 = arith.addf %151, %155 : vector<16x8xf32>
    %cst_89 = arith.constant 0.000000e+00 : f32
    %157 = vector.broadcast %cst_89 : f32 to vector<16x8xf32>
    %158 = arith.maximumf %156, %157 : vector<16x8xf32>
    %c0_90 = arith.constant 0 : index
    %c48_91 = arith.constant 48 : index
    %159 = vector.load %arg6[%c0_90, %c48_91] : memref<16x136xf32, #tpu.memory_space<vmem>>, vector<16x8xf32>
    tpu.vector_store %arg6[%c0_90, %c48_91], %158 {strides = array<i32>} : memref<16x136xf32, #tpu.memory_space<vmem>>, vector<16x8xf32>,
    %c0_92 = arith.constant 0 : index
    %c56 = arith.constant 56 : index
    %160 = vector.load %arg2[%c0_92, %c56] : memref<68x136xf32, #tpu.memory_space<vmem>>, vector<68x8xf32>
    %cst_93 = arith.constant dense<0.000000e+00> : vector<16x8xf32>
    %161 = tpu.matmul %0, %160, %cst_93 {dimension_numbers = #tpu.dot_dimension_numbers<[1], [0], [0], [1], [0, 0, 1, 1], [], []>} : vector<16x68xf32>, vector<68x8xf32>, vector<16x8xf32> -> vector<16x8xf32>
    %c7 = arith.constant 7 : index
    %c0_94 = arith.constant 0 : index
    %162 = vector.load %arg5[%c7, %c0_94] : memref<21x8xf32, #tpu.memory_space<vmem>>, vector<1x8xf32>
    %163 = vector.broadcast %162 : vector<1x8xf32> to vector<16x8xf32>
    %164 = arith.addf %161, %163 : vector<16x8xf32>
    %cst_95 = arith.constant 0.000000e+00 : f32
    %165 = vector.broadcast %cst_95 : f32 to vector<16x8xf32>
    %166 = arith.maximumf %164, %165 : vector<16x8xf32>
    %cst_96 = arith.constant dense<0.000000e+00> : vector<16x8xf32>
    %167 = tpu.matmul %166, %1, %cst_96 {dimension_numbers = #tpu.dot_dimension_numbers<[1], [0], [0], [1], [0, 0, 1, 1], [], []>} : vector<16x8xf32>, vector<8x8xf32>, vector<16x8xf32> -> vector<16x8xf32>
    %168 = vector.broadcast %2 : vector<1x8xf32> to vector<16x8xf32>
    %169 = arith.addf %167, %168 : vector<16x8xf32>
    %cst_97 = arith.constant 0.000000e+00 : f32
    %170 = vector.broadcast %cst_97 : f32 to vector<16x8xf32>
    %171 = arith.maximumf %169, %170 : vector<16x8xf32>
    %172 = vector.broadcast %3 : vector<1x8xf32> to vector<16x8xf32>
    %173 = arith.addf %171, %172 : vector<16x8xf32>
    %c0_98 = arith.constant 0 : index
    %c28 = arith.constant 28 : index
    %174 = vector.load %arg1[%c0_98, %c28] : memref<16x68xf32, #tpu.memory_space<vmem>>, vector<16x4xf32>
    %cst_99 = arith.constant dense<0.000000e+00> : vector<16x8xf32>
    %175 = tpu.matmul %174, %4, %cst_99 {dimension_numbers = #tpu.dot_dimension_numbers<[1], [0], [0], [1], [0, 0, 1, 1], [], []>} : vector<16x4xf32>, vector<4x8xf32>, vector<16x8xf32> -> vector<16x8xf32>
    %176 = vector.broadcast %5 : vector<1x8xf32> to vector<16x8xf32>
    %177 = arith.addf %175, %176 : vector<16x8xf32>
    %178 = arith.addf %173, %177 : vector<16x8xf32>
    %cst_100 = arith.constant 0.000000e+00 : f32
    %179 = vector.broadcast %cst_100 : f32 to vector<16x8xf32>
    %180 = arith.maximumf %178, %179 : vector<16x8xf32>
    %c0_101 = arith.constant 0 : index
    %c56_102 = arith.constant 56 : index
    %181 = vector.load %arg6[%c0_101, %c56_102] : memref<16x136xf32, #tpu.memory_space<vmem>>, vector<16x8xf32>
    tpu.vector_store %arg6[%c0_101, %c56_102], %180 {strides = array<i32>} : memref<16x136xf32, #tpu.memory_space<vmem>>, vector<16x8xf32>,
    %c0_103 = arith.constant 0 : index
    %c64 = arith.constant 64 : index
    %182 = vector.load %arg2[%c0_103, %c64] : memref<68x136xf32, #tpu.memory_space<vmem>>, vector<68x8xf32>
    %cst_104 = arith.constant dense<0.000000e+00> : vector<16x8xf32>
    %183 = tpu.matmul %0, %182, %cst_104 {dimension_numbers = #tpu.dot_dimension_numbers<[1], [0], [0], [1], [0, 0, 1, 1], [], []>} : vector<16x68xf32>, vector<68x8xf32>, vector<16x8xf32> -> vector<16x8xf32>
    %c8_105 = arith.constant 8 : index
    %c0_106 = arith.constant 0 : index
    %184 = vector.load %arg5[%c8_105, %c0_106] : memref<21x8xf32, #tpu.memory_space<vmem>>, vector<1x8xf32>
    %185 = vector.broadcast %184 : vector<1x8xf32> to vector<16x8xf32>
    %186 = arith.addf %183, %185 : vector<16x8xf32>
    %cst_107 = arith.constant 0.000000e+00 : f32
    %187 = vector.broadcast %cst_107 : f32 to vector<16x8xf32>
    %188 = arith.maximumf %186, %187 : vector<16x8xf32>
    %cst_108 = arith.constant dense<0.000000e+00> : vector<16x8xf32>
    %189 = tpu.matmul %188, %1, %cst_108 {dimension_numbers = #tpu.dot_dimension_numbers<[1], [0], [0], [1], [0, 0, 1, 1], [], []>} : vector<16x8xf32>, vector<8x8xf32>, vector<16x8xf32> -> vector<16x8xf32>
    %190 = vector.broadcast %2 : vector<1x8xf32> to vector<16x8xf32>
    %191 = arith.addf %189, %190 : vector<16x8xf32>
    %cst_109 = arith.constant 0.000000e+00 : f32
    %192 = vector.broadcast %cst_109 : f32 to vector<16x8xf32>
    %193 = arith.maximumf %191, %192 : vector<16x8xf32>
    %194 = vector.broadcast %3 : vector<1x8xf32> to vector<16x8xf32>
    %195 = arith.addf %193, %194 : vector<16x8xf32>
    %c0_110 = arith.constant 0 : index
    %c32_111 = arith.constant 32 : index
    %196 = vector.load %arg1[%c0_110, %c32_111] : memref<16x68xf32, #tpu.memory_space<vmem>>, vector<16x4xf32>
    %cst_112 = arith.constant dense<0.000000e+00> : vector<16x8xf32>
    %197 = tpu.matmul %196, %4, %cst_112 {dimension_numbers = #tpu.dot_dimension_numbers<[1], [0], [0], [1], [0, 0, 1, 1], [], []>} : vector<16x4xf32>, vector<4x8xf32>, vector<16x8xf32> -> vector<16x8xf32>
    %198 = vector.broadcast %5 : vector<1x8xf32> to vector<16x8xf32>
    %199 = arith.addf %197, %198 : vector<16x8xf32>
    %200 = arith.addf %195, %199 : vector<16x8xf32>
    %cst_113 = arith.constant 0.000000e+00 : f32
    %201 = vector.broadcast %cst_113 : f32 to vector<16x8xf32>
    %202 = arith.maximumf %200, %201 : vector<16x8xf32>
    %c0_114 = arith.constant 0 : index
    %c64_115 = arith.constant 64 : index
    %203 = vector.load %arg6[%c0_114, %c64_115] : memref<16x136xf32, #tpu.memory_space<vmem>>, vector<16x8xf32>
    tpu.vector_store %arg6[%c0_114, %c64_115], %202 {strides = array<i32>} : memref<16x136xf32, #tpu.memory_space<vmem>>, vector<16x8xf32>,
    %c0_116 = arith.constant 0 : index
    %c72 = arith.constant 72 : index
    %204 = vector.load %arg2[%c0_116, %c72] : memref<68x136xf32, #tpu.memory_space<vmem>>, vector<68x8xf32>
    %cst_117 = arith.constant dense<0.000000e+00> : vector<16x8xf32>
    %205 = tpu.matmul %0, %204, %cst_117 {dimension_numbers = #tpu.dot_dimension_numbers<[1], [0], [0], [1], [0, 0, 1, 1], [], []>} : vector<16x68xf32>, vector<68x8xf32>, vector<16x8xf32> -> vector<16x8xf32>
    %c9 = arith.constant 9 : index
    %c0_118 = arith.constant 0 : index
    %206 = vector.load %arg5[%c9, %c0_118] : memref<21x8xf32, #tpu.memory_space<vmem>>, vector<1x8xf32>
    %207 = vector.broadcast %206 : vector<1x8xf32> to vector<16x8xf32>
    %208 = arith.addf %205, %207 : vector<16x8xf32>
    %cst_119 = arith.constant 0.000000e+00 : f32
    %209 = vector.broadcast %cst_119 : f32 to vector<16x8xf32>
    %210 = arith.maximumf %208, %209 : vector<16x8xf32>
    %cst_120 = arith.constant dense<0.000000e+00> : vector<16x8xf32>
    %211 = tpu.matmul %210, %1, %cst_120 {dimension_numbers = #tpu.dot_dimension_numbers<[1], [0], [0], [1], [0, 0, 1, 1], [], []>} : vector<16x8xf32>, vector<8x8xf32>, vector<16x8xf32> -> vector<16x8xf32>
    %212 = vector.broadcast %2 : vector<1x8xf32> to vector<16x8xf32>
    %213 = arith.addf %211, %212 : vector<16x8xf32>
    %cst_121 = arith.constant 0.000000e+00 : f32
    %214 = vector.broadcast %cst_121 : f32 to vector<16x8xf32>
    %215 = arith.maximumf %213, %214 : vector<16x8xf32>
    %216 = vector.broadcast %3 : vector<1x8xf32> to vector<16x8xf32>
    %217 = arith.addf %215, %216 : vector<16x8xf32>
    %c0_122 = arith.constant 0 : index
    %c36 = arith.constant 36 : index
    %218 = vector.load %arg1[%c0_122, %c36] : memref<16x68xf32, #tpu.memory_space<vmem>>, vector<16x4xf32>
    %cst_123 = arith.constant dense<0.000000e+00> : vector<16x8xf32>
    %219 = tpu.matmul %218, %4, %cst_123 {dimension_numbers = #tpu.dot_dimension_numbers<[1], [0], [0], [1], [0, 0, 1, 1], [], []>} : vector<16x4xf32>, vector<4x8xf32>, vector<16x8xf32> -> vector<16x8xf32>
    %220 = vector.broadcast %5 : vector<1x8xf32> to vector<16x8xf32>
    %221 = arith.addf %219, %220 : vector<16x8xf32>
    %222 = arith.addf %217, %221 : vector<16x8xf32>
    %cst_124 = arith.constant 0.000000e+00 : f32
    %223 = vector.broadcast %cst_124 : f32 to vector<16x8xf32>
    %224 = arith.maximumf %222, %223 : vector<16x8xf32>
    %c0_125 = arith.constant 0 : index
    %c72_126 = arith.constant 72 : index
    %225 = vector.load %arg6[%c0_125, %c72_126] : memref<16x136xf32, #tpu.memory_space<vmem>>, vector<16x8xf32>
    tpu.vector_store %arg6[%c0_125, %c72_126], %224 {strides = array<i32>} : memref<16x136xf32, #tpu.memory_space<vmem>>, vector<16x8xf32>,
    %c0_127 = arith.constant 0 : index
    %c80 = arith.constant 80 : index
    %226 = vector.load %arg2[%c0_127, %c80] : memref<68x136xf32, #tpu.memory_space<vmem>>, vector<68x8xf32>
    %cst_128 = arith.constant dense<0.000000e+00> : vector<16x8xf32>
    %227 = tpu.matmul %0, %226, %cst_128 {dimension_numbers = #tpu.dot_dimension_numbers<[1], [0], [0], [1], [0, 0, 1, 1], [], []>} : vector<16x68xf32>, vector<68x8xf32>, vector<16x8xf32> -> vector<16x8xf32>
    %c10 = arith.constant 10 : index
    %c0_129 = arith.constant 0 : index
    %228 = vector.load %arg5[%c10, %c0_129] : memref<21x8xf32, #tpu.memory_space<vmem>>, vector<1x8xf32>
    %229 = vector.broadcast %228 : vector<1x8xf32> to vector<16x8xf32>
    %230 = arith.addf %227, %229 : vector<16x8xf32>
    %cst_130 = arith.constant 0.000000e+00 : f32
    %231 = vector.broadcast %cst_130 : f32 to vector<16x8xf32>
    %232 = arith.maximumf %230, %231 : vector<16x8xf32>
    %cst_131 = arith.constant dense<0.000000e+00> : vector<16x8xf32>
    %233 = tpu.matmul %232, %1, %cst_131 {dimension_numbers = #tpu.dot_dimension_numbers<[1], [0], [0], [1], [0, 0, 1, 1], [], []>} : vector<16x8xf32>, vector<8x8xf32>, vector<16x8xf32> -> vector<16x8xf32>
    %234 = vector.broadcast %2 : vector<1x8xf32> to vector<16x8xf32>
    %235 = arith.addf %233, %234 : vector<16x8xf32>
    %cst_132 = arith.constant 0.000000e+00 : f32
    %236 = vector.broadcast %cst_132 : f32 to vector<16x8xf32>
    %237 = arith.maximumf %235, %236 : vector<16x8xf32>
    %238 = vector.broadcast %3 : vector<1x8xf32> to vector<16x8xf32>
    %239 = arith.addf %237, %238 : vector<16x8xf32>
    %c0_133 = arith.constant 0 : index
    %c40_134 = arith.constant 40 : index
    %240 = vector.load %arg1[%c0_133, %c40_134] : memref<16x68xf32, #tpu.memory_space<vmem>>, vector<16x4xf32>
    %cst_135 = arith.constant dense<0.000000e+00> : vector<16x8xf32>
    %241 = tpu.matmul %240, %4, %cst_135 {dimension_numbers = #tpu.dot_dimension_numbers<[1], [0], [0], [1], [0, 0, 1, 1], [], []>} : vector<16x4xf32>, vector<4x8xf32>, vector<16x8xf32> -> vector<16x8xf32>
    %242 = vector.broadcast %5 : vector<1x8xf32> to vector<16x8xf32>
    %243 = arith.addf %241, %242 : vector<16x8xf32>
    %244 = arith.addf %239, %243 : vector<16x8xf32>
    %cst_136 = arith.constant 0.000000e+00 : f32
    %245 = vector.broadcast %cst_136 : f32 to vector<16x8xf32>
    %246 = arith.maximumf %244, %245 : vector<16x8xf32>
    %c0_137 = arith.constant 0 : index
    %c80_138 = arith.constant 80 : index
    %247 = vector.load %arg6[%c0_137, %c80_138] : memref<16x136xf32, #tpu.memory_space<vmem>>, vector<16x8xf32>
    tpu.vector_store %arg6[%c0_137, %c80_138], %246 {strides = array<i32>} : memref<16x136xf32, #tpu.memory_space<vmem>>, vector<16x8xf32>,
    %c0_139 = arith.constant 0 : index
    %c88 = arith.constant 88 : index
    %248 = vector.load %arg2[%c0_139, %c88] : memref<68x136xf32, #tpu.memory_space<vmem>>, vector<68x8xf32>
    %cst_140 = arith.constant dense<0.000000e+00> : vector<16x8xf32>
    %249 = tpu.matmul %0, %248, %cst_140 {dimension_numbers = #tpu.dot_dimension_numbers<[1], [0], [0], [1], [0, 0, 1, 1], [], []>} : vector<16x68xf32>, vector<68x8xf32>, vector<16x8xf32> -> vector<16x8xf32>
    %c11 = arith.constant 11 : index
    %c0_141 = arith.constant 0 : index
    %250 = vector.load %arg5[%c11, %c0_141] : memref<21x8xf32, #tpu.memory_space<vmem>>, vector<1x8xf32>
    %251 = vector.broadcast %250 : vector<1x8xf32> to vector<16x8xf32>
    %252 = arith.addf %249, %251 : vector<16x8xf32>
    %cst_142 = arith.constant 0.000000e+00 : f32
    %253 = vector.broadcast %cst_142 : f32 to vector<16x8xf32>
    %254 = arith.maximumf %252, %253 : vector<16x8xf32>
    %cst_143 = arith.constant dense<0.000000e+00> : vector<16x8xf32>
    %255 = tpu.matmul %254, %1, %cst_143 {dimension_numbers = #tpu.dot_dimension_numbers<[1], [0], [0], [1], [0, 0, 1, 1], [], []>} : vector<16x8xf32>, vector<8x8xf32>, vector<16x8xf32> -> vector<16x8xf32>
    %256 = vector.broadcast %2 : vector<1x8xf32> to vector<16x8xf32>
    %257 = arith.addf %255, %256 : vector<16x8xf32>
    %cst_144 = arith.constant 0.000000e+00 : f32
    %258 = vector.broadcast %cst_144 : f32 to vector<16x8xf32>
    %259 = arith.maximumf %257, %258 : vector<16x8xf32>
    %260 = vector.broadcast %3 : vector<1x8xf32> to vector<16x8xf32>
    %261 = arith.addf %259, %260 : vector<16x8xf32>
    %c0_145 = arith.constant 0 : index
    %c44 = arith.constant 44 : index
    %262 = vector.load %arg1[%c0_145, %c44] : memref<16x68xf32, #tpu.memory_space<vmem>>, vector<16x4xf32>
    %cst_146 = arith.constant dense<0.000000e+00> : vector<16x8xf32>
    %263 = tpu.matmul %262, %4, %cst_146 {dimension_numbers = #tpu.dot_dimension_numbers<[1], [0], [0], [1], [0, 0, 1, 1], [], []>} : vector<16x4xf32>, vector<4x8xf32>, vector<16x8xf32> -> vector<16x8xf32>
    %264 = vector.broadcast %5 : vector<1x8xf32> to vector<16x8xf32>
    %265 = arith.addf %263, %264 : vector<16x8xf32>
    %266 = arith.addf %261, %265 : vector<16x8xf32>
    %cst_147 = arith.constant 0.000000e+00 : f32
    %267 = vector.broadcast %cst_147 : f32 to vector<16x8xf32>
    %268 = arith.maximumf %266, %267 : vector<16x8xf32>
    %c0_148 = arith.constant 0 : index
    %c88_149 = arith.constant 88 : index
    %269 = vector.load %arg6[%c0_148, %c88_149] : memref<16x136xf32, #tpu.memory_space<vmem>>, vector<16x8xf32>
    tpu.vector_store %arg6[%c0_148, %c88_149], %268 {strides = array<i32>} : memref<16x136xf32, #tpu.memory_space<vmem>>, vector<16x8xf32>,
    %c0_150 = arith.constant 0 : index
    %c96 = arith.constant 96 : index
    %270 = vector.load %arg2[%c0_150, %c96] : memref<68x136xf32, #tpu.memory_space<vmem>>, vector<68x8xf32>
    %cst_151 = arith.constant dense<0.000000e+00> : vector<16x8xf32>
    %271 = tpu.matmul %0, %270, %cst_151 {dimension_numbers = #tpu.dot_dimension_numbers<[1], [0], [0], [1], [0, 0, 1, 1], [], []>} : vector<16x68xf32>, vector<68x8xf32>, vector<16x8xf32> -> vector<16x8xf32>
    %c12_152 = arith.constant 12 : index
    %c0_153 = arith.constant 0 : index
    %272 = vector.load %arg5[%c12_152, %c0_153] : memref<21x8xf32, #tpu.memory_space<vmem>>, vector<1x8xf32>
    %273 = vector.broadcast %272 : vector<1x8xf32> to vector<16x8xf32>
    %274 = arith.addf %271, %273 : vector<16x8xf32>
    %cst_154 = arith.constant 0.000000e+00 : f32
    %275 = vector.broadcast %cst_154 : f32 to vector<16x8xf32>
    %276 = arith.maximumf %274, %275 : vector<16x8xf32>
    %cst_155 = arith.constant dense<0.000000e+00> : vector<16x8xf32>
    %277 = tpu.matmul %276, %1, %cst_155 {dimension_numbers = #tpu.dot_dimension_numbers<[1], [0], [0], [1], [0, 0, 1, 1], [], []>} : vector<16x8xf32>, vector<8x8xf32>, vector<16x8xf32> -> vector<16x8xf32>
    %278 = vector.broadcast %2 : vector<1x8xf32> to vector<16x8xf32>
    %279 = arith.addf %277, %278 : vector<16x8xf32>
    %cst_156 = arith.constant 0.000000e+00 : f32
    %280 = vector.broadcast %cst_156 : f32 to vector<16x8xf32>
    %281 = arith.maximumf %279, %280 : vector<16x8xf32>
    %282 = vector.broadcast %3 : vector<1x8xf32> to vector<16x8xf32>
    %283 = arith.addf %281, %282 : vector<16x8xf32>
    %c0_157 = arith.constant 0 : index
    %c48_158 = arith.constant 48 : index
    %284 = vector.load %arg1[%c0_157, %c48_158] : memref<16x68xf32, #tpu.memory_space<vmem>>, vector<16x4xf32>
    %cst_159 = arith.constant dense<0.000000e+00> : vector<16x8xf32>
    %285 = tpu.matmul %284, %4, %cst_159 {dimension_numbers = #tpu.dot_dimension_numbers<[1], [0], [0], [1], [0, 0, 1, 1], [], []>} : vector<16x4xf32>, vector<4x8xf32>, vector<16x8xf32> -> vector<16x8xf32>
    %286 = vector.broadcast %5 : vector<1x8xf32> to vector<16x8xf32>
    %287 = arith.addf %285, %286 : vector<16x8xf32>
    %288 = arith.addf %283, %287 : vector<16x8xf32>
    %cst_160 = arith.constant 0.000000e+00 : f32
    %289 = vector.broadcast %cst_160 : f32 to vector<16x8xf32>
    %290 = arith.maximumf %288, %289 : vector<16x8xf32>
    %c0_161 = arith.constant 0 : index
    %c96_162 = arith.constant 96 : index
    %291 = vector.load %arg6[%c0_161, %c96_162] : memref<16x136xf32, #tpu.memory_space<vmem>>, vector<16x8xf32>
    tpu.vector_store %arg6[%c0_161, %c96_162], %290 {strides = array<i32>} : memref<16x136xf32, #tpu.memory_space<vmem>>, vector<16x8xf32>,
    %c0_163 = arith.constant 0 : index
    %c104 = arith.constant 104 : index
    %292 = vector.load %arg2[%c0_163, %c104] : memref<68x136xf32, #tpu.memory_space<vmem>>, vector<68x8xf32>
    %cst_164 = arith.constant dense<0.000000e+00> : vector<16x8xf32>
    %293 = tpu.matmul %0, %292, %cst_164 {dimension_numbers = #tpu.dot_dimension_numbers<[1], [0], [0], [1], [0, 0, 1, 1], [], []>} : vector<16x68xf32>, vector<68x8xf32>, vector<16x8xf32> -> vector<16x8xf32>
    %c13 = arith.constant 13 : index
    %c0_165 = arith.constant 0 : index
    %294 = vector.load %arg5[%c13, %c0_165] : memref<21x8xf32, #tpu.memory_space<vmem>>, vector<1x8xf32>
    %295 = vector.broadcast %294 : vector<1x8xf32> to vector<16x8xf32>
    %296 = arith.addf %293, %295 : vector<16x8xf32>
    %cst_166 = arith.constant 0.000000e+00 : f32
    %297 = vector.broadcast %cst_166 : f32 to vector<16x8xf32>
    %298 = arith.maximumf %296, %297 : vector<16x8xf32>
    %cst_167 = arith.constant dense<0.000000e+00> : vector<16x8xf32>
    %299 = tpu.matmul %298, %1, %cst_167 {dimension_numbers = #tpu.dot_dimension_numbers<[1], [0], [0], [1], [0, 0, 1, 1], [], []>} : vector<16x8xf32>, vector<8x8xf32>, vector<16x8xf32> -> vector<16x8xf32>
    %300 = vector.broadcast %2 : vector<1x8xf32> to vector<16x8xf32>
    %301 = arith.addf %299, %300 : vector<16x8xf32>
    %cst_168 = arith.constant 0.000000e+00 : f32
    %302 = vector.broadcast %cst_168 : f32 to vector<16x8xf32>
    %303 = arith.maximumf %301, %302 : vector<16x8xf32>
    %304 = vector.broadcast %3 : vector<1x8xf32> to vector<16x8xf32>
    %305 = arith.addf %303, %304 : vector<16x8xf32>
    %c0_169 = arith.constant 0 : index
    %c52 = arith.constant 52 : index
    %306 = vector.load %arg1[%c0_169, %c52] : memref<16x68xf32, #tpu.memory_space<vmem>>, vector<16x4xf32>
    %cst_170 = arith.constant dense<0.000000e+00> : vector<16x8xf32>
    %307 = tpu.matmul %306, %4, %cst_170 {dimension_numbers = #tpu.dot_dimension_numbers<[1], [0], [0], [1], [0, 0, 1, 1], [], []>} : vector<16x4xf32>, vector<4x8xf32>, vector<16x8xf32> -> vector<16x8xf32>
    %308 = vector.broadcast %5 : vector<1x8xf32> to vector<16x8xf32>
    %309 = arith.addf %307, %308 : vector<16x8xf32>
    %310 = arith.addf %305, %309 : vector<16x8xf32>
    %cst_171 = arith.constant 0.000000e+00 : f32
    %311 = vector.broadcast %cst_171 : f32 to vector<16x8xf32>
    %312 = arith.maximumf %310, %311 : vector<16x8xf32>
    %c0_172 = arith.constant 0 : index
    %c104_173 = arith.constant 104 : index
    %313 = vector.load %arg6[%c0_172, %c104_173] : memref<16x136xf32, #tpu.memory_space<vmem>>, vector<16x8xf32>
    tpu.vector_store %arg6[%c0_172, %c104_173], %312 {strides = array<i32>} : memref<16x136xf32, #tpu.memory_space<vmem>>, vector<16x8xf32>,
    %c0_174 = arith.constant 0 : index
    %c112 = arith.constant 112 : index
    %314 = vector.load %arg2[%c0_174, %c112] : memref<68x136xf32, #tpu.memory_space<vmem>>, vector<68x8xf32>
    %cst_175 = arith.constant dense<0.000000e+00> : vector<16x8xf32>
    %315 = tpu.matmul %0, %314, %cst_175 {dimension_numbers = #tpu.dot_dimension_numbers<[1], [0], [0], [1], [0, 0, 1, 1], [], []>} : vector<16x68xf32>, vector<68x8xf32>, vector<16x8xf32> -> vector<16x8xf32>
    %c14 = arith.constant 14 : index
    %c0_176 = arith.constant 0 : index
    %316 = vector.load %arg5[%c14, %c0_176] : memref<21x8xf32, #tpu.memory_space<vmem>>, vector<1x8xf32>
    %317 = vector.broadcast %316 : vector<1x8xf32> to vector<16x8xf32>
    %318 = arith.addf %315, %317 : vector<16x8xf32>
    %cst_177 = arith.constant 0.000000e+00 : f32
    %319 = vector.broadcast %cst_177 : f32 to vector<16x8xf32>
    %320 = arith.maximumf %318, %319 : vector<16x8xf32>
    %cst_178 = arith.constant dense<0.000000e+00> : vector<16x8xf32>
    %321 = tpu.matmul %320, %1, %cst_178 {dimension_numbers = #tpu.dot_dimension_numbers<[1], [0], [0], [1], [0, 0, 1, 1], [], []>} : vector<16x8xf32>, vector<8x8xf32>, vector<16x8xf32> -> vector<16x8xf32>
    %322 = vector.broadcast %2 : vector<1x8xf32> to vector<16x8xf32>
    %323 = arith.addf %321, %322 : vector<16x8xf32>
    %cst_179 = arith.constant 0.000000e+00 : f32
    %324 = vector.broadcast %cst_179 : f32 to vector<16x8xf32>
    %325 = arith.maximumf %323, %324 : vector<16x8xf32>
    %326 = vector.broadcast %3 : vector<1x8xf32> to vector<16x8xf32>
    %327 = arith.addf %325, %326 : vector<16x8xf32>
    %c0_180 = arith.constant 0 : index
    %c56_181 = arith.constant 56 : index
    %328 = vector.load %arg1[%c0_180, %c56_181] : memref<16x68xf32, #tpu.memory_space<vmem>>, vector<16x4xf32>
    %cst_182 = arith.constant dense<0.000000e+00> : vector<16x8xf32>
    %329 = tpu.matmul %328, %4, %cst_182 {dimension_numbers = #tpu.dot_dimension_numbers<[1], [0], [0], [1], [0, 0, 1, 1], [], []>} : vector<16x4xf32>, vector<4x8xf32>, vector<16x8xf32> -> vector<16x8xf32>
    %330 = vector.broadcast %5 : vector<1x8xf32> to vector<16x8xf32>
    %331 = arith.addf %329, %330 : vector<16x8xf32>
    %332 = arith.addf %327, %331 : vector<16x8xf32>
    %cst_183 = arith.constant 0.000000e+00 : f32
    %333 = vector.broadcast %cst_183 : f32 to vector<16x8xf32>
    %334 = arith.maximumf %332, %333 : vector<16x8xf32>
    %c0_184 = arith.constant 0 : index
    %c112_185 = arith.constant 112 : index
    %335 = vector.load %arg6[%c0_184, %c112_185] : memref<16x136xf32, #tpu.memory_space<vmem>>, vector<16x8xf32>
    tpu.vector_store %arg6[%c0_184, %c112_185], %334 {strides = array<i32>} : memref<16x136xf32, #tpu.memory_space<vmem>>, vector<16x8xf32>,
    %c0_186 = arith.constant 0 : index
    %c120 = arith.constant 120 : index
    %336 = vector.load %arg2[%c0_186, %c120] : memref<68x136xf32, #tpu.memory_space<vmem>>, vector<68x8xf32>
    %cst_187 = arith.constant dense<0.000000e+00> : vector<16x8xf32>
    %337 = tpu.matmul %0, %336, %cst_187 {dimension_numbers = #tpu.dot_dimension_numbers<[1], [0], [0], [1], [0, 0, 1, 1], [], []>} : vector<16x68xf32>, vector<68x8xf32>, vector<16x8xf32> -> vector<16x8xf32>
    %c15 = arith.constant 15 : index
    %c0_188 = arith.constant 0 : index
    %338 = vector.load %arg5[%c15, %c0_188] : memref<21x8xf32, #tpu.memory_space<vmem>>, vector<1x8xf32>
    %339 = vector.broadcast %338 : vector<1x8xf32> to vector<16x8xf32>
    %340 = arith.addf %337, %339 : vector<16x8xf32>
    %cst_189 = arith.constant 0.000000e+00 : f32
    %341 = vector.broadcast %cst_189 : f32 to vector<16x8xf32>
    %342 = arith.maximumf %340, %341 : vector<16x8xf32>
    %cst_190 = arith.constant dense<0.000000e+00> : vector<16x8xf32>
    %343 = tpu.matmul %342, %1, %cst_190 {dimension_numbers = #tpu.dot_dimension_numbers<[1], [0], [0], [1], [0, 0, 1, 1], [], []>} : vector<16x8xf32>, vector<8x8xf32>, vector<16x8xf32> -> vector<16x8xf32>
    %344 = vector.broadcast %2 : vector<1x8xf32> to vector<16x8xf32>
    %345 = arith.addf %343, %344 : vector<16x8xf32>
    %cst_191 = arith.constant 0.000000e+00 : f32
    %346 = vector.broadcast %cst_191 : f32 to vector<16x8xf32>
    %347 = arith.maximumf %345, %346 : vector<16x8xf32>
    %348 = vector.broadcast %3 : vector<1x8xf32> to vector<16x8xf32>
    %349 = arith.addf %347, %348 : vector<16x8xf32>
    %c0_192 = arith.constant 0 : index
    %c60 = arith.constant 60 : index
    %350 = vector.load %arg1[%c0_192, %c60] : memref<16x68xf32, #tpu.memory_space<vmem>>, vector<16x4xf32>
    %cst_193 = arith.constant dense<0.000000e+00> : vector<16x8xf32>
    %351 = tpu.matmul %350, %4, %cst_193 {dimension_numbers = #tpu.dot_dimension_numbers<[1], [0], [0], [1], [0, 0, 1, 1], [], []>} : vector<16x4xf32>, vector<4x8xf32>, vector<16x8xf32> -> vector<16x8xf32>
    %352 = vector.broadcast %5 : vector<1x8xf32> to vector<16x8xf32>
    %353 = arith.addf %351, %352 : vector<16x8xf32>
    %354 = arith.addf %349, %353 : vector<16x8xf32>
    %cst_194 = arith.constant 0.000000e+00 : f32
    %355 = vector.broadcast %cst_194 : f32 to vector<16x8xf32>
    %356 = arith.maximumf %354, %355 : vector<16x8xf32>
    %c0_195 = arith.constant 0 : index
    %c120_196 = arith.constant 120 : index
    %357 = vector.load %arg6[%c0_195, %c120_196] : memref<16x136xf32, #tpu.memory_space<vmem>>, vector<16x8xf32>
    tpu.vector_store %arg6[%c0_195, %c120_196], %356 {strides = array<i32>} : memref<16x136xf32, #tpu.memory_space<vmem>>, vector<16x8xf32>,
    %c0_197 = arith.constant 0 : index
    %c128 = arith.constant 128 : index
    %358 = vector.load %arg2[%c0_197, %c128] : memref<68x136xf32, #tpu.memory_space<vmem>>, vector<68x8xf32>
    %cst_198 = arith.constant dense<0.000000e+00> : vector<16x8xf32>
    %359 = tpu.matmul %0, %358, %cst_198 {dimension_numbers = #tpu.dot_dimension_numbers<[1], [0], [0], [1], [0, 0, 1, 1], [], []>} : vector<16x68xf32>, vector<68x8xf32>, vector<16x8xf32> -> vector<16x8xf32>
    %c16_199 = arith.constant 16 : index
    %c0_200 = arith.constant 0 : index
    %360 = vector.load %arg5[%c16_199, %c0_200] : memref<21x8xf32, #tpu.memory_space<vmem>>, vector<1x8xf32>
    %361 = vector.broadcast %360 : vector<1x8xf32> to vector<16x8xf32>
    %362 = arith.addf %359, %361 : vector<16x8xf32>
    %cst_201 = arith.constant 0.000000e+00 : f32
    %363 = vector.broadcast %cst_201 : f32 to vector<16x8xf32>
    %364 = arith.maximumf %362, %363 : vector<16x8xf32>
    %cst_202 = arith.constant dense<0.000000e+00> : vector<16x8xf32>
    %365 = tpu.matmul %364, %1, %cst_202 {dimension_numbers = #tpu.dot_dimension_numbers<[1], [0], [0], [1], [0, 0, 1, 1], [], []>} : vector<16x8xf32>, vector<8x8xf32>, vector<16x8xf32> -> vector<16x8xf32>
    %366 = vector.broadcast %2 : vector<1x8xf32> to vector<16x8xf32>
    %367 = arith.addf %365, %366 : vector<16x8xf32>
    %cst_203 = arith.constant 0.000000e+00 : f32
    %368 = vector.broadcast %cst_203 : f32 to vector<16x8xf32>
    %369 = arith.maximumf %367, %368 : vector<16x8xf32>
    %370 = vector.broadcast %3 : vector<1x8xf32> to vector<16x8xf32>
    %371 = arith.addf %369, %370 : vector<16x8xf32>
    %c0_204 = arith.constant 0 : index
    %c64_205 = arith.constant 64 : index
    %372 = vector.load %arg1[%c0_204, %c64_205] : memref<16x68xf32, #tpu.memory_space<vmem>>, vector<16x4xf32>
    %cst_206 = arith.constant dense<0.000000e+00> : vector<16x8xf32>
    %373 = tpu.matmul %372, %4, %cst_206 {dimension_numbers = #tpu.dot_dimension_numbers<[1], [0], [0], [1], [0, 0, 1, 1], [], []>} : vector<16x4xf32>, vector<4x8xf32>, vector<16x8xf32> -> vector<16x8xf32>
    %374 = vector.broadcast %5 : vector<1x8xf32> to vector<16x8xf32>
    %375 = arith.addf %373, %374 : vector<16x8xf32>
    %376 = arith.addf %371, %375 : vector<16x8xf32>
    %cst_207 = arith.constant 0.000000e+00 : f32
    %377 = vector.broadcast %cst_207 : f32 to vector<16x8xf32>
    %378 = arith.maximumf %376, %377 : vector<16x8xf32>
    %c0_208 = arith.constant 0 : index
    %c128_209 = arith.constant 128 : index
    %379 = vector.load %arg6[%c0_208, %c128_209] : memref<16x136xf32, #tpu.memory_space<vmem>>, vector<16x8xf32>
    tpu.vector_store %arg6[%c0_208, %c128_209], %378 {strides = array<i32>} : memref<16x136xf32, #tpu.memory_space<vmem>>, vector<16x8xf32>,
    return
  }
  func.func @transform_0(%arg0: i32) -> (i32, i32) {
    %c0_i32 = arith.constant 0 : i32
    %c0_i32_0 = arith.constant 0 : i32
    return %arg0, %c0_i32 : i32, i32
  }
  func.func @transform_1(%arg0: i32) -> (i32, i32) {
    %c0_i32 = arith.constant 0 : i32
    %c0_i32_0 = arith.constant 0 : i32
    %c0_i32_1 = arith.constant 0 : i32
    return %c0_i32, %c0_i32_0 : i32, i32
  }
  func.func @transform_2(%arg0: i32) -> (i32, i32) {
    %c0_i32 = arith.constant 0 : i32
    %c0_i32_0 = arith.constant 0 : i32
    %c0_i32_1 = arith.constant 0 : i32
    return %c0_i32, %c0_i32_0 : i32, i32
  }
  func.func @transform_3(%arg0: i32) -> (i32, i32) {
    %c0_i32 = arith.constant 0 : i32
    %c0_i32_0 = arith.constant 0 : i32
    %c0_i32_1 = arith.constant 0 : i32
    return %c0_i32, %c0_i32_0 : i32, i32
  }
  func.func @transform_4(%arg0: i32) -> (i32, i32) {
    %c0_i32 = arith.constant 0 : i32
    %c0_i32_0 = arith.constant 0 : i32
    %c0_i32_1 = arith.constant 0 : i32
    return %c0_i32, %c0_i32_0 : i32, i32
  }
  func.func @transform_5(%arg0: i32) -> (i32, i32) {
    %c0_i32 = arith.constant 0 : i32
    %c0_i32_0 = arith.constant 0 : i32
    return %arg0, %c0_i32 : i32, i32
  }
}

module attributes {stable_mosaic.version = 11 : i64} {
  func.func @kernel(%arg0: i32, %arg1: memref<16x68xf32, #tpu.memory_space<vmem>>, %arg2: memref<68x136xf32, #tpu.memory_space<vmem>>, %arg3: memref<8x8xf32, #tpu.memory_space<vmem>>, %arg4: memref<4x8xf32, #tpu.memory_space<vmem>>, %arg5: memref<21x8xf32, #tpu.memory_space<vmem>>, %arg6: memref<16x136xf32, #tpu.memory_space<vmem>>) attributes {dimension_semantics = [#tpu.dimension_semantics<parallel>], iteration_bounds = array<i64: 2>, scalar_prefetch = 0 : i64, scratch_operands = 0 : i64, tpu.core_type = #tpu.core_type<tc>, window_params = [{transform_indices = @transform_0, window_bounds = array<i64: 16, 68>}, {pipeline_mode = #tpu.pipeline_mode<synchronous>, transform_indices = @transform_1, window_bounds = array<i64: 68, 136>}, {pipeline_mode = #tpu.pipeline_mode<synchronous>, transform_indices = @transform_2, window_bounds = array<i64: 8, 8>}, {pipeline_mode = #tpu.pipeline_mode<synchronous>, transform_indices = @transform_3, window_bounds = array<i64: 4, 8>}, {pipeline_mode = #tpu.pipeline_mode<synchronous>, transform_indices = @transform_4, window_bounds = array<i64: 21, 8>}, {transform_indices = @transform_5, window_bounds = array<i64: 16, 136>}]} {
    %c0 = arith.constant 0 : index
    %c0_0 = arith.constant 0 : index
    %0 = vector.load %arg1[%c0, %c0_0] : memref<16x68xf32, #tpu.memory_space<vmem>>, vector<16x68xf32>
    %c0_1 = arith.constant 0 : index
    %c0_2 = arith.constant 0 : index
    %1 = vector.load %arg3[%c0_1, %c0_2] : memref<8x8xf32, #tpu.memory_space<vmem>>, vector<8x8xf32>
    %c17 = arith.constant 17 : index
    %c0_3 = arith.constant 0 : index
    %2 = vector.load %arg5[%c17, %c0_3] : memref<21x8xf32, #tpu.memory_space<vmem>>, vector<1x8xf32>
    %c19 = arith.constant 19 : index
    %c0_4 = arith.constant 0 : index
    %3 = vector.load %arg5[%c19, %c0_4] : memref<21x8xf32, #tpu.memory_space<vmem>>, vector<1x8xf32>
    %c0_5 = arith.constant 0 : index
    %c0_6 = arith.constant 0 : index
    %4 = vector.load %arg4[%c0_5, %c0_6] : memref<4x8xf32, #tpu.memory_space<vmem>>, vector<4x8xf32>
    %c20 = arith.constant 20 : index
    %c0_7 = arith.constant 0 : index
    %5 = vector.load %arg5[%c20, %c0_7] : memref<21x8xf32, #tpu.memory_space<vmem>>, vector<1x8xf32>
    %c0_8 = arith.constant 0 : index
    %c0_9 = arith.constant 0 : index
    %6 = vector.load %arg2[%c0_8, %c0_9] : memref<68x136xf32, #tpu.memory_space<vmem>>, vector<68x8xf32>
    %cst = arith.constant dense<0.000000e+00> : vector<16x8xf32>
    %7 = tpu.matmul %0, %6, %cst {dimension_numbers = #tpu.dot_dimension_numbers<[1], [0], [0], [1], [0, 0, 1, 1], [], []>} : vector<16x68xf32>, vector<68x8xf32>, vector<16x8xf32> -> vector<16x8xf32>
    %c0_10 = arith.constant 0 : index
    %c0_11 = arith.constant 0 : index
    %8 = vector.load %arg5[%c0_10, %c0_11] : memref<21x8xf32, #tpu.memory_space<vmem>>, vector<1x8xf32>
    %9 = vector.broadcast %8 : vector<1x8xf32> to vector<16x8xf32>
    %10 = arith.addf %7, %9 : vector<16x8xf32>
    %cst_12 = arith.constant 0.000000e+00 : f32
    %11 = vector.broadcast %cst_12 : f32 to vector<16x8xf32>
    %12 = arith.maximumf %10, %11 : vector<16x8xf32>
    %cst_13 = arith.constant dense<0.000000e+00> : vector<16x8xf32>
    %13 = tpu.matmul %12, %1, %cst_13 {dimension_numbers = #tpu.dot_dimension_numbers<[1], [0], [0], [1], [0, 0, 1, 1], [], []>} : vector<16x8xf32>, vector<8x8xf32>, vector<16x8xf32> -> vector<16x8xf32>
    %14 = vector.broadcast %2 : vector<1x8xf32> to vector<16x8xf32>
    %15 = arith.addf %13, %14 : vector<16x8xf32>
    %cst_14 = arith.constant 0.000000e+00 : f32
    %16 = vector.broadcast %cst_14 : f32 to vector<16x8xf32>
    %17 = arith.maximumf %15, %16 : vector<16x8xf32>
    %18 = vector.broadcast %3 : vector<1x8xf32> to vector<16x8xf32>
    %19 = arith.addf %17, %18 : vector<16x8xf32>
    %c0_15 = arith.constant 0 : index
    %c0_16 = arith.constant 0 : index
    %20 = vector.load %arg1[%c0_15, %c0_16] : memref<16x68xf32, #tpu.memory_space<vmem>>, vector<16x4xf32>
    %cst_17 = arith.constant dense<0.000000e+00> : vector<16x8xf32>
    %21 = tpu.matmul %20, %4, %cst_17 {dimension_numbers = #tpu.dot_dimension_numbers<[1], [0], [0], [1], [0, 0, 1, 1], [], []>} : vector<16x4xf32>, vector<4x8xf32>, vector<16x8xf32> -> vector<16x8xf32>
    %22 = vector.broadcast %5 : vector<1x8xf32> to vector<16x8xf32>
    %23 = arith.addf %21, %22 : vector<16x8xf32>
    %24 = arith.addf %19, %23 : vector<16x8xf32>
    %cst_18 = arith.constant 0.000000e+00 : f32
    %25 = vector.broadcast %cst_18 : f32 to vector<16x8xf32>
    %26 = arith.maximumf %24, %25 : vector<16x8xf32>
    %c0_19 = arith.constant 0 : index
    %c0_20 = arith.constant 0 : index
    %27 = vector.load %arg6[%c0_19, %c0_20] : memref<16x136xf32, #tpu.memory_space<vmem>>, vector<16x8xf32>
    tpu.vector_store %arg6[%c0_19, %c0_20], %26 {strides = array<i32>} : memref<16x136xf32, #tpu.memory_space<vmem>>, vector<16x8xf32>,
    %c0_21 = arith.constant 0 : index
    %c8 = arith.constant 8 : index
    %28 = vector.load %arg2[%c0_21, %c8] : memref<68x136xf32, #tpu.memory_space<vmem>>, vector<68x8xf32>
    %cst_22 = arith.constant dense<0.000000e+00> : vector<16x8xf32>
    %29 = tpu.matmul %0, %28, %cst_22 {dimension_numbers = #tpu.dot_dimension_numbers<[1], [0], [0], [1], [0, 0, 1, 1], [], []>} : vector<16x68xf32>, vector<68x8xf32>, vector<16x8xf32> -> vector<16x8xf32>
    %c1 = arith.constant 1 : index
    %c0_23 = arith.constant 0 : index
    %30 = vector.load %arg5[%c1, %c0_23] : memref<21x8xf32, #tpu.memory_space<vmem>>, vector<1x8xf32>
    %31 = vector.broadcast %30 : vector<1x8xf32> to vector<16x8xf32>
    %32 = arith.addf %29, %31 : vector<16x8xf32>
    %cst_24 = arith.constant 0.000000e+00 : f32
    %33 = vector.broadcast %cst_24 : f32 to vector<16x8xf32>
    %34 = arith.maximumf %32, %33 : vector<16x8xf32>
    %cst_25 = arith.constant dense<0.000000e+00> : vector<16x8xf32>
    %35 = tpu.matmul %34, %1, %cst_25 {dimension_numbers = #tpu.dot_dimension_numbers<[1], [0], [0], [1], [0, 0, 1, 1], [], []>} : vector<16x8xf32>, vector<8x8xf32>, vector<16x8xf32> -> vector<16x8xf32>
    %36 = vector.broadcast %2 : vector<1x8xf32> to vector<16x8xf32>
    %37 = arith.addf %35, %36 : vector<16x8xf32>
    %cst_26 = arith.constant 0.000000e+00 : f32
    %38 = vector.broadcast %cst_26 : f32 to vector<16x8xf32>
    %39 = arith.maximumf %37, %38 : vector<16x8xf32>
    %40 = vector.broadcast %3 : vector<1x8xf32> to vector<16x8xf32>
    %41 = arith.addf %39, %40 : vector<16x8xf32>
    %c0_27 = arith.constant 0 : index
    %c4 = arith.constant 4 : index
    %42 = vector.load %arg1[%c0_27, %c4] : memref<16x68xf32, #tpu.memory_space<vmem>>, vector<16x4xf32>
    %cst_28 = arith.constant dense<0.000000e+00> : vector<16x8xf32>
    %43 = tpu.matmul %42, %4, %cst_28 {dimension_numbers = #tpu.dot_dimension_numbers<[1], [0], [0], [1], [0, 0, 1, 1], [], []>} : vector<16x4xf32>, vector<4x8xf32>, vector<16x8xf32> -> vector<16x8xf32>
    %44 = vector.broadcast %5 : vector<1x8xf32> to vector<16x8xf32>
    %45 = arith.addf %43, %44 : vector<16x8xf32>
    %46 = arith.addf %41, %45 : vector<16x8xf32>
    %cst_29 = arith.constant 0.000000e+00 : f32
    %47 = vector.broadcast %cst_29 : f32 to vector<16x8xf32>
    %48 = arith.maximumf %46, %47 : vector<16x8xf32>
    %c0_30 = arith.constant 0 : index
    %c8_31 = arith.constant 8 : index
    %49 = vector.load %arg6[%c0_30, %c8_31] : memref<16x136xf32, #tpu.memory_space<vmem>>, vector<16x8xf32>
    tpu.vector_store %arg6[%c0_30, %c8_31], %48 {strides = array<i32>} : memref<16x136xf32, #tpu.memory_space<vmem>>, vector<16x8xf32>,
    %c0_32 = arith.constant 0 : index
    %c16 = arith.constant 16 : index
    %50 = vector.load %arg2[%c0_32, %c16] : memref<68x136xf32, #tpu.memory_space<vmem>>, vector<68x8xf32>
    %cst_33 = arith.constant dense<0.000000e+00> : vector<16x8xf32>
    %51 = tpu.matmul %0, %50, %cst_33 {dimension_numbers = #tpu.dot_dimension_numbers<[1], [0], [0], [1], [0, 0, 1, 1], [], []>} : vector<16x68xf32>, vector<68x8xf32>, vector<16x8xf32> -> vector<16x8xf32>
    %c2 = arith.constant 2 : index
    %c0_34 = arith.constant 0 : index
    %52 = vector.load %arg5[%c2, %c0_34] : memref<21x8xf32, #tpu.memory_space<vmem>>, vector<1x8xf32>
    %53 = vector.broadcast %52 : vector<1x8xf32> to vector<16x8xf32>
    %54 = arith.addf %51, %53 : vector<16x8xf32>
    %cst_35 = arith.constant 0.000000e+00 : f32
    %55 = vector.broadcast %cst_35 : f32 to vector<16x8xf32>
    %56 = arith.maximumf %54, %55 : vector<16x8xf32>
    %cst_36 = arith.constant dense<0.000000e+00> : vector<16x8xf32>
    %57 = tpu.matmul %56, %1, %cst_36 {dimension_numbers = #tpu.dot_dimension_numbers<[1], [0], [0], [1], [0, 0, 1, 1], [], []>} : vector<16x8xf32>, vector<8x8xf32>, vector<16x8xf32> -> vector<16x8xf32>
    %58 = vector.broadcast %2 : vector<1x8xf32> to vector<16x8xf32>
    %59 = arith.addf %57, %58 : vector<16x8xf32>
    %cst_37 = arith.constant 0.000000e+00 : f32
    %60 = vector.broadcast %cst_37 : f32 to vector<16x8xf32>
    %61 = arith.maximumf %59, %60 : vector<16x8xf32>
    %62 = vector.broadcast %3 : vector<1x8xf32> to vector<16x8xf32>
    %63 = arith.addf %61, %62 : vector<16x8xf32>
    %c0_38 = arith.constant 0 : index
    %c8_39 = arith.constant 8 : index
    %64 = vector.load %arg1[%c0_38, %c8_39] : memref<16x68xf32, #tpu.memory_space<vmem>>, vector<16x4xf32>
    %cst_40 = arith.constant dense<0.000000e+00> : vector<16x8xf32>
    %65 = tpu.matmul %64, %4, %cst_40 {dimension_numbers = #tpu.dot_dimension_numbers<[1], [0], [0], [1], [0, 0, 1, 1], [], []>} : vector<16x4xf32>, vector<4x8xf32>, vector<16x8xf32> -> vector<16x8xf32>
    %66 = vector.broadcast %5 : vector<1x8xf32> to vector<16x8xf32>
    %67 = arith.addf %65, %66 : vector<16x8xf32>
    %68 = arith.addf %63, %67 : vector<16x8xf32>
    %cst_41 = arith.constant 0.000000e+00 : f32
    %69 = vector.broadcast %cst_41 : f32 to vector<16x8xf32>
    %70 = arith.maximumf %68, %69 : vector<16x8xf32>
    %c0_42 = arith.constant 0 : index
    %c16_43 = arith.constant 16 : index
    %71 = vector.load %arg6[%c0_42, %c16_43] : memref<16x136xf32, #tpu.memory_space<vmem>>, vector<16x8xf32>
    tpu.vector_store %arg6[%c0_42, %c16_43], %70 {strides = array<i32>} : memref<16x136xf32, #tpu.memory_space<vmem>>, vector<16x8xf32>,
    %c0_44 = arith.constant 0 : index
    %c24 = arith.constant 24 : index
    %72 = vector.load %arg2[%c0_44, %c24] : memref<68x136xf32, #tpu.memory_space<vmem>>, vector<68x8xf32>
    %cst_45 = arith.constant dense<0.000000e+00> : vector<16x8xf32>
    %73 = tpu.matmul %0, %72, %cst_45 {dimension_numbers = #tpu.dot_dimension_numbers<[1], [0], [0], [1], [0, 0, 1, 1], [], []>} : vector<16x68xf32>, vector<68x8xf32>, vector<16x8xf32> -> vector<16x8xf32>
    %c3 = arith.constant 3 : index
    %c0_46 = arith.constant 0 : index
    %74 = vector.load %arg5[%c3, %c0_46] : memref<21x8xf32, #tpu.memory_space<vmem>>, vector<1x8xf32>
    %75 = vector.broadcast %74 : vector<1x8xf32> to vector<16x8xf32>
    %76 = arith.addf %73, %75 : vector<16x8xf32>
    %cst_47 = arith.constant 0.000000e+00 : f32
    %77 = vector.broadcast %cst_47 : f32 to vector<16x8xf32>
    %78 = arith.maximumf %76, %77 : vector<16x8xf32>
    %cst_48 = arith.constant dense<0.000000e+00> : vector<16x8xf32>
    %79 = tpu.matmul %78, %1, %cst_48 {dimension_numbers = #tpu.dot_dimension_numbers<[1], [0], [0], [1], [0, 0, 1, 1], [], []>} : vector<16x8xf32>, vector<8x8xf32>, vector<16x8xf32> -> vector<16x8xf32>
    %80 = vector.broadcast %2 : vector<1x8xf32> to vector<16x8xf32>
    %81 = arith.addf %79, %80 : vector<16x8xf32>
    %cst_49 = arith.constant 0.000000e+00 : f32
    %82 = vector.broadcast %cst_49 : f32 to vector<16x8xf32>
    %83 = arith.maximumf %81, %82 : vector<16x8xf32>
    %84 = vector.broadcast %3 : vector<1x8xf32> to vector<16x8xf32>
    %85 = arith.addf %83, %84 : vector<16x8xf32>
    %c0_50 = arith.constant 0 : index
    %c12 = arith.constant 12 : index
    %86 = vector.load %arg1[%c0_50, %c12] : memref<16x68xf32, #tpu.memory_space<vmem>>, vector<16x4xf32>
    %cst_51 = arith.constant dense<0.000000e+00> : vector<16x8xf32>
    %87 = tpu.matmul %86, %4, %cst_51 {dimension_numbers = #tpu.dot_dimension_numbers<[1], [0], [0], [1], [0, 0, 1, 1], [], []>} : vector<16x4xf32>, vector<4x8xf32>, vector<16x8xf32> -> vector<16x8xf32>
    %88 = vector.broadcast %5 : vector<1x8xf32> to vector<16x8xf32>
    %89 = arith.addf %87, %88 : vector<16x8xf32>
    %90 = arith.addf %85, %89 : vector<16x8xf32>
    %cst_52 = arith.constant 0.000000e+00 : f32
    %91 = vector.broadcast %cst_52 : f32 to vector<16x8xf32>
    %92 = arith.maximumf %90, %91 : vector<16x8xf32>
    %c0_53 = arith.constant 0 : index
    %c24_54 = arith.constant 24 : index
    %93 = vector.load %arg6[%c0_53, %c24_54] : memref<16x136xf32, #tpu.memory_space<vmem>>, vector<16x8xf32>
    tpu.vector_store %arg6[%c0_53, %c24_54], %92 {strides = array<i32>} : memref<16x136xf32, #tpu.memory_space<vmem>>, vector<16x8xf32>,
    %c0_55 = arith.constant 0 : index
    %c32 = arith.constant 32 : index
    %94 = vector.load %arg2[%c0_55, %c32] : memref<68x136xf32, #tpu.memory_space<vmem>>, vector<68x8xf32>
    %cst_56 = arith.constant dense<0.000000e+00> : vector<16x8xf32>
    %95 = tpu.matmul %0, %94, %cst_56 {dimension_numbers = #tpu.dot_dimension_numbers<[1], [0], [0], [1], [0, 0, 1, 1], [], []>} : vector<16x68xf32>, vector<68x8xf32>, vector<16x8xf32> -> vector<16x8xf32>
    %c4_57 = arith.constant 4 : index
    %c0_58 = arith.constant 0 : index
    %96 = vector.load %arg5[%c4_57, %c0_58] : memref<21x8xf32, #tpu.memory_space<vmem>>, vector<1x8xf32>
    %97 = vector.broadcast %96 : vector<1x8xf32> to vector<16x8xf32>
    %98 = arith.addf %95, %97 : vector<16x8xf32>
    %cst_59 = arith.constant 0.000000e+00 : f32
    %99 = vector.broadcast %cst_59 : f32 to vector<16x8xf32>
    %100 = arith.maximumf %98, %99 : vector<16x8xf32>
    %cst_60 = arith.constant dense<0.000000e+00> : vector<16x8xf32>
    %101 = tpu.matmul %100, %1, %cst_60 {dimension_numbers = #tpu.dot_dimension_numbers<[1], [0], [0], [1], [0, 0, 1, 1], [], []>} : vector<16x8xf32>, vector<8x8xf32>, vector<16x8xf32> -> vector<16x8xf32>
    %102 = vector.broadcast %2 : vector<1x8xf32> to vector<16x8xf32>
    %103 = arith.addf %101, %102 : vector<16x8xf32>
    %cst_61 = arith.constant 0.000000e+00 : f32
    %104 = vector.broadcast %cst_61 : f32 to vector<16x8xf32>
    %105 = arith.maximumf %103, %104 : vector<16x8xf32>
    %106 = vector.broadcast %3 : vector<1x8xf32> to vector<16x8xf32>
    %107 = arith.addf %105, %106 : vector<16x8xf32>
    %c0_62 = arith.constant 0 : index
    %c16_63 = arith.constant 16 : index
    %108 = vector.load %arg1[%c0_62, %c16_63] : memref<16x68xf32, #tpu.memory_space<vmem>>, vector<16x4xf32>
    %cst_64 = arith.constant dense<0.000000e+00> : vector<16x8xf32>
    %109 = tpu.matmul %108, %4, %cst_64 {dimension_numbers = #tpu.dot_dimension_numbers<[1], [0], [0], [1], [0, 0, 1, 1], [], []>} : vector<16x4xf32>, vector<4x8xf32>, vector<16x8xf32> -> vector<16x8xf32>
    %110 = vector.broadcast %5 : vector<1x8xf32> to vector<16x8xf32>
    %111 = arith.addf %109, %110 : vector<16x8xf32>
    %112 = arith.addf %107, %111 : vector<16x8xf32>
    %cst_65 = arith.constant 0.000000e+00 : f32
    %113 = vector.broadcast %cst_65 : f32 to vector<16x8xf32>
    %114 = arith.maximumf %112, %113 : vector<16x8xf32>
    %c0_66 = arith.constant 0 : index
    %c32_67 = arith.constant 32 : index
    %115 = vector.load %arg6[%c0_66, %c32_67] : memref<16x136xf32, #tpu.memory_space<vmem>>, vector<16x8xf32>
    tpu.vector_store %arg6[%c0_66, %c32_67], %114 {strides = array<i32>} : memref<16x136xf32, #tpu.memory_space<vmem>>, vector<16x8xf32>,
    %c0_68 = arith.constant 0 : index
    %c40 = arith.constant 40 : index
    %116 = vector.load %arg2[%c0_68, %c40] : memref<68x136xf32, #tpu.memory_space<vmem>>, vector<68x8xf32>
    %cst_69 = arith.constant dense<0.000000e+00> : vector<16x8xf32>
    %117 = tpu.matmul %0, %116, %cst_69 {dimension_numbers = #tpu.dot_dimension_numbers<[1], [0], [0], [1], [0, 0, 1, 1], [], []>} : vector<16x68xf32>, vector<68x8xf32>, vector<16x8xf32> -> vector<16x8xf32>
    %c5 = arith.constant 5 : index
    %c0_70 = arith.constant 0 : index
    %118 = vector.load %arg5[%c5, %c0_70] : memref<21x8xf32, #tpu.memory_space<vmem>>, vector<1x8xf32>
    %119 = vector.broadcast %118 : vector<1x8xf32> to vector<16x8xf32>
    %120 = arith.addf %117, %119 : vector<16x8xf32>
    %cst_71 = arith.constant 0.000000e+00 : f32
    %121 = vector.broadcast %cst_71 : f32 to vector<16x8xf32>
    %122 = arith.maximumf %120, %121 : vector<16x8xf32>
    %cst_72 = arith.constant dense<0.000000e+00> : vector<16x8xf32>
    %123 = tpu.matmul %122, %1, %cst_72 {dimension_numbers = #tpu.dot_dimension_numbers<[1], [0], [0], [1], [0, 0, 1, 1], [], []>} : vector<16x8xf32>, vector<8x8xf32>, vector<16x8xf32> -> vector<16x8xf32>
    %124 = vector.broadcast %2 : vector<1x8xf32> to vector<16x8xf32>
    %125 = arith.addf %123, %124 : vector<16x8xf32>
    %cst_73 = arith.constant 0.000000e+00 : f32
    %126 = vector.broadcast %cst_73 : f32 to vector<16x8xf32>
    %127 = arith.maximumf %125, %126 : vector<16x8xf32>
    %128 = vector.broadcast %3 : vector<1x8xf32> to vector<16x8xf32>
    %129 = arith.addf %127, %128 : vector<16x8xf32>
    %c0_74 = arith.constant 0 : index
    %c20_75 = arith.constant 20 : index
    %130 = vector.load %arg1[%c0_74, %c20_75] : memref<16x68xf32, #tpu.memory_space<vmem>>, vector<16x4xf32>
    %cst_76 = arith.constant dense<0.000000e+00> : vector<16x8xf32>
    %131 = tpu.matmul %130, %4, %cst_76 {dimension_numbers = #tpu.dot_dimension_numbers<[1], [0], [0], [1], [0, 0, 1, 1], [], []>} : vector<16x4xf32>, vector<4x8xf32>, vector<16x8xf32> -> vector<16x8xf32>
    %132 = vector.broadcast %5 : vector<1x8xf32> to vector<16x8xf32>
    %133 = arith.addf %131, %132 : vector<16x8xf32>
    %134 = arith.addf %129, %133 : vector<16x8xf32>
    %cst_77 = arith.constant 0.000000e+00 : f32
    %135 = vector.broadcast %cst_77 : f32 to vector<16x8xf32>
    %136 = arith.maximumf %134, %135 : vector<16x8xf32>
    %c0_78 = arith.constant 0 : index
    %c40_79 = arith.constant 40 : index
    %137 = vector.load %arg6[%c0_78, %c40_79] : memref<16x136xf32, #tpu.memory_space<vmem>>, vector<16x8xf32>
    tpu.vector_store %arg6[%c0_78, %c40_79], %136 {strides = array<i32>} : memref<16x136xf32, #tpu.memory_space<vmem>>, vector<16x8xf32>,
    %c0_80 = arith.constant 0 : index
    %c48 = arith.constant 48 : index
    %138 = vector.load %arg2[%c0_80, %c48] : memref<68x136xf32, #tpu.memory_space<vmem>>, vector<68x8xf32>
    %cst_81 = arith.constant dense<0.000000e+00> : vector<16x8xf32>
    %139 = tpu.matmul %0, %138, %cst_81 {dimension_numbers = #tpu.dot_dimension_numbers<[1], [0], [0], [1], [0, 0, 1, 1], [], []>} : vector<16x68xf32>, vector<68x8xf32>, vector<16x8xf32> -> vector<16x8xf32>
    %c6 = arith.constant 6 : index
    %c0_82 = arith.constant 0 : index
    %140 = vector.load %arg5[%c6, %c0_82] : memref<21x8xf32, #tpu.memory_space<vmem>>, vector<1x8xf32>
    %141 = vector.broadcast %140 : vector<1x8xf32> to vector<16x8xf32>
    %142 = arith.addf %139, %141 : vector<16x8xf32>
    %cst_83 = arith.constant 0.000000e+00 : f32
    %143 = vector.broadcast %cst_83 : f32 to vector<16x8xf32>
    %144 = arith.maximumf %142, %143 : vector<16x8xf32>
    %cst_84 = arith.constant dense<0.000000e+00> : vector<16x8xf32>
    %145 = tpu.matmul %144, %1, %cst_84 {dimension_numbers = #tpu.dot_dimension_numbers<[1], [0], [0], [1], [0, 0, 1, 1], [], []>} : vector<16x8xf32>, vector<8x8xf32>, vector<16x8xf32> -> vector<16x8xf32>
    %146 = vector.broadcast %2 : vector<1x8xf32> to vector<16x8xf32>
    %147 = arith.addf %145, %146 : vector<16x8xf32>
    %cst_85 = arith.constant 0.000000e+00 : f32
    %148 = vector.broadcast %cst_85 : f32 to vector<16x8xf32>
    %149 = arith.maximumf %147, %148 : vector<16x8xf32>
    %150 = vector.broadcast %3 : vector<1x8xf32> to vector<16x8xf32>
    %151 = arith.addf %149, %150 : vector<16x8xf32>
    %c0_86 = arith.constant 0 : index
    %c24_87 = arith.constant 24 : index
    %152 = vector.load %arg1[%c0_86, %c24_87] : memref<16x68xf32, #tpu.memory_space<vmem>>, vector<16x4xf32>
    %cst_88 = arith.constant dense<0.000000e+00> : vector<16x8xf32>
    %153 = tpu.matmul %152, %4, %cst_88 {dimension_numbers = #tpu.dot_dimension_numbers<[1], [0], [0], [1], [0, 0, 1, 1], [], []>} : vector<16x4xf32>, vector<4x8xf32>, vector<16x8xf32> -> vector<16x8xf32>
    %154 = vector.broadcast %5 : vector<1x8xf32> to vector<16x8xf32>
    %155 = arith.addf %153, %154 : vector<16x8xf32>
    %156 = arith.addf %151, %155 : vector<16x8xf32>
    %cst_89 = arith.constant 0.000000e+00 : f32
    %157 = vector.broadcast %cst_89 : f32 to vector<16x8xf32>
    %158 = arith.maximumf %156, %157 : vector<16x8xf32>
    %c0_90 = arith.constant 0 : index
    %c48_91 = arith.constant 48 : index
    %159 = vector.load %arg6[%c0_90, %c48_91] : memref<16x136xf32, #tpu.memory_space<vmem>>, vector<16x8xf32>
    tpu.vector_store %arg6[%c0_90, %c48_91], %158 {strides = array<i32>} : memref<16x136xf32, #tpu.memory_space<vmem>>, vector<16x8xf32>,
    %c0_92 = arith.constant 0 : index
    %c56 = arith.constant 56 : index
    %160 = vector.load %arg2[%c0_92, %c56] : memref<68x136xf32, #tpu.memory_space<vmem>>, vector<68x8xf32>
    %cst_93 = arith.constant dense<0.000000e+00> : vector<16x8xf32>
    %161 = tpu.matmul %0, %160, %cst_93 {dimension_numbers = #tpu.dot_dimension_numbers<[1], [0], [0], [1], [0, 0, 1, 1], [], []>} : vector<16x68xf32>, vector<68x8xf32>, vector<16x8xf32> -> vector<16x8xf32>
    %c7 = arith.constant 7 : index
    %c0_94 = arith.constant 0 : index
    %162 = vector.load %arg5[%c7, %c0_94] : memref<21x8xf32, #tpu.memory_space<vmem>>, vector<1x8xf32>
    %163 = vector.broadcast %162 : vector<1x8xf32> to vector<16x8xf32>
    %164 = arith.addf %161, %163 : vector<16x8xf32>
    %cst_95 = arith.constant 0.000000e+00 : f32
    %165 = vector.broadcast %cst_95 : f32 to vector<16x8xf32>
    %166 = arith.maximumf %164, %165 : vector<16x8xf32>
    %cst_96 = arith.constant dense<0.000000e+00> : vector<16x8xf32>
    %167 = tpu.matmul %166, %1, %cst_96 {dimension_numbers = #tpu.dot_dimension_numbers<[1], [0], [0], [1], [0, 0, 1, 1], [], []>} : vector<16x8xf32>, vector<8x8xf32>, vector<16x8xf32> -> vector<16x8xf32>
    %168 = vector.broadcast %2 : vector<1x8xf32> to vector<16x8xf32>
    %169 = arith.addf %167, %168 : vector<16x8xf32>
    %cst_97 = arith.constant 0.000000e+00 : f32
    %170 = vector.broadcast %cst_97 : f32 to vector<16x8xf32>
    %171 = arith.maximumf %169, %170 : vector<16x8xf32>
    %172 = vector.broadcast %3 : vector<1x8xf32> to vector<16x8xf32>
    %173 = arith.addf %171, %172 : vector<16x8xf32>
    %c0_98 = arith.constant 0 : index
    %c28 = arith.constant 28 : index
    %174 = vector.load %arg1[%c0_98, %c28] : memref<16x68xf32, #tpu.memory_space<vmem>>, vector<16x4xf32>
    %cst_99 = arith.constant dense<0.000000e+00> : vector<16x8xf32>
    %175 = tpu.matmul %174, %4, %cst_99 {dimension_numbers = #tpu.dot_dimension_numbers<[1], [0], [0], [1], [0, 0, 1, 1], [], []>} : vector<16x4xf32>, vector<4x8xf32>, vector<16x8xf32> -> vector<16x8xf32>
    %176 = vector.broadcast %5 : vector<1x8xf32> to vector<16x8xf32>
    %177 = arith.addf %175, %176 : vector<16x8xf32>
    %178 = arith.addf %173, %177 : vector<16x8xf32>
    %cst_100 = arith.constant 0.000000e+00 : f32
    %179 = vector.broadcast %cst_100 : f32 to vector<16x8xf32>
    %180 = arith.maximumf %178, %179 : vector<16x8xf32>
    %c0_101 = arith.constant 0 : index
    %c56_102 = arith.constant 56 : index
    %181 = vector.load %arg6[%c0_101, %c56_102] : memref<16x136xf32, #tpu.memory_space<vmem>>, vector<16x8xf32>
    tpu.vector_store %arg6[%c0_101, %c56_102], %180 {strides = array<i32>} : memref<16x136xf32, #tpu.memory_space<vmem>>, vector<16x8xf32>,
    %c0_103 = arith.constant 0 : index
    %c64 = arith.constant 64 : index
    %182 = vector.load %arg2[%c0_103, %c64] : memref<68x136xf32, #tpu.memory_space<vmem>>, vector<68x8xf32>
    %cst_104 = arith.constant dense<0.000000e+00> : vector<16x8xf32>
    %183 = tpu.matmul %0, %182, %cst_104 {dimension_numbers = #tpu.dot_dimension_numbers<[1], [0], [0], [1], [0, 0, 1, 1], [], []>} : vector<16x68xf32>, vector<68x8xf32>, vector<16x8xf32> -> vector<16x8xf32>
    %c8_105 = arith.constant 8 : index
    %c0_106 = arith.constant 0 : index
    %184 = vector.load %arg5[%c8_105, %c0_106] : memref<21x8xf32, #tpu.memory_space<vmem>>, vector<1x8xf32>
    %185 = vector.broadcast %184 : vector<1x8xf32> to vector<16x8xf32>
    %186 = arith.addf %183, %185 : vector<16x8xf32>
    %cst_107 = arith.constant 0.000000e+00 : f32
    %187 = vector.broadcast %cst_107 : f32 to vector<16x8xf32>
    %188 = arith.maximumf %186, %187 : vector<16x8xf32>
    %cst_108 = arith.constant dense<0.000000e+00> : vector<16x8xf32>
    %189 = tpu.matmul %188, %1, %cst_108 {dimension_numbers = #tpu.dot_dimension_numbers<[1], [0], [0], [1], [0, 0, 1, 1], [], []>} : vector<16x8xf32>, vector<8x8xf32>, vector<16x8xf32> -> vector<16x8xf32>
    %190 = vector.broadcast %2 : vector<1x8xf32> to vector<16x8xf32>
    %191 = arith.addf %189, %190 : vector<16x8xf32>
    %cst_109 = arith.constant 0.000000e+00 : f32
    %192 = vector.broadcast %cst_109 : f32 to vector<16x8xf32>
    %193 = arith.maximumf %191, %192 : vector<16x8xf32>
    %194 = vector.broadcast %3 : vector<1x8xf32> to vector<16x8xf32>
    %195 = arith.addf %193, %194 : vector<16x8xf32>
    %c0_110 = arith.constant 0 : index
    %c32_111 = arith.constant 32 : index
    %196 = vector.load %arg1[%c0_110, %c32_111] : memref<16x68xf32, #tpu.memory_space<vmem>>, vector<16x4xf32>
    %cst_112 = arith.constant dense<0.000000e+00> : vector<16x8xf32>
    %197 = tpu.matmul %196, %4, %cst_112 {dimension_numbers = #tpu.dot_dimension_numbers<[1], [0], [0], [1], [0, 0, 1, 1], [], []>} : vector<16x4xf32>, vector<4x8xf32>, vector<16x8xf32> -> vector<16x8xf32>
    %198 = vector.broadcast %5 : vector<1x8xf32> to vector<16x8xf32>
    %199 = arith.addf %197, %198 : vector<16x8xf32>
    %200 = arith.addf %195, %199 : vector<16x8xf32>
    %cst_113 = arith.constant 0.000000e+00 : f32
    %201 = vector.broadcast %cst_113 : f32 to vector<16x8xf32>
    %202 = arith.maximumf %200, %201 : vector<16x8xf32>
    %c0_114 = arith.constant 0 : index
    %c64_115 = arith.constant 64 : index
    %203 = vector.load %arg6[%c0_114, %c64_115] : memref<16x136xf32, #tpu.memory_space<vmem>>, vector<16x8xf32>
    tpu.vector_store %arg6[%c0_114, %c64_115], %202 {strides = array<i32>} : memref<16x136xf32, #tpu.memory_space<vmem>>, vector<16x8xf32>,
    %c0_116 = arith.constant 0 : index
    %c72 = arith.constant 72 : index
    %204 = vector.load %arg2[%c0_116, %c72] : memref<68x136xf32, #tpu.memory_space<vmem>>, vector<68x8xf32>
    %cst_117 = arith.constant dense<0.000000e+00> : vector<16x8xf32>
    %205 = tpu.matmul %0, %204, %cst_117 {dimension_numbers = #tpu.dot_dimension_numbers<[1], [0], [0], [1], [0, 0, 1, 1], [], []>} : vector<16x68xf32>, vector<68x8xf32>, vector<16x8xf32> -> vector<16x8xf32>
    %c9 = arith.constant 9 : index
    %c0_118 = arith.constant 0 : index
    %206 = vector.load %arg5[%c9, %c0_118] : memref<21x8xf32, #tpu.memory_space<vmem>>, vector<1x8xf32>
    %207 = vector.broadcast %206 : vector<1x8xf32> to vector<16x8xf32>
    %208 = arith.addf %205, %207 : vector<16x8xf32>
    %cst_119 = arith.constant 0.000000e+00 : f32
    %209 = vector.broadcast %cst_119 : f32 to vector<16x8xf32>
    %210 = arith.maximumf %208, %209 : vector<16x8xf32>
    %cst_120 = arith.constant dense<0.000000e+00> : vector<16x8xf32>
    %211 = tpu.matmul %210, %1, %cst_120 {dimension_numbers = #tpu.dot_dimension_numbers<[1], [0], [0], [1], [0, 0, 1, 1], [], []>} : vector<16x8xf32>, vector<8x8xf32>, vector<16x8xf32> -> vector<16x8xf32>
    %212 = vector.broadcast %2 : vector<1x8xf32> to vector<16x8xf32>
    %213 = arith.addf %211, %212 : vector<16x8xf32>
    %cst_121 = arith.constant 0.000000e+00 : f32
    %214 = vector.broadcast %cst_121 : f32 to vector<16x8xf32>
    %215 = arith.maximumf %213, %214 : vector<16x8xf32>
    %216 = vector.broadcast %3 : vector<1x8xf32> to vector<16x8xf32>
    %217 = arith.addf %215, %216 : vector<16x8xf32>
    %c0_122 = arith.constant 0 : index
    %c36 = arith.constant 36 : index
    %218 = vector.load %arg1[%c0_122, %c36] : memref<16x68xf32, #tpu.memory_space<vmem>>, vector<16x4xf32>
    %cst_123 = arith.constant dense<0.000000e+00> : vector<16x8xf32>
    %219 = tpu.matmul %218, %4, %cst_123 {dimension_numbers = #tpu.dot_dimension_numbers<[1], [0], [0], [1], [0, 0, 1, 1], [], []>} : vector<16x4xf32>, vector<4x8xf32>, vector<16x8xf32> -> vector<16x8xf32>
    %220 = vector.broadcast %5 : vector<1x8xf32> to vector<16x8xf32>
    %221 = arith.addf %219, %220 : vector<16x8xf32>
    %222 = arith.addf %217, %221 : vector<16x8xf32>
    %cst_124 = arith.constant 0.000000e+00 : f32
    %223 = vector.broadcast %cst_124 : f32 to vector<16x8xf32>
    %224 = arith.maximumf %222, %223 : vector<16x8xf32>
    %c0_125 = arith.constant 0 : index
    %c72_126 = arith.constant 72 : index
    %225 = vector.load %arg6[%c0_125, %c72_126] : memref<16x136xf32, #tpu.memory_space<vmem>>, vector<16x8xf32>
    tpu.vector_store %arg6[%c0_125, %c72_126], %224 {strides = array<i32>} : memref<16x136xf32, #tpu.memory_space<vmem>>, vector<16x8xf32>,
    %c0_127 = arith.constant 0 : index
    %c80 = arith.constant 80 : index
    %226 = vector.load %arg2[%c0_127, %c80] : memref<68x136xf32, #tpu.memory_space<vmem>>, vector<68x8xf32>
    %cst_128 = arith.constant dense<0.000000e+00> : vector<16x8xf32>
    %227 = tpu.matmul %0, %226, %cst_128 {dimension_numbers = #tpu.dot_dimension_numbers<[1], [0], [0], [1], [0, 0, 1, 1], [], []>} : vector<16x68xf32>, vector<68x8xf32>, vector<16x8xf32> -> vector<16x8xf32>
    %c10 = arith.constant 10 : index
    %c0_129 = arith.constant 0 : index
    %228 = vector.load %arg5[%c10, %c0_129] : memref<21x8xf32, #tpu.memory_space<vmem>>, vector<1x8xf32>
    %229 = vector.broadcast %228 : vector<1x8xf32> to vector<16x8xf32>
    %230 = arith.addf %227, %229 : vector<16x8xf32>
    %cst_130 = arith.constant 0.000000e+00 : f32
    %231 = vector.broadcast %cst_130 : f32 to vector<16x8xf32>
    %232 = arith.maximumf %230, %231 : vector<16x8xf32>
    %cst_131 = arith.constant dense<0.000000e+00> : vector<16x8xf32>
    %233 = tpu.matmul %232, %1, %cst_131 {dimension_numbers = #tpu.dot_dimension_numbers<[1], [0], [0], [1], [0, 0, 1, 1], [], []>} : vector<16x8xf32>, vector<8x8xf32>, vector<16x8xf32> -> vector<16x8xf32>
    %234 = vector.broadcast %2 : vector<1x8xf32> to vector<16x8xf32>
    %235 = arith.addf %233, %234 : vector<16x8xf32>
    %cst_132 = arith.constant 0.000000e+00 : f32
    %236 = vector.broadcast %cst_132 : f32 to vector<16x8xf32>
    %237 = arith.maximumf %235, %236 : vector<16x8xf32>
    %238 = vector.broadcast %3 : vector<1x8xf32> to vector<16x8xf32>
    %239 = arith.addf %237, %238 : vector<16x8xf32>
    %c0_133 = arith.constant 0 : index
    %c40_134 = arith.constant 40 : index
    %240 = vector.load %arg1[%c0_133, %c40_134] : memref<16x68xf32, #tpu.memory_space<vmem>>, vector<16x4xf32>
    %cst_135 = arith.constant dense<0.000000e+00> : vector<16x8xf32>
    %241 = tpu.matmul %240, %4, %cst_135 {dimension_numbers = #tpu.dot_dimension_numbers<[1], [0], [0], [1], [0, 0, 1, 1], [], []>} : vector<16x4xf32>, vector<4x8xf32>, vector<16x8xf32> -> vector<16x8xf32>
    %242 = vector.broadcast %5 : vector<1x8xf32> to vector<16x8xf32>
    %243 = arith.addf %241, %242 : vector<16x8xf32>
    %244 = arith.addf %239, %243 : vector<16x8xf32>
    %cst_136 = arith.constant 0.000000e+00 : f32
    %245 = vector.broadcast %cst_136 : f32 to vector<16x8xf32>
    %246 = arith.maximumf %244, %245 : vector<16x8xf32>
    %c0_137 = arith.constant 0 : index
    %c80_138 = arith.constant 80 : index
    %247 = vector.load %arg6[%c0_137, %c80_138] : memref<16x136xf32, #tpu.memory_space<vmem>>, vector<16x8xf32>
    tpu.vector_store %arg6[%c0_137, %c80_138], %246 {strides = array<i32>} : memref<16x136xf32, #tpu.memory_space<vmem>>, vector<16x8xf32>,
    %c0_139 = arith.constant 0 : index
    %c88 = arith.constant 88 : index
    %248 = vector.load %arg2[%c0_139, %c88] : memref<68x136xf32, #tpu.memory_space<vmem>>, vector<68x8xf32>
    %cst_140 = arith.constant dense<0.000000e+00> : vector<16x8xf32>
    %249 = tpu.matmul %0, %248, %cst_140 {dimension_numbers = #tpu.dot_dimension_numbers<[1], [0], [0], [1], [0, 0, 1, 1], [], []>} : vector<16x68xf32>, vector<68x8xf32>, vector<16x8xf32> -> vector<16x8xf32>
    %c11 = arith.constant 11 : index
    %c0_141 = arith.constant 0 : index
    %250 = vector.load %arg5[%c11, %c0_141] : memref<21x8xf32, #tpu.memory_space<vmem>>, vector<1x8xf32>
    %251 = vector.broadcast %250 : vector<1x8xf32> to vector<16x8xf32>
    %252 = arith.addf %249, %251 : vector<16x8xf32>
    %cst_142 = arith.constant 0.000000e+00 : f32
    %253 = vector.broadcast %cst_142 : f32 to vector<16x8xf32>
    %254 = arith.maximumf %252, %253 : vector<16x8xf32>
    %cst_143 = arith.constant dense<0.000000e+00> : vector<16x8xf32>
    %255 = tpu.matmul %254, %1, %cst_143 {dimension_numbers = #tpu.dot_dimension_numbers<[1], [0], [0], [1], [0, 0, 1, 1], [], []>} : vector<16x8xf32>, vector<8x8xf32>, vector<16x8xf32> -> vector<16x8xf32>
    %256 = vector.broadcast %2 : vector<1x8xf32> to vector<16x8xf32>
    %257 = arith.addf %255, %256 : vector<16x8xf32>
    %cst_144 = arith.constant 0.000000e+00 : f32
    %258 = vector.broadcast %cst_144 : f32 to vector<16x8xf32>
    %259 = arith.maximumf %257, %258 : vector<16x8xf32>
    %260 = vector.broadcast %3 : vector<1x8xf32> to vector<16x8xf32>
    %261 = arith.addf %259, %260 : vector<16x8xf32>
    %c0_145 = arith.constant 0 : index
    %c44 = arith.constant 44 : index
    %262 = vector.load %arg1[%c0_145, %c44] : memref<16x68xf32, #tpu.memory_space<vmem>>, vector<16x4xf32>
    %cst_146 = arith.constant dense<0.000000e+00> : vector<16x8xf32>
    %263 = tpu.matmul %262, %4, %cst_146 {dimension_numbers = #tpu.dot_dimension_numbers<[1], [0], [0], [1], [0, 0, 1, 1], [], []>} : vector<16x4xf32>, vector<4x8xf32>, vector<16x8xf32> -> vector<16x8xf32>
    %264 = vector.broadcast %5 : vector<1x8xf32> to vector<16x8xf32>
    %265 = arith.addf %263, %264 : vector<16x8xf32>
    %266 = arith.addf %261, %265 : vector<16x8xf32>
    %cst_147 = arith.constant 0.000000e+00 : f32
    %267 = vector.broadcast %cst_147 : f32 to vector<16x8xf32>
    %268 = arith.maximumf %266, %267 : vector<16x8xf32>
    %c0_148 = arith.constant 0 : index
    %c88_149 = arith.constant 88 : index
    %269 = vector.load %arg6[%c0_148, %c88_149] : memref<16x136xf32, #tpu.memory_space<vmem>>, vector<16x8xf32>
    tpu.vector_store %arg6[%c0_148, %c88_149], %268 {strides = array<i32>} : memref<16x136xf32, #tpu.memory_space<vmem>>, vector<16x8xf32>,
    %c0_150 = arith.constant 0 : index
    %c96 = arith.constant 96 : index
    %270 = vector.load %arg2[%c0_150, %c96] : memref<68x136xf32, #tpu.memory_space<vmem>>, vector<68x8xf32>
    %cst_151 = arith.constant dense<0.000000e+00> : vector<16x8xf32>
    %271 = tpu.matmul %0, %270, %cst_151 {dimension_numbers = #tpu.dot_dimension_numbers<[1], [0], [0], [1], [0, 0, 1, 1], [], []>} : vector<16x68xf32>, vector<68x8xf32>, vector<16x8xf32> -> vector<16x8xf32>
    %c12_152 = arith.constant 12 : index
    %c0_153 = arith.constant 0 : index
    %272 = vector.load %arg5[%c12_152, %c0_153] : memref<21x8xf32, #tpu.memory_space<vmem>>, vector<1x8xf32>
    %273 = vector.broadcast %272 : vector<1x8xf32> to vector<16x8xf32>
    %274 = arith.addf %271, %273 : vector<16x8xf32>
    %cst_154 = arith.constant 0.000000e+00 : f32
    %275 = vector.broadcast %cst_154 : f32 to vector<16x8xf32>
    %276 = arith.maximumf %274, %275 : vector<16x8xf32>
    %cst_155 = arith.constant dense<0.000000e+00> : vector<16x8xf32>
    %277 = tpu.matmul %276, %1, %cst_155 {dimension_numbers = #tpu.dot_dimension_numbers<[1], [0], [0], [1], [0, 0, 1, 1], [], []>} : vector<16x8xf32>, vector<8x8xf32>, vector<16x8xf32> -> vector<16x8xf32>
    %278 = vector.broadcast %2 : vector<1x8xf32> to vector<16x8xf32>
    %279 = arith.addf %277, %278 : vector<16x8xf32>
    %cst_156 = arith.constant 0.000000e+00 : f32
    %280 = vector.broadcast %cst_156 : f32 to vector<16x8xf32>
    %281 = arith.maximumf %279, %280 : vector<16x8xf32>
    %282 = vector.broadcast %3 : vector<1x8xf32> to vector<16x8xf32>
    %283 = arith.addf %281, %282 : vector<16x8xf32>
    %c0_157 = arith.constant 0 : index
    %c48_158 = arith.constant 48 : index
    %284 = vector.load %arg1[%c0_157, %c48_158] : memref<16x68xf32, #tpu.memory_space<vmem>>, vector<16x4xf32>
    %cst_159 = arith.constant dense<0.000000e+00> : vector<16x8xf32>
    %285 = tpu.matmul %284, %4, %cst_159 {dimension_numbers = #tpu.dot_dimension_numbers<[1], [0], [0], [1], [0, 0, 1, 1], [], []>} : vector<16x4xf32>, vector<4x8xf32>, vector<16x8xf32> -> vector<16x8xf32>
    %286 = vector.broadcast %5 : vector<1x8xf32> to vector<16x8xf32>
    %287 = arith.addf %285, %286 : vector<16x8xf32>
    %288 = arith.addf %283, %287 : vector<16x8xf32>
    %cst_160 = arith.constant 0.000000e+00 : f32
    %289 = vector.broadcast %cst_160 : f32 to vector<16x8xf32>
    %290 = arith.maximumf %288, %289 : vector<16x8xf32>
    %c0_161 = arith.constant 0 : index
    %c96_162 = arith.constant 96 : index
    %291 = vector.load %arg6[%c0_161, %c96_162] : memref<16x136xf32, #tpu.memory_space<vmem>>, vector<16x8xf32>
    tpu.vector_store %arg6[%c0_161, %c96_162], %290 {strides = array<i32>} : memref<16x136xf32, #tpu.memory_space<vmem>>, vector<16x8xf32>,
    %c0_163 = arith.constant 0 : index
    %c104 = arith.constant 104 : index
    %292 = vector.load %arg2[%c0_163, %c104] : memref<68x136xf32, #tpu.memory_space<vmem>>, vector<68x8xf32>
    %cst_164 = arith.constant dense<0.000000e+00> : vector<16x8xf32>
    %293 = tpu.matmul %0, %292, %cst_164 {dimension_numbers = #tpu.dot_dimension_numbers<[1], [0], [0], [1], [0, 0, 1, 1], [], []>} : vector<16x68xf32>, vector<68x8xf32>, vector<16x8xf32> -> vector<16x8xf32>
    %c13 = arith.constant 13 : index
    %c0_165 = arith.constant 0 : index
    %294 = vector.load %arg5[%c13, %c0_165] : memref<21x8xf32, #tpu.memory_space<vmem>>, vector<1x8xf32>
    %295 = vector.broadcast %294 : vector<1x8xf32> to vector<16x8xf32>
    %296 = arith.addf %293, %295 : vector<16x8xf32>
    %cst_166 = arith.constant 0.000000e+00 : f32
    %297 = vector.broadcast %cst_166 : f32 to vector<16x8xf32>
    %298 = arith.maximumf %296, %297 : vector<16x8xf32>
    %cst_167 = arith.constant dense<0.000000e+00> : vector<16x8xf32>
    %299 = tpu.matmul %298, %1, %cst_167 {dimension_numbers = #tpu.dot_dimension_numbers<[1], [0], [0], [1], [0, 0, 1, 1], [], []>} : vector<16x8xf32>, vector<8x8xf32>, vector<16x8xf32> -> vector<16x8xf32>
    %300 = vector.broadcast %2 : vector<1x8xf32> to vector<16x8xf32>
    %301 = arith.addf %299, %300 : vector<16x8xf32>
    %cst_168 = arith.constant 0.000000e+00 : f32
    %302 = vector.broadcast %cst_168 : f32 to vector<16x8xf32>
    %303 = arith.maximumf %301, %302 : vector<16x8xf32>
    %304 = vector.broadcast %3 : vector<1x8xf32> to vector<16x8xf32>
    %305 = arith.addf %303, %304 : vector<16x8xf32>
    %c0_169 = arith.constant 0 : index
    %c52 = arith.constant 52 : index
    %306 = vector.load %arg1[%c0_169, %c52] : memref<16x68xf32, #tpu.memory_space<vmem>>, vector<16x4xf32>
    %cst_170 = arith.constant dense<0.000000e+00> : vector<16x8xf32>
    %307 = tpu.matmul %306, %4, %cst_170 {dimension_numbers = #tpu.dot_dimension_numbers<[1], [0], [0], [1], [0, 0, 1, 1], [], []>} : vector<16x4xf32>, vector<4x8xf32>, vector<16x8xf32> -> vector<16x8xf32>
    %308 = vector.broadcast %5 : vector<1x8xf32> to vector<16x8xf32>
    %309 = arith.addf %307, %308 : vector<16x8xf32>
    %310 = arith.addf %305, %309 : vector<16x8xf32>
    %cst_171 = arith.constant 0.000000e+00 : f32
    %311 = vector.broadcast %cst_171 : f32 to vector<16x8xf32>
    %312 = arith.maximumf %310, %311 : vector<16x8xf32>
    %c0_172 = arith.constant 0 : index
    %c104_173 = arith.constant 104 : index
    %313 = vector.load %arg6[%c0_172, %c104_173] : memref<16x136xf32, #tpu.memory_space<vmem>>, vector<16x8xf32>
    tpu.vector_store %arg6[%c0_172, %c104_173], %312 {strides = array<i32>} : memref<16x136xf32, #tpu.memory_space<vmem>>, vector<16x8xf32>,
    %c0_174 = arith.constant 0 : index
    %c112 = arith.constant 112 : index
    %314 = vector.load %arg2[%c0_174, %c112] : memref<68x136xf32, #tpu.memory_space<vmem>>, vector<68x8xf32>
    %cst_175 = arith.constant dense<0.000000e+00> : vector<16x8xf32>
    %315 = tpu.matmul %0, %314, %cst_175 {dimension_numbers = #tpu.dot_dimension_numbers<[1], [0], [0], [1], [0, 0, 1, 1], [], []>} : vector<16x68xf32>, vector<68x8xf32>, vector<16x8xf32> -> vector<16x8xf32>
    %c14 = arith.constant 14 : index
    %c0_176 = arith.constant 0 : index
    %316 = vector.load %arg5[%c14, %c0_176] : memref<21x8xf32, #tpu.memory_space<vmem>>, vector<1x8xf32>
    %317 = vector.broadcast %316 : vector<1x8xf32> to vector<16x8xf32>
    %318 = arith.addf %315, %317 : vector<16x8xf32>
    %cst_177 = arith.constant 0.000000e+00 : f32
    %319 = vector.broadcast %cst_177 : f32 to vector<16x8xf32>
    %320 = arith.maximumf %318, %319 : vector<16x8xf32>
    %cst_178 = arith.constant dense<0.000000e+00> : vector<16x8xf32>
    %321 = tpu.matmul %320, %1, %cst_178 {dimension_numbers = #tpu.dot_dimension_numbers<[1], [0], [0], [1], [0, 0, 1, 1], [], []>} : vector<16x8xf32>, vector<8x8xf32>, vector<16x8xf32> -> vector<16x8xf32>
    %322 = vector.broadcast %2 : vector<1x8xf32> to vector<16x8xf32>
    %323 = arith.addf %321, %322 : vector<16x8xf32>
    %cst_179 = arith.constant 0.000000e+00 : f32
    %324 = vector.broadcast %cst_179 : f32 to vector<16x8xf32>
    %325 = arith.maximumf %323, %324 : vector<16x8xf32>
    %326 = vector.broadcast %3 : vector<1x8xf32> to vector<16x8xf32>
    %327 = arith.addf %325, %326 : vector<16x8xf32>
    %c0_180 = arith.constant 0 : index
    %c56_181 = arith.constant 56 : index
    %328 = vector.load %arg1[%c0_180, %c56_181] : memref<16x68xf32, #tpu.memory_space<vmem>>, vector<16x4xf32>
    %cst_182 = arith.constant dense<0.000000e+00> : vector<16x8xf32>
    %329 = tpu.matmul %328, %4, %cst_182 {dimension_numbers = #tpu.dot_dimension_numbers<[1], [0], [0], [1], [0, 0, 1, 1], [], []>} : vector<16x4xf32>, vector<4x8xf32>, vector<16x8xf32> -> vector<16x8xf32>
    %330 = vector.broadcast %5 : vector<1x8xf32> to vector<16x8xf32>
    %331 = arith.addf %329, %330 : vector<16x8xf32>
    %332 = arith.addf %327, %331 : vector<16x8xf32>
    %cst_183 = arith.constant 0.000000e+00 : f32
    %333 = vector.broadcast %cst_183 : f32 to vector<16x8xf32>
    %334 = arith.maximumf %332, %333 : vector<16x8xf32>
    %c0_184 = arith.constant 0 : index
    %c112_185 = arith.constant 112 : index
    %335 = vector.load %arg6[%c0_184, %c112_185] : memref<16x136xf32, #tpu.memory_space<vmem>>, vector<16x8xf32>
    tpu.vector_store %arg6[%c0_184, %c112_185], %334 {strides = array<i32>} : memref<16x136xf32, #tpu.memory_space<vmem>>, vector<16x8xf32>,
    %c0_186 = arith.constant 0 : index
    %c120 = arith.constant 120 : index
    %336 = vector.load %arg2[%c0_186, %c120] : memref<68x136xf32, #tpu.memory_space<vmem>>, vector<68x8xf32>
    %cst_187 = arith.constant dense<0.000000e+00> : vector<16x8xf32>
    %337 = tpu.matmul %0, %336, %cst_187 {dimension_numbers = #tpu.dot_dimension_numbers<[1], [0], [0], [1], [0, 0, 1, 1], [], []>} : vector<16x68xf32>, vector<68x8xf32>, vector<16x8xf32> -> vector<16x8xf32>
    %c15 = arith.constant 15 : index
    %c0_188 = arith.constant 0 : index
    %338 = vector.load %arg5[%c15, %c0_188] : memref<21x8xf32, #tpu.memory_space<vmem>>, vector<1x8xf32>
    %339 = vector.broadcast %338 : vector<1x8xf32> to vector<16x8xf32>
    %340 = arith.addf %337, %339 : vector<16x8xf32>
    %cst_189 = arith.constant 0.000000e+00 : f32
    %341 = vector.broadcast %cst_189 : f32 to vector<16x8xf32>
    %342 = arith.maximumf %340, %341 : vector<16x8xf32>
    %cst_190 = arith.constant dense<0.000000e+00> : vector<16x8xf32>
    %343 = tpu.matmul %342, %1, %cst_190 {dimension_numbers = #tpu.dot_dimension_numbers<[1], [0], [0], [1], [0, 0, 1, 1], [], []>} : vector<16x8xf32>, vector<8x8xf32>, vector<16x8xf32> -> vector<16x8xf32>
    %344 = vector.broadcast %2 : vector<1x8xf32> to vector<16x8xf32>
    %345 = arith.addf %343, %344 : vector<16x8xf32>
    %cst_191 = arith.constant 0.000000e+00 : f32
    %346 = vector.broadcast %cst_191 : f32 to vector<16x8xf32>
    %347 = arith.maximumf %345, %346 : vector<16x8xf32>
    %348 = vector.broadcast %3 : vector<1x8xf32> to vector<16x8xf32>
    %349 = arith.addf %347, %348 : vector<16x8xf32>
    %c0_192 = arith.constant 0 : index
    %c60 = arith.constant 60 : index
    %350 = vector.load %arg1[%c0_192, %c60] : memref<16x68xf32, #tpu.memory_space<vmem>>, vector<16x4xf32>
    %cst_193 = arith.constant dense<0.000000e+00> : vector<16x8xf32>
    %351 = tpu.matmul %350, %4, %cst_193 {dimension_numbers = #tpu.dot_dimension_numbers<[1], [0], [0], [1], [0, 0, 1, 1], [], []>} : vector<16x4xf32>, vector<4x8xf32>, vector<16x8xf32> -> vector<16x8xf32>
    %352 = vector.broadcast %5 : vector<1x8xf32> to vector<16x8xf32>
    %353 = arith.addf %351, %352 : vector<16x8xf32>
    %354 = arith.addf %349, %353 : vector<16x8xf32>
    %cst_194 = arith.constant 0.000000e+00 : f32
    %355 = vector.broadcast %cst_194 : f32 to vector<16x8xf32>
    %356 = arith.maximumf %354, %355 : vector<16x8xf32>
    %c0_195 = arith.constant 0 : index
    %c120_196 = arith.constant 120 : index
    %357 = vector.load %arg6[%c0_195, %c120_196] : memref<16x136xf32, #tpu.memory_space<vmem>>, vector<16x8xf32>
    tpu.vector_store %arg6[%c0_195, %c120_196], %356 {strides = array<i32>} : memref<16x136xf32, #tpu.memory_space<vmem>>, vector<16x8xf32>,
    %c0_197 = arith.constant 0 : index
    %c128 = arith.constant 128 : index
    %358 = vector.load %arg2[%c0_197, %c128] : memref<68x136xf32, #tpu.memory_space<vmem>>, vector<68x8xf32>
    %cst_198 = arith.constant dense<0.000000e+00> : vector<16x8xf32>
    %359 = tpu.matmul %0, %358, %cst_198 {dimension_numbers = #tpu.dot_dimension_numbers<[1], [0], [0], [1], [0, 0, 1, 1], [], []>} : vector<16x68xf32>, vector<68x8xf32>, vector<16x8xf32> -> vector<16x8xf32>
    %c16_199 = arith.constant 16 : index
    %c0_200 = arith.constant 0 : index
    %360 = vector.load %arg5[%c16_199, %c0_200] : memref<21x8xf32, #tpu.memory_space<vmem>>, vector<1x8xf32>
    %361 = vector.broadcast %360 : vector<1x8xf32> to vector<16x8xf32>
    %362 = arith.addf %359, %361 : vector<16x8xf32>
    %cst_201 = arith.constant 0.000000e+00 : f32
    %363 = vector.broadcast %cst_201 : f32 to vector<16x8xf32>
    %364 = arith.maximumf %362, %363 : vector<16x8xf32>
    %cst_202 = arith.constant dense<0.000000e+00> : vector<16x8xf32>
    %365 = tpu.matmul %364, %1, %cst_202 {dimension_numbers = #tpu.dot_dimension_numbers<[1], [0], [0], [1], [0, 0, 1, 1], [], []>} : vector<16x8xf32>, vector<8x8xf32>, vector<16x8xf32> -> vector<16x8xf32>
    %366 = vector.broadcast %2 : vector<1x8xf32> to vector<16x8xf32>
    %367 = arith.addf %365, %366 : vector<16x8xf32>
    %cst_203 = arith.constant 0.000000e+00 : f32
    %368 = vector.broadcast %cst_203 : f32 to vector<16x8xf32>
    %369 = arith.maximumf %367, %368 : vector<16x8xf32>
    %370 = vector.broadcast %3 : vector<1x8xf32> to vector<16x8xf32>
    %371 = arith.addf %369, %370 : vector<16x8xf32>
    %c0_204 = arith.constant 0 : index
    %c64_205 = arith.constant 64 : index
    %372 = vector.load %arg1[%c0_204, %c64_205] : memref<16x68xf32, #tpu.memory_space<vmem>>, vector<16x4xf32>
    %cst_206 = arith.constant dense<0.000000e+00> : vector<16x8xf32>
    %373 = tpu.matmul %372, %4, %cst_206 {dimension_numbers = #tpu.dot_dimension_numbers<[1], [0], [0], [1], [0, 0, 1, 1], [], []>} : vector<16x4xf32>, vector<4x8xf32>, vector<16x8xf32> -> vector<16x8xf32>
    %374 = vector.broadcast %5 : vector<1x8xf32> to vector<16x8xf32>
    %375 = arith.addf %373, %374 : vector<16x8xf32>
    %376 = arith.addf %371, %375 : vector<16x8xf32>
    %cst_207 = arith.constant 0.000000e+00 : f32
    %377 = vector.broadcast %cst_207 : f32 to vector<16x8xf32>
    %378 = arith.maximumf %376, %377 : vector<16x8xf32>
    %c0_208 = arith.constant 0 : index
    %c128_209 = arith.constant 128 : index
    %379 = vector.load %arg6[%c0_208, %c128_209] : memref<16x136xf32, #tpu.memory_space<vmem>>, vector<16x8xf32>
    tpu.vector_store %arg6[%c0_208, %c128_209], %378 {strides = array<i32>} : memref<16x136xf32, #tpu.memory_space<vmem>>, vector<16x8xf32>,
    return
  }
  func.func @transform_0(%arg0: i32) -> (i32, i32) {
    %c0_i32 = arith.constant 0 : i32
    %c0_i32_0 = arith.constant 0 : i32
    return %arg0, %c0_i32 : i32, i32
  }
  func.func @transform_1(%arg0: i32) -> (i32, i32) {
    %c0_i32 = arith.constant 0 : i32
    %c0_i32_0 = arith.constant 0 : i32
    %c0_i32_1 = arith.constant 0 : i32
    return %c0_i32, %c0_i32_0 : i32, i32
  }
  func.func @transform_2(%arg0: i32) -> (i32, i32) {
    %c0_i32 = arith.constant 0 : i32
    %c0_i32_0 = arith.constant 0 : i32
    %c0_i32_1 = arith.constant 0 : i32
    return %c0_i32, %c0_i32_0 : i32, i32
  }
  func.func @transform_3(%arg0: i32) -> (i32, i32) {
    %c0_i32 = arith.constant 0 : i32
    %c0_i32_0 = arith.constant 0 : i32
    %c0_i32_1 = arith.constant 0 : i32
    return %c0_i32, %c0_i32_0 : i32, i32
  }
  func.func @transform_4(%arg0: i32) -> (i32, i32) {
    %c0_i32 = arith.constant 0 : i32
    %c0_i32_0 = arith.constant 0 : i32
    %c0_i32_1 = arith.constant 0 : i32
    return %c0_i32, %c0_i32_0 : i32, i32
  }
  func.func @transform_5(%arg0: i32) -> (i32, i32) {
    %c0_i32 = arith.constant 0 : i32
    %c0_i32_0 = arith.constant 0 : i32
    return %arg0, %c0_i32 : i32, i32
  }
}

</mosaic_0001>

<bundles_post_ra>
// kernel: tpu_custom_call.1
= control target key start
LH: loop header
LB: loop body
LE: loop exit
PB: predicated region body
PF: predicated region fallthrough
CT: control target
= control target key end

     0   :  { %10 = vsyncpa [#allocation3], 0  ;;  %s8665_s0 = inlined_call_operand.vmem [shape: f32[32,68], index: 0, kind: input, shape index: {}]   ;;  %s8666_s1 = inlined_call_operand.vmem [shape: f32[68,136], index: 1, kind: input, shape index: {}]   ;;  %s8667_s2 = inlined_call_operand.vmem [shape: f32[8,8], index: 2, kind: input, shape index: {}]   ;;  %s8668_s3 = inlined_call_operand.vmem [shape: f32[4,8], index: 3, kind: input, shape index: {}]   ;;  %s8669_s4 = inlined_call_operand.vmem [shape: f32[21,8], index: 4, kind: input, shape index: {}]   ;;  %s8670_s5 = inlined_call_operand.hbm [shape: f32[32,136], index: 5, kind: output, shape index: {}]  }
   0x1   :  { %12 = vsyncpa [#allocation3 + $0x1], 0  ;;  %s7348_s18 = smov 0   ;;  %s7350_s19 = smov 0  }
   0x2   :  { %s7352_s20 = smov 0   ;;  %s7354_s21 = smov 0  }
   0x3 LB: > { %s7369_s22 = sadd.s32 4294967295, %s7291_s21   ;;  %s5596_s23 = sadd.s32 4294967294, %s7291_s21   ;;  %s7291_s21 = sphi %s7354_s21, %s8794_s21   ;;  %s7287_s20 = sphi %s7352_s20, %s8793_s20   ;;  %s7283_s19 = sphi %s7350_s19, %s8792_s19   ;;  %s7279_s18 = sphi %s7348_s18, %s8791_s18  }
   0x4   : > { %s7373_s24 = sadd.s32 1, %s7291_s21   ;;  %s135_s25 = sadd.s32 1, %s7287_s20 }
   0x5   : > { %s132_s26 = ssub.s32 %s7291_s21, %s7373_s24  ;;  %p145_p0 = scmp.ne.s32.totalorder %s7287_s20, %s7283_s19 }
   0x6   : > { %p133_p1 = scmp.eq.s32.totalorder %s132_s26, 0  ;;  %p146_p2 = scmp.eq.s32.totalorder %s7369_s22, 1 }
   0x7   : > { %p151_p3 = scmp.ne.s32.totalorder %s7283_s19, %s7279_s18  ;;  %p152_p4 = scmp.eq.s32.totalorder %s5596_s23, 1 }
   0x8   : > { %s7384_s27 = scalar_select %p133_p1, %s7287_s20, %s135_s25  }
   0x9   : > { %p7386_p5 = por %p146_p2, %p145_p0  ;;  %p7390_p6 = por %p152_p4, %p151_p3 }
   0xa   : > { %p5599_p7 = scmp.ge.s32.totalorder %s7291_s21, 1  ;;  %p191_p8 = scmp.lt.s32.totalorder %s7291_s21, 3 }
   0xc   : > { %p192_p9 = pnand %p5599_p7, %p191_p8 }
   0xe   : > { %195 = sbr.rel (%p192_p9) target bundleno = 3995 (0xf9b), region = 40 }
  0x15   : > { %v522_v0 = vld [vmem:[%s8666_s1] sm:$0xff]  ;;  %v523_v1 = vld [vmem:[%s8666_s1 + $0x10] sm:$0xff]  ;;  %s5601_s11 = sshll.u32 %s7369_s22, 1  ;;  %s8671_s6 = smov 120   ;;  %vm254_vm0 = vcmask 1043456   ;;  %vm247_vm1 = vcmask 556032  }
  0x16   : > { %v524_v2 = vld [vmem:[%s8666_s1 + $0x20] sm:$0xff]  ;;  %v7406_v3 = vpack.i.bf16 %v523_v1, %v522_v0  ;;  %v6583_v4 = vpack.c.bf16 %v523_v1, %v522_v0  ;;  %v525_v5 = vld [vmem:[%s8666_s1 + $0x30] sm:$0xff]  ;;  %p220_p10 = scmp.lt.s32.totalorder %s5601_s11, 3  ;;  %vm433_vm2 = vcmask 31744   ;;  %s8673_s15 = smov 112   ;;  %vm339_vm3 = vcmask 64512  }
  0x17   : > { %v526_v6 = vld [vmem:[%s8666_s1 + $0x40] sm:$0xff]  ;;  %v527_v7 = vld [vmem:[%s8666_s1 + $0x50] sm:$0xff]  ;;  %v6587_v8 = vpack.c.bf16 %v525_v5, %v524_v2  ;;  %v7427_v12 = vpack.i.bf16 %v525_v5, %v524_v2  ;;  %s7295_s7 = smov 124   ;;  %s8675_s8 = smov 104   ;;  %vm834_vm4 = vcmask 130112   ;;  %vm1149_vm5 = vcmask 195712  }
  0x18   : > { %v7417_v9 = vpack.i.bf16 %v527_v7, %v526_v6  ;;  %v528_v10 = vld [vmem:[%s8666_s1 + $0x60] sm:$0xff]  ;;  %v529_v11 = vld [vmem:[%s8666_s1 + $0x70] sm:$0xff]  ;;  %6919 = vrot.lane.b32.xlu0 %v7406_v3, %s8671_s6  ;;  %6584 = vmatprep.subr.bf16.mxu0 %v6583_v4  ;;  %s8796_s11 = smov (!%p220_p10, %s5601_s11), 3  ;;  %v6591_v15 = vpack.c.bf16 %v527_v7, %v526_v6  ;;  %s7297_s14 = smov 116   ;;  %vm1464_vm6 = vcmask 261312   ;;  %vm1779_vm7 = vcmask 326912  }
  0x19   : > { %6586 = vmatpush3.bf16.msra.mxu0 %v6583_v4  ;;  %v7431_v13 = vpack.i.bf16 %v529_v11, %v528_v10  ;;  %v7436_v14 = vld [vmem:[%s8668_s3] sm:$0xf]  ;;  %s5602_s9 = sshll.u32 %s8796_s11, 3  ;;  %v6595_v18 = vpack.c.bf16 %v529_v11, %v528_v10  ;;  %s8677_s16 = smov 96   ;;  %vm2094_vm8 = vcmask 392512   ;;  %vm2409_vm9 = vcmask 458112  }
  0x1a   : > { %6929 = vrot.lane.b32.xlu1 %v7417_v9, %s8671_s6  ;;  %6588 = vmatprep.subr.bf16.mxu0 %v6587_v8  ;;  %s7443_s13 = scalar_lea.vmem %s8665_s0, %s5602_s9  ;;  %v530_v17 = vld [vmem:[%s8666_s1 + $0x80] sm:$0xf]  ;;  %s8679_s25 = smov 88   ;;  %vm2724_vm10 = vcmask 523712   ;;  %vm3039_vm11 = vcmask 589312   ;;  %vm3354_vm12 = vcmask 654912  }
  0x1b   : > { %6082 = vmatprep.subr.msk.mxu1 %vm254_vm0, %v7436_v14  ;;  %v7450_v16 = vld [vmem:[%s7443_s13] sm:$0xff]  ;;  %v7460_v19 = vld [vmem:[%s7443_s13 + $0x8] sm:$0xff]  ;;  %s8681_s9 = smov 80   ;;  %s7302_s11 = smov 72   ;;  %vm3669_vm13 = vcmask 720512   ;;  %vm3984_vm14 = vcmask 786112  }
  0x1c   : > { %6083 = vmatpush3.msk.msra.mxu1 %vm254_vm0, %v7436_v14  ;;  %6924 = vrot.lane.b32.xlu0 %v7427_v12, %s8671_s6  ;;  %v241_v20 = vld [vmem:[%s8666_s1 + $0x80] sm:$0xf]  ;;  %s7303_s23 = smov 100   ;;  %s7304_s26 = smov 64   ;;  %vm4299_vm15 = vcmask 851712  }
  0x1d   : > { %6590 = vmatpush3.bf16.msra.mxu0 %v6587_v8  ;;  %6074 = vmatprep.mubr.msk.f32.mxu0 %vm247_vm1, %v7450_v16  ;;  %v845_v21 = vld [vmem:[%s8666_s1 + $0x80] sm:$0xf]  ;;  %s8683_s10 = smov 56   ;;  %s7306_s30 = smov 92  }
  0x1e   : > { %6934 = vrot.lane.b32.xlu1 %v7431_v13, %s8671_s6  ;;  %6592 = vmatprep.subr.bf16.mxu0 %v6591_v15  ;;  %v7491_v22 = vld [vmem:[%s8667_s2] sm:$0xff]  ;;  %s7309_s17 = smov 84   ;;  %s8768_s12 = smov 88  }
  0x1f   : > { %6084 = vmatprep.mubr.msk.f32.mxu1 %vm433_vm2, %v7450_v16  ;;  %v1160_v39 = vld [vmem:[%s8666_s1 + $0x80] sm:$0xf] }
  0x20   : > { %561 = vrot.lane.b32.xlu0 %v530_v17, %s8671_s6  ;;  %6085 = vmatmul.mubr.msk.f32.vlgmr.msra.gmra.mrb[0].mxu1 %vm433_vm2, %v7460_v19  ;;  %v5603_v60 = vld [vmem:[%s8669_s4] ss:$0 sm:$0xff]  ;;  %v5615_v10 = vld [vmem:[%s8669_s4 + $0x1] ss:$0 sm:$0xff] }
  0x21   : > { %6594 = vmatpush3.bf16.msra.mxu0 %v6591_v15  ;;  %6105 = vmatprep.mubr.msk.f32.mxu1 %vm247_vm1, %v7450_v16  ;;  %v1475_v4 = vld [vmem:[%s8666_s1 + $0x80] sm:$0xf] }
  0x22   : > { %6939 = vrot.lane.b32.xlu1 %v7406_v3, %s8673_s15  ;;  %6596 = vmatprep.subr.bf16.mxu0 %v6595_v18  ;;  %v1790_v5 = vld [vmem:[%s8666_s1 + $0x80] sm:$0xf] }
  0x23   : > { %v2105_v6 = vld [vmem:[%s8666_s1 + $0x80] sm:$0xf] }
  0x24   : > { %6944 = vrot.lane.b32.xlu0 %v7427_v12, %s8673_s15  ;;  %v2420_v7 = vld [vmem:[%s8666_s1 + $0x80] sm:$0xf] }
  0x25   : > { %6598 = vmatpush3.bf16.msra.mxu0 %v6595_v18  ;;  %v2735_v8 = vld [vmem:[%s8666_s1 + $0x80] sm:$0xf] }
  0x26   : > { %6949 = vrot.lane.b32.xlu1 %v7417_v9, %s8673_s15  ;;  %6072 = vmatprep.subr.msk.mxu0 %vm254_vm0, %v241_v20 }
  0x28   : > { %6954 = vrot.lane.b32.xlu0 %v7431_v13, %s8673_s15 }
  0x29   : > { %6073 = vmatpush3.msk.msra.mxu0 %vm254_vm0, %v241_v20 }
  0x2a   : > { %876 = vrot.lane.b32.xlu1 %v845_v21, %s8673_s15  ;;  %6075 = vmatmul.mubr.msk.f32.vlgmr.msra.gmra.mrb[0].mxu0 %vm247_vm1, %v7460_v19  ;;  %v3050_v21 = vld [vmem:[%s8666_s1 + $0x80] sm:$0xf] }
  0x2b   : > { %6077 = vmatprep.subr.mxu0 %v7491_v22 }
  0x2c   : > { %6078 = vmatpush3.msra.mxu0 %v7491_v22  ;;  %739 = vrot.lane.b32.xlu0 %v7450_v16, %s7295_s7 }
  0x2d   : > { %6108 = vmatprep.subr.mxu0 %v7491_v22 }
  0x2e   : > { %741 = vrot.lane.b32.xlu1 %v7460_v19, %s7295_s7  ;;  %s7300_s7 = smov 108  }
  0x30   : > { %6959 = vrot.lane.b32.xlu0 %v7406_v3, %s8675_s8 }
  0x32   : > { %1054 = vrot.lane.b32.xlu1 %v7450_v16, %s8671_s6 }
  0x34   : > { %1056 = vrot.lane.b32.xlu0 %v7460_v19, %s8671_s6  ;;  %s7312_s6 = smov 76  }
  0x36   : > { %6964 = vrot.lane.b32.xlu1 %v7427_v12, %s8675_s8 }
  0x38   : > { %6969 = vrot.lane.b32.xlu0 %v7417_v9, %s8675_s8 }
  0x3a   : > { %6974 = vrot.lane.b32.xlu1 %v7431_v13, %s8675_s8 }
  0x3c   : > { %1191 = vrot.lane.b32.xlu0 %v1160_v39, %s8675_s8 }
  0x3e   : > { %6979 = vrot.lane.b32.xlu1 %v7406_v3, %s8677_s16 }
  0x40   : > { %1369 = vrot.lane.b32.xlu0 %v7450_v16, %s7297_s14 }
  0x42   : > { %1371 = vrot.lane.b32.xlu1 %v7460_v19, %s7297_s14 }
  0x44   : > { %6984 = vrot.lane.b32.xlu0 %v7427_v12, %s8677_s16 }
  0x46   : > { %6989 = vrot.lane.b32.xlu1 %v7417_v9, %s8677_s16 }
  0x48   : > { %6994 = vrot.lane.b32.xlu0 %v7431_v13, %s8677_s16 }
  0x4a   : > { %1506 = vrot.lane.b32.xlu1 %v1475_v4, %s8677_s16 }
  0x4c   : > { %6999 = vrot.lane.b32.xlu0 %v7406_v3, %s8679_s25 }
  0x4e   : > { %1684 = vrot.lane.b32.xlu1 %v7450_v16, %s8673_s15 }
  0x50   : > { %1686 = vrot.lane.b32.xlu0 %v7460_v19, %s8673_s15  ;;  %s7313_s15 = smov 16  }
  0x52   : > { %7004 = vrot.lane.b32.xlu1 %v7427_v12, %s8679_s25 }
  0x54   : > { %7009 = vrot.lane.b32.xlu0 %v7417_v9, %s8679_s25 }
  0x56   : > { %7014 = vrot.lane.b32.xlu1 %v7431_v13, %s8679_s25 }
  0x58   : > { %1821 = vrot.lane.b32.xlu0 %v1790_v5, %s8679_s25 }
  0x5a   : > { %7019 = vrot.lane.b32.xlu1 %v7406_v3, %s8681_s9 }
  0x5c   : > { %1999 = vrot.lane.b32.xlu0 %v7450_v16, %s7300_s7 }
  0x5e   : > { %2001 = vrot.lane.b32.xlu1 %v7460_v19, %s7300_s7  ;;  %s8685_s7 = smov 48  }
  0x60   : > { %7024 = vrot.lane.b32.xlu0 %v7427_v12, %s8681_s9 }
  0x62   : > { %7029 = vrot.lane.b32.xlu1 %v7417_v9, %s8681_s9 }
  0x64   : > { %7034 = vrot.lane.b32.xlu0 %v7431_v13, %s8681_s9 }
  0x66   : > { %2136 = vrot.lane.b32.xlu1 %v2105_v6, %s8681_s9  ;;  %v4831_v6 = vld [vmem:[%s7443_s13 + $0x8] sm:$0xff] }
  0x68   : > { %7039 = vrot.lane.b32.xlu0 %v7406_v3, %s7302_s11 }
  0x6a   : > { %2314 = vrot.lane.b32.xlu1 %v7450_v16, %s8675_s8 }
  0x6c   : > { %2316 = vrot.lane.b32.xlu0 %v7460_v19, %s8675_s8  ;;  %s7314_s8 = smov 8  }
  0x6e   : > { %7044 = vrot.lane.b32.xlu1 %v7427_v12, %s7302_s11 }
  0x70   : > { %7049 = vrot.lane.b32.xlu0 %v7417_v9, %s7302_s11 }
  0x72   : > { %7054 = vrot.lane.b32.xlu1 %v7431_v13, %s7302_s11 }
  0x74   : > { %2451 = vrot.lane.b32.xlu0 %v2420_v7, %s7302_s11  ;;  %v4830_v7 = vld [vmem:[%s7443_s13] sm:$0xff] }
  0x76   : > { %7059 = vrot.lane.b32.xlu1 %v7406_v3, %s7304_s26 }
  0x78   : > { %2629 = vrot.lane.b32.xlu0 %v7450_v16, %s7303_s23 }
  0x7a   : > { %2631 = vrot.lane.b32.xlu1 %v7460_v19, %s7303_s23  ;;  %s7310_s23 = smov 32  }
  0x7c   : > { %7064 = vrot.lane.b32.xlu0 %v7427_v12, %s7304_s26 }
  0x7e   : > { %7069 = vrot.lane.b32.xlu1 %v7417_v9, %s7304_s26 }
  0x80   : > { %7074 = vrot.lane.b32.xlu0 %v7431_v13, %s7304_s26 }
  0x82   : > { %2766 = vrot.lane.b32.xlu1 %v2735_v8, %s7304_s26 }
  0x84   : > { %7079 = vrot.lane.b32.xlu0 %v7406_v3, %s8683_s10 }
  0x86   : > { %2944 = vrot.lane.b32.xlu1 %v7450_v16, %s8677_s16 }
  0x88   : > { %2946 = vrot.lane.b32.xlu0 %v7460_v19, %s8677_s16  ;;  %s216_s16 = sand.u32 1, %s7283_s19  }
  0x8a   : > { %v6920_v23 = vpop.permute.xlu0 %6919  ;;  %7084 = vrot.lane.b32.xlu1 %v7427_v12, %s8683_s10 }
  0x8b   : > { %v6922_v24 = vunpack.i.h.bf16 %v6920_v23  ;;  %v6921_v25 = vunpack.i.l.bf16 %v6920_v23 }
  0x8c   : > { %v6930_v26 = vpop.permute.xlu1 %6929  ;;  %7089 = vrot.lane.b32.xlu0 %v7417_v9, %s8683_s10 }
  0x8d   : > { %v6599_v27 = vpack.c.bf16 %v6922_v24, %v6921_v25  ;;  %v6932_v28 = vunpack.i.h.bf16 %v6930_v26  ;;  %v6931_v29 = vunpack.i.l.bf16 %v6930_v26 }
  0x8e   : > { %v6925_v30 = vpop.permute.xlu0 %6924  ;;  %7094 = vrot.lane.b32.xlu1 %v7431_v13, %s8683_s10 }
  0x8f   : > { %v6927_v31 = vunpack.i.h.bf16 %v6925_v30  ;;  %v6926_v32 = vunpack.i.l.bf16 %v6925_v30  ;;  %6600 = vmatprep.subr.bf16.mxu1 %v6599_v27  ;;  %v6607_v37 = vpack.c.bf16 %v6932_v28, %v6931_v29  ;;  %v5624_v28 = vld [vmem:[%s8669_s4 + $0x2] ss:$0 sm:$0xff] }
  0x90   : > { %v6935_v33 = vpop.permute.xlu1 %6934  ;;  %6602 = vmatpush3.bf16.msra.mxu1 %v6599_v27  ;;  %3081 = vrot.lane.b32.xlu0 %v3050_v21, %s8683_s10  ;;  %s8769_s10 = smov 96  }
  0x91   : > { %v6603_v34 = vpack.c.bf16 %v6927_v31, %v6926_v32  ;;  %v6937_v35 = vunpack.i.h.bf16 %v6935_v33  ;;  %v6936_v36 = vunpack.i.l.bf16 %v6935_v33 }
  0x92   : > { %v562_v38 = vpop.permute.xlu0 %561  ;;  %7099 = vrot.lane.b32.xlu1 %v7406_v3, %s8685_s7 }
  0x93   : > { %6604 = vmatprep.subr.bf16.mxu1 %v6603_v34  ;;  %v6611_v40 = vpack.c.bf16 %v6937_v35, %v6936_v36 }
  0x94   : > { %6606 = vmatpush3.bf16.msra.mxu1 %v6603_v34  ;;  %v6940_v41 = vpop.permute.xlu1 %6939  ;;  %3259 = vrot.lane.b32.xlu0 %v7450_v16, %s7306_s30 }
  0x95   : > { %6608 = vmatprep.subr.bf16.mxu1 %v6607_v37  ;;  %v6942_v43 = vunpack.i.h.bf16 %v6940_v41  ;;  %v6941_v44 = vunpack.i.l.bf16 %v6940_v41 }
  0x96   : > { %v6945_v42 = vpop.permute.xlu0 %6944  ;;  %3261 = vrot.lane.b32.xlu1 %v7460_v19, %s7306_s30  ;;  %s7308_s30 = smov 40  }
  0x97   : > { %v6947_v45 = vunpack.i.h.bf16 %v6945_v42  ;;  %v6946_v46 = vunpack.i.l.bf16 %v6945_v42  ;;  %v6615_v48 = vpack.c.bf16 %v6942_v43, %v6941_v44 }
  0x98   : > { %6610 = vmatpush3.bf16.msra.mxu1 %v6607_v37  ;;  %v6950_v47 = vpop.permute.xlu1 %6949  ;;  %7104 = vrot.lane.b32.xlu0 %v7427_v12, %s8685_s7  ;;  %v3365_v37 = vld [vmem:[%s8666_s1 + $0x80] sm:$0xf] }
  0x99   : > { %6612 = vmatprep.subr.bf16.mxu1 %v6611_v40  ;;  %v6952_v49 = vunpack.i.h.bf16 %v6950_v47  ;;  %v6951_v50 = vunpack.i.l.bf16 %v6950_v47  ;;  %v6619_v51 = vpack.c.bf16 %v6947_v45, %v6946_v46 }
  0x9a   : > { %v6955_v52 = vpop.permute.xlu0 %6954  ;;  %7109 = vrot.lane.b32.xlu1 %v7417_v9, %s8685_s7 }
  0x9b   : > { %v6957_v53 = vunpack.i.h.bf16 %v6955_v52  ;;  %v6956_v54 = vunpack.i.l.bf16 %v6955_v52  ;;  %v6623_v55 = vpack.c.bf16 %v6952_v49, %v6951_v50 }
  0x9c   : > { %6614 = vmatpush3.bf16.msra.mxu1 %v6611_v40  ;;  %v877_v57 = vpop.permute.xlu1 %876  ;;  %7114 = vrot.lane.b32.xlu0 %v7431_v13, %s8685_s7 }
  0x9d   : > { %6103 = vmatprep.subr.msk.mxu1 %vm254_vm0, %v562_v38  ;;  %v6627_v56 = vpack.c.bf16 %v6957_v53, %v6956_v54  ;;  %v3995_v54 = vld [vmem:[%s8666_s1 + $0x80] sm:$0xf] }
  0x9e   : > { %v740_v24 = vpop.permute.xlu0 %739  ;;  %3396 = vrot.lane.b32.xlu1 %v3365_v37, %s8685_s7  ;;  %s8748_s7 = smov 56  }
  0xa0   : > { %6104 = vmatpush3.msk.msra.mxu1 %vm254_vm0, %v562_v38  ;;  %v742_v25 = vpop.permute.xlu1 %741  ;;  %7119 = vrot.lane.b32.xlu0 %v7406_v3, %s7308_s30 }
  0xa1   : > { %6106 = vmatmul.mubr.msk.f32.vlgmr.msra.gmra.mrb[2].mxu1 %vm247_vm1, %v7460_v19  ;;  %6616 = vmatprep.subr.bf16.mxu1 %v6615_v48 }
  0xa2   : > { %6618 = vmatpush3.bf16.msra.mxu1 %v6615_v48  ;;  %6136 = vmatprep.mubr.msk.f32.mxu1 %vm247_vm1, %v7450_v16  ;;  %v6960_v26 = vpop.permute.xlu0 %6959 }
  0xa3   : > { %6620 = vmatprep.subr.bf16.mxu1 %v6619_v51  ;;  %v6962_v33 = vunpack.i.h.bf16 %v6960_v26  ;;  %v6961_v34 = vunpack.i.l.bf16 %v6960_v26  ;;  %3574 = vrot.lane.b32.xlu1 %v7450_v16, %s8679_s25  ;;  %v7795_v26 = vld [vmem:[%s8669_s4 + $0x14] ss:$0 sm:$0xff] }
  0xa4   : > { %v1055_v27 = vpop.permute.xlu1 %1054  ;;  %3576 = vrot.lane.b32.xlu0 %v7460_v19, %s8679_s25  ;;  %s7315_s25 = smov 68  }
  0xa5   : > { %v6631_v42 = vpack.c.bf16 %v6962_v33, %v6961_v34 }
  0xa6   : > { %6622 = vmatpush3.bf16.msra.mxu1 %v6619_v51  ;;  %v1057_v30 = vpop.permute.xlu0 %1056  ;;  %v3680_v51 = vld [vmem:[%s8666_s1 + $0x80] sm:$0xf] }
  0xa7   : > { %6624 = vmatprep.subr.bf16.mxu1 %v6623_v55  ;;  %7124 = vrot.lane.b32.xlu1 %v7427_v12, %s7308_s30 }
  0xa8   : > { %v6965_v36 = vpop.permute.xlu1 %6964  ;;  %7129 = vrot.lane.b32.xlu0 %v7417_v9, %s7308_s30 }
  0xa9   : > { %v6967_v40 = vunpack.i.h.bf16 %v6965_v36  ;;  %v6966_v41 = vunpack.i.l.bf16 %v6965_v36 }
  0xaa   : > { %6626 = vmatpush3.bf16.msra.mxu1 %v6623_v55  ;;  %v6970_v43 = vpop.permute.xlu0 %6969  ;;  %v4310_v55 = vld [vmem:[%s8666_s1 + $0x80] sm:$0xf] }
  0xab   : > { %6628 = vmatprep.subr.bf16.mxu1 %v6627_v56  ;;  %v6972_v44 = vunpack.i.h.bf16 %v6970_v43  ;;  %v6971_v45 = vunpack.i.l.bf16 %v6970_v43  ;;  %v6635_v46 = vpack.c.bf16 %v6967_v40, %v6966_v41  ;;  %7134 = vrot.lane.b32.xlu1 %v7431_v13, %s7308_s30 }
  0xac   : > { %v6975_v47 = vpop.permute.xlu1 %6974  ;;  %3711 = vrot.lane.b32.xlu0 %v3680_v51, %s7308_s30 }
  0xad   : > { %v6977_v48 = vunpack.i.h.bf16 %v6975_v47  ;;  %v6976_v49 = vunpack.i.l.bf16 %v6975_v47  ;;  %v6639_v50 = vpack.c.bf16 %v6972_v44, %v6971_v45 }
  0xae   : > { %6630 = vmatpush3.bf16.msra.mxu1 %v6627_v56  ;;  %v1192_v53 = vpop.permute.xlu0 %1191  ;;  %v4618_v56 = vld [vmem:[%s8666_s1 + $0x10] sm:$0xff] }
  0xaf   : > { %6134 = vmatprep.subr.msk.mxu1 %vm254_vm0, %v877_v57  ;;  %v6643_v52 = vpack.c.bf16 %v6977_v48, %v6976_v49  ;;  %7139 = vrot.lane.b32.xlu1 %v7406_v3, %s7310_s23 }
  0xb0   : > { %3889 = vrot.lane.b32.xlu0 %v7450_v16, %s7309_s17  ;;  %v7758_v5 = vpop.permute.xlu1 %6979 }
  0xb2   : > { %6135 = vmatpush3.msk.msra.mxu1 %vm254_vm0, %v877_v57  ;;  %v4620_v57 = vld [vmem:[%s8666_s1 + $0x30] sm:$0xff]  ;;  %v7755_v4 = vpop.permute.xlu0 %1369 }
  0xb3   : > { %6137 = vmatmul.mubr.msk.f32.vlgmr.msra.gmra.mrb[4].mxu1 %vm247_vm1, %v7460_v19  ;;  %6170 = vmatprep.subr.mxu1 %v7491_v22 }
  0xb4   : > { %6171 = vmatpush3.msra.mxu1 %v7491_v22  ;;  %7144 = vrot.lane.b32.xlu0 %v7427_v12, %s7310_s23 }
  0xb5   : > { %6175 = vmatprep.subr.msk.mxu1 %vm254_vm0, %v7436_v14  ;;  %3891 = vrot.lane.b32.xlu1 %v7460_v19, %s7309_s17  ;;  %s7311_s17 = smov 24  }
  0xb6   : > { %v7765_v8 = vpop.permute.xlu0 %6984 }
  0xb8   : > { %7154 = vrot.lane.b32.xlu0 %v7431_v13, %s7310_s23 }
  0xb9   : > { %7149 = vrot.lane.b32.xlu1 %v7417_v9, %s7310_s23 }
  0xbc   : > { %7159 = vrot.lane.b32.xlu0 %v7406_v3, %s7311_s17  ;;  %v4617_v3 = vld [vmem:[%s8666_s1] sm:$0xff] }
  0xbd   : > { %4026 = vrot.lane.b32.xlu1 %v3995_v54, %s7310_s23 }
  0xc0   : > { %4206 = vrot.lane.b32.xlu0 %v7460_v19, %s8681_s9 }
  0xc1   : > { %4204 = vrot.lane.b32.xlu1 %v7450_v16, %s8681_s9 }
  0xc4   : > { %7169 = vrot.lane.b32.xlu0 %v7417_v9, %s7311_s17  ;;  %v7178_v9 = vpack.i.bf16 %v4618_v56, %v4617_v3 }
  0xc5   : > { %7164 = vrot.lane.b32.xlu1 %v7427_v12, %s7311_s17  ;;  %v4619_v12 = vld [vmem:[%s8666_s1 + $0x20] sm:$0xff] }
  0xc8   : > { %4341 = vrot.lane.b32.xlu0 %v4310_v55, %s7311_s17 }
  0xc9   : > { %7174 = vrot.lane.b32.xlu1 %v7431_v13, %s7311_s17  ;;  %v4623_v13 = vld [vmem:[%s8666_s1 + $0x60] sm:$0xff] }
  0xcc   : > { %4519 = vrot.lane.b32.xlu0 %v7450_v16, %s7312_s6 }
  0xcd   : > { %7179 = vrot.lane.b32.xlu1 %v7178_v9, %s7313_s15 }
  0xd1   : > { %4521 = vrot.lane.b32.xlu1 %v7460_v19, %s7312_s6  ;;  %s8788_s6 = smov 120  }
  0xf3   : > { %v7528_v58 = vpop.f32.mrb[0].mxu1 }
  0xf4   : > { %v7530_v59 = vpop.f32.mrb[1].mxu1 }
  0xfd   : > { %v6076_v61 = vpop.f32.mrb[0].mxu0 }
  0xfe   : > { %v330_v62 = vadd.f32 %v6076_v61, %v5603_v60  ;;  %v324_v63 = vpop.f32.mrb[1].mxu0  ;;  %v4624_v61 = vld [vmem:[%s8666_s1 + $0x70] sm:$0xff] }
  0xff   : > { %v325_v0 = vadd.f32 %v5603_v60, %v324_v63  ;;  %v7183_v60 = vpack.i.bf16 %v4620_v57, %v4619_v12  ;;  %v4622_v63 = vld [vmem:[%s8666_s1 + $0x50] sm:$0xff] }
 0x100   : > { %v334_v1 = vmax.f32 %v330_v62, 0.0  ;;  %v4621_v62 = vld [vmem:[%s8666_s1 + $0x40] sm:$0xff] }
 0x101   : > { %v333_v2 = vmax.f32 %v325_v0, 0.0  ;;  %7184 = vrot.lane.b32.xlu0 %v7183_v60, %s7313_s15  ;;  %v7193_v0 = vpack.i.bf16 %v4624_v61, %v4623_v13 }
 0x103   : > { %6079 = vmatprep.mubr.msk.f32.mxu0 %vm339_vm3, %v333_v2  ;;  %v4625_v2 = vld [vmem:[%s8666_s1 + $0x80] sm:$0xf] }
 0x104   : > { %6080 = vmatmul.mubr.msk.f32.vlgmr.msra.gmra.mrb[2].mxu0 %vm339_vm3, %v334_v1  ;;  %v7188_v1 = vpack.i.bf16 %v4622_v63, %v4621_v62 }
 0x105   : > { %6109 = vmatpush3.msra.mxu0 %v7491_v22  ;;  %7194 = vrot.lane.b32.xlu0 %v7193_v0, %s7313_s15 }
 0x106   : > { %6113 = vmatprep.subr.msk.mxu0 %vm254_vm0, %v7436_v14  ;;  %7189 = vrot.lane.b32.xlu1 %v7188_v1, %s7313_s15 }
 0x109   : > { %7199 = vrot.lane.b32.xlu0 %v7178_v9, %s7314_s8 }
 0x10a   : > { %4656 = vrot.lane.b32.xlu1 %v4625_v2, %s7313_s15 }
 0x10d   : > { %4836 = vrot.lane.b32.xlu0 %v4831_v6, %s7302_s11 }
 0x10e   : > { %4834 = vrot.lane.b32.xlu1 %v4830_v7, %s7302_s11 }
 0x111   : > { %7209 = vrot.lane.b32.xlu0 %v7188_v1, %s7314_s8 }
 0x112   : > { %7204 = vrot.lane.b32.xlu1 %v7183_v60, %s7314_s8 }
 0x116   : > { %7214 = vrot.lane.b32.xlu1 %v7193_v0, %s7314_s8 }
 0x11a   : > { %5149 = vrot.lane.b32.xlu1 %v4830_v7, %s7315_s25 }
 0x11e   : > { %5430 = vrot.lane.b32.xlu1 %v4830_v7, %s7304_s26 }
 0x174   : > { %v6107_v11 = vpop.f32.mrb[2].mxu1 }
 0x175   : > { %v645_v15 = vadd.f32 %v6107_v11, %v5615_v10  ;;  %v639_v17 = vpop.f32.mrb[3].mxu1  ;;  %v4940_v11 = vld [vmem:[%s8666_s1 + $0x80] sm:$0xf] }
 0x176   : > { %v640_v18 = vadd.f32 %v5615_v10, %v639_v17  ;;  %v7767_v10 = vpop.permute.xlu1 %1371  ;;  %4971 = vrot.lane.b32.xlu0 %v4940_v11, %s7314_s8 }
 0x177   : > { %v649_v20 = vmax.f32 %v645_v15, 0.0  ;;  %v7774_v15 = vpop.permute.xlu0 %6994 }
 0x178   : > { %v648_v23 = vmax.f32 %v640_v18, 0.0  ;;  %v7783_v18 = vld [vmem:[%s8669_s4 + $0x11] ss:$0 sm:$0xff] }
 0x17a   : > { %6110 = vmatprep.mubr.msk.f32.mxu0 %vm339_vm3, %v648_v23  ;;  %v7777_v17 = vpop.permute.xlu1 %6989  ;;  %5151 = vrot.lane.b32.xlu0 %v4831_v6, %s7315_s25  ;;  %s5600_s25 = sshll.u32 %s216_s16, 5 }
 0x17b   : > { %6111 = vmatmul.mubr.msk.f32.vlgmr.msra.gmra.mrb[4].mxu0 %vm339_vm3, %v649_v20  ;;  %v7785_v20 = vpop.permute.xlu0 %6999  ;;  %s7820_s9 = scalar_lea.vmem [#allocation2], %s5600_s25  ;;  %s5766_s25 = sshll.u32 %s7369_s22, 9 }
 0x17c   : > { %6114 = vmatpush3.msk.msra.mxu0 %vm254_vm0, %v7436_v14  ;;  %6115 = vmatprep.mubr.msk.f32.mxu0 %vm433_vm2, %v740_v24  ;;  %s8623_s22 = scalar_lea.sflag [#allocation3], %s216_s16 }
 0x17d   : > { %6139 = vmatprep.subr.mxu0 %v7491_v22 }
 0x17e   : > { %v7787_v21 = vpop.permute.xlu1 %1506  ;;  %5432 = vrot.lane.b32.xlu0 %v4831_v6, %s7304_s26 }
 0x17f   : > { %6116 = vmatmul.mubr.msk.f32.vlgmr.msra.gmra.mrb[6].mxu0 %vm433_vm2, %v742_v25 }
 0x180   : > { %6140 = vmatpush3.msra.mxu0 %v7491_v22 }
 0x181   : > { %6144 = vmatprep.subr.msk.mxu0 %vm254_vm0, %v7436_v14 }
 0x182   : > { %v7809_v34 = vpop.permute.xlu1 %1684 }
 0x186   : > { %v6138_v29 = vpop.f32.mrb[4].mxu1 }
 0x187   : > { %v960_v31 = vadd.f32 %v6138_v29, %v5624_v28  ;;  %v954_v32 = vpop.f32.mrb[5].mxu1 }
 0x188   : > { %v955_v35 = vadd.f32 %v5624_v28, %v954_v32  ;;  %v513_v32 = vadd.f32 %v7528_v58, %v7795_v26 }
 0x189   : > { %v964_v39 = vmax.f32 %v960_v31, 0.0  ;;  %v7804_v31 = vpop.permute.xlu0 %1686 }
 0x18a   : > { %v963_v38 = vmax.f32 %v955_v35, 0.0  ;;  %v508_v35 = vadd.f32 %v7795_v26, %v7530_v59 }
 0x18c   : > { %6141 = vmatprep.mubr.msk.f32.mxu0 %vm339_vm3, %v963_v38 }
 0x18d   : > { %6142 = vmatmul.mubr.msk.f32.vlgmr.msra.gmra.mrb[8].mxu0 %vm339_vm3, %v964_v39  ;;  %v7816_v41 = vpop.permute.xlu0 %7009 }
 0x18e   : > { %6145 = vmatpush3.msk.msra.mxu0 %vm254_vm0, %v7436_v14  ;;  %6146 = vmatprep.mubr.msk.f32.mxu0 %vm433_vm2, %v1055_v27  ;;  %v7800_v27 = vld [vmem:[%s8669_s4 + $0x13] ss:$0 sm:$0xff] }
 0x18f   : > { %6632 = vmatprep.subr.bf16.mxu0 %v6631_v42 }
 0x191   : > { %6147 = vmatmul.mubr.msk.f32.vlgmr.msra.gmra.mrb[10].mxu0 %vm433_vm2, %v1057_v30  ;;  %v7826_v58 = vpop.permute.xlu0 %1821 }
 0x192   : > { %6634 = vmatpush3.bf16.msra.mxu0 %v6631_v42  ;;  %6167 = vmatprep.mubr.msk.f32.mxu0 %vm247_vm1, %v7450_v16  ;;  %v7818_v42 = vpop.permute.xlu1 %7004 }
 0x193   : > { %6636 = vmatprep.subr.bf16.mxu0 %v6635_v46 }
 0x195   : > { %v7830_v43 = vpop.permute.xlu0 %1999 }
 0x196   : > { %6638 = vmatpush3.bf16.msra.mxu0 %v6635_v46  ;;  %v7828_v59 = vpop.permute.xlu1 %7014 }
 0x197   : > { %6640 = vmatprep.subr.bf16.mxu0 %v6639_v50 }
 0x199   : > { %v7834_v45 = vpop.permute.xlu0 %7024 }
 0x19a   : > { %6642 = vmatpush3.bf16.msra.mxu0 %v6639_v50  ;;  %v7832_v44 = vpop.permute.xlu1 %7019 }
 0x19b   : > { %6644 = vmatprep.subr.bf16.mxu0 %v6643_v52 }
 0x19d   : > { %v7838_v47 = vpop.permute.xlu0 %7034 }
 0x19e   : > { %6646 = vmatpush3.bf16.msra.mxu0 %v6643_v52  ;;  %v7836_v46 = vpop.permute.xlu1 %2001 }
 0x19f   : > { %6165 = vmatprep.subr.msk.mxu0 %vm254_vm0, %v1192_v53 }
 0x1a1   : > { %v7842_v49 = vpop.permute.xlu0 %7039 }
 0x1a2   : > { %6166 = vmatpush3.msk.msra.mxu0 %vm254_vm0, %v1192_v53  ;;  %v7840_v48 = vpop.permute.xlu1 %7029 }
 0x1a3   : > { %6168 = vmatmul.mubr.msk.f32.vlgmr.msra.gmra.mrb[12].mxu0 %vm247_vm1, %v7460_v19  ;;  %6201 = vmatprep.subr.mxu0 %v7491_v22 }
 0x1a4   : > { %6202 = vmatpush3.msra.mxu0 %v7491_v22 }
 0x1a5   : > { %6206 = vmatprep.subr.msk.mxu0 %vm254_vm0, %v7436_v14  ;;  %v7846_v51 = vpop.permute.xlu0 %2316 }
 0x1a6   : > { %v7844_v50 = vpop.permute.xlu1 %2136 }
 0x1a9   : > { %v7850_v53 = vpop.permute.xlu0 %7049 }
 0x1aa   : > { %v7848_v52 = vpop.permute.xlu1 %2314 }
 0x1ad   : > { %v7854_v55 = vpop.permute.xlu0 %2451 }
 0x1ae   : > { %v7852_v54 = vpop.permute.xlu1 %7044 }
 0x1b1   : > { %v7858_v56 = vpop.permute.xlu0 %2629 }
 0x1b2   : > { %v7856_v3 = vpop.permute.xlu1 %7054 }
 0x1b5   : > { %v7862_v12 = vpop.permute.xlu0 %7064 }
 0x1b6   : > { %v7860_v9 = vpop.permute.xlu1 %7059 }
 0x1b9   : > { %v7866_v60 = vpop.permute.xlu0 %7074 }
 0x1ba   : > { %v7864_v57 = vpop.permute.xlu1 %2631 }
 0x1bd   : > { %v7870_v61 = vpop.permute.xlu0 %7079 }
 0x1be   : > { %v7868_v13 = vpop.permute.xlu1 %7069 }
 0x1c1   : > { %v7874_v63 = vpop.permute.xlu0 %2946 }
 0x1c2   : > { %v7872_v62 = vpop.permute.xlu1 %2766 }
 0x1c5   : > { %v7878_v1 = vpop.permute.xlu0 %7089 }
 0x1c6   : > { %v7876_v0 = vpop.permute.xlu1 %2944 }
 0x1c9   : > { %v7882_v6 = vpop.permute.xlu0 %3081 }
 0x1ca   : > { %v7880_v2 = vpop.permute.xlu1 %7084  ;;  %8711 = vst [vmem:[#allocation5_spill] sm:$0xff] %v7882_v6 }
 0x1cd   : > { %v7886_v11 = vpop.permute.xlu0 %3259 }
 0x1ce   : > { %v7884_v7 = vpop.permute.xlu1 %7094  ;;  %8712 = vst [vmem:[#allocation6_spill] sm:$0xff] %v7886_v11 }
 0x1d7   : > { %v6081_v23 = vpop.f32.mrb[2].mxu0 }
 0x1d8   : > { %v418_v24 = vadd.f32 %v6081_v23, %v7783_v18  ;;  %v412_v25 = vpop.f32.mrb[3].mxu0  ;;  %v7888_v23 = vpop.permute.xlu1 %7099 }
 0x1d9   : > { %v413_v28 = vadd.f32 %v7783_v18, %v412_v25  ;;  %8713 = vst [vmem:[#allocation7_spill] sm:$0xff] %v7888_v23 }
 0x1da   : > { %v422_v29 = vmax.f32 %v418_v24, 0.0  ;;  %v7890_v24 = vpop.permute.xlu0 %7104 }
 0x1db   : > { %v421_v30 = vmax.f32 %v413_v28, 0.0  ;;  %8714 = vst [vmem:[#allocation8_spill] sm:$0xff] %v7890_v24 }
 0x1dc   : > { %v428_v33 = vadd.f32 %v7800_v27, %v422_v29  ;;  %v7892_v25 = vpop.permute.xlu1 %3261 }
 0x1dd   : > { %v427_v36 = vadd.f32 %v7800_v27, %v421_v30  ;;  %8715 = vst [vmem:[#allocation9_spill] sm:$0xff] %v7892_v25 }
 0x1de   : > { %v517_v37 = vadd.f32 %v513_v32, %v428_v33  ;;  %v7894_v28 = vpop.permute.xlu0 %7114 }
 0x1df   : > { %v516_v38 = vadd.f32 %v508_v35, %v427_v36  ;;  %8716 = vst [vmem:[#allocation10_spill] sm:$0xff] %v7894_v28 }
 0x1e0   : > { %v519_v39 = vmax.f32 %v517_v37, 0.0  ;;  %v7896_v30 = vpop.permute.xlu1 %7109 }
 0x1e1   : > { %v518_v40 = vmax.f32 %v516_v38, 0.0  ;;  %8717 = vst [vmem:[#allocation11_spill] sm:$0xff] %v7896_v30 }
 0x1e2   : > { %521 = vst.msk [vmem:[%s7820_s9 + $0x10] sm:$0xff] %vm339_vm3, %v519_v39  ;;  %v7902_v24 = vpop.permute.xlu0 %7119 }
 0x1e3   : > { %520 = vst.msk [vmem:[%s7820_s9] sm:$0xff] %vm339_vm3, %v518_v40  ;;  %8718 = vst [vmem:[#allocation12_spill] sm:$0xff] %v7902_v24 }
 0x1e4   : > { %v7906_v30 = vpop.permute.xlu1 %3396 }
 0x1e5   : > { %8719 = vst [vmem:[#allocation13_spill] sm:$0xff] %v7906_v30 }
 0x24e   : > { %v6112_v29 = vpop.f32.mrb[4].mxu0 }
 0x24f   : > { %v728_v32 = vadd.f32 %v6112_v29, %v7783_v18  ;;  %v722_v33 = vpop.f32.mrb[5].mxu0 }
 0x250   : > { %v723_v35 = vadd.f32 %v7783_v18, %v722_v33 }
 0x251   : > { %v732_v36 = vmax.f32 %v728_v32, 0.0  ;;  %v7909_v32 = vpop.permute.xlu0 %3576 }
 0x252   : > { %v731_v37 = vmax.f32 %v723_v35, 0.0  ;;  %v6117_v38 = vpop.f32.mrb[6].mxu0  ;;  %8720 = vst [vmem:[#allocation14_spill] sm:$0xff] %v7909_v32  ;;  %v7912_v35 = vpop.permute.xlu1 %3574 }
 0x253   : > { %v734_v39 = vadd.f32 %v7800_v27, %v732_v36  ;;  %v819_v40 = vadd.f32 %v6117_v38, %v7795_v26  ;;  %v813_v11 = vpop.f32.mrb[7].mxu0  ;;  %8721 = vst [vmem:[#allocation15_spill] sm:$0xff] %v7912_v35 }
 0x254   : > { %v733_v28 = vadd.f32 %v7800_v27, %v731_v37  ;;  %v814_v25 = vadd.f32 %v7795_v26, %v813_v11 }
 0x255   : > { %v823_v29 = vadd.f32 %v819_v40, %v734_v39  ;;  %v7914_v36 = vpop.permute.xlu0 %7129 }
 0x256   : > { %v822_v23 = vadd.f32 %v814_v25, %v733_v28  ;;  %8722 = vst [vmem:[#allocation16_spill] sm:$0xff] %v7914_v36  ;;  %v7916_v37 = vpop.permute.xlu1 %7124 }
 0x257   : > { %v825_v6 = vmax.f32 %v823_v29, 0.0  ;;  %8723 = vst [vmem:[#allocation17_spill] sm:$0xff] %v7916_v37 }
 0x258   : > { %v824_v33 = vmax.f32 %v822_v23, 0.0 }
 0x259   : > { %830 = vrot.lane.b32.xlu0 %v825_v6, %s7314_s8 }
 0x25a   : > { %828 = vrot.lane.b32.xlu1 %v824_v33, %s7314_s8  ;;  %v7922_v33 = vpop.permute.xlu0 %3711  ;;  %v7926_v35 = vpop.permute.xlu1 %7134  ;;  %s5534_s8 = sshll.u32 %s7820_s9, 4  ;;  %s8615_s8 = int_to_ptr.vmem [resolvable:$true] %s5534_s8 }
 0x25b   : > { %8724 = vst [vmem:[#allocation18_spill] sm:$0xff] %v7922_v33  ;;  %s7229_s14 = scalar_lea.vmem %s8615_s8, 512 }
 0x25c   : > { %p7230_p11 = scmp.ne.s32.totalorder %s8615_s8, %s7229_s14 }
 0x25e   : > { %p7231_p12 = pnand %p7230_p11, %p7386_p5 }
 0x260   : > { %v6143_v38 = vpop.f32.mrb[8].mxu0  ;;  %p7232_p13 = pneg %p7231_p12 }
 0x261   : > { %v1043_v11 = vadd.f32 %v6143_v38, %v7783_v18  ;;  %v1037_v24 = vpop.f32.mrb[9].mxu0 }
 0x262   : > { %v1038_v25 = vadd.f32 %v7783_v18, %v1037_v24 }
 0x263   : > { %v1047_v28 = vmax.f32 %v1043_v11, 0.0  ;;  %v7929_v11 = vpop.permute.xlu0 %3889 }
 0x264   : > { %v1046_v23 = vmax.f32 %v1038_v25, 0.0  ;;  %v6148_v39 = vpop.f32.mrb[10].mxu0  ;;  %8725 = vst [vmem:[#allocation19_spill] sm:$0xff] %v7929_v11  ;;  %v7932_v25 = vpop.permute.xlu1 %7139  ;;  %v6987_v11 = vunpack.i.h.bf16 %v7765_v8 }
 0x265   : > { %v1049_v6 = vadd.f32 %v7800_v27, %v1047_v28  ;;  %v1134_v40 = vadd.f32 %v6148_v39, %v7795_v26  ;;  %v1128_v29 = vpop.f32.mrb[11].mxu0  ;;  %8726 = vst [vmem:[#allocation20_spill] sm:$0xff] %v7932_v25 }
 0x266   : > { %v1048_v32 = vadd.f32 %v7800_v27, %v1046_v23  ;;  %v1129_v36 = vadd.f32 %v7795_v26, %v1128_v29  ;;  %v5633_v23 = vld [vmem:[%s8669_s4 + $0x3] ss:$0 sm:$0xff] }
 0x267   : > { %v1138_v38 = vadd.f32 %v1134_v40, %v1049_v6  ;;  %v7934_v28 = vpop.permute.xlu0 %7144 }
 0x268   : > { %v1137_v37 = vadd.f32 %v1129_v36, %v1048_v32  ;;  %8727 = vst [vmem:[#allocation21_spill] sm:$0xff] %v7934_v28  ;;  %v7936_v39 = vpop.permute.xlu1 %3891  ;;  %v6982_v32 = vunpack.i.h.bf16 %v7758_v5  ;;  %v6981_v36 = vunpack.i.l.bf16 %v7758_v5 }
 0x269   : > { %v1140_v30 = vmax.f32 %v1138_v38, 0.0  ;;  %8728 = vst [vmem:[#allocation22_spill] sm:$0xff] %v7936_v39  ;;  %v6986_v39 = vunpack.i.l.bf16 %v7765_v8  ;;  %v6991_v8 = vunpack.i.l.bf16 %v7777_v17 }
 0x26a   : > { %v1139_v24 = vmax.f32 %v1137_v37, 0.0  ;;  %v6647_v25 = vpack.c.bf16 %v6982_v32, %v6981_v36  ;;  %v6996_v32 = vunpack.i.l.bf16 %v7774_v15 }
 0x26b   : > { %1145 = vrot.lane.b32.xlu0 %v1140_v30, %s7313_s15  ;;  %v7943_v40 = vpop.permute.xlu0 %7154 }
 0x26c   : > { %1143 = vrot.lane.b32.xlu1 %v1139_v24, %s7313_s15  ;;  %v7945_v38 = vpop.permute.xlu1 %7149 }
 0x26f   : > { %v7951_v33 = vpop.permute.xlu0 %7159 }
 0x270   : > { %v7957_v5 = vpop.permute.xlu1 %4026 }
 0x273   : > { %v7967_v36 = vpop.permute.xlu0 %4206 }
 0x276   : > { %v6169_v6 = vpop.f32.mrb[12].mxu0 }
 0x277   : > { %v1275_v30 = vadd.f32 %v6169_v6, %v5633_v23  ;;  %v1269_v37 = vpop.f32.mrb[13].mxu0  ;;  %v6651_v6 = vpack.c.bf16 %v6987_v11, %v6986_v39  ;;  %v7971_v11 = vpop.permute.xlu0 %7169 }
 0x278   : > { %v1270_v29 = vadd.f32 %v5633_v23, %v1269_v37  ;;  %v6992_v23 = vunpack.i.h.bf16 %v7777_v17 }
 0x279   : > { %v1279_v28 = vmax.f32 %v1275_v30, 0.0  ;;  %v7969_v30 = vpop.permute.xlu1 %4204 }
 0x27a   : > { %v1278_v24 = vmax.f32 %v1270_v29, 0.0 }
 0x27c   : > { %6172 = vmatprep.mubr.msk.f32.mxu1 %vm339_vm3, %v1278_v24 }
 0x27d   : > { %6173 = vmatmul.mubr.msk.f32.vlgmr.msra.gmra.mrb[6].mxu1 %vm339_vm3, %v1279_v28  ;;  %v6997_v28 = vunpack.i.h.bf16 %v7774_v15 }
 0x27e   : > { %6176 = vmatpush3.msk.msra.mxu1 %vm254_vm0, %v7436_v14  ;;  %6177 = vmatprep.mubr.msk.f32.mxu1 %vm433_vm2, %v7755_v4  ;;  %v6655_v4 = vpack.c.bf16 %v6992_v23, %v6991_v8 }
 0x27f   : > { %6648 = vmatprep.subr.bf16.mxu1 %v6647_v25  ;;  %v6659_v17 = vpack.c.bf16 %v6997_v28, %v6996_v32 }
 0x281   : > { %6178 = vmatmul.mubr.msk.f32.vlgmr.msra.gmra.mrb[8].mxu1 %vm433_vm2, %v7767_v10  ;;  %v7973_v10 = vpop.permute.xlu1 %7164 }
 0x282   : > { %6650 = vmatpush3.bf16.msra.mxu1 %v6647_v25  ;;  %6198 = vmatprep.mubr.msk.f32.mxu1 %vm247_vm1, %v7450_v16  ;;  %v7977_v16 = vpop.permute.xlu0 %4341 }
 0x283   : > { %6652 = vmatprep.subr.bf16.mxu1 %v6651_v6 }
 0x285   : > { %v7979_v15 = vpop.permute.xlu1 %7174 }
 0x286   : > { %6654 = vmatpush3.bf16.msra.mxu1 %v6651_v6  ;;  %v7987_v25 = vpop.permute.xlu0 %4519 }
 0x287   : > { %6656 = vmatprep.subr.bf16.mxu1 %v6655_v4  ;;  %8729 = vst [vmem:[#allocation23_spill] sm:$0xff] %v7987_v25 }
 0x289   : > { %v7991_v39 = vpop.permute.xlu1 %7179 }
 0x28a   : > { %6658 = vmatpush3.bf16.msra.mxu1 %v6655_v4  ;;  %8730 = vst [vmem:[#allocation24_spill] sm:$0xff] %v7991_v39  ;;  %v7993_v37 = vpop.permute.xlu0 %7184 }
 0x28b   : > { %6660 = vmatprep.subr.bf16.mxu1 %v6659_v17  ;;  %8731 = vst [vmem:[#allocation25_spill] sm:$0xff] %v7993_v37 }
 0x28d   : > { %v7995_v29 = vpop.permute.xlu1 %4521 }
 0x28e   : > { %6662 = vmatpush3.bf16.msra.mxu1 %v6659_v17  ;;  %8732 = vst [vmem:[#allocation26_spill] sm:$0xff] %v7995_v29  ;;  %v7997_v24 = vpop.permute.xlu0 %7194 }
 0x28f   : > { %6196 = vmatprep.subr.msk.mxu1 %vm254_vm0, %v7787_v21  ;;  %8733 = vst [vmem:[#allocation27_spill] sm:$0xff] %v7997_v24 }
 0x292   : > { %6197 = vmatpush3.msk.msra.mxu1 %vm254_vm0, %v7787_v21  ;;  %v7999_v21 = vpop.permute.xlu1 %7189 }
 0x293   : > { %6199 = vmatmul.mubr.msk.f32.vlgmr.msra.gmra.mrb[10].mxu1 %vm247_vm1, %v7460_v19  ;;  %6232 = vmatprep.subr.mxu1 %v7491_v22  ;;  %8734 = vst [vmem:[#allocation28_spill] sm:$0xff] %v7999_v21  ;;  %v8001_v19 = vpop.permute.xlu0 %7199 }
 0x294   : > { %6233 = vmatpush3.msra.mxu1 %v7491_v22  ;;  %8735 = vst [vmem:[#allocation29_spill] sm:$0xff] %v8001_v19 }
 0x295   : > { %6237 = vmatprep.subr.msk.mxu1 %vm254_vm0, %v7436_v14 }
 0x296   : > { %v8003_v22 = vpop.permute.xlu1 %4656 }
 0x297   : > { %8736 = vst [vmem:[#allocation30_spill] sm:$0xff] %v8003_v22  ;;  %v8005_v23 = vpop.permute.xlu0 %4836 }
 0x298   : > { %8737 = vst [vmem:[#allocation31_spill] sm:$0xff] %v8005_v23 }
 0x29a   : > { %v8007_v8 = vpop.permute.xlu1 %4834 }
 0x29b   : > { %8738 = vst [vmem:[#allocation32_spill] sm:$0xff] %v8007_v8  ;;  %v8009_v14 = vpop.permute.xlu0 %7209 }
 0x29c   : > { %8739 = vst [vmem:[#allocation33_spill] sm:$0xff] %v8009_v14 }
 0x29e   : > { %v8011_v6 = vpop.permute.xlu1 %7204 }
 0x29f   : > { %8740 = vst [vmem:[#allocation34_spill] sm:$0xff] %v8011_v6  ;;  %v8013_v28 = vpop.permute.xlu0 %4971 }
 0x2a0   : > { %8741 = vst [vmem:[#allocation35_spill] sm:$0xff] %v8013_v28 }
 0x2a2   : > { %v8015_v32 = vpop.permute.xlu1 %7214 }
 0x2a3   : > { %8742 = vst [vmem:[#allocation36_spill] sm:$0xff] %v8015_v32  ;;  %v8017_v4 = vpop.permute.xlu0 %5151 }
 0x2a4   : > { %8743 = vst [vmem:[#allocation37_spill] sm:$0xff] %v8017_v4 }
 0x2a6   : > { %v8019_v17 = vpop.permute.xlu1 %5149 }
 0x2a7   : > { %8744 = vst [vmem:[#allocation38_spill] sm:$0xff] %v8019_v17  ;;  %v8021_v19 = vpop.permute.xlu0 %5432 }
 0x2a8   : > { %8745 = vst [vmem:[#allocation39_spill] sm:$0xff] %v8021_v19 }
 0x2aa   : > { %v8023_v22 = vpop.permute.xlu1 %5430 }
 0x2ab   : > { %8746 = vst [vmem:[#allocation40_spill] sm:$0xff] %v8023_v22 }
 0x2cb   : > { %v831_v23 = vpop.permute.xlu0 %830 }
 0x2cc   : > { %836 = vst.msk [vmem:[%s7820_s9 + $0x10] sm:$0xff] %vm834_vm4, %v831_v23  ;;  %v829_v8 = vpop.permute.xlu1 %828 }
 0x2cd   : > { %835 = vst.msk [vmem:[%s7820_s9] sm:$0xff] %vm834_vm4, %v829_v8  ;;  %vm4614_vm4 = vcmask 917312  }
 0x2dd   : > { %v1146_v14 = vpop.permute.xlu0 %1145 }
 0x2de   : > { %1151 = vst.msk [vmem:[%s7820_s9 + $0x10] sm:$0xff] %vm1149_vm5, %v1146_v14  ;;  %v1144_v6 = vpop.permute.xlu1 %1143 }
 0x2df   : > { %1150 = vst.msk [vmem:[%s7820_s9] sm:$0xff] %vm1149_vm5, %v1144_v6  ;;  %vm4929_vm5 = vcmask 982912  }
 0x350   : > { %v6174_v28 = vpop.f32.mrb[6].mxu1 }
 0x351   : > { %v1358_v32 = vadd.f32 %v6174_v28, %v7783_v18  ;;  %v1352_v4 = vpop.f32.mrb[7].mxu1  ;;  %v5642_v28 = vld [vmem:[%s8669_s4 + $0x4] ss:$0 sm:$0xff] }
 0x352   : > { %v1353_v17 = vadd.f32 %v7783_v18, %v1352_v4 }
 0x353   : > { %v1362_v24 = vmax.f32 %v1358_v32, 0.0  ;;  %v7001_v32 = vunpack.i.l.bf16 %v7785_v20 }
 0x354   : > { %v1361_v19 = vmax.f32 %v1353_v17, 0.0  ;;  %v6179_v29 = vpop.f32.mrb[8].mxu1 }
 0x355   : > { %v1364_v22 = vadd.f32 %v7800_v27, %v1362_v24  ;;  %v1449_v23 = vadd.f32 %v6179_v29, %v7795_v26  ;;  %v1443_v21 = vpop.f32.mrb[9].mxu1  ;;  %v7002_v29 = vunpack.i.h.bf16 %v7785_v20  ;;  %v7012_v20 = vunpack.i.h.bf16 %v7816_v41 }
 0x356   : > { %v1363_v8 = vadd.f32 %v7800_v27, %v1361_v19  ;;  %v1444_v14 = vadd.f32 %v7795_v26, %v1443_v21 }
 0x357   : > { %v1453_v25 = vadd.f32 %v1449_v23, %v1364_v22  ;;  %v8049_v23 = vld [vmem:[%s8668_s3] sm:$0xf] }
 0x358   : > { %v1452_v6 = vadd.f32 %v1444_v14, %v1363_v8  ;;  %v8060_v14 = vld [vmem:[%s7443_s13] sm:$0xff] }
 0x359   : > { %v1455_v37 = vmax.f32 %v1453_v25, 0.0  ;;  %v7007_v25 = vunpack.i.h.bf16 %v7818_v42 }
 0x35a   : > { %v1454_v39 = vmax.f32 %v1452_v6, 0.0  ;;  %v7017_v6 = vunpack.i.h.bf16 %v7828_v59 }
 0x35b   : > { %1460 = vrot.lane.b32.xlu0 %v1455_v37, %s7311_s17  ;;  %v7006_v37 = vunpack.i.l.bf16 %v7818_v42  ;;  %v7011_v42 = vunpack.i.l.bf16 %v7816_v41 }
 0x35c   : > { %1458 = vrot.lane.b32.xlu1 %v1454_v39, %s7311_s17  ;;  %v6663_v39 = vpack.c.bf16 %v7002_v29, %v7001_v32 }
 0x35d   : > { %v6667_v8 = vpack.c.bf16 %v7007_v25, %v7006_v37 }
 0x366   : > { %v6200_v24 = vpop.f32.mrb[10].mxu1 }
 0x367   : > { %v1590_v19 = vadd.f32 %v6200_v24, %v5642_v28  ;;  %v1584_v4 = vpop.f32.mrb[11].mxu1 }
 0x368   : > { %v1585_v21 = vadd.f32 %v5642_v28, %v1584_v4  ;;  %v6671_v28 = vpack.c.bf16 %v7012_v20, %v7011_v42 }
 0x369   : > { %v1594_v17 = vmax.f32 %v1590_v19, 0.0 }
 0x36a   : > { %v1593_v22 = vmax.f32 %v1585_v21, 0.0 }
 0x36c   : > { %6203 = vmatprep.mubr.msk.f32.mxu0 %vm339_vm3, %v1593_v22 }
 0x36d   : > { %6204 = vmatmul.mubr.msk.f32.vlgmr.msra.gmra.mrb[14].mxu0 %vm339_vm3, %v1594_v17 }
 0x36e   : > { %6207 = vmatpush3.msk.msra.mxu0 %vm254_vm0, %v8049_v23  ;;  %6208 = vmatprep.mubr.msk.f32.mxu0 %vm433_vm2, %v7809_v34  ;;  %v7016_v34 = vunpack.i.l.bf16 %v7828_v59  ;;  %v8078_v59 = vld [vmem:[%s8667_s2] sm:$0xff] }
 0x36f   : > { %6664 = vmatprep.subr.bf16.mxu0 %v6663_v39 }
 0x370   : > { %v6675_v41 = vpack.c.bf16 %v7017_v6, %v7016_v34 }
 0x371   : > { %6209 = vmatmul.mubr.msk.f32.vlgmr.msra.gmra.mrb[16].mxu0 %vm433_vm2, %v7804_v31  ;;  %v8071_v31 = vld [vmem:[%s7443_s13 + $0x8] sm:$0xff] }
 0x372   : > { %6666 = vmatpush3.bf16.msra.mxu0 %v6663_v39  ;;  %6229 = vmatprep.mubr.msk.f32.mxu0 %vm247_vm1, %v8060_v14 }
 0x373   : > { %6668 = vmatprep.subr.bf16.mxu0 %v6667_v8 }
 0x376   : > { %6670 = vmatpush3.bf16.msra.mxu0 %v6667_v8 }
 0x377   : > { %6672 = vmatprep.subr.bf16.mxu0 %v6671_v28 }
 0x37a   : > { %6674 = vmatpush3.bf16.msra.mxu0 %v6671_v28 }
 0x37b   : > { %6676 = vmatprep.subr.bf16.mxu0 %v6675_v41 }
 0x37e   : > { %6678 = vmatpush3.bf16.msra.mxu0 %v6675_v41  ;;  %v5651_v41 = vld [vmem:[%s8669_s4 + $0x5] ss:$0 sm:$0xff] }
 0x37f   : > { %6227 = vmatprep.subr.msk.mxu0 %vm254_vm0, %v7826_v58 }
 0x382   : > { %6228 = vmatpush3.msk.msra.mxu0 %vm254_vm0, %v7826_v58 }
 0x383   : > { %6230 = vmatmul.mubr.msk.f32.vlgmr.msra.gmra.mrb[18].mxu0 %vm247_vm1, %v8071_v31  ;;  %6263 = vmatprep.subr.mxu0 %v8078_v59 }
 0x384   : > { %6264 = vmatpush3.msra.mxu0 %v8078_v59 }
 0x385   : > { %6268 = vmatprep.subr.msk.mxu0 %vm254_vm0, %v8049_v23 }
 0x3cd   : > { %v1461_v24 = vpop.permute.xlu0 %1460 }
 0x3ce   : > { %1466 = vst.msk [vmem:[%s7820_s9 + $0x10] sm:$0xff] %vm1464_vm6, %v1461_v24  ;;  %v1459_v58 = vpop.permute.xlu1 %1458 }
 0x3cf   : > { %1465 = vst.msk [vmem:[%s7820_s9] sm:$0xff] %vm1464_vm6, %v1459_v58  ;;  %v7022_v58 = vunpack.i.h.bf16 %v7832_v44 }
 0x440   : > { %v6205_v29 = vpop.f32.mrb[14].mxu0 }
 0x441   : > { %v1673_v32 = vadd.f32 %v6205_v29, %v7783_v18  ;;  %v1667_v19 = vpop.f32.mrb[15].mxu0  ;;  %v7021_v29 = vunpack.i.l.bf16 %v7832_v44  ;;  %v7032_v44 = vunpack.i.h.bf16 %v7840_v48 }
 0x442   : > { %v1668_v4 = vadd.f32 %v7783_v18, %v1667_v19 }
 0x443   : > { %v1677_v21 = vmax.f32 %v1673_v32, 0.0 }
 0x444   : > { %v1676_v22 = vmax.f32 %v1668_v4, 0.0  ;;  %v6210_v25 = vpop.f32.mrb[16].mxu0 }
 0x445   : > { %v1679_v37 = vadd.f32 %v7800_v27, %v1677_v21  ;;  %v1764_v17 = vadd.f32 %v6210_v25, %v7795_v26  ;;  %v1758_v39 = vpop.f32.mrb[17].mxu0  ;;  %v7026_v25 = vunpack.i.l.bf16 %v7834_v45 }
 0x446   : > { %v1678_v20 = vadd.f32 %v7800_v27, %v1676_v22  ;;  %v1759_v42 = vadd.f32 %v7795_v26, %v1758_v39  ;;  %v7027_v22 = vunpack.i.h.bf16 %v7834_v45  ;;  %v7031_v39 = vunpack.i.l.bf16 %v7840_v48 }
 0x447   : > { %v1768_v8 = vadd.f32 %v1764_v17, %v1679_v37  ;;  %v6679_v17 = vpack.c.bf16 %v7022_v58, %v7021_v29  ;;  %v7037_v45 = vunpack.i.h.bf16 %v7838_v47 }
 0x448   : > { %v1767_v6 = vadd.f32 %v1759_v42, %v1678_v20  ;;  %v6683_v20 = vpack.c.bf16 %v7027_v22, %v7026_v25  ;;  %v7036_v42 = vunpack.i.l.bf16 %v7838_v47 }
 0x449   : > { %v1770_v34 = vmax.f32 %v1768_v8, 0.0 }
 0x44a   : > { %v1769_v28 = vmax.f32 %v1767_v6, 0.0  ;;  %v6691_v48 = vpack.c.bf16 %v7037_v45, %v7036_v42 }
 0x44b   : > { %1775 = vrot.lane.b32.xlu0 %v1770_v34, %s7310_s23 }
 0x44c   : > { %1773 = vrot.lane.b32.xlu1 %v1769_v28, %s7310_s23  ;;  %s8613_s23 = scalar_lea.hbm %s8670_s5, %s5766_s25 }
 0x456   : > { %v6231_v24 = vpop.f32.mrb[18].mxu0 }
 0x457   : > { %v1905_v32 = vadd.f32 %v6231_v24, %v5651_v41  ;;  %v1899_v19 = vpop.f32.mrb[19].mxu0 }
 0x458   : > { %v1900_v4 = vadd.f32 %v5651_v41, %v1899_v19 }
 0x459   : > { %v1909_v37 = vmax.f32 %v1905_v32, 0.0 }
 0x45a   : > { %v1908_v21 = vmax.f32 %v1900_v4, 0.0 }
 0x45c   : > { %6234 = vmatprep.mubr.msk.f32.mxu1 %vm339_vm3, %v1908_v21 }
 0x45d   : > { %6235 = vmatmul.mubr.msk.f32.vlgmr.msra.gmra.mrb[12].mxu1 %vm339_vm3, %v1909_v37 }
 0x45e   : > { %6238 = vmatpush3.msk.msra.mxu1 %vm254_vm0, %v8049_v23  ;;  %6239 = vmatprep.mubr.msk.f32.mxu1 %vm433_vm2, %v7830_v43  ;;  %v6687_v43 = vpack.c.bf16 %v7032_v44, %v7031_v39  ;;  %v7042_v39 = vunpack.i.h.bf16 %v7842_v49 }
 0x45f   : > { %6680 = vmatprep.subr.bf16.mxu1 %v6679_v17 }
 0x461   : > { %6240 = vmatmul.mubr.msk.f32.vlgmr.msra.gmra.mrb[14].mxu1 %vm433_vm2, %v7836_v46 }
 0x462   : > { %6682 = vmatpush3.bf16.msra.mxu1 %v6679_v17  ;;  %6260 = vmatprep.mubr.msk.f32.mxu1 %vm247_vm1, %v8060_v14  ;;  %v5660_v17 = vld [vmem:[%s8669_s4 + $0x6] ss:$0 sm:$0xff] }
 0x463   : > { %6684 = vmatprep.subr.bf16.mxu1 %v6683_v20 }
 0x466   : > { %6686 = vmatpush3.bf16.msra.mxu1 %v6683_v20  ;;  %v7041_v20 = vunpack.i.l.bf16 %v7842_v49  ;;  %v7052_v49 = vunpack.i.h.bf16 %v7850_v53 }
 0x467   : > { %6688 = vmatprep.subr.bf16.mxu1 %v6687_v43 }
 0x46a   : > { %6690 = vmatpush3.bf16.msra.mxu1 %v6687_v43 }
 0x46b   : > { %6692 = vmatprep.subr.bf16.mxu1 %v6691_v48 }
 0x46e   : > { %6694 = vmatpush3.bf16.msra.mxu1 %v6691_v48 }
 0x46f   : > { %6258 = vmatprep.subr.msk.mxu1 %vm254_vm0, %v7844_v50 }
 0x472   : > { %6259 = vmatpush3.msk.msra.mxu1 %vm254_vm0, %v7844_v50 }
 0x473   : > { %6261 = vmatmul.mubr.msk.f32.vlgmr.msra.gmra.mrb[16].mxu1 %vm247_vm1, %v8071_v31  ;;  %6294 = vmatprep.subr.mxu1 %v8078_v59 }
 0x474   : > { %6295 = vmatpush3.msra.mxu1 %v8078_v59 }
 0x475   : > { %6299 = vmatprep.subr.msk.mxu1 %vm254_vm0, %v8049_v23 }
 0x4bd   : > { %v1776_v46 = vpop.permute.xlu0 %1775 }
 0x4be   : > { %1781 = vst.msk [vmem:[%s7820_s9 + $0x10] sm:$0xff] %vm1779_vm7, %v1776_v46  ;;  %v1774_v47 = vpop.permute.xlu1 %1773  ;;  %v6695_v46 = vpack.c.bf16 %v7042_v39, %v7041_v20 }
 0x4bf   : > { %1780 = vst.msk [vmem:[%s7820_s9] sm:$0xff] %vm1779_vm7, %v1774_v47  ;;  %v7047_v47 = vunpack.i.h.bf16 %v7852_v54 }
 0x530   : > { %v6236_v8 = vpop.f32.mrb[12].mxu1 }
 0x531   : > { %v1988_v6 = vadd.f32 %v6236_v8, %v7783_v18  ;;  %v1982_v34 = vpop.f32.mrb[13].mxu1  ;;  %v7046_v8 = vunpack.i.l.bf16 %v7852_v54 }
 0x532   : > { %v1983_v50 = vadd.f32 %v7783_v18, %v1982_v34  ;;  %v7051_v34 = vunpack.i.l.bf16 %v7850_v53 }
 0x533   : > { %v1992_v28 = vmax.f32 %v1988_v6, 0.0 }
 0x534   : > { %v1991_v41 = vmax.f32 %v1983_v50, 0.0  ;;  %v6241_v24 = vpop.f32.mrb[14].mxu1  ;;  %v6699_v50 = vpack.c.bf16 %v7047_v47, %v7046_v8  ;;  %v6703_v54 = vpack.c.bf16 %v7052_v49, %v7051_v34  ;;  %v7067_v34 = vunpack.i.h.bf16 %v7862_v12 }
 0x535   : > { %v1994_v58 = vadd.f32 %v7800_v27, %v1992_v28  ;;  %v2079_v29 = vadd.f32 %v6241_v24, %v7795_v26  ;;  %v2073_v32 = vpop.f32.mrb[15].mxu1  ;;  %v7057_v28 = vunpack.i.h.bf16 %v7856_v3 }
 0x536   : > { %v1993_v19 = vadd.f32 %v7800_v27, %v1991_v41  ;;  %v2074_v4 = vadd.f32 %v7795_v26, %v2073_v32  ;;  %v7056_v41 = vunpack.i.l.bf16 %v7856_v3 }
 0x537   : > { %v2083_v21 = vadd.f32 %v2079_v29, %v1994_v58 }
 0x538   : > { %v2082_v22 = vadd.f32 %v2074_v4, %v1993_v19 }
 0x539   : > { %v2085_v25 = vmax.f32 %v2083_v21, 0.0 }
 0x53a   : > { %v2084_v37 = vmax.f32 %v2082_v22, 0.0 }
 0x53b   : > { %2090 = vrot.lane.b32.xlu0 %v2085_v25, %s7308_s30 }
 0x53c   : > { %2088 = vrot.lane.b32.xlu1 %v2084_v37, %s7308_s30  ;;  %s8747_s30 = smov 48  }
 0x546   : > { %v6262_v44 = vpop.f32.mrb[16].mxu1 }
 0x547   : > { %v2220_v45 = vadd.f32 %v6262_v44, %v5660_v17  ;;  %v2214_v42 = vpop.f32.mrb[17].mxu1 }
 0x548   : > { %v2215_v43 = vadd.f32 %v5660_v17, %v2214_v42 }
 0x549   : > { %v2224_v6 = vmax.f32 %v2220_v45, 0.0  ;;  %v5669_v45 = vld [vmem:[%s8669_s4 + $0x7] ss:$0 sm:$0xff] }
 0x54a   : > { %v2223_v48 = vmax.f32 %v2215_v43, 0.0  ;;  %v7062_v43 = vunpack.i.h.bf16 %v7860_v9 }
 0x54c   : > { %6265 = vmatprep.mubr.msk.f32.mxu0 %vm339_vm3, %v2223_v48  ;;  %v7061_v48 = vunpack.i.l.bf16 %v7860_v9 }
 0x54d   : > { %6266 = vmatmul.mubr.msk.f32.vlgmr.msra.gmra.mrb[20].mxu0 %vm339_vm3, %v2224_v6 }
 0x54e   : > { %6269 = vmatpush3.msk.msra.mxu0 %vm254_vm0, %v8049_v23  ;;  %6270 = vmatprep.mubr.msk.f32.mxu0 %vm433_vm2, %v7848_v52  ;;  %v6707_v52 = vpack.c.bf16 %v7057_v28, %v7056_v41  ;;  %v6711_v49 = vpack.c.bf16 %v7062_v43, %v7061_v48  ;;  %v7072_v28 = vunpack.i.h.bf16 %v7868_v13  ;;  %v7071_v41 = vunpack.i.l.bf16 %v7868_v13 }
 0x54f   : > { %6696 = vmatprep.subr.bf16.mxu0 %v6695_v46 }
 0x551   : > { %6271 = vmatmul.mubr.msk.f32.vlgmr.msra.gmra.mrb[22].mxu0 %vm433_vm2, %v7846_v51 }
 0x552   : > { %6698 = vmatpush3.bf16.msra.mxu0 %v6695_v46  ;;  %6291 = vmatprep.mubr.msk.f32.mxu0 %vm247_vm1, %v8060_v14 }
 0x553   : > { %6700 = vmatprep.subr.bf16.mxu0 %v6699_v50 }
 0x556   : > { %6702 = vmatpush3.bf16.msra.mxu0 %v6699_v50  ;;  %v7066_v50 = vunpack.i.l.bf16 %v7862_v12  ;;  %v7077_v12 = vunpack.i.h.bf16 %v7866_v60 }
 0x557   : > { %6704 = vmatprep.subr.bf16.mxu0 %v6703_v54 }
 0x558   : > { %v6715_v9 = vpack.c.bf16 %v7067_v34, %v7066_v50  ;;  %v7091_v34 = vunpack.i.l.bf16 %v7878_v1 }
 0x55a   : > { %6706 = vmatpush3.bf16.msra.mxu0 %v6703_v54 }
 0x55b   : > { %6708 = vmatprep.subr.bf16.mxu0 %v6707_v52 }
 0x55e   : > { %6710 = vmatpush3.bf16.msra.mxu0 %v6707_v52  ;;  %v7076_v52 = vunpack.i.l.bf16 %v7866_v60 }
 0x55f   : > { %6289 = vmatprep.subr.msk.mxu0 %vm254_vm0, %v7854_v55 }
 0x562   : > { %6290 = vmatpush3.msk.msra.mxu0 %vm254_vm0, %v7854_v55 }
 0x563   : > { %6292 = vmatmul.mubr.msk.f32.vlgmr.msra.gmra.mrb[24].mxu0 %vm247_vm1, %v8071_v31  ;;  %6325 = vmatprep.subr.mxu0 %v8078_v59 }
 0x564   : > { %6326 = vmatpush3.msra.mxu0 %v8078_v59 }
 0x565   : > { %6330 = vmatprep.subr.msk.mxu0 %vm254_vm0, %v8049_v23 }
 0x5ad   : > { %v2091_v51 = vpop.permute.xlu0 %2090 }
 0x5ae   : > { %2096 = vst.msk [vmem:[%s7820_s9 + $0x10] sm:$0xff] %vm2094_vm8, %v2091_v51  ;;  %v2089_v53 = vpop.permute.xlu1 %2088  ;;  %v6719_v51 = vpack.c.bf16 %v7072_v28, %v7071_v41 }
 0x5af   : > { %2095 = vst.msk [vmem:[%s7820_s9] sm:$0xff] %vm2094_vm8, %v2089_v53 }
 0x620   : > { %v6267_v3 = vpop.f32.mrb[20].mxu0 }
 0x621   : > { %v2303_v24 = vadd.f32 %v6267_v3, %v7783_v18  ;;  %v2297_v58 = vpop.f32.mrb[21].mxu0 }
 0x622   : > { %v2298_v55 = vadd.f32 %v7783_v18, %v2297_v58 }
 0x623   : > { %v2307_v29 = vmax.f32 %v2303_v24, 0.0 }
 0x624   : > { %v2306_v32 = vmax.f32 %v2298_v55, 0.0  ;;  %v6272_v19 = vpop.f32.mrb[22].mxu0 }
 0x625   : > { %v2309_v4 = vadd.f32 %v7800_v27, %v2307_v29  ;;  %v2394_v21 = vadd.f32 %v6272_v19, %v7795_v26  ;;  %v2388_v22 = vpop.f32.mrb[23].mxu0 }
 0x626   : > { %v2308_v25 = vadd.f32 %v7800_v27, %v2306_v32  ;;  %v2389_v37 = vadd.f32 %v7795_v26, %v2388_v22 }
 0x627   : > { %v2398_v17 = vadd.f32 %v2394_v21, %v2309_v4 }
 0x628   : > { %v2397_v44 = vadd.f32 %v2389_v37, %v2308_v25 }
 0x629   : > { %v2400_v39 = vmax.f32 %v2398_v17, 0.0 }
 0x62a   : > { %v2399_v20 = vmax.f32 %v2397_v44, 0.0  ;;  %v5678_v44 = vld [vmem:[%s8669_s4 + $0x8] ss:$0 sm:$0xff] }
 0x62b   : > { %2405 = vrot.lane.b32.xlu0 %v2400_v39, %s8747_s30 }
 0x62c   : > { %2403 = vrot.lane.b32.xlu1 %v2399_v20, %s8747_s30  ;;  %v7082_v20 = vunpack.i.h.bf16 %v7870_v61  ;;  %s7316_s30 = smov [#allocation2]  }
 0x636   : > { %v6293_v42 = vpop.f32.mrb[24].mxu0 }
 0x637   : > { %v2535_v46 = vadd.f32 %v6293_v42, %v5669_v45  ;;  %v2529_v47 = vpop.f32.mrb[25].mxu0 }
 0x638   : > { %v2530_v8 = vadd.f32 %v5669_v45, %v2529_v47  ;;  %v7081_v45 = vunpack.i.l.bf16 %v7870_v61  ;;  %v7092_v61 = vunpack.i.h.bf16 %v7878_v1  ;;  %v8749_v1 = vld [vmem:[#allocation5_spill] sm:$0xff] }
 0x639   : > { %v2539_v54 = vmax.f32 %v2535_v46, 0.0 }
 0x63a   : > { %v2538_v6 = vmax.f32 %v2530_v8, 0.0  ;;  %v6727_v47 = vpack.c.bf16 %v7082_v20, %v7081_v45  ;;  %v7087_v8 = vunpack.i.h.bf16 %v7880_v2  ;;  %v8752_v45 = vld [vmem:[#allocation6_spill] sm:$0xff] }
 0x63c   : > { %6296 = vmatprep.mubr.msk.f32.mxu1 %vm339_vm3, %v2538_v6  ;;  %v7086_v6 = vunpack.i.l.bf16 %v7880_v2  ;;  %v6735_v2 = vpack.c.bf16 %v7092_v61, %v7091_v34 }
 0x63d   : > { %6297 = vmatmul.mubr.msk.f32.vlgmr.msra.gmra.mrb[18].mxu1 %vm339_vm3, %v2539_v54  ;;  %v7097_v54 = vunpack.i.h.bf16 %v7884_v7 }
 0x63e   : > { %6300 = vmatpush3.msk.msra.mxu1 %vm254_vm0, %v8049_v23  ;;  %6301 = vmatprep.mubr.msk.f32.mxu1 %vm433_vm2, %v7858_v56  ;;  %v6723_v56 = vpack.c.bf16 %v7077_v12, %v7076_v52  ;;  %v6731_v50 = vpack.c.bf16 %v7087_v8, %v7086_v6  ;;  %v8755_v8 = vld [vmem:[#allocation10_spill] sm:$0xff] }
 0x63f   : > { %6712 = vmatprep.subr.bf16.mxu1 %v6711_v49  ;;  %v7117_v6 = vunpack.i.h.bf16 %v8755_v8 }
 0x641   : > { %6302 = vmatmul.mubr.msk.f32.vlgmr.msra.gmra.mrb[20].mxu1 %vm433_vm2, %v7864_v57 }
 0x642   : > { %6714 = vmatpush3.bf16.msra.mxu1 %v6711_v49  ;;  %6322 = vmatprep.mubr.msk.f32.mxu1 %vm247_vm1, %v8060_v14 }
 0x643   : > { %6716 = vmatprep.subr.bf16.mxu1 %v6715_v9 }
 0x646   : > { %6718 = vmatpush3.bf16.msra.mxu1 %v6715_v9  ;;  %v7096_v9 = vunpack.i.l.bf16 %v7884_v7 }
 0x647   : > { %6720 = vmatprep.subr.bf16.mxu1 %v6719_v51 }
 0x64a   : > { %6722 = vmatpush3.bf16.msra.mxu1 %v6719_v51 }
 0x64b   : > { %6724 = vmatprep.subr.bf16.mxu1 %v6723_v56 }
 0x64e   : > { %6726 = vmatpush3.bf16.msra.mxu1 %v6723_v56 }
 0x64f   : > { %6320 = vmatprep.subr.msk.mxu1 %vm254_vm0, %v7872_v62 }
 0x652   : > { %6321 = vmatpush3.msk.msra.mxu1 %vm254_vm0, %v7872_v62 }
 0x653   : > { %6323 = vmatmul.mubr.msk.f32.vlgmr.msra.gmra.mrb[22].mxu1 %vm247_vm1, %v8071_v31  ;;  %6356 = vmatprep.subr.mxu1 %v8078_v59 }
 0x654   : > { %6357 = vmatpush3.msra.mxu1 %v8078_v59 }
 0x655   : > { %6361 = vmatprep.subr.msk.mxu1 %vm254_vm0, %v8049_v23 }
 0x69d   : > { %v2406_v57 = vpop.permute.xlu0 %2405 }
 0x69e   : > { %2411 = vst.msk [vmem:[%s7820_s9 + $0x10] sm:$0xff] %vm2409_vm9, %v2406_v57  ;;  %v2404_v60 = vpop.permute.xlu1 %2403 }
 0x69f   : > { %2410 = vst.msk [vmem:[%s7820_s9] sm:$0xff] %vm2409_vm9, %v2404_v60 }
 0x710   : > { %v6298_v13 = vpop.f32.mrb[18].mxu1 }
 0x711   : > { %v2618_v53 = vadd.f32 %v6298_v13, %v7783_v18  ;;  %v2612_v3 = vpop.f32.mrb[19].mxu1 }
 0x712   : > { %v2613_v62 = vadd.f32 %v7783_v18, %v2612_v3 }
 0x713   : > { %v2622_v24 = vmax.f32 %v2618_v53, 0.0 }
 0x714   : > { %v2621_v58 = vmax.f32 %v2613_v62, 0.0  ;;  %v6303_v55 = vpop.f32.mrb[20].mxu1 }
 0x715   : > { %v2624_v29 = vadd.f32 %v7800_v27, %v2622_v24  ;;  %v2709_v32 = vadd.f32 %v6303_v55, %v7795_v26  ;;  %v2703_v19 = vpop.f32.mrb[21].mxu1 }
 0x716   : > { %v2623_v4 = vadd.f32 %v7800_v27, %v2621_v58  ;;  %v2704_v21 = vadd.f32 %v7795_v26, %v2703_v19  ;;  %v8750_v19 = vld [vmem:[#allocation7_spill] sm:$0xff] }
 0x717   : > { %v2713_v22 = vadd.f32 %v2709_v32, %v2624_v29 }
 0x718   : > { %v2712_v25 = vadd.f32 %v2704_v21, %v2623_v4  ;;  %v7102_v4 = vunpack.i.h.bf16 %v8750_v19  ;;  %v7101_v21 = vunpack.i.l.bf16 %v8750_v19 }
 0x719   : > { %v2715_v37 = vmax.f32 %v2713_v22, 0.0 }
 0x71a   : > { %v2714_v17 = vmax.f32 %v2712_v25, 0.0 }
 0x71b   : > { %2720 = vrot.lane.b32.xlu0 %v2715_v37, %s8748_s7  ;;  %v6743_v37 = vpack.c.bf16 %v7102_v4, %v7101_v21 }
 0x71c   : > { %2718 = vrot.lane.b32.xlu1 %v2714_v17, %s8748_s7  ;;  %v8751_v17 = vld [vmem:[#allocation8_spill] sm:$0xff] }
 0x726   : > { %v6324_v39 = vpop.f32.mrb[22].mxu1 }
 0x727   : > { %v2850_v42 = vadd.f32 %v6324_v39, %v5678_v44  ;;  %v2844_v43 = vpop.f32.mrb[23].mxu1  ;;  %v7106_v39 = vunpack.i.l.bf16 %v8751_v17 }
 0x728   : > { %v2845_v48 = vadd.f32 %v5678_v44, %v2844_v43  ;;  %v7107_v44 = vunpack.i.h.bf16 %v8751_v17  ;;  %v8753_v43 = vld [vmem:[#allocation11_spill] sm:$0xff] }
 0x729   : > { %v2854_v49 = vmax.f32 %v2850_v42, 0.0 }
 0x72a   : > { %v2853_v46 = vmax.f32 %v2845_v48, 0.0  ;;  %v6747_v42 = vpack.c.bf16 %v7107_v44, %v7106_v39  ;;  %v7112_v48 = vunpack.i.h.bf16 %v8753_v43  ;;  %v8759_v39 = vld [vmem:[#allocation15_spill] sm:$0xff] }
 0x72c   : > { %6327 = vmatprep.mubr.msk.f32.mxu0 %vm339_vm3, %v2853_v46  ;;  %v7111_v46 = vunpack.i.l.bf16 %v8753_v43 }
 0x72d   : > { %6328 = vmatmul.mubr.msk.f32.vlgmr.msra.gmra.mrb[26].mxu0 %vm339_vm3, %v2854_v49  ;;  %v7116_v49 = vunpack.i.l.bf16 %v8755_v8  ;;  %v7136_v8 = vunpack.i.l.bf16 %v7926_v35 }
 0x72e   : > { %6331 = vmatpush3.msk.msra.mxu0 %vm254_vm0, %v8049_v23  ;;  %6332 = vmatprep.mubr.msk.f32.mxu0 %vm433_vm2, %v7876_v0  ;;  %v6739_v0 = vpack.c.bf16 %v7097_v54, %v7096_v9  ;;  %v6751_v61 = vpack.c.bf16 %v7112_v48, %v7111_v46  ;;  %v8761_v48 = vld [vmem:[#allocation14_spill] sm:$0xff] }
 0x72f   : > { %6728 = vmatprep.subr.bf16.mxu0 %v6727_v47  ;;  %v6755_v34 = vpack.c.bf16 %v7117_v6, %v7116_v49  ;;  %v8762_v49 = vld [vmem:[#allocation18_spill] sm:$0xff] }
 0x731   : > { %6333 = vmatmul.mubr.msk.f32.vlgmr.msra.gmra.mrb[28].mxu0 %vm433_vm2, %v7874_v63 }
 0x732   : > { %6730 = vmatpush3.bf16.msra.mxu0 %v6727_v47  ;;  %6353 = vmatprep.mubr.msk.f32.mxu0 %vm247_vm1, %v8060_v14  ;;  %v8754_v47 = vld [vmem:[#allocation9_spill] sm:$0xff] }
 0x733   : > { %6732 = vmatprep.subr.bf16.mxu0 %v6731_v50 }
 0x736   : > { %6734 = vmatpush3.bf16.msra.mxu0 %v6731_v50  ;;  %v8756_v50 = vld [vmem:[#allocation13_spill] sm:$0xff] }
 0x737   : > { %6736 = vmatprep.subr.bf16.mxu0 %v6735_v2 }
 0x73a   : > { %6738 = vmatpush3.bf16.msra.mxu0 %v6735_v2 }
 0x73b   : > { %6740 = vmatprep.subr.bf16.mxu0 %v6739_v0 }
 0x73e   : > { %6742 = vmatpush3.bf16.msra.mxu0 %v6739_v0  ;;  %v8294_v0 = vld [vmem:[%s8669_s4 + $0x11] ss:$0 sm:$0xff] }
 0x73f   : > { %6351 = vmatprep.subr.msk.mxu0 %vm254_vm0, %v8749_v1 }
 0x742   : > { %6352 = vmatpush3.msk.msra.mxu0 %vm254_vm0, %v8749_v1 }
 0x743   : > { %6354 = vmatmul.mubr.msk.f32.vlgmr.msra.gmra.mrb[30].mxu0 %vm247_vm1, %v8071_v31  ;;  %6387 = vmatprep.subr.mxu0 %v8078_v59 }
 0x744   : > { %6388 = vmatpush3.msra.mxu0 %v8078_v59 }
 0x745   : > { %6392 = vmatprep.subr.msk.mxu0 %vm254_vm0, %v8049_v23 }
 0x78d   : > { %v2721_v63 = vpop.permute.xlu0 %2720 }
 0x78e   : > { %2726 = vst.msk [vmem:[%s7820_s9 + $0x10] sm:$0xff] %vm2724_vm10, %v2721_v63  ;;  %v2719_v7 = vpop.permute.xlu1 %2718 }
 0x78f   : > { %2725 = vst.msk [vmem:[%s7820_s9] sm:$0xff] %vm2724_vm10, %v2719_v7 }
 0x800   : > { %v6329_v28 = vpop.f32.mrb[26].mxu0 }
 0x801   : > { %v2933_v41 = vadd.f32 %v6329_v28, %v7783_v18  ;;  %v2927_v12 = vpop.f32.mrb[27].mxu0 }
 0x802   : > { %v2928_v52 = vadd.f32 %v7783_v18, %v2927_v12  ;;  %v5687_v18 = vld [vmem:[%s8669_s4 + $0x9] ss:$0 sm:$0xff] }
 0x803   : > { %v2937_v51 = vmax.f32 %v2933_v41, 0.0 }
 0x804   : > { %v2936_v56 = vmax.f32 %v2928_v52, 0.0  ;;  %v6334_v57 = vpop.f32.mrb[28].mxu0  ;;  %v8301_v52 = vld [vmem:[%s8669_s4 + $0x13] ss:$0 sm:$0xff] }
 0x805   : > { %v2939_v60 = vadd.f32 %v7800_v27, %v2937_v51  ;;  %v3024_v13 = vadd.f32 %v6334_v57, %v7795_v26  ;;  %v3018_v53 = vpop.f32.mrb[29].mxu0 }
 0x806   : > { %v2938_v3 = vadd.f32 %v7800_v27, %v2936_v56  ;;  %v3019_v62 = vadd.f32 %v7795_v26, %v3018_v53  ;;  %v8307_v56 = vld [vmem:[%s8669_s4 + $0x14] ss:$0 sm:$0xff] }
 0x807   : > { %v3028_v24 = vadd.f32 %v3024_v13, %v2939_v60 }
 0x808   : > { %v3027_v58 = vadd.f32 %v3019_v62, %v2938_v3 }
 0x809   : > { %v3030_v55 = vmax.f32 %v3028_v24, 0.0 }
 0x80a   : > { %v3029_v29 = vmax.f32 %v3027_v58, 0.0 }
 0x80b   : > { %3035 = vrot.lane.b32.xlu0 %v3030_v55, %s7304_s26  ;;  %v5696_v55 = vld [vmem:[%s8669_s4 + $0xa] ss:$0 sm:$0xff] }
 0x80c   : > { %3033 = vrot.lane.b32.xlu1 %v3029_v29, %s7304_s26 }
 0x816   : > { %v6355_v32 = vpop.f32.mrb[30].mxu0 }
 0x817   : > { %v3165_v27 = vadd.f32 %v6355_v32, %v5687_v18  ;;  %v3159_v22 = vpop.f32.mrb[31].mxu0 }
 0x818   : > { %v3160_v26 = vadd.f32 %v5687_v18, %v3159_v22  ;;  %v8757_v18 = vld [vmem:[#allocation12_spill] sm:$0xff] }
 0x819   : > { %v3169_v20 = vmax.f32 %v3165_v27, 0.0  ;;  %v7122_v32 = vunpack.i.h.bf16 %v8757_v18  ;;  %v7121_v19 = vunpack.i.l.bf16 %v8757_v18 }
 0x81a   : > { %v3168_v25 = vmax.f32 %v3160_v26, 0.0 }
 0x81b   : > { %v6759_v26 = vpack.c.bf16 %v7122_v32, %v7121_v19 }
 0x81c   : > { %6358 = vmatprep.mubr.msk.f32.mxu1 %vm339_vm3, %v3168_v25  ;;  %v8758_v25 = vld [vmem:[#allocation17_spill] sm:$0xff] }
 0x81d   : > { %6359 = vmatmul.mubr.msk.f32.vlgmr.msra.gmra.mrb[24].mxu1 %vm339_vm3, %v3169_v20  ;;  %v7126_v17 = vunpack.i.l.bf16 %v8758_v25  ;;  %v8760_v20 = vld [vmem:[#allocation16_spill] sm:$0xff] }
 0x81e   : > { %6362 = vmatpush3.msk.msra.mxu1 %vm254_vm0, %v8049_v23  ;;  %6363 = vmatprep.mubr.msk.f32.mxu1 %vm433_vm2, %v8752_v45  ;;  %v7132_v45 = vunpack.i.h.bf16 %v8760_v20 }
 0x81f   : > { %6744 = vmatprep.subr.bf16.mxu1 %v6743_v37 }
 0x821   : > { %6364 = vmatmul.mubr.msk.f32.vlgmr.msra.gmra.mrb[26].mxu1 %vm433_vm2, %v8754_v47  ;;  %v7137_v47 = vunpack.i.h.bf16 %v7926_v35 }
 0x822   : > { %6746 = vmatpush3.bf16.msra.mxu1 %v6743_v37  ;;  %6384 = vmatprep.mubr.msk.f32.mxu1 %vm247_vm1, %v8060_v14  ;;  %v7127_v37 = vunpack.i.h.bf16 %v8758_v25  ;;  %v8766_v25 = vld [vmem:[#allocation19_spill] sm:$0xff] }
 0x823   : > { %6748 = vmatprep.subr.bf16.mxu1 %v6747_v42  ;;  %v6771_v6 = vpack.c.bf16 %v7137_v47, %v7136_v8 }
 0x824   : > { %v6763_v43 = vpack.c.bf16 %v7127_v37, %v7126_v17  ;;  %v7152_v17 = vunpack.i.h.bf16 %v7945_v38 }
 0x826   : > { %6750 = vmatpush3.bf16.msra.mxu1 %v6747_v42  ;;  %v7131_v42 = vunpack.i.l.bf16 %v8760_v20  ;;  %v7157_v20 = vunpack.i.h.bf16 %v7943_v40 }
 0x827   : > { %6752 = vmatprep.subr.bf16.mxu1 %v6751_v61 }
 0x828   : > { %v6767_v46 = vpack.c.bf16 %v7132_v45, %v7131_v42  ;;  %v7156_v45 = vunpack.i.l.bf16 %v7943_v40 }
 0x82a   : > { %6754 = vmatpush3.bf16.msra.mxu1 %v6751_v61 }
 0x82b   : > { %6756 = vmatprep.subr.bf16.mxu1 %v6755_v34 }
 0x82e   : > { %6758 = vmatpush3.bf16.msra.mxu1 %v6755_v34 }
 0x82f   : > { %6382 = vmatprep.subr.msk.mxu1 %vm254_vm0, %v8756_v50 }
 0x832   : > { %6383 = vmatpush3.msk.msra.mxu1 %vm254_vm0, %v8756_v50 }
 0x833   : > { %6385 = vmatmul.mubr.msk.f32.vlgmr.msra.gmra.mrb[28].mxu1 %vm247_vm1, %v8071_v31  ;;  %6418 = vmatprep.subr.mxu1 %v8078_v59 }
 0x834   : > { %6419 = vmatpush3.msra.mxu1 %v8078_v59 }
 0x835   : > { %6423 = vmatprep.subr.msk.mxu1 %vm254_vm0, %v8049_v23 }
 0x87d   : > { %v3036_v2 = vpop.permute.xlu0 %3035 }
 0x87e   : > { %3041 = vst.msk [vmem:[%s7820_s9 + $0x10] sm:$0xff] %vm3039_vm11, %v3036_v2  ;;  %v3034_v54 = vpop.permute.xlu1 %3033 }
 0x87f   : > { %3040 = vst.msk [vmem:[%s7820_s9] sm:$0xff] %vm3039_vm11, %v3034_v54 }
 0x8f0   : > { %v6360_v9 = vpop.f32.mrb[24].mxu1 }
 0x8f1   : > { %v3248_v1 = vadd.f32 %v8294_v0, %v6360_v9  ;;  %v3242_v63 = vpop.f32.mrb[25].mxu1 }
 0x8f2   : > { %v3243_v7 = vadd.f32 %v8294_v0, %v3242_v63 }
 0x8f3   : > { %v3252_v28 = vmax.f32 %v3248_v1, 0.0 }
 0x8f4   : > { %v3251_v41 = vmax.f32 %v3243_v7, 0.0  ;;  %v6365_v12 = vpop.f32.mrb[26].mxu1 }
 0x8f5   : > { %v3254_v51 = vadd.f32 %v8301_v52, %v3252_v28  ;;  %v3339_v57 = vadd.f32 %v8307_v56, %v6365_v12  ;;  %v3333_v60 = vpop.f32.mrb[27].mxu1 }
 0x8f6   : > { %v3253_v13 = vadd.f32 %v8301_v52, %v3251_v41  ;;  %v3334_v53 = vadd.f32 %v8307_v56, %v3333_v60 }
 0x8f7   : > { %v3343_v3 = vadd.f32 %v3339_v57, %v3254_v51 }
 0x8f8   : > { %v3342_v62 = vadd.f32 %v3334_v53, %v3253_v13 }
 0x8f9   : > { %v3345_v24 = vmax.f32 %v3343_v3, 0.0  ;;  %v5705_v3 = vld [vmem:[%s8669_s4 + $0xb] ss:$0 sm:$0xff] }
 0x8fa   : > { %v3344_v58 = vmax.f32 %v3342_v62, 0.0 }
 0x8fb   : > { %3350 = vrot.lane.b32.xlu0 %v3345_v24, %s7302_s11  ;;  %v8764_v24 = vld [vmem:[#allocation20_spill] sm:$0xff] }
 0x8fc   : > { %3348 = vrot.lane.b32.xlu1 %v3344_v58, %s7302_s11  ;;  %s8763_s11 = smov 80   ;;  %v7142_v58 = vunpack.i.h.bf16 %v8764_v24 }
 0x906   : > { %v6386_v29 = vpop.f32.mrb[28].mxu1 }
 0x907   : > { %v3480_v4 = vadd.f32 %v6386_v29, %v5696_v55  ;;  %v3474_v21 = vpop.f32.mrb[29].mxu1 }
 0x908   : > { %v3475_v27 = vadd.f32 %v5696_v55, %v3474_v21  ;;  %v7141_v55 = vunpack.i.l.bf16 %v8764_v24  ;;  %v8765_v21 = vld [vmem:[#allocation21_spill] sm:$0xff] }
 0x909   : > { %v3484_v44 = vmax.f32 %v3480_v4, 0.0 }
 0x90a   : > { %v3483_v22 = vmax.f32 %v3475_v27, 0.0  ;;  %v6775_v4 = vpack.c.bf16 %v7142_v58, %v7141_v55  ;;  %v7147_v27 = vunpack.i.h.bf16 %v8765_v21  ;;  %v7171_v58 = vunpack.i.l.bf16 %v7971_v11 }
 0x90c   : > { %6389 = vmatprep.mubr.msk.f32.mxu0 %vm339_vm3, %v3483_v22  ;;  %v7146_v22 = vunpack.i.l.bf16 %v8765_v21 }
 0x90d   : > { %6390 = vmatmul.mubr.msk.f32.vlgmr.msra.gmra.mrb[32].mxu0 %vm339_vm3, %v3484_v44  ;;  %v7151_v44 = vunpack.i.l.bf16 %v7945_v38 }
 0x90e   : > { %6393 = vmatpush3.msk.msra.mxu0 %vm254_vm0, %v8049_v23  ;;  %6394 = vmatprep.mubr.msk.f32.mxu0 %vm433_vm2, %v8759_v39  ;;  %v6779_v37 = vpack.c.bf16 %v7147_v27, %v7146_v22  ;;  %v8767_v39 = vld [vmem:[#allocation22_spill] sm:$0xff] }
 0x90f   : > { %6760 = vmatprep.subr.bf16.mxu0 %v6759_v26  ;;  %v6783_v42 = vpack.c.bf16 %v7152_v17, %v7151_v44 }
 0x911   : > { %6395 = vmatmul.mubr.msk.f32.vlgmr.msra.gmra.mrb[34].mxu0 %vm433_vm2, %v8761_v48 }
 0x912   : > { %6762 = vmatpush3.bf16.msra.mxu0 %v6759_v26  ;;  %6415 = vmatprep.mubr.msk.f32.mxu0 %vm247_vm1, %v8060_v14 }
 0x913   : > { %6764 = vmatprep.subr.bf16.mxu0 %v6763_v43 }
 0x916   : > { %6766 = vmatpush3.bf16.msra.mxu0 %v6763_v43  ;;  %v6787_v43 = vpack.c.bf16 %v7157_v20, %v7156_v45  ;;  %v8770_v45 = vld [vmem:[#allocation24_spill] sm:$0xff] }
 0x917   : > { %6768 = vmatprep.subr.bf16.mxu0 %v6767_v46 }
 0x91a   : > { %6770 = vmatpush3.bf16.msra.mxu0 %v6767_v46 }
 0x91b   : > { %6772 = vmatprep.subr.bf16.mxu0 %v6771_v6 }
 0x91e   : > { %6774 = vmatpush3.bf16.msra.mxu0 %v6771_v6 }
 0x91f   : > { %6413 = vmatprep.subr.msk.mxu0 %vm254_vm0, %v8762_v49 }
 0x922   : > { %6414 = vmatpush3.msk.msra.mxu0 %vm254_vm0, %v8762_v49 }
 0x923   : > { %6416 = vmatmul.mubr.msk.f32.vlgmr.msra.gmra.mrb[36].mxu0 %vm247_vm1, %v8071_v31  ;;  %6449 = vmatprep.subr.mxu0 %v8078_v59 }
 0x924   : > { %6450 = vmatpush3.msra.mxu0 %v8078_v59 }
 0x925   : > { %6454 = vmatprep.subr.msk.mxu0 %vm254_vm0, %v8049_v23 }
 0x96d   : > { %v3351_v35 = vpop.permute.xlu0 %3350 }
 0x96e   : > { %3356 = vst.msk [vmem:[%s7820_s9 + $0x10] sm:$0xff] %vm3354_vm12, %v3351_v35  ;;  %v3349_v61 = vpop.permute.xlu1 %3348 }
 0x96f   : > { %3355 = vst.msk [vmem:[%s7820_s9] sm:$0xff] %vm3354_vm12, %v3349_v61 }
 0x9e0   : > { %v6391_v34 = vpop.f32.mrb[32].mxu0 }
 0x9e1   : > { %v3563_v50 = vadd.f32 %v8294_v0, %v6391_v34  ;;  %v3557_v2 = vpop.f32.mrb[33].mxu0 }
 0x9e2   : > { %v3558_v54 = vadd.f32 %v8294_v0, %v3557_v2 }
 0x9e3   : > { %v3567_v9 = vmax.f32 %v3563_v50, 0.0 }
 0x9e4   : > { %v3566_v1 = vmax.f32 %v3558_v54, 0.0  ;;  %v6396_v63 = vpop.f32.mrb[34].mxu0 }
 0x9e5   : > { %v3569_v7 = vadd.f32 %v8301_v52, %v3567_v9  ;;  %v3654_v28 = vadd.f32 %v8307_v56, %v6396_v63  ;;  %v3648_v41 = vpop.f32.mrb[35].mxu0 }
 0x9e6   : > { %v3568_v12 = vadd.f32 %v8301_v52, %v3566_v1  ;;  %v3649_v51 = vadd.f32 %v8307_v56, %v3648_v41  ;;  %v7162_v41 = vunpack.i.h.bf16 %v7951_v33 }
 0x9e7   : > { %v3658_v57 = vadd.f32 %v3654_v28, %v3569_v7  ;;  %v5714_v7 = vld [vmem:[%s8669_s4 + $0xc] ss:$0 sm:$0xff] }
 0x9e8   : > { %v3657_v60 = vadd.f32 %v3649_v51, %v3568_v12  ;;  %v7161_v12 = vunpack.i.l.bf16 %v7951_v33  ;;  %v7172_v33 = vunpack.i.h.bf16 %v7971_v11 }
 0x9e9   : > { %v3660_v13 = vmax.f32 %v3658_v57, 0.0 }
 0x9ea   : > { %v3659_v53 = vmax.f32 %v3657_v60, 0.0 }
 0x9eb   : > { %3665 = vrot.lane.b32.xlu0 %v3660_v13, %s8763_s11 }
 0x9ec   : > { %3663 = vrot.lane.b32.xlu1 %v3659_v53, %s8763_s11  ;;  %v6791_v53 = vpack.c.bf16 %v7162_v41, %v7161_v12  ;;  %v8776_v12 = vld [vmem:[#allocation30_spill] sm:$0xff] }
 0x9f6   : > { %v6417_v62 = vpop.f32.mrb[36].mxu0 }
 0x9f7   : > { %v3795_v29 = vadd.f32 %v6417_v62, %v5705_v3  ;;  %v3789_v18 = vpop.f32.mrb[37].mxu0  ;;  %v7166_v62 = vunpack.i.l.bf16 %v7973_v10 }
 0x9f8   : > { %v3790_v32 = vadd.f32 %v5705_v3, %v3789_v18  ;;  %v7167_v3 = vunpack.i.h.bf16 %v7973_v10  ;;  %v6799_v10 = vpack.c.bf16 %v7172_v33, %v7171_v58 }
 0x9f9   : > { %v3799_v26 = vmax.f32 %v3795_v29, 0.0  ;;  %v7177_v29 = vunpack.i.h.bf16 %v7979_v15 }
 0x9fa   : > { %v3798_v19 = vmax.f32 %v3790_v32, 0.0  ;;  %v6795_v55 = vpack.c.bf16 %v7167_v3, %v7166_v62 }
 0x9fc   : > { %6420 = vmatprep.mubr.msk.f32.mxu1 %vm339_vm3, %v3798_v19 }
 0x9fd   : > { %6421 = vmatmul.mubr.msk.f32.vlgmr.msra.gmra.mrb[30].mxu1 %vm339_vm3, %v3799_v26 }
 0x9fe   : > { %6424 = vmatpush3.msk.msra.mxu1 %vm254_vm0, %v8049_v23  ;;  %6425 = vmatprep.mubr.msk.f32.mxu1 %vm433_vm2, %v8766_v25 }
 0x9ff   : > { %6776 = vmatprep.subr.bf16.mxu1 %v6775_v4 }
 0xa01   : > { %6426 = vmatmul.mubr.msk.f32.vlgmr.msra.gmra.mrb[32].mxu1 %vm433_vm2, %v8767_v39  ;;  %v5723_v39 = vld [vmem:[%s8669_s4 + $0xd] ss:$0 sm:$0xff] }
 0xa02   : > { %6778 = vmatpush3.bf16.msra.mxu1 %v6775_v4  ;;  %6446 = vmatprep.mubr.msk.f32.mxu1 %vm247_vm1, %v8060_v14 }
 0xa03   : > { %6780 = vmatprep.subr.bf16.mxu1 %v6779_v37 }
 0xa06   : > { %6782 = vmatpush3.bf16.msra.mxu1 %v6779_v37 }
 0xa07   : > { %6784 = vmatprep.subr.bf16.mxu1 %v6783_v42 }
 0xa0a   : > { %6786 = vmatpush3.bf16.msra.mxu1 %v6783_v42  ;;  %v7182_v42 = vunpack.i.h.bf16 %v8770_v45 }
 0xa0b   : > { %6788 = vmatprep.subr.bf16.mxu1 %v6787_v43 }
 0xa0e   : > { %6790 = vmatpush3.bf16.msra.mxu1 %v6787_v43  ;;  %v7181_v43 = vunpack.i.l.bf16 %v8770_v45  ;;  %v8781_v45 = vld [vmem:[#allocation33_spill] sm:$0xff] }
 0xa0f   : > { %6444 = vmatprep.subr.msk.mxu1 %vm254_vm0, %v7957_v5 }
 0xa12   : > { %6445 = vmatpush3.msk.msra.mxu1 %vm254_vm0, %v7957_v5 }
 0xa13   : > { %6447 = vmatmul.mubr.msk.f32.vlgmr.msra.gmra.mrb[34].mxu1 %vm247_vm1, %v8071_v31  ;;  %6480 = vmatprep.subr.mxu1 %v8078_v59 }
 0xa14   : > { %6481 = vmatpush3.msra.mxu1 %v8078_v59 }
 0xa15   : > { %6485 = vmatprep.subr.msk.mxu1 %vm254_vm0, %v8049_v23 }
 0xa5d   : > { %v3666_v40 = vpop.permute.xlu0 %3665 }
 0xa5e   : > { %3671 = vst.msk [vmem:[%s7820_s9 + $0x10] sm:$0xff] %vm3669_vm13, %v3666_v40  ;;  %v3664_v38 = vpop.permute.xlu1 %3663 }
 0xa5f   : > { %3670 = vst.msk [vmem:[%s7820_s9] sm:$0xff] %vm3669_vm13, %v3664_v38 }
 0xad0   : > { %v6422_v48 = vpop.f32.mrb[30].mxu1 }
 0xad1   : > { %v3878_v46 = vadd.f32 %v8294_v0, %v6422_v48  ;;  %v3872_v47 = vpop.f32.mrb[31].mxu1 }
 0xad2   : > { %v3873_v5 = vadd.f32 %v8294_v0, %v3872_v47  ;;  %v6807_v47 = vpack.c.bf16 %v7182_v42, %v7181_v43  ;;  %v7212_v42 = vunpack.i.h.bf16 %v8781_v45  ;;  %v7211_v43 = vunpack.i.l.bf16 %v8781_v45 }
 0xad3   : > { %v3882_v8 = vmax.f32 %v3878_v46, 0.0 }
 0xad4   : > { %v3881_v6 = vmax.f32 %v3873_v5, 0.0  ;;  %v6427_v49 = vpop.f32.mrb[32].mxu1  ;;  %v8771_v5 = vld [vmem:[#allocation25_spill] sm:$0xff] }
 0xad5   : > { %v3884_v35 = vadd.f32 %v8301_v52, %v3882_v8  ;;  %v3969_v61 = vadd.f32 %v8307_v56, %v6427_v49  ;;  %v3963_v34 = vpop.f32.mrb[33].mxu1  ;;  %v7187_v8 = vunpack.i.h.bf16 %v8771_v5 }
 0xad6   : > { %v3883_v50 = vadd.f32 %v8301_v52, %v3881_v6  ;;  %v3964_v2 = vadd.f32 %v8307_v56, %v3963_v34  ;;  %v7186_v6 = vunpack.i.l.bf16 %v8771_v5  ;;  %v8773_v34 = vld [vmem:[#allocation28_spill] sm:$0xff] }
 0xad7   : > { %v3973_v54 = vadd.f32 %v3969_v61, %v3884_v35  ;;  %v8772_v35 = vld [vmem:[#allocation23_spill] sm:$0xff] }
 0xad8   : > { %v3972_v9 = vadd.f32 %v3964_v2, %v3883_v50  ;;  %v6811_v61 = vpack.c.bf16 %v7187_v8, %v7186_v6  ;;  %v7192_v50 = vunpack.i.h.bf16 %v8773_v34  ;;  %v7191_v2 = vunpack.i.l.bf16 %v8773_v34  ;;  %v8784_v6 = vld [vmem:[#allocation35_spill] sm:$0xff] }
 0xad9   : > { %v3975_v1 = vmax.f32 %v3973_v54, 0.0  ;;  %v8774_v54 = vld [vmem:[#allocation26_spill] sm:$0xff] }
 0xada   : > { %v3974_v63 = vmax.f32 %v3972_v9, 0.0  ;;  %v8460_v9 = vld [vmem:[%s7443_s13] sm:$0xff] }
 0xadb   : > { %3980 = vrot.lane.b32.xlu0 %v3975_v1, %s8768_s12  ;;  %v8775_v1 = vld [vmem:[#allocation27_spill] sm:$0xff] }
 0xadc   : > { %3978 = vrot.lane.b32.xlu1 %v3974_v63, %s8768_s12  ;;  %v7197_v63 = vunpack.i.h.bf16 %v8775_v1  ;;  %s8785_s12 = smov 112  }
 0xae6   : > { %v6448_v28 = vpop.f32.mrb[34].mxu1 }
 0xae7   : > { %v4110_v51 = vadd.f32 %v6448_v28, %v5714_v7  ;;  %v4104_v57 = vpop.f32.mrb[35].mxu1  ;;  %v6815_v28 = vpack.c.bf16 %v7192_v50, %v7191_v2 }
 0xae8   : > { %v4105_v60 = vadd.f32 %v5714_v7, %v4104_v57  ;;  %v7196_v7 = vunpack.i.l.bf16 %v8775_v1  ;;  %v8478_v57 = vld [vmem:[%s8667_s2] sm:$0xff] }
 0xae9   : > { %v4114_v24 = vmax.f32 %v4110_v51, 0.0  ;;  %v8471_v51 = vld [vmem:[%s7443_s13 + $0x8] sm:$0xff]  ;;  %s8777_s13 = smov 104  }
 0xaea   : > { %v4113_v13 = vmax.f32 %v4105_v60, 0.0  ;;  %v6819_v41 = vpack.c.bf16 %v7197_v63, %v7196_v7 }
 0xaec   : > { %6451 = vmatprep.mubr.msk.f32.mxu0 %vm339_vm3, %v4113_v13 }
 0xaed   : > { %6452 = vmatmul.mubr.msk.f32.vlgmr.msra.gmra.mrb[38].mxu0 %vm339_vm3, %v4114_v24 }
 0xaee   : > { %6455 = vmatpush3.msk.msra.mxu0 %vm254_vm0, %v8049_v23  ;;  %6456 = vmatprep.mubr.msk.f32.mxu0 %vm433_vm2, %v7969_v30  ;;  %v7176_v23 = vunpack.i.l.bf16 %v7979_v15 }
 0xaef   : > { %6792 = vmatprep.subr.bf16.mxu0 %v6791_v53 }
 0xaf0   : > { %v6803_v30 = vpack.c.bf16 %v7177_v29, %v7176_v23 }
 0xaf1   : > { %6457 = vmatmul.mubr.msk.f32.vlgmr.msra.gmra.mrb[40].mxu0 %vm433_vm2, %v7967_v36  ;;  %v8428_v36 = vld [vmem:[%s8668_s3] sm:$0xf] }
 0xaf2   : > { %6794 = vmatpush3.bf16.msra.mxu0 %v6791_v53  ;;  %6477 = vmatprep.mubr.msk.f32.mxu0 %vm247_vm1, %v8060_v14 }
 0xaf3   : > { %6796 = vmatprep.subr.bf16.mxu0 %v6795_v55 }
 0xaf6   : > { %6798 = vmatpush3.bf16.msra.mxu0 %v6795_v55 }
 0xaf7   : > { %6800 = vmatprep.subr.bf16.mxu0 %v6799_v10 }
 0xafa   : > { %6802 = vmatpush3.bf16.msra.mxu0 %v6799_v10 }
 0xafb   : > { %6804 = vmatprep.subr.bf16.mxu0 %v6803_v30 }
 0xafe   : > { %6806 = vmatpush3.bf16.msra.mxu0 %v6803_v30 }
 0xaff   : > { %6475 = vmatprep.subr.msk.mxu0 %vm254_vm0, %v7977_v16 }
 0xb02   : > { %6476 = vmatpush3.msk.msra.mxu0 %vm254_vm0, %v7977_v16 }
 0xb03   : > { %6478 = vmatmul.mubr.msk.f32.vlgmr.msra.gmra.mrb[42].mxu0 %vm247_vm1, %v8071_v31  ;;  %6511 = vmatprep.subr.mxu0 %v8078_v59 }
 0xb04   : > { %6512 = vmatpush3.msra.mxu0 %v8078_v59 }
 0xb05   : > { %6516 = vmatprep.subr.msk.mxu0 %vm254_vm0, %v8428_v36 }
 0xb4d   : > { %v3981_v11 = vpop.permute.xlu0 %3980 }
 0xb4e   : > { %3986 = vst.msk [vmem:[%s7820_s9 + $0x10] sm:$0xff] %vm3984_vm14, %v3981_v11  ;;  %v3979_v15 = vpop.permute.xlu1 %3978 }
 0xb4f   : > { %3985 = vst.msk [vmem:[%s7820_s9] sm:$0xff] %vm3984_vm14, %v3979_v15 }
 0xbc0   : > { %v6453_v16 = vpop.f32.mrb[38].mxu0 }
 0xbc1   : > { %v4193_v14 = vadd.f32 %v8294_v0, %v6453_v16  ;;  %v4187_v31 = vpop.f32.mrb[39].mxu0 }
 0xbc2   : > { %v4188_v18 = vadd.f32 %v8294_v0, %v4187_v31 }
 0xbc3   : > { %v4197_v59 = vmax.f32 %v4193_v14, 0.0 }
 0xbc4   : > { %v4196_v32 = vmax.f32 %v4188_v18, 0.0  ;;  %v6458_v19 = vpop.f32.mrb[40].mxu0  ;;  %v5732_v18 = vld [vmem:[%s8669_s4 + $0xe] ss:$0 sm:$0xff] }
 0xbc5   : > { %v4199_v4 = vadd.f32 %v8301_v52, %v4197_v59  ;;  %v4284_v21 = vadd.f32 %v8307_v56, %v6458_v19  ;;  %v4278_v27 = vpop.f32.mrb[41].mxu0 }
 0xbc6   : > { %v4198_v22 = vadd.f32 %v8301_v52, %v4196_v32  ;;  %v4279_v26 = vadd.f32 %v8307_v56, %v4278_v27  ;;  %v8778_v32 = vld [vmem:[#allocation29_spill] sm:$0xff] }
 0xbc7   : > { %v4288_v25 = vadd.f32 %v4284_v21, %v4199_v4  ;;  %v7202_v19 = vunpack.i.h.bf16 %v8778_v32  ;;  %v7201_v4 = vunpack.i.l.bf16 %v8778_v32  ;;  %v8787_v32 = vld [vmem:[#allocation37_spill] sm:$0xff] }
 0xbc8   : > { %v4287_v37 = vadd.f32 %v4279_v26, %v4198_v22 }
 0xbc9   : > { %v4290_v17 = vmax.f32 %v4288_v25, 0.0  ;;  %v6823_v25 = vpack.c.bf16 %v7202_v19, %v7201_v4  ;;  %v5253_v4 = vld [vmem:[%s8666_s1 + $0x68] sm:$0xff] }
 0xbca   : > { %v4289_v44 = vmax.f32 %v4287_v37, 0.0  ;;  %v8779_v37 = vld [vmem:[#allocation34_spill] sm:$0xff] }
 0xbcb   : > { %4295 = vrot.lane.b32.xlu0 %v4290_v17, %s8769_s10  ;;  %v7207_v17 = vunpack.i.h.bf16 %v8779_v37 }
 0xbcc   : > { %4293 = vrot.lane.b32.xlu1 %v4289_v44, %s8769_s10  ;;  %v7206_v44 = vunpack.i.l.bf16 %v8779_v37  ;;  %s7233_s10 = sshll.u32 %s7316_s30, 4  ;;  %s7234_s10 = int_to_ptr.vmem [resolvable:$false] %s7233_s10 }
 0xbcd   : > { %s7235_s17 = scalar_lea.vmem %s7234_s10, 1024  ;;  %p7236_p0 = scmp.lt.s32.totalorder %s8615_s8, %s7234_s10 }
 0xbce   : > { %p7237_p1 = scmp.lt.s32.totalorder %s7235_s17, %s7229_s14 }
 0xbd0   : > { %p7238_p2 = por %p7237_p1, %p7236_p0 }
 0xbd2   : > { %p7239_p3 = pnand %p7238_p2, %p7232_p13 }
 0xbd6   : > { %v6479_v20 = vpop.f32.mrb[42].mxu0 }
 0xbd7   : > { %v4425_v40 = vadd.f32 %v6479_v20, %v5723_v39  ;;  %v4419_v38 = vpop.f32.mrb[43].mxu0  ;;  %v8780_v20 = vld [vmem:[#allocation32_spill] sm:$0xff] }
 0xbd8   : > { %v4420_v48 = vadd.f32 %v5723_v39, %v4419_v38  ;;  %v8782_v38 = vld [vmem:[#allocation31_spill] sm:$0xff] }
 0xbd9   : > { %v4429_v49 = vmax.f32 %v4425_v40, 0.0  ;;  %v6827_v40 = vpack.c.bf16 %v7207_v17, %v7206_v44 }
 0xbda   : > { %v4428_v46 = vmax.f32 %v4420_v48, 0.0  ;;  %v6831_v48 = vpack.c.bf16 %v7212_v42, %v7211_v43 }
 0xbdc   : > { %6482 = vmatprep.mubr.msk.f32.mxu1 %vm339_vm3, %v4428_v46  ;;  %v8783_v46 = vld [vmem:[#allocation36_spill] sm:$0xff] }
 0xbdd   : > { %6483 = vmatmul.mubr.msk.f32.vlgmr.msra.gmra.mrb[36].mxu1 %vm339_vm3, %v4429_v49  ;;  %v7216_v5 = vunpack.i.l.bf16 %v8783_v46 }
 0xbde   : > { %6486 = vmatpush3.msk.msra.mxu1 %vm254_vm0, %v8428_v36  ;;  %6487 = vmatprep.mubr.msk.f32.mxu1 %vm433_vm2, %v8772_v35 }
 0xbdf   : > { %6808 = vmatprep.subr.bf16.mxu1 %v6807_v47 }
 0xbe1   : > { %6488 = vmatmul.mubr.msk.f32.vlgmr.msra.gmra.mrb[38].mxu1 %vm433_vm2, %v8774_v54 }
 0xbe2   : > { %6810 = vmatpush3.bf16.msra.mxu1 %v6807_v47  ;;  %6508 = vmatprep.mubr.msk.f32.mxu1 %vm247_vm1, %v8460_v9  ;;  %v7217_v47 = vunpack.i.h.bf16 %v8783_v46 }
 0xbe3   : > { %6812 = vmatprep.subr.bf16.mxu1 %v6811_v61 }
 0xbe4   : > { %v6835_v8 = vpack.c.bf16 %v7217_v47, %v7216_v5 }
 0xbe6   : > { %6814 = vmatpush3.bf16.msra.mxu1 %v6811_v61 }
 0xbe7   : > { %6816 = vmatprep.subr.bf16.mxu1 %v6815_v28 }
 0xbea   : > { %6818 = vmatpush3.bf16.msra.mxu1 %v6815_v28 }
 0xbeb   : > { %6820 = vmatprep.subr.bf16.mxu1 %v6819_v41 }
 0xbee   : > { %6822 = vmatpush3.bf16.msra.mxu1 %v6819_v41 }
 0xbef   : > { %6506 = vmatprep.subr.msk.mxu1 %vm254_vm0, %v8776_v12 }
 0xbf2   : > { %6507 = vmatpush3.msk.msra.mxu1 %vm254_vm0, %v8776_v12 }
 0xbf3   : > { %6509 = vmatmul.mubr.msk.f32.vlgmr.msra.gmra.mrb[40].mxu1 %vm247_vm1, %v8471_v51  ;;  %6542 = vmatprep.subr.mxu1 %v8478_v57 }
 0xbf4   : > { %6543 = vmatpush3.msra.mxu1 %v8478_v57 }
 0xbf5   : > { %6547 = vmatprep.subr.msk.mxu1 %vm254_vm0, %v8428_v36 }
 0xc3d   : > { %v4296_v60 = vpop.permute.xlu0 %4295 }
 0xc3e   : > { %4301 = vst.msk [vmem:[%s7820_s9 + $0x10] sm:$0xff] %vm4299_vm15, %v4296_v60  ;;  %v4294_v13 = vpop.permute.xlu1 %4293 }
 0xc3f   : > { %4300 = vst.msk [vmem:[%s7820_s9] sm:$0xff] %vm4299_vm15, %v4294_v13 }
 0xcb0   : > { %v6484_v53 = vpop.f32.mrb[36].mxu1 }
 0xcb1   : > { %v4508_v3 = vadd.f32 %v8294_v0, %v6484_v53  ;;  %v4502_v62 = vpop.f32.mrb[37].mxu1 }
 0xcb2   : > { %v4503_v24 = vadd.f32 %v8294_v0, %v4502_v62  ;;  %v5741_v62 = vld [vmem:[%s8669_s4 + $0xf] ss:$0 sm:$0xff] }
 0xcb3   : > { %v4512_v33 = vmax.f32 %v4508_v3, 0.0 }
 0xcb4   : > { %v4511_v58 = vmax.f32 %v4503_v24, 0.0  ;;  %v6489_v55 = vpop.f32.mrb[38].mxu1 }
 0xcb5   : > { %v4514_v10 = vadd.f32 %v8301_v52, %v4512_v33  ;;  %v4599_v29 = vadd.f32 %v8307_v56, %v6489_v55  ;;  %v4593_v23 = vpop.f32.mrb[39].mxu1 }
 0xcb6   : > { %v4513_v30 = vadd.f32 %v8301_v52, %v4511_v58  ;;  %v4594_v11 = vadd.f32 %v8307_v56, %v4593_v23 }
 0xcb7   : > { %v4603_v15 = vadd.f32 %v4599_v29, %v4514_v10  ;;  %v5247_v10 = vld [vmem:[%s8666_s1 + $0x8] sm:$0xff]  ;;  %v5248_v29 = vld [vmem:[%s8666_s1 + $0x18] sm:$0xff] }
 0xcb8   : > { %v4602_v16 = vadd.f32 %v4594_v11, %v4513_v30  ;;  %v6839_v11 = vpack.c.bf16 %v5248_v29, %v5247_v10 }
 0xcb9   : > { %v4605_v14 = vmax.f32 %v4603_v15, 0.0  ;;  %v5249_v15 = vld [vmem:[%s8666_s1 + $0x28] sm:$0xff] }
 0xcba   : > { %v4604_v31 = vmax.f32 %v4602_v16, 0.0  ;;  %v5250_v16 = vld [vmem:[%s8666_s1 + $0x38] sm:$0xff] }
 0xcbb   : > { %4610 = vrot.lane.b32.xlu0 %v4605_v14, %s8777_s13  ;;  %v8786_v14 = vld [vmem:[#allocation38_spill] sm:$0xff] }
 0xcbc   : > { %4608 = vrot.lane.b32.xlu1 %v4604_v31, %s8777_s13  ;;  %v6843_v31 = vpack.c.bf16 %v5250_v16, %v5249_v15 }
 0xcc6   : > { %v6510_v59 = vpop.f32.mrb[40].mxu1 }
 0xcc7   : > { %v4740_v21 = vadd.f32 %v6510_v59, %v5732_v18  ;;  %v4734_v27 = vpop.f32.mrb[41].mxu1  ;;  %v5252_v59 = vld [vmem:[%s8666_s1 + $0x58] sm:$0xff] }
 0xcc8   : > { %v4735_v22 = vadd.f32 %v5732_v18, %v4734_v27  ;;  %v5251_v18 = vld [vmem:[%s8666_s1 + $0x48] sm:$0xff] }
 0xcc9   : > { %v4744_v39 = vmax.f32 %v4740_v21, 0.0  ;;  %v6847_v19 = vpack.c.bf16 %v5252_v59, %v5251_v18  ;;  %v5254_v21 = vld [vmem:[%s8666_s1 + $0x78] sm:$0xff] }
 0xcca   : > { %v4743_v26 = vmax.f32 %v4735_v22, 0.0  ;;  %v6851_v27 = vpack.c.bf16 %v5254_v21, %v5253_v4 }
 0xccc   : > { %6513 = vmatprep.mubr.msk.f32.mxu0 %vm339_vm3, %v4743_v26 }
 0xccd   : > { %6514 = vmatmul.mubr.msk.f32.vlgmr.msra.gmra.mrb[44].mxu0 %vm339_vm3, %v4744_v39 }
 0xcce   : > { %6517 = vmatpush3.msk.msra.mxu0 %vm254_vm0, %v8428_v36  ;;  %6518 = vmatprep.mubr.msk.f32.mxu0 %vm433_vm2, %v8780_v20 }
 0xccf   : > { %6824 = vmatprep.subr.bf16.mxu0 %v6823_v25 }
 0xcd1   : > { %6519 = vmatmul.mubr.msk.f32.vlgmr.msra.gmra.mrb[46].mxu0 %vm433_vm2, %v8782_v38 }
 0xcd2   : > { %6826 = vmatpush3.bf16.msra.mxu0 %v6823_v25  ;;  %6539 = vmatprep.mubr.msk.f32.mxu0 %vm247_vm1, %v8460_v9 }
 0xcd3   : > { %6828 = vmatprep.subr.bf16.mxu0 %v6827_v40 }
 0xcd6   : > { %6830 = vmatpush3.bf16.msra.mxu0 %v6827_v40 }
 0xcd7   : > { %6832 = vmatprep.subr.bf16.mxu0 %v6831_v48 }
 0xcda   : > { %6834 = vmatpush3.bf16.msra.mxu0 %v6831_v48 }
 0xcdb   : > { %6836 = vmatprep.subr.bf16.mxu0 %v6835_v8 }
 0xcde   : > { %6838 = vmatpush3.bf16.msra.mxu0 %v6835_v8  ;;  %v5750_v8 = vld [vmem:[%s8669_s4 + $0x10] ss:$0 sm:$0xff] }
 0xcdf   : > { %6537 = vmatprep.subr.msk.mxu0 %vm254_vm0, %v8784_v6 }
 0xce2   : > { %6538 = vmatpush3.msk.msra.mxu0 %vm254_vm0, %v8784_v6 }
 0xce3   : > { %6540 = vmatmul.mubr.msk.f32.vlgmr.msra.gmra.mrb[48].mxu0 %vm247_vm1, %v8471_v51  ;;  %6573 = vmatprep.subr.mxu0 %v8478_v57 }
 0xce4   : > { %6574 = vmatpush3.msra.mxu0 %v8478_v57 }
 0xce5   : > { %6578 = vmatprep.subr.msk.mxu0 %vm254_vm0, %v8428_v36 }
 0xd2d   : > { %v4611_v49 = vpop.permute.xlu0 %4610 }
 0xd2e   : > { %4616 = vst.msk [vmem:[%s7820_s9 + $0x10] sm:$0xff] %vm4614_vm4, %v4611_v49  ;;  %v4609_v35 = vpop.permute.xlu1 %4608 }
 0xd2f   : > { %4615 = vst.msk [vmem:[%s7820_s9] sm:$0xff] %vm4614_vm4, %v4609_v35 }
 0xda0   : > { %v6515_v61 = vpop.f32.mrb[44].mxu0 }
 0xda1   : > { %v4823_v34 = vadd.f32 %v8294_v0, %v6515_v61  ;;  %v4817_v50 = vpop.f32.mrb[45].mxu0 }
 0xda2   : > { %v4818_v2 = vadd.f32 %v8294_v0, %v4817_v50 }
 0xda3   : > { %v4827_v54 = vmax.f32 %v4823_v34, 0.0 }
 0xda4   : > { %v4826_v1 = vmax.f32 %v4818_v2, 0.0  ;;  %v6520_v63 = vpop.f32.mrb[46].mxu0  ;;  %v8789_v2 = vld [vmem:[#allocation40_spill] sm:$0xff] }
 0xda5   : > { %v4829_v7 = vadd.f32 %v8301_v52, %v4827_v54  ;;  %v4914_v28 = vadd.f32 %v8307_v56, %v6520_v63  ;;  %v4908_v41 = vpop.f32.mrb[47].mxu0  ;;  %v8790_v54 = vld [vmem:[#allocation39_spill] sm:$0xff] }
 0xda6   : > { %v4828_v12 = vadd.f32 %v8301_v52, %v4826_v1  ;;  %v4909_v57 = vadd.f32 %v8307_v56, %v4908_v41 }
 0xda7   : > { %v4918_v60 = vadd.f32 %v4914_v28, %v4829_v7 }
 0xda8   : > { %v4917_v13 = vadd.f32 %v4909_v57, %v4828_v12 }
 0xda9   : > { %v4920_v53 = vmax.f32 %v4918_v60, 0.0 }
 0xdaa   : > { %v4919_v3 = vmax.f32 %v4917_v13, 0.0 }
 0xdab   : > { %4925 = vrot.lane.b32.xlu0 %v4920_v53, %s8785_s12 }
 0xdac   : > { %4923 = vrot.lane.b32.xlu1 %v4919_v3, %s8785_s12 }
 0xdb6   : > { %v6541_v24 = vpop.f32.mrb[48].mxu0 }
 0xdb7   : > { %v5055_v33 = vadd.f32 %v6541_v24, %v5741_v62  ;;  %v5049_v58 = vpop.f32.mrb[49].mxu0 }
 0xdb8   : > { %v5050_v55 = vadd.f32 %v5741_v62, %v5049_v58 }
 0xdb9   : > { %v5059_v30 = vmax.f32 %v5055_v33, 0.0 }
 0xdba   : > { %v5058_v23 = vmax.f32 %v5050_v55, 0.0 }
 0xdbc   : > { %6544 = vmatprep.mubr.msk.f32.mxu1 %vm339_vm3, %v5058_v23 }
 0xdbd   : > { %6545 = vmatmul.mubr.msk.f32.vlgmr.msra.gmra.mrb[42].mxu1 %vm339_vm3, %v5059_v30 }
 0xdbe   : > { %6548 = vmatpush3.msk.msra.mxu1 %vm254_vm0, %v8428_v36  ;;  %6549 = vmatprep.mubr.msk.f32.mxu1 %vm433_vm2, %v8786_v14 }
 0xdbf   : > { %6840 = vmatprep.subr.bf16.mxu1 %v6839_v11 }
 0xdc1   : > { %6550 = vmatmul.mubr.msk.f32.vlgmr.msra.gmra.mrb[44].mxu1 %vm433_vm2, %v8787_v32 }
 0xdc2   : > { %6842 = vmatpush3.bf16.msra.mxu1 %v6839_v11  ;;  %6570 = vmatprep.mubr.msk.f32.mxu1 %vm247_vm1, %v8460_v9  ;;  %v5255_v9 = vld [vmem:[%s8666_s1 + $0x88] sm:$0xf] }
 0xdc3   : > { %6844 = vmatprep.subr.bf16.mxu1 %v6843_v31 }
 0xdc6   : > { %6846 = vmatpush3.bf16.msra.mxu1 %v6843_v31 }
 0xdc7   : > { %6848 = vmatprep.subr.bf16.mxu1 %v6847_v19 }
 0xdca   : > { %6850 = vmatpush3.bf16.msra.mxu1 %v6847_v19 }
 0xdcb   : > { %6852 = vmatprep.subr.bf16.mxu1 %v6851_v27 }
 0xdce   : > { %6854 = vmatpush3.bf16.msra.mxu1 %v6851_v27 }
 0xdcf   : > { %6568 = vmatprep.subr.msk.mxu1 %vm254_vm0, %v5255_v9 }
 0xdd2   : > { %6569 = vmatpush3.msk.msra.mxu1 %vm254_vm0, %v5255_v9 }
 0xdd3   : > { %6571 = vmatmul.mubr.msk.f32.vlgmr.msra.gmra.mrb[46].mxu1 %vm247_vm1, %v8471_v51  ;;  %vm5244_vm1 = vcmask 1048512  }
 0xe1d   : > { %v4926_v22 = vpop.permute.xlu0 %4925 }
 0xe1e   : > { %4931 = vst.msk [vmem:[%s7820_s9 + $0x10] sm:$0xff] %vm4929_vm5, %v4926_v22  ;;  %v4924_v26 = vpop.permute.xlu1 %4923 }
 0xe1f   : > { %4930 = vst.msk [vmem:[%s7820_s9] sm:$0xff] %vm4929_vm5, %v4924_v26 }
 0xe90   : > { %v6546_v25 = vpop.f32.mrb[42].mxu1 }
 0xe91   : > { %v5138_v37 = vadd.f32 %v8294_v0, %v6546_v25  ;;  %v5132_v17 = vpop.f32.mrb[43].mxu1 }
 0xe92   : > { %v5133_v44 = vadd.f32 %v8294_v0, %v5132_v17 }
 0xe93   : > { %v5142_v39 = vmax.f32 %v5138_v37, 0.0 }
 0xe94   : > { %v5141_v20 = vmax.f32 %v5133_v44, 0.0  ;;  %v6551_v45 = vpop.f32.mrb[44].mxu1 }
 0xe95   : > { %v5144_v42 = vadd.f32 %v8301_v52, %v5142_v39  ;;  %v5229_v43 = vadd.f32 %v8307_v56, %v6551_v45  ;;  %v5223_v40 = vpop.f32.mrb[45].mxu1 }
 0xe96   : > { %v5143_v51 = vadd.f32 %v8301_v52, %v5141_v20  ;;  %v5224_v38 = vadd.f32 %v8307_v56, %v5223_v40 }
 0xe97   : > { %v5233_v48 = vadd.f32 %v5229_v43, %v5144_v42 }
 0xe98   : > { %v5232_v46 = vadd.f32 %v5224_v38, %v5143_v51 }
 0xe99   : > { %v5235_v47 = vmax.f32 %v5233_v48, 0.0 }
 0xe9a   : > { %v5234_v5 = vmax.f32 %v5232_v46, 0.0 }
 0xe9b   : > { %5240 = vrot.lane.b32.xlu0 %v5235_v47, %s8788_s6 }
 0xe9c   : > { %5238 = vrot.lane.b32.xlu1 %v5234_v5, %s8788_s6 }
 0xea6   : > { %v6572_v6 = vpop.f32.mrb[46].mxu1 }
 0xea7   : > { %v5336_v49 = vadd.f32 %v6572_v6, %v5750_v8  ;;  %v5330_v35 = vpop.f32.mrb[47].mxu1 }
 0xea8   : > { %v5331_v61 = vadd.f32 %v5750_v8, %v5330_v35 }
 0xea9   : > { %v5340_v50 = vmax.f32 %v5336_v49, 0.0 }
 0xeaa   : > { %v5339_v34 = vmax.f32 %v5331_v61, 0.0 }
 0xeac   : > { %6575 = vmatprep.mubr.msk.f32.mxu0 %vm339_vm3, %v5339_v34 }
 0xead   : > { %6576 = vmatmul.mubr.msk.f32.vlgmr.msra.gmra.mrb[50].mxu0 %vm339_vm3, %v5340_v50 }
 0xeae   : > { %6579 = vmatpush3.msk.msra.mxu0 %vm254_vm0, %v8428_v36  ;;  %6580 = vmatprep.mubr.msk.f32.mxu0 %vm433_vm2, %v8789_v2 }
 0xeb1   : > { %6581 = vmatmul.mubr.msk.f32.vlgmr.msra.gmra.mrb[52].mxu0 %vm433_vm2, %v8790_v54 }
 0xf0d   : > { %v5241_v1 = vpop.permute.xlu0 %5240 }
 0xf0e   : > { %5246 = vst.msk [vmem:[%s7820_s9 + $0x10] sm:$0xff] %vm5244_vm1, %v5241_v1  ;;  %v5239_v63 = vpop.permute.xlu1 %5238 }
 0xf0f   : > { %5245 = vst.msk [vmem:[%s7820_s9] sm:$0xff] %vm5244_vm1, %v5239_v63 }
 0xf80   : > { %v6577_v7 = vpop.f32.mrb[50].mxu0 }
 0xf81   : > { %v5419_v28 = vadd.f32 %v8294_v0, %v6577_v7  ;;  %v5413_v41 = vpop.f32.mrb[51].mxu0 }
 0xf82   : > { %v5414_v12 = vadd.f32 %v8294_v0, %v5413_v41 }
 0xf83   : > { %v5423_v36 = vmax.f32 %v5419_v28, 0.0 }
 0xf84   : > { %v5422_v57 = vmax.f32 %v5414_v12, 0.0  ;;  %v6582_v60 = vpop.f32.mrb[52].mxu0 }
 0xf85   : > { %v5425_v13 = vadd.f32 %v8301_v52, %v5423_v36  ;;  %v5510_v53 = vadd.f32 %v8307_v56, %v6582_v60  ;;  %v5504_v3 = vpop.f32.mrb[53].mxu0 }
 0xf86   : > { %v5424_v62 = vadd.f32 %v8301_v52, %v5422_v57  ;;  %v5505_v24 = vadd.f32 %v8307_v56, %v5504_v3 }
 0xf87   : > { %v5514_v33 = vadd.f32 %v5510_v53, %v5425_v13 }
 0xf88   : > { %v5513_v0 = vadd.f32 %v5505_v24, %v5424_v62 }
 0xf89   : > { %v5516_v58 = vmax.f32 %v5514_v33, 0.0 }
 0xf8a   : > { %v5515_v55 = vmax.f32 %v5513_v0, 0.0 }
 0xf8b   : > { %5518 = vst.msk [vmem:[%s7820_s9 + $0x18] sm:$0xff] %vm339_vm3, %v5516_v58 }
 0xf8c   : > { %5517 = vst.msk [vmem:[%s7820_s9 + $0x8] sm:$0xff] %vm339_vm3, %v5515_v55 }
 0xf8d   : > { %7242 = shalt.err (!%p7239_p3)
}
 0xf8e   : > { %s7243_s16 = scalar_lea.hbm %s8613_s23, 512  ;;  %s7247_s6 = scalar_lea.hbm %s8670_s5, 1024 }
 0xf8f   : > { %p7244_p4 = scmp.ne.s32.totalorder %s8613_s23, %s7243_s16  ;;  %p7248_p9 = scmp.lt.u32.totalorder %s8613_s23, %s8670_s5 }
 0xf90   : > { %p7249_p10 = scmp.lt.u32.totalorder %s7247_s6, %s7243_s16  ;;  %p7251_p12 = scmp.lt.u32.totalorder %s7243_s16, %s8613_s23 }
 0xf91   : > { %p7245_p7 = pnand %p7244_p4, %p7386_p5 }
 0xf92   : > { %p7250_p11 = por %p7249_p10, %p7248_p9 }
 0xf93   : > { %p7246_p8 = pneg %p7245_p7 }
 0xf94   : > { %p7252_p13 = por %p7251_p12, %p7250_p11 }
 0xf96   : > { %p7253_p0 = pnand %p7252_p13, %p7246_p8 }
 0xf98   : > { %7256 = shalt.err (!%p7253_p0)
}
 0xf99   : > { %s7317_s25 = smov 256  }
 0xf9a   : > { %6855 = dma.vmem_to_hbm [thread:$0]  (%p7386_p5), %s8615_s8, 512, %s8613_s23, %s8623_s22, %s7317_s25, %s7317_s25, %s7313_s15  }
 0xf9b PF: > { %p6861_p1 = scmp.ge.s32.totalorder %s7291_s21, 2  ;;  %s5549_s12 = sand.u32 1, %s7279_s18  }
 0xf9c   : > { %s5550_s26 = scalar_lea.sflag [#allocation3], %s5549_s12 }
 0xf9d   : > { %p6858_p2 = pnand %p6861_p1, %p7390_p6 }
 0xf9f   : > { %7274 = dma.done.wait (!%p6858_p2), %s5550_s26, 512  }
 0xfa0   : > { %7276 = vsyncadd (!%p6858_p2), %s5550_s26, 4294966784  ;;  %p15_p3 = scmp.ge.s32.totalorder %s7373_s24, 4   ;;  %s8791_s18 = smov %s7283_s19 }
 0xfa1   : > { %s8792_s19 = smov %s7287_s20  ;;  %s8793_s20 = smov %s7384_s27 }
 0xfa2   : > { %s8794_s21 = smov %s7373_s24  ;;  %17 = sbr.rel (!%p15_p3) target bundleno = 3 (0x3), region = 75 }
 0xfa9   :  { %5555 = vsyncpa [#allocation3], 1 }
 0xfaa   :  { %5557 = vsyncpa [#allocation3 + $0x1], 1 }

// kernel: tpu_custom_call.1
= control target key start
LH: loop header
LB: loop body
LE: loop exit
PB: predicated region body
PF: predicated region fallthrough
CT: control target
= control target key end

     0   :  { %10 = vsyncpa [#allocation3], 0  ;;  %s8665_s0 = inlined_call_operand.vmem [shape: f32[32,68], index: 0, kind: input, shape index: {}]   ;;  %s8666_s1 = inlined_call_operand.vmem [shape: f32[68,136], index: 1, kind: input, shape index: {}]   ;;  %s8667_s2 = inlined_call_operand.vmem [shape: f32[8,8], index: 2, kind: input, shape index: {}]   ;;  %s8668_s3 = inlined_call_operand.vmem [shape: f32[4,8], index: 3, kind: input, shape index: {}]   ;;  %s8669_s4 = inlined_call_operand.vmem [shape: f32[21,8], index: 4, kind: input, shape index: {}]   ;;  %s8670_s5 = inlined_call_operand.hbm [shape: f32[32,136], index: 5, kind: output, shape index: {}]  }
   0x1   :  { %12 = vsyncpa [#allocation3 + $0x1], 0  ;;  %s7348_s18 = smov 0   ;;  %s7350_s19 = smov 0  }
   0x2   :  { %s7352_s20 = smov 0   ;;  %s7354_s21 = smov 0  }
   0x3 LB: > { %s7369_s22 = sadd.s32 4294967295, %s7291_s21   ;;  %s5596_s23 = sadd.s32 4294967294, %s7291_s21   ;;  %s7291_s21 = sphi %s7354_s21, %s8794_s21   ;;  %s7287_s20 = sphi %s7352_s20, %s8793_s20   ;;  %s7283_s19 = sphi %s7350_s19, %s8792_s19   ;;  %s7279_s18 = sphi %s7348_s18, %s8791_s18  }
   0x4   : > { %s7373_s24 = sadd.s32 1, %s7291_s21   ;;  %s135_s25 = sadd.s32 1, %s7287_s20 }
   0x5   : > { %s132_s26 = ssub.s32 %s7291_s21, %s7373_s24  ;;  %p145_p0 = scmp.ne.s32.totalorder %s7287_s20, %s7283_s19 }
   0x6   : > { %p133_p1 = scmp.eq.s32.totalorder %s132_s26, 0  ;;  %p146_p2 = scmp.eq.s32.totalorder %s7369_s22, 1 }
   0x7   : > { %p151_p3 = scmp.ne.s32.totalorder %s7283_s19, %s7279_s18  ;;  %p152_p4 = scmp.eq.s32.totalorder %s5596_s23, 1 }
   0x8   : > { %s7384_s27 = scalar_select %p133_p1, %s7287_s20, %s135_s25  }
   0x9   : > { %p7386_p5 = por %p146_p2, %p145_p0  ;;  %p7390_p6 = por %p152_p4, %p151_p3 }
   0xa   : > { %p5599_p7 = scmp.ge.s32.totalorder %s7291_s21, 1  ;;  %p191_p8 = scmp.lt.s32.totalorder %s7291_s21, 3 }
   0xc   : > { %p192_p9 = pnand %p5599_p7, %p191_p8 }
   0xe   : > { %195 = sbr.rel (%p192_p9) target bundleno = 3995 (0xf9b), region = 40 }
  0x15   : > { %v522_v0 = vld [vmem:[%s8666_s1] sm:$0xff]  ;;  %v523_v1 = vld [vmem:[%s8666_s1 + $0x10] sm:$0xff]  ;;  %s5601_s11 = sshll.u32 %s7369_s22, 1  ;;  %s8671_s6 = smov 120   ;;  %vm254_vm0 = vcmask 1043456   ;;  %vm247_vm1 = vcmask 556032  }
  0x16   : > { %v524_v2 = vld [vmem:[%s8666_s1 + $0x20] sm:$0xff]  ;;  %v7406_v3 = vpack.i.bf16 %v523_v1, %v522_v0  ;;  %v6583_v4 = vpack.c.bf16 %v523_v1, %v522_v0  ;;  %v525_v5 = vld [vmem:[%s8666_s1 + $0x30] sm:$0xff]  ;;  %p220_p10 = scmp.lt.s32.totalorder %s5601_s11, 3  ;;  %vm433_vm2 = vcmask 31744   ;;  %s8673_s15 = smov 112   ;;  %vm339_vm3 = vcmask 64512  }
  0x17   : > { %v526_v6 = vld [vmem:[%s8666_s1 + $0x40] sm:$0xff]  ;;  %v527_v7 = vld [vmem:[%s8666_s1 + $0x50] sm:$0xff]  ;;  %v6587_v8 = vpack.c.bf16 %v525_v5, %v524_v2  ;;  %v7427_v12 = vpack.i.bf16 %v525_v5, %v524_v2  ;;  %s7295_s7 = smov 124   ;;  %s8675_s8 = smov 104   ;;  %vm834_vm4 = vcmask 130112   ;;  %vm1149_vm5 = vcmask 195712  }
  0x18   : > { %v7417_v9 = vpack.i.bf16 %v527_v7, %v526_v6  ;;  %v528_v10 = vld [vmem:[%s8666_s1 + $0x60] sm:$0xff]  ;;  %v529_v11 = vld [vmem:[%s8666_s1 + $0x70] sm:$0xff]  ;;  %6919 = vrot.lane.b32.xlu0 %v7406_v3, %s8671_s6  ;;  %6584 = vmatprep.subr.bf16.mxu0 %v6583_v4  ;;  %s8796_s11 = smov (!%p220_p10, %s5601_s11), 3  ;;  %v6591_v15 = vpack.c.bf16 %v527_v7, %v526_v6  ;;  %s7297_s14 = smov 116   ;;  %vm1464_vm6 = vcmask 261312   ;;  %vm1779_vm7 = vcmask 326912  }
  0x19   : > { %6586 = vmatpush3.bf16.msra.mxu0 %v6583_v4  ;;  %v7431_v13 = vpack.i.bf16 %v529_v11, %v528_v10  ;;  %v7436_v14 = vld [vmem:[%s8668_s3] sm:$0xf]  ;;  %s5602_s9 = sshll.u32 %s8796_s11, 3  ;;  %v6595_v18 = vpack.c.bf16 %v529_v11, %v528_v10  ;;  %s8677_s16 = smov 96   ;;  %vm2094_vm8 = vcmask 392512   ;;  %vm2409_vm9 = vcmask 458112  }
  0x1a   : > { %6929 = vrot.lane.b32.xlu1 %v7417_v9, %s8671_s6  ;;  %6588 = vmatprep.subr.bf16.mxu0 %v6587_v8  ;;  %s7443_s13 = scalar_lea.vmem %s8665_s0, %s5602_s9  ;;  %v530_v17 = vld [vmem:[%s8666_s1 + $0x80] sm:$0xf]  ;;  %s8679_s25 = smov 88   ;;  %vm2724_vm10 = vcmask 523712   ;;  %vm3039_vm11 = vcmask 589312   ;;  %vm3354_vm12 = vcmask 654912  }
  0x1b   : > { %6082 = vmatprep.subr.msk.mxu1 %vm254_vm0, %v7436_v14  ;;  %v7450_v16 = vld [vmem:[%s7443_s13] sm:$0xff]  ;;  %v7460_v19 = vld [vmem:[%s7443_s13 + $0x8] sm:$0xff]  ;;  %s8681_s9 = smov 80   ;;  %s7302_s11 = smov 72   ;;  %vm3669_vm13 = vcmask 720512   ;;  %vm3984_vm14 = vcmask 786112  }
  0x1c   : > { %6083 = vmatpush3.msk.msra.mxu1 %vm254_vm0, %v7436_v14  ;;  %6924 = vrot.lane.b32.xlu0 %v7427_v12, %s8671_s6  ;;  %v241_v20 = vld [vmem:[%s8666_s1 + $0x80] sm:$0xf]  ;;  %s7303_s23 = smov 100   ;;  %s7304_s26 = smov 64   ;;  %vm4299_vm15 = vcmask 851712  }
  0x1d   : > { %6590 = vmatpush3.bf16.msra.mxu0 %v6587_v8  ;;  %6074 = vmatprep.mubr.msk.f32.mxu0 %vm247_vm1, %v7450_v16  ;;  %v845_v21 = vld [vmem:[%s8666_s1 + $0x80] sm:$0xf]  ;;  %s8683_s10 = smov 56   ;;  %s7306_s30 = smov 92  }
  0x1e   : > { %6934 = vrot.lane.b32.xlu1 %v7431_v13, %s8671_s6  ;;  %6592 = vmatprep.subr.bf16.mxu0 %v6591_v15  ;;  %v7491_v22 = vld [vmem:[%s8667_s2] sm:$0xff]  ;;  %s7309_s17 = smov 84   ;;  %s8768_s12 = smov 88  }
  0x1f   : > { %6084 = vmatprep.mubr.msk.f32.mxu1 %vm433_vm2, %v7450_v16  ;;  %v1160_v39 = vld [vmem:[%s8666_s1 + $0x80] sm:$0xf] }
  0x20   : > { %561 = vrot.lane.b32.xlu0 %v530_v17, %s8671_s6  ;;  %6085 = vmatmul.mubr.msk.f32.vlgmr.msra.gmra.mrb[0].mxu1 %vm433_vm2, %v7460_v19  ;;  %v5603_v60 = vld [vmem:[%s8669_s4] ss:$0 sm:$0xff]  ;;  %v5615_v10 = vld [vmem:[%s8669_s4 + $0x1] ss:$0 sm:$0xff] }
  0x21   : > { %6594 = vmatpush3.bf16.msra.mxu0 %v6591_v15  ;;  %6105 = vmatprep.mubr.msk.f32.mxu1 %vm247_vm1, %v7450_v16  ;;  %v1475_v4 = vld [vmem:[%s8666_s1 + $0x80] sm:$0xf] }
  0x22   : > { %6939 = vrot.lane.b32.xlu1 %v7406_v3, %s8673_s15  ;;  %6596 = vmatprep.subr.bf16.mxu0 %v6595_v18  ;;  %v1790_v5 = vld [vmem:[%s8666_s1 + $0x80] sm:$0xf] }
  0x23   : > { %v2105_v6 = vld [vmem:[%s8666_s1 + $0x80] sm:$0xf] }
  0x24   : > { %6944 = vrot.lane.b32.xlu0 %v7427_v12, %s8673_s15  ;;  %v2420_v7 = vld [vmem:[%s8666_s1 + $0x80] sm:$0xf] }
  0x25   : > { %6598 = vmatpush3.bf16.msra.mxu0 %v6595_v18  ;;  %v2735_v8 = vld [vmem:[%s8666_s1 + $0x80] sm:$0xf] }
  0x26   : > { %6949 = vrot.lane.b32.xlu1 %v7417_v9, %s8673_s15  ;;  %6072 = vmatprep.subr.msk.mxu0 %vm254_vm0, %v241_v20 }
  0x28   : > { %6954 = vrot.lane.b32.xlu0 %v7431_v13, %s8673_s15 }
  0x29   : > { %6073 = vmatpush3.msk.msra.mxu0 %vm254_vm0, %v241_v20 }
  0x2a   : > { %876 = vrot.lane.b32.xlu1 %v845_v21, %s8673_s15  ;;  %6075 = vmatmul.mubr.msk.f32.vlgmr.msra.gmra.mrb[0].mxu0 %vm247_vm1, %v7460_v19  ;;  %v3050_v21 = vld [vmem:[%s8666_s1 + $0x80] sm:$0xf] }
  0x2b   : > { %6077 = vmatprep.subr.mxu0 %v7491_v22 }
  0x2c   : > { %6078 = vmatpush3.msra.mxu0 %v7491_v22  ;;  %739 = vrot.lane.b32.xlu0 %v7450_v16, %s7295_s7 }
  0x2d   : > { %6108 = vmatprep.subr.mxu0 %v7491_v22 }
  0x2e   : > { %741 = vrot.lane.b32.xlu1 %v7460_v19, %s7295_s7  ;;  %s7300_s7 = smov 108  }
  0x30   : > { %6959 = vrot.lane.b32.xlu0 %v7406_v3, %s8675_s8 }
  0x32   : > { %1054 = vrot.lane.b32.xlu1 %v7450_v16, %s8671_s6 }
  0x34   : > { %1056 = vrot.lane.b32.xlu0 %v7460_v19, %s8671_s6  ;;  %s7312_s6 = smov 76  }
  0x36   : > { %6964 = vrot.lane.b32.xlu1 %v7427_v12, %s8675_s8 }
  0x38   : > { %6969 = vrot.lane.b32.xlu0 %v7417_v9, %s8675_s8 }
  0x3a   : > { %6974 = vrot.lane.b32.xlu1 %v7431_v13, %s8675_s8 }
  0x3c   : > { %1191 = vrot.lane.b32.xlu0 %v1160_v39, %s8675_s8 }
  0x3e   : > { %6979 = vrot.lane.b32.xlu1 %v7406_v3, %s8677_s16 }
  0x40   : > { %1369 = vrot.lane.b32.xlu0 %v7450_v16, %s7297_s14 }
  0x42   : > { %1371 = vrot.lane.b32.xlu1 %v7460_v19, %s7297_s14 }
  0x44   : > { %6984 = vrot.lane.b32.xlu0 %v7427_v12, %s8677_s16 }
  0x46   : > { %6989 = vrot.lane.b32.xlu1 %v7417_v9, %s8677_s16 }
  0x48   : > { %6994 = vrot.lane.b32.xlu0 %v7431_v13, %s8677_s16 }
  0x4a   : > { %1506 = vrot.lane.b32.xlu1 %v1475_v4, %s8677_s16 }
  0x4c   : > { %6999 = vrot.lane.b32.xlu0 %v7406_v3, %s8679_s25 }
  0x4e   : > { %1684 = vrot.lane.b32.xlu1 %v7450_v16, %s8673_s15 }
  0x50   : > { %1686 = vrot.lane.b32.xlu0 %v7460_v19, %s8673_s15  ;;  %s7313_s15 = smov 16  }
  0x52   : > { %7004 = vrot.lane.b32.xlu1 %v7427_v12, %s8679_s25 }
  0x54   : > { %7009 = vrot.lane.b32.xlu0 %v7417_v9, %s8679_s25 }
  0x56   : > { %7014 = vrot.lane.b32.xlu1 %v7431_v13, %s8679_s25 }
  0x58   : > { %1821 = vrot.lane.b32.xlu0 %v1790_v5, %s8679_s25 }
  0x5a   : > { %7019 = vrot.lane.b32.xlu1 %v7406_v3, %s8681_s9 }
  0x5c   : > { %1999 = vrot.lane.b32.xlu0 %v7450_v16, %s7300_s7 }
  0x5e   : > { %2001 = vrot.lane.b32.xlu1 %v7460_v19, %s7300_s7  ;;  %s8685_s7 = smov 48  }
  0x60   : > { %7024 = vrot.lane.b32.xlu0 %v7427_v12, %s8681_s9 }
  0x62   : > { %7029 = vrot.lane.b32.xlu1 %v7417_v9, %s8681_s9 }
  0x64   : > { %7034 = vrot.lane.b32.xlu0 %v7431_v13, %s8681_s9 }
  0x66   : > { %2136 = vrot.lane.b32.xlu1 %v2105_v6, %s8681_s9  ;;  %v4831_v6 = vld [vmem:[%s7443_s13 + $0x8] sm:$0xff] }
  0x68   : > { %7039 = vrot.lane.b32.xlu0 %v7406_v3, %s7302_s11 }
  0x6a   : > { %2314 = vrot.lane.b32.xlu1 %v7450_v16, %s8675_s8 }
  0x6c   : > { %2316 = vrot.lane.b32.xlu0 %v7460_v19, %s8675_s8  ;;  %s7314_s8 = smov 8  }
  0x6e   : > { %7044 = vrot.lane.b32.xlu1 %v7427_v12, %s7302_s11 }
  0x70   : > { %7049 = vrot.lane.b32.xlu0 %v7417_v9, %s7302_s11 }
  0x72   : > { %7054 = vrot.lane.b32.xlu1 %v7431_v13, %s7302_s11 }
  0x74   : > { %2451 = vrot.lane.b32.xlu0 %v2420_v7, %s7302_s11  ;;  %v4830_v7 = vld [vmem:[%s7443_s13] sm:$0xff] }
  0x76   : > { %7059 = vrot.lane.b32.xlu1 %v7406_v3, %s7304_s26 }
  0x78   : > { %2629 = vrot.lane.b32.xlu0 %v7450_v16, %s7303_s23 }
  0x7a   : > { %2631 = vrot.lane.b32.xlu1 %v7460_v19, %s7303_s23  ;;  %s7310_s23 = smov 32  }
  0x7c   : > { %7064 = vrot.lane.b32.xlu0 %v7427_v12, %s7304_s26 }
  0x7e   : > { %7069 = vrot.lane.b32.xlu1 %v7417_v9, %s7304_s26 }
  0x80   : > { %7074 = vrot.lane.b32.xlu0 %v7431_v13, %s7304_s26 }
  0x82   : > { %2766 = vrot.lane.b32.xlu1 %v2735_v8, %s7304_s26 }
  0x84   : > { %7079 = vrot.lane.b32.xlu0 %v7406_v3, %s8683_s10 }
  0x86   : > { %2944 = vrot.lane.b32.xlu1 %v7450_v16, %s8677_s16 }
  0x88   : > { %2946 = vrot.lane.b32.xlu0 %v7460_v19, %s8677_s16  ;;  %s216_s16 = sand.u32 1, %s7283_s19  }
  0x8a   : > { %v6920_v23 = vpop.permute.xlu0 %6919  ;;  %7084 = vrot.lane.b32.xlu1 %v7427_v12, %s8683_s10 }
  0x8b   : > { %v6922_v24 = vunpack.i.h.bf16 %v6920_v23  ;;  %v6921_v25 = vunpack.i.l.bf16 %v6920_v23 }
  0x8c   : > { %v6930_v26 = vpop.permute.xlu1 %6929  ;;  %7089 = vrot.lane.b32.xlu0 %v7417_v9, %s8683_s10 }
  0x8d   : > { %v6599_v27 = vpack.c.bf16 %v6922_v24, %v6921_v25  ;;  %v6932_v28 = vunpack.i.h.bf16 %v6930_v26  ;;  %v6931_v29 = vunpack.i.l.bf16 %v6930_v26 }
  0x8e   : > { %v6925_v30 = vpop.permute.xlu0 %6924  ;;  %7094 = vrot.lane.b32.xlu1 %v7431_v13, %s8683_s10 }
  0x8f   : > { %v6927_v31 = vunpack.i.h.bf16 %v6925_v30  ;;  %v6926_v32 = vunpack.i.l.bf16 %v6925_v30  ;;  %6600 = vmatprep.subr.bf16.mxu1 %v6599_v27  ;;  %v6607_v37 = vpack.c.bf16 %v6932_v28, %v6931_v29  ;;  %v5624_v28 = vld [vmem:[%s8669_s4 + $0x2] ss:$0 sm:$0xff] }
  0x90   : > { %v6935_v33 = vpop.permute.xlu1 %6934  ;;  %6602 = vmatpush3.bf16.msra.mxu1 %v6599_v27  ;;  %3081 = vrot.lane.b32.xlu0 %v3050_v21, %s8683_s10  ;;  %s8769_s10 = smov 96  }
  0x91   : > { %v6603_v34 = vpack.c.bf16 %v6927_v31, %v6926_v32  ;;  %v6937_v35 = vunpack.i.h.bf16 %v6935_v33  ;;  %v6936_v36 = vunpack.i.l.bf16 %v6935_v33 }
  0x92   : > { %v562_v38 = vpop.permute.xlu0 %561  ;;  %7099 = vrot.lane.b32.xlu1 %v7406_v3, %s8685_s7 }
  0x93   : > { %6604 = vmatprep.subr.bf16.mxu1 %v6603_v34  ;;  %v6611_v40 = vpack.c.bf16 %v6937_v35, %v6936_v36 }
  0x94   : > { %6606 = vmatpush3.bf16.msra.mxu1 %v6603_v34  ;;  %v6940_v41 = vpop.permute.xlu1 %6939  ;;  %3259 = vrot.lane.b32.xlu0 %v7450_v16, %s7306_s30 }
  0x95   : > { %6608 = vmatprep.subr.bf16.mxu1 %v6607_v37  ;;  %v6942_v43 = vunpack.i.h.bf16 %v6940_v41  ;;  %v6941_v44 = vunpack.i.l.bf16 %v6940_v41 }
  0x96   : > { %v6945_v42 = vpop.permute.xlu0 %6944  ;;  %3261 = vrot.lane.b32.xlu1 %v7460_v19, %s7306_s30  ;;  %s7308_s30 = smov 40  }
  0x97   : > { %v6947_v45 = vunpack.i.h.bf16 %v6945_v42  ;;  %v6946_v46 = vunpack.i.l.bf16 %v6945_v42  ;;  %v6615_v48 = vpack.c.bf16 %v6942_v43, %v6941_v44 }
  0x98   : > { %6610 = vmatpush3.bf16.msra.mxu1 %v6607_v37  ;;  %v6950_v47 = vpop.permute.xlu1 %6949  ;;  %7104 = vrot.lane.b32.xlu0 %v7427_v12, %s8685_s7  ;;  %v3365_v37 = vld [vmem:[%s8666_s1 + $0x80] sm:$0xf] }
  0x99   : > { %6612 = vmatprep.subr.bf16.mxu1 %v6611_v40  ;;  %v6952_v49 = vunpack.i.h.bf16 %v6950_v47  ;;  %v6951_v50 = vunpack.i.l.bf16 %v6950_v47  ;;  %v6619_v51 = vpack.c.bf16 %v6947_v45, %v6946_v46 }
  0x9a   : > { %v6955_v52 = vpop.permute.xlu0 %6954  ;;  %7109 = vrot.lane.b32.xlu1 %v7417_v9, %s8685_s7 }
  0x9b   : > { %v6957_v53 = vunpack.i.h.bf16 %v6955_v52  ;;  %v6956_v54 = vunpack.i.l.bf16 %v6955_v52  ;;  %v6623_v55 = vpack.c.bf16 %v6952_v49, %v6951_v50 }
  0x9c   : > { %6614 = vmatpush3.bf16.msra.mxu1 %v6611_v40  ;;  %v877_v57 = vpop.permute.xlu1 %876  ;;  %7114 = vrot.lane.b32.xlu0 %v7431_v13, %s8685_s7 }
  0x9d   : > { %6103 = vmatprep.subr.msk.mxu1 %vm254_vm0, %v562_v38  ;;  %v6627_v56 = vpack.c.bf16 %v6957_v53, %v6956_v54  ;;  %v3995_v54 = vld [vmem:[%s8666_s1 + $0x80] sm:$0xf] }
  0x9e   : > { %v740_v24 = vpop.permute.xlu0 %739  ;;  %3396 = vrot.lane.b32.xlu1 %v3365_v37, %s8685_s7  ;;  %s8748_s7 = smov 56  }
  0xa0   : > { %6104 = vmatpush3.msk.msra.mxu1 %vm254_vm0, %v562_v38  ;;  %v742_v25 = vpop.permute.xlu1 %741  ;;  %7119 = vrot.lane.b32.xlu0 %v7406_v3, %s7308_s30 }
  0xa1   : > { %6106 = vmatmul.mubr.msk.f32.vlgmr.msra.gmra.mrb[2].mxu1 %vm247_vm1, %v7460_v19  ;;  %6616 = vmatprep.subr.bf16.mxu1 %v6615_v48 }
  0xa2   : > { %6618 = vmatpush3.bf16.msra.mxu1 %v6615_v48  ;;  %6136 = vmatprep.mubr.msk.f32.mxu1 %vm247_vm1, %v7450_v16  ;;  %v6960_v26 = vpop.permute.xlu0 %6959 }
  0xa3   : > { %6620 = vmatprep.subr.bf16.mxu1 %v6619_v51  ;;  %v6962_v33 = vunpack.i.h.bf16 %v6960_v26  ;;  %v6961_v34 = vunpack.i.l.bf16 %v6960_v26  ;;  %3574 = vrot.lane.b32.xlu1 %v7450_v16, %s8679_s25  ;;  %v7795_v26 = vld [vmem:[%s8669_s4 + $0x14] ss:$0 sm:$0xff] }
  0xa4   : > { %v1055_v27 = vpop.permute.xlu1 %1054  ;;  %3576 = vrot.lane.b32.xlu0 %v7460_v19, %s8679_s25  ;;  %s7315_s25 = smov 68  }
  0xa5   : > { %v6631_v42 = vpack.c.bf16 %v6962_v33, %v6961_v34 }
  0xa6   : > { %6622 = vmatpush3.bf16.msra.mxu1 %v6619_v51  ;;  %v1057_v30 = vpop.permute.xlu0 %1056  ;;  %v3680_v51 = vld [vmem:[%s8666_s1 + $0x80] sm:$0xf] }
  0xa7   : > { %6624 = vmatprep.subr.bf16.mxu1 %v6623_v55  ;;  %7124 = vrot.lane.b32.xlu1 %v7427_v12, %s7308_s30 }
  0xa8   : > { %v6965_v36 = vpop.permute.xlu1 %6964  ;;  %7129 = vrot.lane.b32.xlu0 %v7417_v9, %s7308_s30 }
  0xa9   : > { %v6967_v40 = vunpack.i.h.bf16 %v6965_v36  ;;  %v6966_v41 = vunpack.i.l.bf16 %v6965_v36 }
  0xaa   : > { %6626 = vmatpush3.bf16.msra.mxu1 %v6623_v55  ;;  %v6970_v43 = vpop.permute.xlu0 %6969  ;;  %v4310_v55 = vld [vmem:[%s8666_s1 + $0x80] sm:$0xf] }
  0xab   : > { %6628 = vmatprep.subr.bf16.mxu1 %v6627_v56  ;;  %v6972_v44 = vunpack.i.h.bf16 %v6970_v43  ;;  %v6971_v45 = vunpack.i.l.bf16 %v6970_v43  ;;  %v6635_v46 = vpack.c.bf16 %v6967_v40, %v6966_v41  ;;  %7134 = vrot.lane.b32.xlu1 %v7431_v13, %s7308_s30 }
  0xac   : > { %v6975_v47 = vpop.permute.xlu1 %6974  ;;  %3711 = vrot.lane.b32.xlu0 %v3680_v51, %s7308_s30 }
  0xad   : > { %v6977_v48 = vunpack.i.h.bf16 %v6975_v47  ;;  %v6976_v49 = vunpack.i.l.bf16 %v6975_v47  ;;  %v6639_v50 = vpack.c.bf16 %v6972_v44, %v6971_v45 }
  0xae   : > { %6630 = vmatpush3.bf16.msra.mxu1 %v6627_v56  ;;  %v1192_v53 = vpop.permute.xlu0 %1191  ;;  %v4618_v56 = vld [vmem:[%s8666_s1 + $0x10] sm:$0xff] }
  0xaf   : > { %6134 = vmatprep.subr.msk.mxu1 %vm254_vm0, %v877_v57  ;;  %v6643_v52 = vpack.c.bf16 %v6977_v48, %v6976_v49  ;;  %7139 = vrot.lane.b32.xlu1 %v7406_v3, %s7310_s23 }
  0xb0   : > { %3889 = vrot.lane.b32.xlu0 %v7450_v16, %s7309_s17  ;;  %v7758_v5 = vpop.permute.xlu1 %6979 }
  0xb2   : > { %6135 = vmatpush3.msk.msra.mxu1 %vm254_vm0, %v877_v57  ;;  %v4620_v57 = vld [vmem:[%s8666_s1 + $0x30] sm:$0xff]  ;;  %v7755_v4 = vpop.permute.xlu0 %1369 }
  0xb3   : > { %6137 = vmatmul.mubr.msk.f32.vlgmr.msra.gmra.mrb[4].mxu1 %vm247_vm1, %v7460_v19  ;;  %6170 = vmatprep.subr.mxu1 %v7491_v22 }
  0xb4   : > { %6171 = vmatpush3.msra.mxu1 %v7491_v22  ;;  %7144 = vrot.lane.b32.xlu0 %v7427_v12, %s7310_s23 }
  0xb5   : > { %6175 = vmatprep.subr.msk.mxu1 %vm254_vm0, %v7436_v14  ;;  %3891 = vrot.lane.b32.xlu1 %v7460_v19, %s7309_s17  ;;  %s7311_s17 = smov 24  }
  0xb6   : > { %v7765_v8 = vpop.permute.xlu0 %6984 }
  0xb8   : > { %7154 = vrot.lane.b32.xlu0 %v7431_v13, %s7310_s23 }
  0xb9   : > { %7149 = vrot.lane.b32.xlu1 %v7417_v9, %s7310_s23 }
  0xbc   : > { %7159 = vrot.lane.b32.xlu0 %v7406_v3, %s7311_s17  ;;  %v4617_v3 = vld [vmem:[%s8666_s1] sm:$0xff] }
  0xbd   : > { %4026 = vrot.lane.b32.xlu1 %v3995_v54, %s7310_s23 }
  0xc0   : > { %4206 = vrot.lane.b32.xlu0 %v7460_v19, %s8681_s9 }
  0xc1   : > { %4204 = vrot.lane.b32.xlu1 %v7450_v16, %s8681_s9 }
  0xc4   : > { %7169 = vrot.lane.b32.xlu0 %v7417_v9, %s7311_s17  ;;  %v7178_v9 = vpack.i.bf16 %v4618_v56, %v4617_v3 }
  0xc5   : > { %7164 = vrot.lane.b32.xlu1 %v7427_v12, %s7311_s17  ;;  %v4619_v12 = vld [vmem:[%s8666_s1 + $0x20] sm:$0xff] }
  0xc8   : > { %4341 = vrot.lane.b32.xlu0 %v4310_v55, %s7311_s17 }
  0xc9   : > { %7174 = vrot.lane.b32.xlu1 %v7431_v13, %s7311_s17  ;;  %v4623_v13 = vld [vmem:[%s8666_s1 + $0x60] sm:$0xff] }
  0xcc   : > { %4519 = vrot.lane.b32.xlu0 %v7450_v16, %s7312_s6 }
  0xcd   : > { %7179 = vrot.lane.b32.xlu1 %v7178_v9, %s7313_s15 }
  0xd1   : > { %4521 = vrot.lane.b32.xlu1 %v7460_v19, %s7312_s6  ;;  %s8788_s6 = smov 120  }
  0xf3   : > { %v7528_v58 = vpop.f32.mrb[0].mxu1 }
  0xf4   : > { %v7530_v59 = vpop.f32.mrb[1].mxu1 }
  0xfd   : > { %v6076_v61 = vpop.f32.mrb[0].mxu0 }
  0xfe   : > { %v330_v62 = vadd.f32 %v6076_v61, %v5603_v60  ;;  %v324_v63 = vpop.f32.mrb[1].mxu0  ;;  %v4624_v61 = vld [vmem:[%s8666_s1 + $0x70] sm:$0xff] }
  0xff   : > { %v325_v0 = vadd.f32 %v5603_v60, %v324_v63  ;;  %v7183_v60 = vpack.i.bf16 %v4620_v57, %v4619_v12  ;;  %v4622_v63 = vld [vmem:[%s8666_s1 + $0x50] sm:$0xff] }
 0x100   : > { %v334_v1 = vmax.f32 %v330_v62, 0.0  ;;  %v4621_v62 = vld [vmem:[%s8666_s1 + $0x40] sm:$0xff] }
 0x101   : > { %v333_v2 = vmax.f32 %v325_v0, 0.0  ;;  %7184 = vrot.lane.b32.xlu0 %v7183_v60, %s7313_s15  ;;  %v7193_v0 = vpack.i.bf16 %v4624_v61, %v4623_v13 }
 0x103   : > { %6079 = vmatprep.mubr.msk.f32.mxu0 %vm339_vm3, %v333_v2  ;;  %v4625_v2 = vld [vmem:[%s8666_s1 + $0x80] sm:$0xf] }
 0x104   : > { %6080 = vmatmul.mubr.msk.f32.vlgmr.msra.gmra.mrb[2].mxu0 %vm339_vm3, %v334_v1  ;;  %v7188_v1 = vpack.i.bf16 %v4622_v63, %v4621_v62 }
 0x105   : > { %6109 = vmatpush3.msra.mxu0 %v7491_v22  ;;  %7194 = vrot.lane.b32.xlu0 %v7193_v0, %s7313_s15 }
 0x106   : > { %6113 = vmatprep.subr.msk.mxu0 %vm254_vm0, %v7436_v14  ;;  %7189 = vrot.lane.b32.xlu1 %v7188_v1, %s7313_s15 }
 0x109   : > { %7199 = vrot.lane.b32.xlu0 %v7178_v9, %s7314_s8 }
 0x10a   : > { %4656 = vrot.lane.b32.xlu1 %v4625_v2, %s7313_s15 }
 0x10d   : > { %4836 = vrot.lane.b32.xlu0 %v4831_v6, %s7302_s11 }
 0x10e   : > { %4834 = vrot.lane.b32.xlu1 %v4830_v7, %s7302_s11 }
 0x111   : > { %7209 = vrot.lane.b32.xlu0 %v7188_v1, %s7314_s8 }
 0x112   : > { %7204 = vrot.lane.b32.xlu1 %v7183_v60, %s7314_s8 }
 0x116   : > { %7214 = vrot.lane.b32.xlu1 %v7193_v0, %s7314_s8 }
 0x11a   : > { %5149 = vrot.lane.b32.xlu1 %v4830_v7, %s7315_s25 }
 0x11e   : > { %5430 = vrot.lane.b32.xlu1 %v4830_v7, %s7304_s26 }
 0x174   : > { %v6107_v11 = vpop.f32.mrb[2].mxu1 }
 0x175   : > { %v645_v15 = vadd.f32 %v6107_v11, %v5615_v10  ;;  %v639_v17 = vpop.f32.mrb[3].mxu1  ;;  %v4940_v11 = vld [vmem:[%s8666_s1 + $0x80] sm:$0xf] }
 0x176   : > { %v640_v18 = vadd.f32 %v5615_v10, %v639_v17  ;;  %v7767_v10 = vpop.permute.xlu1 %1371  ;;  %4971 = vrot.lane.b32.xlu0 %v4940_v11, %s7314_s8 }
 0x177   : > { %v649_v20 = vmax.f32 %v645_v15, 0.0  ;;  %v7774_v15 = vpop.permute.xlu0 %6994 }
 0x178   : > { %v648_v23 = vmax.f32 %v640_v18, 0.0  ;;  %v7783_v18 = vld [vmem:[%s8669_s4 + $0x11] ss:$0 sm:$0xff] }
 0x17a   : > { %6110 = vmatprep.mubr.msk.f32.mxu0 %vm339_vm3, %v648_v23  ;;  %v7777_v17 = vpop.permute.xlu1 %6989  ;;  %5151 = vrot.lane.b32.xlu0 %v4831_v6, %s7315_s25  ;;  %s5600_s25 = sshll.u32 %s216_s16, 5 }
 0x17b   : > { %6111 = vmatmul.mubr.msk.f32.vlgmr.msra.gmra.mrb[4].mxu0 %vm339_vm3, %v649_v20  ;;  %v7785_v20 = vpop.permute.xlu0 %6999  ;;  %s7820_s9 = scalar_lea.vmem [#allocation2], %s5600_s25  ;;  %s5766_s25 = sshll.u32 %s7369_s22, 9 }
 0x17c   : > { %6114 = vmatpush3.msk.msra.mxu0 %vm254_vm0, %v7436_v14  ;;  %6115 = vmatprep.mubr.msk.f32.mxu0 %vm433_vm2, %v740_v24  ;;  %s8623_s22 = scalar_lea.sflag [#allocation3], %s216_s16 }
 0x17d   : > { %6139 = vmatprep.subr.mxu0 %v7491_v22 }
 0x17e   : > { %v7787_v21 = vpop.permute.xlu1 %1506  ;;  %5432 = vrot.lane.b32.xlu0 %v4831_v6, %s7304_s26 }
 0x17f   : > { %6116 = vmatmul.mubr.msk.f32.vlgmr.msra.gmra.mrb[6].mxu0 %vm433_vm2, %v742_v25 }
 0x180   : > { %6140 = vmatpush3.msra.mxu0 %v7491_v22 }
 0x181   : > { %6144 = vmatprep.subr.msk.mxu0 %vm254_vm0, %v7436_v14 }
 0x182   : > { %v7809_v34 = vpop.permute.xlu1 %1684 }
 0x186   : > { %v6138_v29 = vpop.f32.mrb[4].mxu1 }
 0x187   : > { %v960_v31 = vadd.f32 %v6138_v29, %v5624_v28  ;;  %v954_v32 = vpop.f32.mrb[5].mxu1 }
 0x188   : > { %v955_v35 = vadd.f32 %v5624_v28, %v954_v32  ;;  %v513_v32 = vadd.f32 %v7528_v58, %v7795_v26 }
 0x189   : > { %v964_v39 = vmax.f32 %v960_v31, 0.0  ;;  %v7804_v31 = vpop.permute.xlu0 %1686 }
 0x18a   : > { %v963_v38 = vmax.f32 %v955_v35, 0.0  ;;  %v508_v35 = vadd.f32 %v7795_v26, %v7530_v59 }
 0x18c   : > { %6141 = vmatprep.mubr.msk.f32.mxu0 %vm339_vm3, %v963_v38 }
 0x18d   : > { %6142 = vmatmul.mubr.msk.f32.vlgmr.msra.gmra.mrb[8].mxu0 %vm339_vm3, %v964_v39  ;;  %v7816_v41 = vpop.permute.xlu0 %7009 }
 0x18e   : > { %6145 = vmatpush3.msk.msra.mxu0 %vm254_vm0, %v7436_v14  ;;  %6146 = vmatprep.mubr.msk.f32.mxu0 %vm433_vm2, %v1055_v27  ;;  %v7800_v27 = vld [vmem:[%s8669_s4 + $0x13] ss:$0 sm:$0xff] }
 0x18f   : > { %6632 = vmatprep.subr.bf16.mxu0 %v6631_v42 }
 0x191   : > { %6147 = vmatmul.mubr.msk.f32.vlgmr.msra.gmra.mrb[10].mxu0 %vm433_vm2, %v1057_v30  ;;  %v7826_v58 = vpop.permute.xlu0 %1821 }
 0x192   : > { %6634 = vmatpush3.bf16.msra.mxu0 %v6631_v42  ;;  %6167 = vmatprep.mubr.msk.f32.mxu0 %vm247_vm1, %v7450_v16  ;;  %v7818_v42 = vpop.permute.xlu1 %7004 }
 0x193   : > { %6636 = vmatprep.subr.bf16.mxu0 %v6635_v46 }
 0x195   : > { %v7830_v43 = vpop.permute.xlu0 %1999 }
 0x196   : > { %6638 = vmatpush3.bf16.msra.mxu0 %v6635_v46  ;;  %v7828_v59 = vpop.permute.xlu1 %7014 }
 0x197   : > { %6640 = vmatprep.subr.bf16.mxu0 %v6639_v50 }
 0x199   : > { %v7834_v45 = vpop.permute.xlu0 %7024 }
 0x19a   : > { %6642 = vmatpush3.bf16.msra.mxu0 %v6639_v50  ;;  %v7832_v44 = vpop.permute.xlu1 %7019 }
 0x19b   : > { %6644 = vmatprep.subr.bf16.mxu0 %v6643_v52 }
 0x19d   : > { %v7838_v47 = vpop.permute.xlu0 %7034 }
 0x19e   : > { %6646 = vmatpush3.bf16.msra.mxu0 %v6643_v52  ;;  %v7836_v46 = vpop.permute.xlu1 %2001 }
 0x19f   : > { %6165 = vmatprep.subr.msk.mxu0 %vm254_vm0, %v1192_v53 }
 0x1a1   : > { %v7842_v49 = vpop.permute.xlu0 %7039 }
 0x1a2   : > { %6166 = vmatpush3.msk.msra.mxu0 %vm254_vm0, %v1192_v53  ;;  %v7840_v48 = vpop.permute.xlu1 %7029 }
 0x1a3   : > { %6168 = vmatmul.mubr.msk.f32.vlgmr.msra.gmra.mrb[12].mxu0 %vm247_vm1, %v7460_v19  ;;  %6201 = vmatprep.subr.mxu0 %v7491_v22 }
 0x1a4   : > { %6202 = vmatpush3.msra.mxu0 %v7491_v22 }
 0x1a5   : > { %6206 = vmatprep.subr.msk.mxu0 %vm254_vm0, %v7436_v14  ;;  %v7846_v51 = vpop.permute.xlu0 %2316 }
 0x1a6   : > { %v7844_v50 = vpop.permute.xlu1 %2136 }
 0x1a9   : > { %v7850_v53 = vpop.permute.xlu0 %7049 }
 0x1aa   : > { %v7848_v52 = vpop.permute.xlu1 %2314 }
 0x1ad   : > { %v7854_v55 = vpop.permute.xlu0 %2451 }
 0x1ae   : > { %v7852_v54 = vpop.permute.xlu1 %7044 }
 0x1b1   : > { %v7858_v56 = vpop.permute.xlu0 %2629 }
 0x1b2   : > { %v7856_v3 = vpop.permute.xlu1 %7054 }
 0x1b5   : > { %v7862_v12 = vpop.permute.xlu0 %7064 }
 0x1b6   : > { %v7860_v9 = vpop.permute.xlu1 %7059 }
 0x1b9   : > { %v7866_v60 = vpop.permute.xlu0 %7074 }
 0x1ba   : > { %v7864_v57 = vpop.permute.xlu1 %2631 }
 0x1bd   : > { %v7870_v61 = vpop.permute.xlu0 %7079 }
 0x1be   : > { %v7868_v13 = vpop.permute.xlu1 %7069 }
 0x1c1   : > { %v7874_v63 = vpop.permute.xlu0 %2946 }
 0x1c2   : > { %v7872_v62 = vpop.permute.xlu1 %2766 }
 0x1c5   : > { %v7878_v1 = vpop.permute.xlu0 %7089 }
 0x1c6   : > { %v7876_v0 = vpop.permute.xlu1 %2944 }
 0x1c9   : > { %v7882_v6 = vpop.permute.xlu0 %3081 }
 0x1ca   : > { %v7880_v2 = vpop.permute.xlu1 %7084  ;;  %8711 = vst [vmem:[#allocation5_spill] sm:$0xff] %v7882_v6 }
 0x1cd   : > { %v7886_v11 = vpop.permute.xlu0 %3259 }
 0x1ce   : > { %v7884_v7 = vpop.permute.xlu1 %7094  ;;  %8712 = vst [vmem:[#allocation6_spill] sm:$0xff] %v7886_v11 }
 0x1d7   : > { %v6081_v23 = vpop.f32.mrb[2].mxu0 }
 0x1d8   : > { %v418_v24 = vadd.f32 %v6081_v23, %v7783_v18  ;;  %v412_v25 = vpop.f32.mrb[3].mxu0  ;;  %v7888_v23 = vpop.permute.xlu1 %7099 }
 0x1d9   : > { %v413_v28 = vadd.f32 %v7783_v18, %v412_v25  ;;  %8713 = vst [vmem:[#allocation7_spill] sm:$0xff] %v7888_v23 }
 0x1da   : > { %v422_v29 = vmax.f32 %v418_v24, 0.0  ;;  %v7890_v24 = vpop.permute.xlu0 %7104 }
 0x1db   : > { %v421_v30 = vmax.f32 %v413_v28, 0.0  ;;  %8714 = vst [vmem:[#allocation8_spill] sm:$0xff] %v7890_v24 }
 0x1dc   : > { %v428_v33 = vadd.f32 %v7800_v27, %v422_v29  ;;  %v7892_v25 = vpop.permute.xlu1 %3261 }
 0x1dd   : > { %v427_v36 = vadd.f32 %v7800_v27, %v421_v30  ;;  %8715 = vst [vmem:[#allocation9_spill] sm:$0xff] %v7892_v25 }
 0x1de   : > { %v517_v37 = vadd.f32 %v513_v32, %v428_v33  ;;  %v7894_v28 = vpop.permute.xlu0 %7114 }
 0x1df   : > { %v516_v38 = vadd.f32 %v508_v35, %v427_v36  ;;  %8716 = vst [vmem:[#allocation10_spill] sm:$0xff] %v7894_v28 }
 0x1e0   : > { %v519_v39 = vmax.f32 %v517_v37, 0.0  ;;  %v7896_v30 = vpop.permute.xlu1 %7109 }
 0x1e1   : > { %v518_v40 = vmax.f32 %v516_v38, 0.0  ;;  %8717 = vst [vmem:[#allocation11_spill] sm:$0xff] %v7896_v30 }
 0x1e2   : > { %521 = vst.msk [vmem:[%s7820_s9 + $0x10] sm:$0xff] %vm339_vm3, %v519_v39  ;;  %v7902_v24 = vpop.permute.xlu0 %7119 }
 0x1e3   : > { %520 = vst.msk [vmem:[%s7820_s9] sm:$0xff] %vm339_vm3, %v518_v40  ;;  %8718 = vst [vmem:[#allocation12_spill] sm:$0xff] %v7902_v24 }
 0x1e4   : > { %v7906_v30 = vpop.permute.xlu1 %3396 }
 0x1e5   : > { %8719 = vst [vmem:[#allocation13_spill] sm:$0xff] %v7906_v30 }
 0x24e   : > { %v6112_v29 = vpop.f32.mrb[4].mxu0 }
 0x24f   : > { %v728_v32 = vadd.f32 %v6112_v29, %v7783_v18  ;;  %v722_v33 = vpop.f32.mrb[5].mxu0 }
 0x250   : > { %v723_v35 = vadd.f32 %v7783_v18, %v722_v33 }
 0x251   : > { %v732_v36 = vmax.f32 %v728_v32, 0.0  ;;  %v7909_v32 = vpop.permute.xlu0 %3576 }
 0x252   : > { %v731_v37 = vmax.f32 %v723_v35, 0.0  ;;  %v6117_v38 = vpop.f32.mrb[6].mxu0  ;;  %8720 = vst [vmem:[#allocation14_spill] sm:$0xff] %v7909_v32  ;;  %v7912_v35 = vpop.permute.xlu1 %3574 }
 0x253   : > { %v734_v39 = vadd.f32 %v7800_v27, %v732_v36  ;;  %v819_v40 = vadd.f32 %v6117_v38, %v7795_v26  ;;  %v813_v11 = vpop.f32.mrb[7].mxu0  ;;  %8721 = vst [vmem:[#allocation15_spill] sm:$0xff] %v7912_v35 }
 0x254   : > { %v733_v28 = vadd.f32 %v7800_v27, %v731_v37  ;;  %v814_v25 = vadd.f32 %v7795_v26, %v813_v11 }
 0x255   : > { %v823_v29 = vadd.f32 %v819_v40, %v734_v39  ;;  %v7914_v36 = vpop.permute.xlu0 %7129 }
 0x256   : > { %v822_v23 = vadd.f32 %v814_v25, %v733_v28  ;;  %8722 = vst [vmem:[#allocation16_spill] sm:$0xff] %v7914_v36  ;;  %v7916_v37 = vpop.permute.xlu1 %7124 }
 0x257   : > { %v825_v6 = vmax.f32 %v823_v29, 0.0  ;;  %8723 = vst [vmem:[#allocation17_spill] sm:$0xff] %v7916_v37 }
 0x258   : > { %v824_v33 = vmax.f32 %v822_v23, 0.0 }
 0x259   : > { %830 = vrot.lane.b32.xlu0 %v825_v6, %s7314_s8 }
 0x25a   : > { %828 = vrot.lane.b32.xlu1 %v824_v33, %s7314_s8  ;;  %v7922_v33 = vpop.permute.xlu0 %3711  ;;  %v7926_v35 = vpop.permute.xlu1 %7134  ;;  %s5534_s8 = sshll.u32 %s7820_s9, 4  ;;  %s8615_s8 = int_to_ptr.vmem [resolvable:$true] %s5534_s8 }
 0x25b   : > { %8724 = vst [vmem:[#allocation18_spill] sm:$0xff] %v7922_v33  ;;  %s7229_s14 = scalar_lea.vmem %s8615_s8, 512 }
 0x25c   : > { %p7230_p11 = scmp.ne.s32.totalorder %s8615_s8, %s7229_s14 }
 0x25e   : > { %p7231_p12 = pnand %p7230_p11, %p7386_p5 }
 0x260   : > { %v6143_v38 = vpop.f32.mrb[8].mxu0  ;;  %p7232_p13 = pneg %p7231_p12 }
 0x261   : > { %v1043_v11 = vadd.f32 %v6143_v38, %v7783_v18  ;;  %v1037_v24 = vpop.f32.mrb[9].mxu0 }
 0x262   : > { %v1038_v25 = vadd.f32 %v7783_v18, %v1037_v24 }
 0x263   : > { %v1047_v28 = vmax.f32 %v1043_v11, 0.0  ;;  %v7929_v11 = vpop.permute.xlu0 %3889 }
 0x264   : > { %v1046_v23 = vmax.f32 %v1038_v25, 0.0  ;;  %v6148_v39 = vpop.f32.mrb[10].mxu0  ;;  %8725 = vst [vmem:[#allocation19_spill] sm:$0xff] %v7929_v11  ;;  %v7932_v25 = vpop.permute.xlu1 %7139  ;;  %v6987_v11 = vunpack.i.h.bf16 %v7765_v8 }
 0x265   : > { %v1049_v6 = vadd.f32 %v7800_v27, %v1047_v28  ;;  %v1134_v40 = vadd.f32 %v6148_v39, %v7795_v26  ;;  %v1128_v29 = vpop.f32.mrb[11].mxu0  ;;  %8726 = vst [vmem:[#allocation20_spill] sm:$0xff] %v7932_v25 }
 0x266   : > { %v1048_v32 = vadd.f32 %v7800_v27, %v1046_v23  ;;  %v1129_v36 = vadd.f32 %v7795_v26, %v1128_v29  ;;  %v5633_v23 = vld [vmem:[%s8669_s4 + $0x3] ss:$0 sm:$0xff] }
 0x267   : > { %v1138_v38 = vadd.f32 %v1134_v40, %v1049_v6  ;;  %v7934_v28 = vpop.permute.xlu0 %7144 }
 0x268   : > { %v1137_v37 = vadd.f32 %v1129_v36, %v1048_v32  ;;  %8727 = vst [vmem:[#allocation21_spill] sm:$0xff] %v7934_v28  ;;  %v7936_v39 = vpop.permute.xlu1 %3891  ;;  %v6982_v32 = vunpack.i.h.bf16 %v7758_v5  ;;  %v6981_v36 = vunpack.i.l.bf16 %v7758_v5 }
 0x269   : > { %v1140_v30 = vmax.f32 %v1138_v38, 0.0  ;;  %8728 = vst [vmem:[#allocation22_spill] sm:$0xff] %v7936_v39  ;;  %v6986_v39 = vunpack.i.l.bf16 %v7765_v8  ;;  %v6991_v8 = vunpack.i.l.bf16 %v7777_v17 }
 0x26a   : > { %v1139_v24 = vmax.f32 %v1137_v37, 0.0  ;;  %v6647_v25 = vpack.c.bf16 %v6982_v32, %v6981_v36  ;;  %v6996_v32 = vunpack.i.l.bf16 %v7774_v15 }
 0x26b   : > { %1145 = vrot.lane.b32.xlu0 %v1140_v30, %s7313_s15  ;;  %v7943_v40 = vpop.permute.xlu0 %7154 }
 0x26c   : > { %1143 = vrot.lane.b32.xlu1 %v1139_v24, %s7313_s15  ;;  %v7945_v38 = vpop.permute.xlu1 %7149 }
 0x26f   : > { %v7951_v33 = vpop.permute.xlu0 %7159 }
 0x270   : > { %v7957_v5 = vpop.permute.xlu1 %4026 }
 0x273   : > { %v7967_v36 = vpop.permute.xlu0 %4206 }
 0x276   : > { %v6169_v6 = vpop.f32.mrb[12].mxu0 }
 0x277   : > { %v1275_v30 = vadd.f32 %v6169_v6, %v5633_v23  ;;  %v1269_v37 = vpop.f32.mrb[13].mxu0  ;;  %v6651_v6 = vpack.c.bf16 %v6987_v11, %v6986_v39  ;;  %v7971_v11 = vpop.permute.xlu0 %7169 }
 0x278   : > { %v1270_v29 = vadd.f32 %v5633_v23, %v1269_v37  ;;  %v6992_v23 = vunpack.i.h.bf16 %v7777_v17 }
 0x279   : > { %v1279_v28 = vmax.f32 %v1275_v30, 0.0  ;;  %v7969_v30 = vpop.permute.xlu1 %4204 }
 0x27a   : > { %v1278_v24 = vmax.f32 %v1270_v29, 0.0 }
 0x27c   : > { %6172 = vmatprep.mubr.msk.f32.mxu1 %vm339_vm3, %v1278_v24 }
 0x27d   : > { %6173 = vmatmul.mubr.msk.f32.vlgmr.msra.gmra.mrb[6].mxu1 %vm339_vm3, %v1279_v28  ;;  %v6997_v28 = vunpack.i.h.bf16 %v7774_v15 }
 0x27e   : > { %6176 = vmatpush3.msk.msra.mxu1 %vm254_vm0, %v7436_v14  ;;  %6177 = vmatprep.mubr.msk.f32.mxu1 %vm433_vm2, %v7755_v4  ;;  %v6655_v4 = vpack.c.bf16 %v6992_v23, %v6991_v8 }
 0x27f   : > { %6648 = vmatprep.subr.bf16.mxu1 %v6647_v25  ;;  %v6659_v17 = vpack.c.bf16 %v6997_v28, %v6996_v32 }
 0x281   : > { %6178 = vmatmul.mubr.msk.f32.vlgmr.msra.gmra.mrb[8].mxu1 %vm433_vm2, %v7767_v10  ;;  %v7973_v10 = vpop.permute.xlu1 %7164 }
 0x282   : > { %6650 = vmatpush3.bf16.msra.mxu1 %v6647_v25  ;;  %6198 = vmatprep.mubr.msk.f32.mxu1 %vm247_vm1, %v7450_v16  ;;  %v7977_v16 = vpop.permute.xlu0 %4341 }
 0x283   : > { %6652 = vmatprep.subr.bf16.mxu1 %v6651_v6 }
 0x285   : > { %v7979_v15 = vpop.permute.xlu1 %7174 }
 0x286   : > { %6654 = vmatpush3.bf16.msra.mxu1 %v6651_v6  ;;  %v7987_v25 = vpop.permute.xlu0 %4519 }
 0x287   : > { %6656 = vmatprep.subr.bf16.mxu1 %v6655_v4  ;;  %8729 = vst [vmem:[#allocation23_spill] sm:$0xff] %v7987_v25 }
 0x289   : > { %v7991_v39 = vpop.permute.xlu1 %7179 }
 0x28a   : > { %6658 = vmatpush3.bf16.msra.mxu1 %v6655_v4  ;;  %8730 = vst [vmem:[#allocation24_spill] sm:$0xff] %v7991_v39  ;;  %v7993_v37 = vpop.permute.xlu0 %7184 }
 0x28b   : > { %6660 = vmatprep.subr.bf16.mxu1 %v6659_v17  ;;  %8731 = vst [vmem:[#allocation25_spill] sm:$0xff] %v7993_v37 }
 0x28d   : > { %v7995_v29 = vpop.permute.xlu1 %4521 }
 0x28e   : > { %6662 = vmatpush3.bf16.msra.mxu1 %v6659_v17  ;;  %8732 = vst [vmem:[#allocation26_spill] sm:$0xff] %v7995_v29  ;;  %v7997_v24 = vpop.permute.xlu0 %7194 }
 0x28f   : > { %6196 = vmatprep.subr.msk.mxu1 %vm254_vm0, %v7787_v21  ;;  %8733 = vst [vmem:[#allocation27_spill] sm:$0xff] %v7997_v24 }
 0x292   : > { %6197 = vmatpush3.msk.msra.mxu1 %vm254_vm0, %v7787_v21  ;;  %v7999_v21 = vpop.permute.xlu1 %7189 }
 0x293   : > { %6199 = vmatmul.mubr.msk.f32.vlgmr.msra.gmra.mrb[10].mxu1 %vm247_vm1, %v7460_v19  ;;  %6232 = vmatprep.subr.mxu1 %v7491_v22  ;;  %8734 = vst [vmem:[#allocation28_spill] sm:$0xff] %v7999_v21  ;;  %v8001_v19 = vpop.permute.xlu0 %7199 }
 0x294   : > { %6233 = vmatpush3.msra.mxu1 %v7491_v22  ;;  %8735 = vst [vmem:[#allocation29_spill] sm:$0xff] %v8001_v19 }
 0x295   : > { %6237 = vmatprep.subr.msk.mxu1 %vm254_vm0, %v7436_v14 }
 0x296   : > { %v8003_v22 = vpop.permute.xlu1 %4656 }
 0x297   : > { %8736 = vst [vmem:[#allocation30_spill] sm:$0xff] %v8003_v22  ;;  %v8005_v23 = vpop.permute.xlu0 %4836 }
 0x298   : > { %8737 = vst [vmem:[#allocation31_spill] sm:$0xff] %v8005_v23 }
 0x29a   : > { %v8007_v8 = vpop.permute.xlu1 %4834 }
 0x29b   : > { %8738 = vst [vmem:[#allocation32_spill] sm:$0xff] %v8007_v8  ;;  %v8009_v14 = vpop.permute.xlu0 %7209 }
 0x29c   : > { %8739 = vst [vmem:[#allocation33_spill] sm:$0xff] %v8009_v14 }
 0x29e   : > { %v8011_v6 = vpop.permute.xlu1 %7204 }
 0x29f   : > { %8740 = vst [vmem:[#allocation34_spill] sm:$0xff] %v8011_v6  ;;  %v8013_v28 = vpop.permute.xlu0 %4971 }
 0x2a0   : > { %8741 = vst [vmem:[#allocation35_spill] sm:$0xff] %v8013_v28 }
 0x2a2   : > { %v8015_v32 = vpop.permute.xlu1 %7214 }
 0x2a3   : > { %8742 = vst [vmem:[#allocation36_spill] sm:$0xff] %v8015_v32  ;;  %v8017_v4 = vpop.permute.xlu0 %5151 }
 0x2a4   : > { %8743 = vst [vmem:[#allocation37_spill] sm:$0xff] %v8017_v4 }
 0x2a6   : > { %v8019_v17 = vpop.permute.xlu1 %5149 }
 0x2a7   : > { %8744 = vst [vmem:[#allocation38_spill] sm:$0xff] %v8019_v17  ;;  %v8021_v19 = vpop.permute.xlu0 %5432 }
 0x2a8   : > { %8745 = vst [vmem:[#allocation39_spill] sm:$0xff] %v8021_v19 }
 0x2aa   : > { %v8023_v22 = vpop.permute.xlu1 %5430 }
 0x2ab   : > { %8746 = vst [vmem:[#allocation40_spill] sm:$0xff] %v8023_v22 }
 0x2cb   : > { %v831_v23 = vpop.permute.xlu0 %830 }
 0x2cc   : > { %836 = vst.msk [vmem:[%s7820_s9 + $0x10] sm:$0xff] %vm834_vm4, %v831_v23  ;;  %v829_v8 = vpop.permute.xlu1 %828 }
 0x2cd   : > { %835 = vst.msk [vmem:[%s7820_s9] sm:$0xff] %vm834_vm4, %v829_v8  ;;  %vm4614_vm4 = vcmask 917312  }
 0x2dd   : > { %v1146_v14 = vpop.permute.xlu0 %1145 }
 0x2de   : > { %1151 = vst.msk [vmem:[%s7820_s9 + $0x10] sm:$0xff] %vm1149_vm5, %v1146_v14  ;;  %v1144_v6 = vpop.permute.xlu1 %1143 }
 0x2df   : > { %1150 = vst.msk [vmem:[%s7820_s9] sm:$0xff] %vm1149_vm5, %v1144_v6  ;;  %vm4929_vm5 = vcmask 982912  }
 0x350   : > { %v6174_v28 = vpop.f32.mrb[6].mxu1 }
 0x351   : > { %v1358_v32 = vadd.f32 %v6174_v28, %v7783_v18  ;;  %v1352_v4 = vpop.f32.mrb[7].mxu1  ;;  %v5642_v28 = vld [vmem:[%s8669_s4 + $0x4] ss:$0 sm:$0xff] }
 0x352   : > { %v1353_v17 = vadd.f32 %v7783_v18, %v1352_v4 }
 0x353   : > { %v1362_v24 = vmax.f32 %v1358_v32, 0.0  ;;  %v7001_v32 = vunpack.i.l.bf16 %v7785_v20 }
 0x354   : > { %v1361_v19 = vmax.f32 %v1353_v17, 0.0  ;;  %v6179_v29 = vpop.f32.mrb[8].mxu1 }
 0x355   : > { %v1364_v22 = vadd.f32 %v7800_v27, %v1362_v24  ;;  %v1449_v23 = vadd.f32 %v6179_v29, %v7795_v26  ;;  %v1443_v21 = vpop.f32.mrb[9].mxu1  ;;  %v7002_v29 = vunpack.i.h.bf16 %v7785_v20  ;;  %v7012_v20 = vunpack.i.h.bf16 %v7816_v41 }
 0x356   : > { %v1363_v8 = vadd.f32 %v7800_v27, %v1361_v19  ;;  %v1444_v14 = vadd.f32 %v7795_v26, %v1443_v21 }
 0x357   : > { %v1453_v25 = vadd.f32 %v1449_v23, %v1364_v22  ;;  %v8049_v23 = vld [vmem:[%s8668_s3] sm:$0xf] }
 0x358   : > { %v1452_v6 = vadd.f32 %v1444_v14, %v1363_v8  ;;  %v8060_v14 = vld [vmem:[%s7443_s13] sm:$0xff] }
 0x359   : > { %v1455_v37 = vmax.f32 %v1453_v25, 0.0  ;;  %v7007_v25 = vunpack.i.h.bf16 %v7818_v42 }
 0x35a   : > { %v1454_v39 = vmax.f32 %v1452_v6, 0.0  ;;  %v7017_v6 = vunpack.i.h.bf16 %v7828_v59 }
 0x35b   : > { %1460 = vrot.lane.b32.xlu0 %v1455_v37, %s7311_s17  ;;  %v7006_v37 = vunpack.i.l.bf16 %v7818_v42  ;;  %v7011_v42 = vunpack.i.l.bf16 %v7816_v41 }
 0x35c   : > { %1458 = vrot.lane.b32.xlu1 %v1454_v39, %s7311_s17  ;;  %v6663_v39 = vpack.c.bf16 %v7002_v29, %v7001_v32 }
 0x35d   : > { %v6667_v8 = vpack.c.bf16 %v7007_v25, %v7006_v37 }
 0x366   : > { %v6200_v24 = vpop.f32.mrb[10].mxu1 }
 0x367   : > { %v1590_v19 = vadd.f32 %v6200_v24, %v5642_v28  ;;  %v1584_v4 = vpop.f32.mrb[11].mxu1 }
 0x368   : > { %v1585_v21 = vadd.f32 %v5642_v28, %v1584_v4  ;;  %v6671_v28 = vpack.c.bf16 %v7012_v20, %v7011_v42 }
 0x369   : > { %v1594_v17 = vmax.f32 %v1590_v19, 0.0 }
 0x36a   : > { %v1593_v22 = vmax.f32 %v1585_v21, 0.0 }
 0x36c   : > { %6203 = vmatprep.mubr.msk.f32.mxu0 %vm339_vm3, %v1593_v22 }
 0x36d   : > { %6204 = vmatmul.mubr.msk.f32.vlgmr.msra.gmra.mrb[14].mxu0 %vm339_vm3, %v1594_v17 }
 0x36e   : > { %6207 = vmatpush3.msk.msra.mxu0 %vm254_vm0, %v8049_v23  ;;  %6208 = vmatprep.mubr.msk.f32.mxu0 %vm433_vm2, %v7809_v34  ;;  %v7016_v34 = vunpack.i.l.bf16 %v7828_v59  ;;  %v8078_v59 = vld [vmem:[%s8667_s2] sm:$0xff] }
 0x36f   : > { %6664 = vmatprep.subr.bf16.mxu0 %v6663_v39 }
 0x370   : > { %v6675_v41 = vpack.c.bf16 %v7017_v6, %v7016_v34 }
 0x371   : > { %6209 = vmatmul.mubr.msk.f32.vlgmr.msra.gmra.mrb[16].mxu0 %vm433_vm2, %v7804_v31  ;;  %v8071_v31 = vld [vmem:[%s7443_s13 + $0x8] sm:$0xff] }
 0x372   : > { %6666 = vmatpush3.bf16.msra.mxu0 %v6663_v39  ;;  %6229 = vmatprep.mubr.msk.f32.mxu0 %vm247_vm1, %v8060_v14 }
 0x373   : > { %6668 = vmatprep.subr.bf16.mxu0 %v6667_v8 }
 0x376   : > { %6670 = vmatpush3.bf16.msra.mxu0 %v6667_v8 }
 0x377   : > { %6672 = vmatprep.subr.bf16.mxu0 %v6671_v28 }
 0x37a   : > { %6674 = vmatpush3.bf16.msra.mxu0 %v6671_v28 }
 0x37b   : > { %6676 = vmatprep.subr.bf16.mxu0 %v6675_v41 }
 0x37e   : > { %6678 = vmatpush3.bf16.msra.mxu0 %v6675_v41  ;;  %v5651_v41 = vld [vmem:[%s8669_s4 + $0x5] ss:$0 sm:$0xff] }
 0x37f   : > { %6227 = vmatprep.subr.msk.mxu0 %vm254_vm0, %v7826_v58 }
 0x382   : > { %6228 = vmatpush3.msk.msra.mxu0 %vm254_vm0, %v7826_v58 }
 0x383   : > { %6230 = vmatmul.mubr.msk.f32.vlgmr.msra.gmra.mrb[18].mxu0 %vm247_vm1, %v8071_v31  ;;  %6263 = vmatprep.subr.mxu0 %v8078_v59 }
 0x384   : > { %6264 = vmatpush3.msra.mxu0 %v8078_v59 }
 0x385   : > { %6268 = vmatprep.subr.msk.mxu0 %vm254_vm0, %v8049_v23 }
 0x3cd   : > { %v1461_v24 = vpop.permute.xlu0 %1460 }
 0x3ce   : > { %1466 = vst.msk [vmem:[%s7820_s9 + $0x10] sm:$0xff] %vm1464_vm6, %v1461_v24  ;;  %v1459_v58 = vpop.permute.xlu1 %1458 }
 0x3cf   : > { %1465 = vst.msk [vmem:[%s7820_s9] sm:$0xff] %vm1464_vm6, %v1459_v58  ;;  %v7022_v58 = vunpack.i.h.bf16 %v7832_v44 }
 0x440   : > { %v6205_v29 = vpop.f32.mrb[14].mxu0 }
 0x441   : > { %v1673_v32 = vadd.f32 %v6205_v29, %v7783_v18  ;;  %v1667_v19 = vpop.f32.mrb[15].mxu0  ;;  %v7021_v29 = vunpack.i.l.bf16 %v7832_v44  ;;  %v7032_v44 = vunpack.i.h.bf16 %v7840_v48 }
 0x442   : > { %v1668_v4 = vadd.f32 %v7783_v18, %v1667_v19 }
 0x443   : > { %v1677_v21 = vmax.f32 %v1673_v32, 0.0 }
 0x444   : > { %v1676_v22 = vmax.f32 %v1668_v4, 0.0  ;;  %v6210_v25 = vpop.f32.mrb[16].mxu0 }
 0x445   : > { %v1679_v37 = vadd.f32 %v7800_v27, %v1677_v21  ;;  %v1764_v17 = vadd.f32 %v6210_v25, %v7795_v26  ;;  %v1758_v39 = vpop.f32.mrb[17].mxu0  ;;  %v7026_v25 = vunpack.i.l.bf16 %v7834_v45 }
 0x446   : > { %v1678_v20 = vadd.f32 %v7800_v27, %v1676_v22  ;;  %v1759_v42 = vadd.f32 %v7795_v26, %v1758_v39  ;;  %v7027_v22 = vunpack.i.h.bf16 %v7834_v45  ;;  %v7031_v39 = vunpack.i.l.bf16 %v7840_v48 }
 0x447   : > { %v1768_v8 = vadd.f32 %v1764_v17, %v1679_v37  ;;  %v6679_v17 = vpack.c.bf16 %v7022_v58, %v7021_v29  ;;  %v7037_v45 = vunpack.i.h.bf16 %v7838_v47 }
 0x448   : > { %v1767_v6 = vadd.f32 %v1759_v42, %v1678_v20  ;;  %v6683_v20 = vpack.c.bf16 %v7027_v22, %v7026_v25  ;;  %v7036_v42 = vunpack.i.l.bf16 %v7838_v47 }
 0x449   : > { %v1770_v34 = vmax.f32 %v1768_v8, 0.0 }
 0x44a   : > { %v1769_v28 = vmax.f32 %v1767_v6, 0.0  ;;  %v6691_v48 = vpack.c.bf16 %v7037_v45, %v7036_v42 }
 0x44b   : > { %1775 = vrot.lane.b32.xlu0 %v1770_v34, %s7310_s23 }
 0x44c   : > { %1773 = vrot.lane.b32.xlu1 %v1769_v28, %s7310_s23  ;;  %s8613_s23 = scalar_lea.hbm %s8670_s5, %s5766_s25 }
 0x456   : > { %v6231_v24 = vpop.f32.mrb[18].mxu0 }
 0x457   : > { %v1905_v32 = vadd.f32 %v6231_v24, %v5651_v41  ;;  %v1899_v19 = vpop.f32.mrb[19].mxu0 }
 0x458   : > { %v1900_v4 = vadd.f32 %v5651_v41, %v1899_v19 }
 0x459   : > { %v1909_v37 = vmax.f32 %v1905_v32, 0.0 }
 0x45a   : > { %v1908_v21 = vmax.f32 %v1900_v4, 0.0 }
 0x45c   : > { %6234 = vmatprep.mubr.msk.f32.mxu1 %vm339_vm3, %v1908_v21 }
 0x45d   : > { %6235 = vmatmul.mubr.msk.f32.vlgmr.msra.gmra.mrb[12].mxu1 %vm339_vm3, %v1909_v37 }
 0x45e   : > { %6238 = vmatpush3.msk.msra.mxu1 %vm254_vm0, %v8049_v23  ;;  %6239 = vmatprep.mubr.msk.f32.mxu1 %vm433_vm2, %v7830_v43  ;;  %v6687_v43 = vpack.c.bf16 %v7032_v44, %v7031_v39  ;;  %v7042_v39 = vunpack.i.h.bf16 %v7842_v49 }
 0x45f   : > { %6680 = vmatprep.subr.bf16.mxu1 %v6679_v17 }
 0x461   : > { %6240 = vmatmul.mubr.msk.f32.vlgmr.msra.gmra.mrb[14].mxu1 %vm433_vm2, %v7836_v46 }
 0x462   : > { %6682 = vmatpush3.bf16.msra.mxu1 %v6679_v17  ;;  %6260 = vmatprep.mubr.msk.f32.mxu1 %vm247_vm1, %v8060_v14  ;;  %v5660_v17 = vld [vmem:[%s8669_s4 + $0x6] ss:$0 sm:$0xff] }
 0x463   : > { %6684 = vmatprep.subr.bf16.mxu1 %v6683_v20 }
 0x466   : > { %6686 = vmatpush3.bf16.msra.mxu1 %v6683_v20  ;;  %v7041_v20 = vunpack.i.l.bf16 %v7842_v49  ;;  %v7052_v49 = vunpack.i.h.bf16 %v7850_v53 }
 0x467   : > { %6688 = vmatprep.subr.bf16.mxu1 %v6687_v43 }
 0x46a   : > { %6690 = vmatpush3.bf16.msra.mxu1 %v6687_v43 }
 0x46b   : > { %6692 = vmatprep.subr.bf16.mxu1 %v6691_v48 }
 0x46e   : > { %6694 = vmatpush3.bf16.msra.mxu1 %v6691_v48 }
 0x46f   : > { %6258 = vmatprep.subr.msk.mxu1 %vm254_vm0, %v7844_v50 }
 0x472   : > { %6259 = vmatpush3.msk.msra.mxu1 %vm254_vm0, %v7844_v50 }
 0x473   : > { %6261 = vmatmul.mubr.msk.f32.vlgmr.msra.gmra.mrb[16].mxu1 %vm247_vm1, %v8071_v31  ;;  %6294 = vmatprep.subr.mxu1 %v8078_v59 }
 0x474   : > { %6295 = vmatpush3.msra.mxu1 %v8078_v59 }
 0x475   : > { %6299 = vmatprep.subr.msk.mxu1 %vm254_vm0, %v8049_v23 }
 0x4bd   : > { %v1776_v46 = vpop.permute.xlu0 %1775 }
 0x4be   : > { %1781 = vst.msk [vmem:[%s7820_s9 + $0x10] sm:$0xff] %vm1779_vm7, %v1776_v46  ;;  %v1774_v47 = vpop.permute.xlu1 %1773  ;;  %v6695_v46 = vpack.c.bf16 %v7042_v39, %v7041_v20 }
 0x4bf   : > { %1780 = vst.msk [vmem:[%s7820_s9] sm:$0xff] %vm1779_vm7, %v1774_v47  ;;  %v7047_v47 = vunpack.i.h.bf16 %v7852_v54 }
 0x530   : > { %v6236_v8 = vpop.f32.mrb[12].mxu1 }
 0x531   : > { %v1988_v6 = vadd.f32 %v6236_v8, %v7783_v18  ;;  %v1982_v34 = vpop.f32.mrb[13].mxu1  ;;  %v7046_v8 = vunpack.i.l.bf16 %v7852_v54 }
 0x532   : > { %v1983_v50 = vadd.f32 %v7783_v18, %v1982_v34  ;;  %v7051_v34 = vunpack.i.l.bf16 %v7850_v53 }
 0x533   : > { %v1992_v28 = vmax.f32 %v1988_v6, 0.0 }
 0x534   : > { %v1991_v41 = vmax.f32 %v1983_v50, 0.0  ;;  %v6241_v24 = vpop.f32.mrb[14].mxu1  ;;  %v6699_v50 = vpack.c.bf16 %v7047_v47, %v7046_v8  ;;  %v6703_v54 = vpack.c.bf16 %v7052_v49, %v7051_v34  ;;  %v7067_v34 = vunpack.i.h.bf16 %v7862_v12 }
 0x535   : > { %v1994_v58 = vadd.f32 %v7800_v27, %v1992_v28  ;;  %v2079_v29 = vadd.f32 %v6241_v24, %v7795_v26  ;;  %v2073_v32 = vpop.f32.mrb[15].mxu1  ;;  %v7057_v28 = vunpack.i.h.bf16 %v7856_v3 }
 0x536   : > { %v1993_v19 = vadd.f32 %v7800_v27, %v1991_v41  ;;  %v2074_v4 = vadd.f32 %v7795_v26, %v2073_v32  ;;  %v7056_v41 = vunpack.i.l.bf16 %v7856_v3 }
 0x537   : > { %v2083_v21 = vadd.f32 %v2079_v29, %v1994_v58 }
 0x538   : > { %v2082_v22 = vadd.f32 %v2074_v4, %v1993_v19 }
 0x539   : > { %v2085_v25 = vmax.f32 %v2083_v21, 0.0 }
 0x53a   : > { %v2084_v37 = vmax.f32 %v2082_v22, 0.0 }
 0x53b   : > { %2090 = vrot.lane.b32.xlu0 %v2085_v25, %s7308_s30 }
 0x53c   : > { %2088 = vrot.lane.b32.xlu1 %v2084_v37, %s7308_s30  ;;  %s8747_s30 = smov 48  }
 0x546   : > { %v6262_v44 = vpop.f32.mrb[16].mxu1 }
 0x547   : > { %v2220_v45 = vadd.f32 %v6262_v44, %v5660_v17  ;;  %v2214_v42 = vpop.f32.mrb[17].mxu1 }
 0x548   : > { %v2215_v43 = vadd.f32 %v5660_v17, %v2214_v42 }
 0x549   : > { %v2224_v6 = vmax.f32 %v2220_v45, 0.0  ;;  %v5669_v45 = vld [vmem:[%s8669_s4 + $0x7] ss:$0 sm:$0xff] }
 0x54a   : > { %v2223_v48 = vmax.f32 %v2215_v43, 0.0  ;;  %v7062_v43 = vunpack.i.h.bf16 %v7860_v9 }
 0x54c   : > { %6265 = vmatprep.mubr.msk.f32.mxu0 %vm339_vm3, %v2223_v48  ;;  %v7061_v48 = vunpack.i.l.bf16 %v7860_v9 }
 0x54d   : > { %6266 = vmatmul.mubr.msk.f32.vlgmr.msra.gmra.mrb[20].mxu0 %vm339_vm3, %v2224_v6 }
 0x54e   : > { %6269 = vmatpush3.msk.msra.mxu0 %vm254_vm0, %v8049_v23  ;;  %6270 = vmatprep.mubr.msk.f32.mxu0 %vm433_vm2, %v7848_v52  ;;  %v6707_v52 = vpack.c.bf16 %v7057_v28, %v7056_v41  ;;  %v6711_v49 = vpack.c.bf16 %v7062_v43, %v7061_v48  ;;  %v7072_v28 = vunpack.i.h.bf16 %v7868_v13  ;;  %v7071_v41 = vunpack.i.l.bf16 %v7868_v13 }
 0x54f   : > { %6696 = vmatprep.subr.bf16.mxu0 %v6695_v46 }
 0x551   : > { %6271 = vmatmul.mubr.msk.f32.vlgmr.msra.gmra.mrb[22].mxu0 %vm433_vm2, %v7846_v51 }
 0x552   : > { %6698 = vmatpush3.bf16.msra.mxu0 %v6695_v46  ;;  %6291 = vmatprep.mubr.msk.f32.mxu0 %vm247_vm1, %v8060_v14 }
 0x553   : > { %6700 = vmatprep.subr.bf16.mxu0 %v6699_v50 }
 0x556   : > { %6702 = vmatpush3.bf16.msra.mxu0 %v6699_v50  ;;  %v7066_v50 = vunpack.i.l.bf16 %v7862_v12  ;;  %v7077_v12 = vunpack.i.h.bf16 %v7866_v60 }
 0x557   : > { %6704 = vmatprep.subr.bf16.mxu0 %v6703_v54 }
 0x558   : > { %v6715_v9 = vpack.c.bf16 %v7067_v34, %v7066_v50  ;;  %v7091_v34 = vunpack.i.l.bf16 %v7878_v1 }
 0x55a   : > { %6706 = vmatpush3.bf16.msra.mxu0 %v6703_v54 }
 0x55b   : > { %6708 = vmatprep.subr.bf16.mxu0 %v6707_v52 }
 0x55e   : > { %6710 = vmatpush3.bf16.msra.mxu0 %v6707_v52  ;;  %v7076_v52 = vunpack.i.l.bf16 %v7866_v60 }
 0x55f   : > { %6289 = vmatprep.subr.msk.mxu0 %vm254_vm0, %v7854_v55 }
 0x562   : > { %6290 = vmatpush3.msk.msra.mxu0 %vm254_vm0, %v7854_v55 }
 0x563   : > { %6292 = vmatmul.mubr.msk.f32.vlgmr.msra.gmra.mrb[24].mxu0 %vm247_vm1, %v8071_v31  ;;  %6325 = vmatprep.subr.mxu0 %v8078_v59 }
 0x564   : > { %6326 = vmatpush3.msra.mxu0 %v8078_v59 }
 0x565   : > { %6330 = vmatprep.subr.msk.mxu0 %vm254_vm0, %v8049_v23 }
 0x5ad   : > { %v2091_v51 = vpop.permute.xlu0 %2090 }
 0x5ae   : > { %2096 = vst.msk [vmem:[%s7820_s9 + $0x10] sm:$0xff] %vm2094_vm8, %v2091_v51  ;;  %v2089_v53 = vpop.permute.xlu1 %2088  ;;  %v6719_v51 = vpack.c.bf16 %v7072_v28, %v7071_v41 }
 0x5af   : > { %2095 = vst.msk [vmem:[%s7820_s9] sm:$0xff] %vm2094_vm8, %v2089_v53 }
 0x620   : > { %v6267_v3 = vpop.f32.mrb[20].mxu0 }
 0x621   : > { %v2303_v24 = vadd.f32 %v6267_v3, %v7783_v18  ;;  %v2297_v58 = vpop.f32.mrb[21].mxu0 }
 0x622   : > { %v2298_v55 = vadd.f32 %v7783_v18, %v2297_v58 }
 0x623   : > { %v2307_v29 = vmax.f32 %v2303_v24, 0.0 }
 0x624   : > { %v2306_v32 = vmax.f32 %v2298_v55, 0.0  ;;  %v6272_v19 = vpop.f32.mrb[22].mxu0 }
 0x625   : > { %v2309_v4 = vadd.f32 %v7800_v27, %v2307_v29  ;;  %v2394_v21 = vadd.f32 %v6272_v19, %v7795_v26  ;;  %v2388_v22 = vpop.f32.mrb[23].mxu0 }
 0x626   : > { %v2308_v25 = vadd.f32 %v7800_v27, %v2306_v32  ;;  %v2389_v37 = vadd.f32 %v7795_v26, %v2388_v22 }
 0x627   : > { %v2398_v17 = vadd.f32 %v2394_v21, %v2309_v4 }
 0x628   : > { %v2397_v44 = vadd.f32 %v2389_v37, %v2308_v25 }
 0x629   : > { %v2400_v39 = vmax.f32 %v2398_v17, 0.0 }
 0x62a   : > { %v2399_v20 = vmax.f32 %v2397_v44, 0.0  ;;  %v5678_v44 = vld [vmem:[%s8669_s4 + $0x8] ss:$0 sm:$0xff] }
 0x62b   : > { %2405 = vrot.lane.b32.xlu0 %v2400_v39, %s8747_s30 }
 0x62c   : > { %2403 = vrot.lane.b32.xlu1 %v2399_v20, %s8747_s30  ;;  %v7082_v20 = vunpack.i.h.bf16 %v7870_v61  ;;  %s7316_s30 = smov [#allocation2]  }
 0x636   : > { %v6293_v42 = vpop.f32.mrb[24].mxu0 }
 0x637   : > { %v2535_v46 = vadd.f32 %v6293_v42, %v5669_v45  ;;  %v2529_v47 = vpop.f32.mrb[25].mxu0 }
 0x638   : > { %v2530_v8 = vadd.f32 %v5669_v45, %v2529_v47  ;;  %v7081_v45 = vunpack.i.l.bf16 %v7870_v61  ;;  %v7092_v61 = vunpack.i.h.bf16 %v7878_v1  ;;  %v8749_v1 = vld [vmem:[#allocation5_spill] sm:$0xff] }
 0x639   : > { %v2539_v54 = vmax.f32 %v2535_v46, 0.0 }
 0x63a   : > { %v2538_v6 = vmax.f32 %v2530_v8, 0.0  ;;  %v6727_v47 = vpack.c.bf16 %v7082_v20, %v7081_v45  ;;  %v7087_v8 = vunpack.i.h.bf16 %v7880_v2  ;;  %v8752_v45 = vld [vmem:[#allocation6_spill] sm:$0xff] }
 0x63c   : > { %6296 = vmatprep.mubr.msk.f32.mxu1 %vm339_vm3, %v2538_v6  ;;  %v7086_v6 = vunpack.i.l.bf16 %v7880_v2  ;;  %v6735_v2 = vpack.c.bf16 %v7092_v61, %v7091_v34 }
 0x63d   : > { %6297 = vmatmul.mubr.msk.f32.vlgmr.msra.gmra.mrb[18].mxu1 %vm339_vm3, %v2539_v54  ;;  %v7097_v54 = vunpack.i.h.bf16 %v7884_v7 }
 0x63e   : > { %6300 = vmatpush3.msk.msra.mxu1 %vm254_vm0, %v8049_v23  ;;  %6301 = vmatprep.mubr.msk.f32.mxu1 %vm433_vm2, %v7858_v56  ;;  %v6723_v56 = vpack.c.bf16 %v7077_v12, %v7076_v52  ;;  %v6731_v50 = vpack.c.bf16 %v7087_v8, %v7086_v6  ;;  %v8755_v8 = vld [vmem:[#allocation10_spill] sm:$0xff] }
 0x63f   : > { %6712 = vmatprep.subr.bf16.mxu1 %v6711_v49  ;;  %v7117_v6 = vunpack.i.h.bf16 %v8755_v8 }
 0x641   : > { %6302 = vmatmul.mubr.msk.f32.vlgmr.msra.gmra.mrb[20].mxu1 %vm433_vm2, %v7864_v57 }
 0x642   : > { %6714 = vmatpush3.bf16.msra.mxu1 %v6711_v49  ;;  %6322 = vmatprep.mubr.msk.f32.mxu1 %vm247_vm1, %v8060_v14 }
 0x643   : > { %6716 = vmatprep.subr.bf16.mxu1 %v6715_v9 }
 0x646   : > { %6718 = vmatpush3.bf16.msra.mxu1 %v6715_v9  ;;  %v7096_v9 = vunpack.i.l.bf16 %v7884_v7 }
 0x647   : > { %6720 = vmatprep.subr.bf16.mxu1 %v6719_v51 }
 0x64a   : > { %6722 = vmatpush3.bf16.msra.mxu1 %v6719_v51 }
 0x64b   : > { %6724 = vmatprep.subr.bf16.mxu1 %v6723_v56 }
 0x64e   : > { %6726 = vmatpush3.bf16.msra.mxu1 %v6723_v56 }
 0x64f   : > { %6320 = vmatprep.subr.msk.mxu1 %vm254_vm0, %v7872_v62 }
 0x652   : > { %6321 = vmatpush3.msk.msra.mxu1 %vm254_vm0, %v7872_v62 }
 0x653   : > { %6323 = vmatmul.mubr.msk.f32.vlgmr.msra.gmra.mrb[22].mxu1 %vm247_vm1, %v8071_v31  ;;  %6356 = vmatprep.subr.mxu1 %v8078_v59 }
 0x654   : > { %6357 = vmatpush3.msra.mxu1 %v8078_v59 }
 0x655   : > { %6361 = vmatprep.subr.msk.mxu1 %vm254_vm0, %v8049_v23 }
 0x69d   : > { %v2406_v57 = vpop.permute.xlu0 %2405 }
 0x69e   : > { %2411 = vst.msk [vmem:[%s7820_s9 + $0x10] sm:$0xff] %vm2409_vm9, %v2406_v57  ;;  %v2404_v60 = vpop.permute.xlu1 %2403 }
 0x69f   : > { %2410 = vst.msk [vmem:[%s7820_s9] sm:$0xff] %vm2409_vm9, %v2404_v60 }
 0x710   : > { %v6298_v13 = vpop.f32.mrb[18].mxu1 }
 0x711   : > { %v2618_v53 = vadd.f32 %v6298_v13, %v7783_v18  ;;  %v2612_v3 = vpop.f32.mrb[19].mxu1 }
 0x712   : > { %v2613_v62 = vadd.f32 %v7783_v18, %v2612_v3 }
 0x713   : > { %v2622_v24 = vmax.f32 %v2618_v53, 0.0 }
 0x714   : > { %v2621_v58 = vmax.f32 %v2613_v62, 0.0  ;;  %v6303_v55 = vpop.f32.mrb[20].mxu1 }
 0x715   : > { %v2624_v29 = vadd.f32 %v7800_v27, %v2622_v24  ;;  %v2709_v32 = vadd.f32 %v6303_v55, %v7795_v26  ;;  %v2703_v19 = vpop.f32.mrb[21].mxu1 }
 0x716   : > { %v2623_v4 = vadd.f32 %v7800_v27, %v2621_v58  ;;  %v2704_v21 = vadd.f32 %v7795_v26, %v2703_v19  ;;  %v8750_v19 = vld [vmem:[#allocation7_spill] sm:$0xff] }
 0x717   : > { %v2713_v22 = vadd.f32 %v2709_v32, %v2624_v29 }
 0x718   : > { %v2712_v25 = vadd.f32 %v2704_v21, %v2623_v4  ;;  %v7102_v4 = vunpack.i.h.bf16 %v8750_v19  ;;  %v7101_v21 = vunpack.i.l.bf16 %v8750_v19 }
 0x719   : > { %v2715_v37 = vmax.f32 %v2713_v22, 0.0 }
 0x71a   : > { %v2714_v17 = vmax.f32 %v2712_v25, 0.0 }
 0x71b   : > { %2720 = vrot.lane.b32.xlu0 %v2715_v37, %s8748_s7  ;;  %v6743_v37 = vpack.c.bf16 %v7102_v4, %v7101_v21 }
 0x71c   : > { %2718 = vrot.lane.b32.xlu1 %v2714_v17, %s8748_s7  ;;  %v8751_v17 = vld [vmem:[#allocation8_spill] sm:$0xff] }
 0x726   : > { %v6324_v39 = vpop.f32.mrb[22].mxu1 }
 0x727   : > { %v2850_v42 = vadd.f32 %v6324_v39, %v5678_v44  ;;  %v2844_v43 = vpop.f32.mrb[23].mxu1  ;;  %v7106_v39 = vunpack.i.l.bf16 %v8751_v17 }
 0x728   : > { %v2845_v48 = vadd.f32 %v5678_v44, %v2844_v43  ;;  %v7107_v44 = vunpack.i.h.bf16 %v8751_v17  ;;  %v8753_v43 = vld [vmem:[#allocation11_spill] sm:$0xff] }
 0x729   : > { %v2854_v49 = vmax.f32 %v2850_v42, 0.0 }
 0x72a   : > { %v2853_v46 = vmax.f32 %v2845_v48, 0.0  ;;  %v6747_v42 = vpack.c.bf16 %v7107_v44, %v7106_v39  ;;  %v7112_v48 = vunpack.i.h.bf16 %v8753_v43  ;;  %v8759_v39 = vld [vmem:[#allocation15_spill] sm:$0xff] }
 0x72c   : > { %6327 = vmatprep.mubr.msk.f32.mxu0 %vm339_vm3, %v2853_v46  ;;  %v7111_v46 = vunpack.i.l.bf16 %v8753_v43 }
 0x72d   : > { %6328 = vmatmul.mubr.msk.f32.vlgmr.msra.gmra.mrb[26].mxu0 %vm339_vm3, %v2854_v49  ;;  %v7116_v49 = vunpack.i.l.bf16 %v8755_v8  ;;  %v7136_v8 = vunpack.i.l.bf16 %v7926_v35 }
 0x72e   : > { %6331 = vmatpush3.msk.msra.mxu0 %vm254_vm0, %v8049_v23  ;;  %6332 = vmatprep.mubr.msk.f32.mxu0 %vm433_vm2, %v7876_v0  ;;  %v6739_v0 = vpack.c.bf16 %v7097_v54, %v7096_v9  ;;  %v6751_v61 = vpack.c.bf16 %v7112_v48, %v7111_v46  ;;  %v8761_v48 = vld [vmem:[#allocation14_spill] sm:$0xff] }
 0x72f   : > { %6728 = vmatprep.subr.bf16.mxu0 %v6727_v47  ;;  %v6755_v34 = vpack.c.bf16 %v7117_v6, %v7116_v49  ;;  %v8762_v49 = vld [vmem:[#allocation18_spill] sm:$0xff] }
 0x731   : > { %6333 = vmatmul.mubr.msk.f32.vlgmr.msra.gmra.mrb[28].mxu0 %vm433_vm2, %v7874_v63 }
 0x732   : > { %6730 = vmatpush3.bf16.msra.mxu0 %v6727_v47  ;;  %6353 = vmatprep.mubr.msk.f32.mxu0 %vm247_vm1, %v8060_v14  ;;  %v8754_v47 = vld [vmem:[#allocation9_spill] sm:$0xff] }
 0x733   : > { %6732 = vmatprep.subr.bf16.mxu0 %v6731_v50 }
 0x736   : > { %6734 = vmatpush3.bf16.msra.mxu0 %v6731_v50  ;;  %v8756_v50 = vld [vmem:[#allocation13_spill] sm:$0xff] }
 0x737   : > { %6736 = vmatprep.subr.bf16.mxu0 %v6735_v2 }
 0x73a   : > { %6738 = vmatpush3.bf16.msra.mxu0 %v6735_v2 }
 0x73b   : > { %6740 = vmatprep.subr.bf16.mxu0 %v6739_v0 }
 0x73e   : > { %6742 = vmatpush3.bf16.msra.mxu0 %v6739_v0  ;;  %v8294_v0 = vld [vmem:[%s8669_s4 + $0x11] ss:$0 sm:$0xff] }
 0x73f   : > { %6351 = vmatprep.subr.msk.mxu0 %vm254_vm0, %v8749_v1 }
 0x742   : > { %6352 = vmatpush3.msk.msra.mxu0 %vm254_vm0, %v8749_v1 }
 0x743   : > { %6354 = vmatmul.mubr.msk.f32.vlgmr.msra.gmra.mrb[30].mxu0 %vm247_vm1, %v8071_v31  ;;  %6387 = vmatprep.subr.mxu0 %v8078_v59 }
 0x744   : > { %6388 = vmatpush3.msra.mxu0 %v8078_v59 }
 0x745   : > { %6392 = vmatprep.subr.msk.mxu0 %vm254_vm0, %v8049_v23 }
 0x78d   : > { %v2721_v63 = vpop.permute.xlu0 %2720 }
 0x78e   : > { %2726 = vst.msk [vmem:[%s7820_s9 + $0x10] sm:$0xff] %vm2724_vm10, %v2721_v63  ;;  %v2719_v7 = vpop.permute.xlu1 %2718 }
 0x78f   : > { %2725 = vst.msk [vmem:[%s7820_s9] sm:$0xff] %vm2724_vm10, %v2719_v7 }
 0x800   : > { %v6329_v28 = vpop.f32.mrb[26].mxu0 }
 0x801   : > { %v2933_v41 = vadd.f32 %v6329_v28, %v7783_v18  ;;  %v2927_v12 = vpop.f32.mrb[27].mxu0 }
 0x802   : > { %v2928_v52 = vadd.f32 %v7783_v18, %v2927_v12  ;;  %v5687_v18 = vld [vmem:[%s8669_s4 + $0x9] ss:$0 sm:$0xff] }
 0x803   : > { %v2937_v51 = vmax.f32 %v2933_v41, 0.0 }
 0x804   : > { %v2936_v56 = vmax.f32 %v2928_v52, 0.0  ;;  %v6334_v57 = vpop.f32.mrb[28].mxu0  ;;  %v8301_v52 = vld [vmem:[%s8669_s4 + $0x13] ss:$0 sm:$0xff] }
 0x805   : > { %v2939_v60 = vadd.f32 %v7800_v27, %v2937_v51  ;;  %v3024_v13 = vadd.f32 %v6334_v57, %v7795_v26  ;;  %v3018_v53 = vpop.f32.mrb[29].mxu0 }
 0x806   : > { %v2938_v3 = vadd.f32 %v7800_v27, %v2936_v56  ;;  %v3019_v62 = vadd.f32 %v7795_v26, %v3018_v53  ;;  %v8307_v56 = vld [vmem:[%s8669_s4 + $0x14] ss:$0 sm:$0xff] }
 0x807   : > { %v3028_v24 = vadd.f32 %v3024_v13, %v2939_v60 }
 0x808   : > { %v3027_v58 = vadd.f32 %v3019_v62, %v2938_v3 }
 0x809   : > { %v3030_v55 = vmax.f32 %v3028_v24, 0.0 }
 0x80a   : > { %v3029_v29 = vmax.f32 %v3027_v58, 0.0 }
 0x80b   : > { %3035 = vrot.lane.b32.xlu0 %v3030_v55, %s7304_s26  ;;  %v5696_v55 = vld [vmem:[%s8669_s4 + $0xa] ss:$0 sm:$0xff] }
 0x80c   : > { %3033 = vrot.lane.b32.xlu1 %v3029_v29, %s7304_s26 }
 0x816   : > { %v6355_v32 = vpop.f32.mrb[30].mxu0 }
 0x817   : > { %v3165_v27 = vadd.f32 %v6355_v32, %v5687_v18  ;;  %v3159_v22 = vpop.f32.mrb[31].mxu0 }
 0x818   : > { %v3160_v26 = vadd.f32 %v5687_v18, %v3159_v22  ;;  %v8757_v18 = vld [vmem:[#allocation12_spill] sm:$0xff] }
 0x819   : > { %v3169_v20 = vmax.f32 %v3165_v27, 0.0  ;;  %v7122_v32 = vunpack.i.h.bf16 %v8757_v18  ;;  %v7121_v19 = vunpack.i.l.bf16 %v8757_v18 }
 0x81a   : > { %v3168_v25 = vmax.f32 %v3160_v26, 0.0 }
 0x81b   : > { %v6759_v26 = vpack.c.bf16 %v7122_v32, %v7121_v19 }
 0x81c   : > { %6358 = vmatprep.mubr.msk.f32.mxu1 %vm339_vm3, %v3168_v25  ;;  %v8758_v25 = vld [vmem:[#allocation17_spill] sm:$0xff] }
 0x81d   : > { %6359 = vmatmul.mubr.msk.f32.vlgmr.msra.gmra.mrb[24].mxu1 %vm339_vm3, %v3169_v20  ;;  %v7126_v17 = vunpack.i.l.bf16 %v8758_v25  ;;  %v8760_v20 = vld [vmem:[#allocation16_spill] sm:$0xff] }
 0x81e   : > { %6362 = vmatpush3.msk.msra.mxu1 %vm254_vm0, %v8049_v23  ;;  %6363 = vmatprep.mubr.msk.f32.mxu1 %vm433_vm2, %v8752_v45  ;;  %v7132_v45 = vunpack.i.h.bf16 %v8760_v20 }
 0x81f   : > { %6744 = vmatprep.subr.bf16.mxu1 %v6743_v37 }
 0x821   : > { %6364 = vmatmul.mubr.msk.f32.vlgmr.msra.gmra.mrb[26].mxu1 %vm433_vm2, %v8754_v47  ;;  %v7137_v47 = vunpack.i.h.bf16 %v7926_v35 }
 0x822   : > { %6746 = vmatpush3.bf16.msra.mxu1 %v6743_v37  ;;  %6384 = vmatprep.mubr.msk.f32.mxu1 %vm247_vm1, %v8060_v14  ;;  %v7127_v37 = vunpack.i.h.bf16 %v8758_v25  ;;  %v8766_v25 = vld [vmem:[#allocation19_spill] sm:$0xff] }
 0x823   : > { %6748 = vmatprep.subr.bf16.mxu1 %v6747_v42  ;;  %v6771_v6 = vpack.c.bf16 %v7137_v47, %v7136_v8 }
 0x824   : > { %v6763_v43 = vpack.c.bf16 %v7127_v37, %v7126_v17  ;;  %v7152_v17 = vunpack.i.h.bf16 %v7945_v38 }
 0x826   : > { %6750 = vmatpush3.bf16.msra.mxu1 %v6747_v42  ;;  %v7131_v42 = vunpack.i.l.bf16 %v8760_v20  ;;  %v7157_v20 = vunpack.i.h.bf16 %v7943_v40 }
 0x827   : > { %6752 = vmatprep.subr.bf16.mxu1 %v6751_v61 }
 0x828   : > { %v6767_v46 = vpack.c.bf16 %v7132_v45, %v7131_v42  ;;  %v7156_v45 = vunpack.i.l.bf16 %v7943_v40 }
 0x82a   : > { %6754 = vmatpush3.bf16.msra.mxu1 %v6751_v61 }
 0x82b   : > { %6756 = vmatprep.subr.bf16.mxu1 %v6755_v34 }
 0x82e   : > { %6758 = vmatpush3.bf16.msra.mxu1 %v6755_v34 }
 0x82f   : > { %6382 = vmatprep.subr.msk.mxu1 %vm254_vm0, %v8756_v50 }
 0x832   : > { %6383 = vmatpush3.msk.msra.mxu1 %vm254_vm0, %v8756_v50 }
 0x833   : > { %6385 = vmatmul.mubr.msk.f32.vlgmr.msra.gmra.mrb[28].mxu1 %vm247_vm1, %v8071_v31  ;;  %6418 = vmatprep.subr.mxu1 %v8078_v59 }
 0x834   : > { %6419 = vmatpush3.msra.mxu1 %v8078_v59 }
 0x835   : > { %6423 = vmatprep.subr.msk.mxu1 %vm254_vm0, %v8049_v23 }
 0x87d   : > { %v3036_v2 = vpop.permute.xlu0 %3035 }
 0x87e   : > { %3041 = vst.msk [vmem:[%s7820_s9 + $0x10] sm:$0xff] %vm3039_vm11, %v3036_v2  ;;  %v3034_v54 = vpop.permute.xlu1 %3033 }
 0x87f   : > { %3040 = vst.msk [vmem:[%s7820_s9] sm:$0xff] %vm3039_vm11, %v3034_v54 }
 0x8f0   : > { %v6360_v9 = vpop.f32.mrb[24].mxu1 }
 0x8f1   : > { %v3248_v1 = vadd.f32 %v8294_v0, %v6360_v9  ;;  %v3242_v63 = vpop.f32.mrb[25].mxu1 }
 0x8f2   : > { %v3243_v7 = vadd.f32 %v8294_v0, %v3242_v63 }
 0x8f3   : > { %v3252_v28 = vmax.f32 %v3248_v1, 0.0 }
 0x8f4   : > { %v3251_v41 = vmax.f32 %v3243_v7, 0.0  ;;  %v6365_v12 = vpop.f32.mrb[26].mxu1 }
 0x8f5   : > { %v3254_v51 = vadd.f32 %v8301_v52, %v3252_v28  ;;  %v3339_v57 = vadd.f32 %v8307_v56, %v6365_v12  ;;  %v3333_v60 = vpop.f32.mrb[27].mxu1 }
 0x8f6   : > { %v3253_v13 = vadd.f32 %v8301_v52, %v3251_v41  ;;  %v3334_v53 = vadd.f32 %v8307_v56, %v3333_v60 }
 0x8f7   : > { %v3343_v3 = vadd.f32 %v3339_v57, %v3254_v51 }
 0x8f8   : > { %v3342_v62 = vadd.f32 %v3334_v53, %v3253_v13 }
 0x8f9   : > { %v3345_v24 = vmax.f32 %v3343_v3, 0.0  ;;  %v5705_v3 = vld [vmem:[%s8669_s4 + $0xb] ss:$0 sm:$0xff] }
 0x8fa   : > { %v3344_v58 = vmax.f32 %v3342_v62, 0.0 }
 0x8fb   : > { %3350 = vrot.lane.b32.xlu0 %v3345_v24, %s7302_s11  ;;  %v8764_v24 = vld [vmem:[#allocation20_spill] sm:$0xff] }
 0x8fc   : > { %3348 = vrot.lane.b32.xlu1 %v3344_v58, %s7302_s11  ;;  %s8763_s11 = smov 80   ;;  %v7142_v58 = vunpack.i.h.bf16 %v8764_v24 }
 0x906   : > { %v6386_v29 = vpop.f32.mrb[28].mxu1 }
 0x907   : > { %v3480_v4 = vadd.f32 %v6386_v29, %v5696_v55  ;;  %v3474_v21 = vpop.f32.mrb[29].mxu1 }
 0x908   : > { %v3475_v27 = vadd.f32 %v5696_v55, %v3474_v21  ;;  %v7141_v55 = vunpack.i.l.bf16 %v8764_v24  ;;  %v8765_v21 = vld [vmem:[#allocation21_spill] sm:$0xff] }
 0x909   : > { %v3484_v44 = vmax.f32 %v3480_v4, 0.0 }
 0x90a   : > { %v3483_v22 = vmax.f32 %v3475_v27, 0.0  ;;  %v6775_v4 = vpack.c.bf16 %v7142_v58, %v7141_v55  ;;  %v7147_v27 = vunpack.i.h.bf16 %v8765_v21  ;;  %v7171_v58 = vunpack.i.l.bf16 %v7971_v11 }
 0x90c   : > { %6389 = vmatprep.mubr.msk.f32.mxu0 %vm339_vm3, %v3483_v22  ;;  %v7146_v22 = vunpack.i.l.bf16 %v8765_v21 }
 0x90d   : > { %6390 = vmatmul.mubr.msk.f32.vlgmr.msra.gmra.mrb[32].mxu0 %vm339_vm3, %v3484_v44  ;;  %v7151_v44 = vunpack.i.l.bf16 %v7945_v38 }
 0x90e   : > { %6393 = vmatpush3.msk.msra.mxu0 %vm254_vm0, %v8049_v23  ;;  %6394 = vmatprep.mubr.msk.f32.mxu0 %vm433_vm2, %v8759_v39  ;;  %v6779_v37 = vpack.c.bf16 %v7147_v27, %v7146_v22  ;;  %v8767_v39 = vld [vmem:[#allocation22_spill] sm:$0xff] }
 0x90f   : > { %6760 = vmatprep.subr.bf16.mxu0 %v6759_v26  ;;  %v6783_v42 = vpack.c.bf16 %v7152_v17, %v7151_v44 }
 0x911   : > { %6395 = vmatmul.mubr.msk.f32.vlgmr.msra.gmra.mrb[34].mxu0 %vm433_vm2, %v8761_v48 }
 0x912   : > { %6762 = vmatpush3.bf16.msra.mxu0 %v6759_v26  ;;  %6415 = vmatprep.mubr.msk.f32.mxu0 %vm247_vm1, %v8060_v14 }
 0x913   : > { %6764 = vmatprep.subr.bf16.mxu0 %v6763_v43 }
 0x916   : > { %6766 = vmatpush3.bf16.msra.mxu0 %v6763_v43  ;;  %v6787_v43 = vpack.c.bf16 %v7157_v20, %v7156_v45  ;;  %v8770_v45 = vld [vmem:[#allocation24_spill] sm:$0xff] }
 0x917   : > { %6768 = vmatprep.subr.bf16.mxu0 %v6767_v46 }
 0x91a   : > { %6770 = vmatpush3.bf16.msra.mxu0 %v6767_v46 }
 0x91b   : > { %6772 = vmatprep.subr.bf16.mxu0 %v6771_v6 }
 0x91e   : > { %6774 = vmatpush3.bf16.msra.mxu0 %v6771_v6 }
 0x91f   : > { %6413 = vmatprep.subr.msk.mxu0 %vm254_vm0, %v8762_v49 }
 0x922   : > { %6414 = vmatpush3.msk.msra.mxu0 %vm254_vm0, %v8762_v49 }
 0x923   : > { %6416 = vmatmul.mubr.msk.f32.vlgmr.msra.gmra.mrb[36].mxu0 %vm247_vm1, %v8071_v31  ;;  %6449 = vmatprep.subr.mxu0 %v8078_v59 }
 0x924   : > { %6450 = vmatpush3.msra.mxu0 %v8078_v59 }
 0x925   : > { %6454 = vmatprep.subr.msk.mxu0 %vm254_vm0, %v8049_v23 }
 0x96d   : > { %v3351_v35 = vpop.permute.xlu0 %3350 }
 0x96e   : > { %3356 = vst.msk [vmem:[%s7820_s9 + $0x10] sm:$0xff] %vm3354_vm12, %v3351_v35  ;;  %v3349_v61 = vpop.permute.xlu1 %3348 }
 0x96f   : > { %3355 = vst.msk [vmem:[%s7820_s9] sm:$0xff] %vm3354_vm12, %v3349_v61 }
 0x9e0   : > { %v6391_v34 = vpop.f32.mrb[32].mxu0 }
 0x9e1   : > { %v3563_v50 = vadd.f32 %v8294_v0, %v6391_v34  ;;  %v3557_v2 = vpop.f32.mrb[33].mxu0 }
 0x9e2   : > { %v3558_v54 = vadd.f32 %v8294_v0, %v3557_v2 }
 0x9e3   : > { %v3567_v9 = vmax.f32 %v3563_v50, 0.0 }
 0x9e4   : > { %v3566_v1 = vmax.f32 %v3558_v54, 0.0  ;;  %v6396_v63 = vpop.f32.mrb[34].mxu0 }
 0x9e5   : > { %v3569_v7 = vadd.f32 %v8301_v52, %v3567_v9  ;;  %v3654_v28 = vadd.f32 %v8307_v56, %v6396_v63  ;;  %v3648_v41 = vpop.f32.mrb[35].mxu0 }
 0x9e6   : > { %v3568_v12 = vadd.f32 %v8301_v52, %v3566_v1  ;;  %v3649_v51 = vadd.f32 %v8307_v56, %v3648_v41  ;;  %v7162_v41 = vunpack.i.h.bf16 %v7951_v33 }
 0x9e7   : > { %v3658_v57 = vadd.f32 %v3654_v28, %v3569_v7  ;;  %v5714_v7 = vld [vmem:[%s8669_s4 + $0xc] ss:$0 sm:$0xff] }
 0x9e8   : > { %v3657_v60 = vadd.f32 %v3649_v51, %v3568_v12  ;;  %v7161_v12 = vunpack.i.l.bf16 %v7951_v33  ;;  %v7172_v33 = vunpack.i.h.bf16 %v7971_v11 }
 0x9e9   : > { %v3660_v13 = vmax.f32 %v3658_v57, 0.0 }
 0x9ea   : > { %v3659_v53 = vmax.f32 %v3657_v60, 0.0 }
 0x9eb   : > { %3665 = vrot.lane.b32.xlu0 %v3660_v13, %s8763_s11 }
 0x9ec   : > { %3663 = vrot.lane.b32.xlu1 %v3659_v53, %s8763_s11  ;;  %v6791_v53 = vpack.c.bf16 %v7162_v41, %v7161_v12  ;;  %v8776_v12 = vld [vmem:[#allocation30_spill] sm:$0xff] }
 0x9f6   : > { %v6417_v62 = vpop.f32.mrb[36].mxu0 }
 0x9f7   : > { %v3795_v29 = vadd.f32 %v6417_v62, %v5705_v3  ;;  %v3789_v18 = vpop.f32.mrb[37].mxu0  ;;  %v7166_v62 = vunpack.i.l.bf16 %v7973_v10 }
 0x9f8   : > { %v3790_v32 = vadd.f32 %v5705_v3, %v3789_v18  ;;  %v7167_v3 = vunpack.i.h.bf16 %v7973_v10  ;;  %v6799_v10 = vpack.c.bf16 %v7172_v33, %v7171_v58 }
 0x9f9   : > { %v3799_v26 = vmax.f32 %v3795_v29, 0.0  ;;  %v7177_v29 = vunpack.i.h.bf16 %v7979_v15 }
 0x9fa   : > { %v3798_v19 = vmax.f32 %v3790_v32, 0.0  ;;  %v6795_v55 = vpack.c.bf16 %v7167_v3, %v7166_v62 }
 0x9fc   : > { %6420 = vmatprep.mubr.msk.f32.mxu1 %vm339_vm3, %v3798_v19 }
 0x9fd   : > { %6421 = vmatmul.mubr.msk.f32.vlgmr.msra.gmra.mrb[30].mxu1 %vm339_vm3, %v3799_v26 }
 0x9fe   : > { %6424 = vmatpush3.msk.msra.mxu1 %vm254_vm0, %v8049_v23  ;;  %6425 = vmatprep.mubr.msk.f32.mxu1 %vm433_vm2, %v8766_v25 }
 0x9ff   : > { %6776 = vmatprep.subr.bf16.mxu1 %v6775_v4 }
 0xa01   : > { %6426 = vmatmul.mubr.msk.f32.vlgmr.msra.gmra.mrb[32].mxu1 %vm433_vm2, %v8767_v39  ;;  %v5723_v39 = vld [vmem:[%s8669_s4 + $0xd] ss:$0 sm:$0xff] }
 0xa02   : > { %6778 = vmatpush3.bf16.msra.mxu1 %v6775_v4  ;;  %6446 = vmatprep.mubr.msk.f32.mxu1 %vm247_vm1, %v8060_v14 }
 0xa03   : > { %6780 = vmatprep.subr.bf16.mxu1 %v6779_v37 }
 0xa06   : > { %6782 = vmatpush3.bf16.msra.mxu1 %v6779_v37 }
 0xa07   : > { %6784 = vmatprep.subr.bf16.mxu1 %v6783_v42 }
 0xa0a   : > { %6786 = vmatpush3.bf16.msra.mxu1 %v6783_v42  ;;  %v7182_v42 = vunpack.i.h.bf16 %v8770_v45 }
 0xa0b   : > { %6788 = vmatprep.subr.bf16.mxu1 %v6787_v43 }
 0xa0e   : > { %6790 = vmatpush3.bf16.msra.mxu1 %v6787_v43  ;;  %v7181_v43 = vunpack.i.l.bf16 %v8770_v45  ;;  %v8781_v45 = vld [vmem:[#allocation33_spill] sm:$0xff] }
 0xa0f   : > { %6444 = vmatprep.subr.msk.mxu1 %vm254_vm0, %v7957_v5 }
 0xa12   : > { %6445 = vmatpush3.msk.msra.mxu1 %vm254_vm0, %v7957_v5 }
 0xa13   : > { %6447 = vmatmul.mubr.msk.f32.vlgmr.msra.gmra.mrb[34].mxu1 %vm247_vm1, %v8071_v31  ;;  %6480 = vmatprep.subr.mxu1 %v8078_v59 }
 0xa14   : > { %6481 = vmatpush3.msra.mxu1 %v8078_v59 }
 0xa15   : > { %6485 = vmatprep.subr.msk.mxu1 %vm254_vm0, %v8049_v23 }
 0xa5d   : > { %v3666_v40 = vpop.permute.xlu0 %3665 }
 0xa5e   : > { %3671 = vst.msk [vmem:[%s7820_s9 + $0x10] sm:$0xff] %vm3669_vm13, %v3666_v40  ;;  %v3664_v38 = vpop.permute.xlu1 %3663 }
 0xa5f   : > { %3670 = vst.msk [vmem:[%s7820_s9] sm:$0xff] %vm3669_vm13, %v3664_v38 }
 0xad0   : > { %v6422_v48 = vpop.f32.mrb[30].mxu1 }
 0xad1   : > { %v3878_v46 = vadd.f32 %v8294_v0, %v6422_v48  ;;  %v3872_v47 = vpop.f32.mrb[31].mxu1 }
 0xad2   : > { %v3873_v5 = vadd.f32 %v8294_v0, %v3872_v47  ;;  %v6807_v47 = vpack.c.bf16 %v7182_v42, %v7181_v43  ;;  %v7212_v42 = vunpack.i.h.bf16 %v8781_v45  ;;  %v7211_v43 = vunpack.i.l.bf16 %v8781_v45 }
 0xad3   : > { %v3882_v8 = vmax.f32 %v3878_v46, 0.0 }
 0xad4   : > { %v3881_v6 = vmax.f32 %v3873_v5, 0.0  ;;  %v6427_v49 = vpop.f32.mrb[32].mxu1  ;;  %v8771_v5 = vld [vmem:[#allocation25_spill] sm:$0xff] }
 0xad5   : > { %v3884_v35 = vadd.f32 %v8301_v52, %v3882_v8  ;;  %v3969_v61 = vadd.f32 %v8307_v56, %v6427_v49  ;;  %v3963_v34 = vpop.f32.mrb[33].mxu1  ;;  %v7187_v8 = vunpack.i.h.bf16 %v8771_v5 }
 0xad6   : > { %v3883_v50 = vadd.f32 %v8301_v52, %v3881_v6  ;;  %v3964_v2 = vadd.f32 %v8307_v56, %v3963_v34  ;;  %v7186_v6 = vunpack.i.l.bf16 %v8771_v5  ;;  %v8773_v34 = vld [vmem:[#allocation28_spill] sm:$0xff] }
 0xad7   : > { %v3973_v54 = vadd.f32 %v3969_v61, %v3884_v35  ;;  %v8772_v35 = vld [vmem:[#allocation23_spill] sm:$0xff] }
 0xad8   : > { %v3972_v9 = vadd.f32 %v3964_v2, %v3883_v50  ;;  %v6811_v61 = vpack.c.bf16 %v7187_v8, %v7186_v6  ;;  %v7192_v50 = vunpack.i.h.bf16 %v8773_v34  ;;  %v7191_v2 = vunpack.i.l.bf16 %v8773_v34  ;;  %v8784_v6 = vld [vmem:[#allocation35_spill] sm:$0xff] }
 0xad9   : > { %v3975_v1 = vmax.f32 %v3973_v54, 0.0  ;;  %v8774_v54 = vld [vmem:[#allocation26_spill] sm:$0xff] }
 0xada   : > { %v3974_v63 = vmax.f32 %v3972_v9, 0.0  ;;  %v8460_v9 = vld [vmem:[%s7443_s13] sm:$0xff] }
 0xadb   : > { %3980 = vrot.lane.b32.xlu0 %v3975_v1, %s8768_s12  ;;  %v8775_v1 = vld [vmem:[#allocation27_spill] sm:$0xff] }
 0xadc   : > { %3978 = vrot.lane.b32.xlu1 %v3974_v63, %s8768_s12  ;;  %v7197_v63 = vunpack.i.h.bf16 %v8775_v1  ;;  %s8785_s12 = smov 112  }
 0xae6   : > { %v6448_v28 = vpop.f32.mrb[34].mxu1 }
 0xae7   : > { %v4110_v51 = vadd.f32 %v6448_v28, %v5714_v7  ;;  %v4104_v57 = vpop.f32.mrb[35].mxu1  ;;  %v6815_v28 = vpack.c.bf16 %v7192_v50, %v7191_v2 }
 0xae8   : > { %v4105_v60 = vadd.f32 %v5714_v7, %v4104_v57  ;;  %v7196_v7 = vunpack.i.l.bf16 %v8775_v1  ;;  %v8478_v57 = vld [vmem:[%s8667_s2] sm:$0xff] }
 0xae9   : > { %v4114_v24 = vmax.f32 %v4110_v51, 0.0  ;;  %v8471_v51 = vld [vmem:[%s7443_s13 + $0x8] sm:$0xff]  ;;  %s8777_s13 = smov 104  }
 0xaea   : > { %v4113_v13 = vmax.f32 %v4105_v60, 0.0  ;;  %v6819_v41 = vpack.c.bf16 %v7197_v63, %v7196_v7 }
 0xaec   : > { %6451 = vmatprep.mubr.msk.f32.mxu0 %vm339_vm3, %v4113_v13 }
 0xaed   : > { %6452 = vmatmul.mubr.msk.f32.vlgmr.msra.gmra.mrb[38].mxu0 %vm339_vm3, %v4114_v24 }
 0xaee   : > { %6455 = vmatpush3.msk.msra.mxu0 %vm254_vm0, %v8049_v23  ;;  %6456 = vmatprep.mubr.msk.f32.mxu0 %vm433_vm2, %v7969_v30  ;;  %v7176_v23 = vunpack.i.l.bf16 %v7979_v15 }
 0xaef   : > { %6792 = vmatprep.subr.bf16.mxu0 %v6791_v53 }
 0xaf0   : > { %v6803_v30 = vpack.c.bf16 %v7177_v29, %v7176_v23 }
 0xaf1   : > { %6457 = vmatmul.mubr.msk.f32.vlgmr.msra.gmra.mrb[40].mxu0 %vm433_vm2, %v7967_v36  ;;  %v8428_v36 = vld [vmem:[%s8668_s3] sm:$0xf] }
 0xaf2   : > { %6794 = vmatpush3.bf16.msra.mxu0 %v6791_v53  ;;  %6477 = vmatprep.mubr.msk.f32.mxu0 %vm247_vm1, %v8060_v14 }
 0xaf3   : > { %6796 = vmatprep.subr.bf16.mxu0 %v6795_v55 }
 0xaf6   : > { %6798 = vmatpush3.bf16.msra.mxu0 %v6795_v55 }
 0xaf7   : > { %6800 = vmatprep.subr.bf16.mxu0 %v6799_v10 }
 0xafa   : > { %6802 = vmatpush3.bf16.msra.mxu0 %v6799_v10 }
 0xafb   : > { %6804 = vmatprep.subr.bf16.mxu0 %v6803_v30 }
 0xafe   : > { %6806 = vmatpush3.bf16.msra.mxu0 %v6803_v30 }
 0xaff   : > { %6475 = vmatprep.subr.msk.mxu0 %vm254_vm0, %v7977_v16 }
 0xb02   : > { %6476 = vmatpush3.msk.msra.mxu0 %vm254_vm0, %v7977_v16 }
 0xb03   : > { %6478 = vmatmul.mubr.msk.f32.vlgmr.msra.gmra.mrb[42].mxu0 %vm247_vm1, %v8071_v31  ;;  %6511 = vmatprep.subr.mxu0 %v8078_v59 }
 0xb04   : > { %6512 = vmatpush3.msra.mxu0 %v8078_v59 }
 0xb05   : > { %6516 = vmatprep.subr.msk.mxu0 %vm254_vm0, %v8428_v36 }
 0xb4d   : > { %v3981_v11 = vpop.permute.xlu0 %3980 }
 0xb4e   : > { %3986 = vst.msk [vmem:[%s7820_s9 + $0x10] sm:$0xff] %vm3984_vm14, %v3981_v11  ;;  %v3979_v15 = vpop.permute.xlu1 %3978 }
 0xb4f   : > { %3985 = vst.msk [vmem:[%s7820_s9] sm:$0xff] %vm3984_vm14, %v3979_v15 }
 0xbc0   : > { %v6453_v16 = vpop.f32.mrb[38].mxu0 }
 0xbc1   : > { %v4193_v14 = vadd.f32 %v8294_v0, %v6453_v16  ;;  %v4187_v31 = vpop.f32.mrb[39].mxu0 }
 0xbc2   : > { %v4188_v18 = vadd.f32 %v8294_v0, %v4187_v31 }
 0xbc3   : > { %v4197_v59 = vmax.f32 %v4193_v14, 0.0 }
 0xbc4   : > { %v4196_v32 = vmax.f32 %v4188_v18, 0.0  ;;  %v6458_v19 = vpop.f32.mrb[40].mxu0  ;;  %v5732_v18 = vld [vmem:[%s8669_s4 + $0xe] ss:$0 sm:$0xff] }
 0xbc5   : > { %v4199_v4 = vadd.f32 %v8301_v52, %v4197_v59  ;;  %v4284_v21 = vadd.f32 %v8307_v56, %v6458_v19  ;;  %v4278_v27 = vpop.f32.mrb[41].mxu0 }
 0xbc6   : > { %v4198_v22 = vadd.f32 %v8301_v52, %v4196_v32  ;;  %v4279_v26 = vadd.f32 %v8307_v56, %v4278_v27  ;;  %v8778_v32 = vld [vmem:[#allocation29_spill] sm:$0xff] }
 0xbc7   : > { %v4288_v25 = vadd.f32 %v4284_v21, %v4199_v4  ;;  %v7202_v19 = vunpack.i.h.bf16 %v8778_v32  ;;  %v7201_v4 = vunpack.i.l.bf16 %v8778_v32  ;;  %v8787_v32 = vld [vmem:[#allocation37_spill] sm:$0xff] }
 0xbc8   : > { %v4287_v37 = vadd.f32 %v4279_v26, %v4198_v22 }
 0xbc9   : > { %v4290_v17 = vmax.f32 %v4288_v25, 0.0  ;;  %v6823_v25 = vpack.c.bf16 %v7202_v19, %v7201_v4  ;;  %v5253_v4 = vld [vmem:[%s8666_s1 + $0x68] sm:$0xff] }
 0xbca   : > { %v4289_v44 = vmax.f32 %v4287_v37, 0.0  ;;  %v8779_v37 = vld [vmem:[#allocation34_spill] sm:$0xff] }
 0xbcb   : > { %4295 = vrot.lane.b32.xlu0 %v4290_v17, %s8769_s10  ;;  %v7207_v17 = vunpack.i.h.bf16 %v8779_v37 }
 0xbcc   : > { %4293 = vrot.lane.b32.xlu1 %v4289_v44, %s8769_s10  ;;  %v7206_v44 = vunpack.i.l.bf16 %v8779_v37  ;;  %s7233_s10 = sshll.u32 %s7316_s30, 4  ;;  %s7234_s10 = int_to_ptr.vmem [resolvable:$false] %s7233_s10 }
 0xbcd   : > { %s7235_s17 = scalar_lea.vmem %s7234_s10, 1024  ;;  %p7236_p0 = scmp.lt.s32.totalorder %s8615_s8, %s7234_s10 }
 0xbce   : > { %p7237_p1 = scmp.lt.s32.totalorder %s7235_s17, %s7229_s14 }
 0xbd0   : > { %p7238_p2 = por %p7237_p1, %p7236_p0 }
 0xbd2   : > { %p7239_p3 = pnand %p7238_p2, %p7232_p13 }
 0xbd6   : > { %v6479_v20 = vpop.f32.mrb[42].mxu0 }
 0xbd7   : > { %v4425_v40 = vadd.f32 %v6479_v20, %v5723_v39  ;;  %v4419_v38 = vpop.f32.mrb[43].mxu0  ;;  %v8780_v20 = vld [vmem:[#allocation32_spill] sm:$0xff] }
 0xbd8   : > { %v4420_v48 = vadd.f32 %v5723_v39, %v4419_v38  ;;  %v8782_v38 = vld [vmem:[#allocation31_spill] sm:$0xff] }
 0xbd9   : > { %v4429_v49 = vmax.f32 %v4425_v40, 0.0  ;;  %v6827_v40 = vpack.c.bf16 %v7207_v17, %v7206_v44 }
 0xbda   : > { %v4428_v46 = vmax.f32 %v4420_v48, 0.0  ;;  %v6831_v48 = vpack.c.bf16 %v7212_v42, %v7211_v43 }
 0xbdc   : > { %6482 = vmatprep.mubr.msk.f32.mxu1 %vm339_vm3, %v4428_v46  ;;  %v8783_v46 = vld [vmem:[#allocation36_spill] sm:$0xff] }
 0xbdd   : > { %6483 = vmatmul.mubr.msk.f32.vlgmr.msra.gmra.mrb[36].mxu1 %vm339_vm3, %v4429_v49  ;;  %v7216_v5 = vunpack.i.l.bf16 %v8783_v46 }
 0xbde   : > { %6486 = vmatpush3.msk.msra.mxu1 %vm254_vm0, %v8428_v36  ;;  %6487 = vmatprep.mubr.msk.f32.mxu1 %vm433_vm2, %v8772_v35 }
 0xbdf   : > { %6808 = vmatprep.subr.bf16.mxu1 %v6807_v47 }
 0xbe1   : > { %6488 = vmatmul.mubr.msk.f32.vlgmr.msra.gmra.mrb[38].mxu1 %vm433_vm2, %v8774_v54 }
 0xbe2   : > { %6810 = vmatpush3.bf16.msra.mxu1 %v6807_v47  ;;  %6508 = vmatprep.mubr.msk.f32.mxu1 %vm247_vm1, %v8460_v9  ;;  %v7217_v47 = vunpack.i.h.bf16 %v8783_v46 }
 0xbe3   : > { %6812 = vmatprep.subr.bf16.mxu1 %v6811_v61 }
 0xbe4   : > { %v6835_v8 = vpack.c.bf16 %v7217_v47, %v7216_v5 }
 0xbe6   : > { %6814 = vmatpush3.bf16.msra.mxu1 %v6811_v61 }
 0xbe7   : > { %6816 = vmatprep.subr.bf16.mxu1 %v6815_v28 }
 0xbea   : > { %6818 = vmatpush3.bf16.msra.mxu1 %v6815_v28 }
 0xbeb   : > { %6820 = vmatprep.subr.bf16.mxu1 %v6819_v41 }
 0xbee   : > { %6822 = vmatpush3.bf16.msra.mxu1 %v6819_v41 }
 0xbef   : > { %6506 = vmatprep.subr.msk.mxu1 %vm254_vm0, %v8776_v12 }
 0xbf2   : > { %6507 = vmatpush3.msk.msra.mxu1 %vm254_vm0, %v8776_v12 }
 0xbf3   : > { %6509 = vmatmul.mubr.msk.f32.vlgmr.msra.gmra.mrb[40].mxu1 %vm247_vm1, %v8471_v51  ;;  %6542 = vmatprep.subr.mxu1 %v8478_v57 }
 0xbf4   : > { %6543 = vmatpush3.msra.mxu1 %v8478_v57 }
 0xbf5   : > { %6547 = vmatprep.subr.msk.mxu1 %vm254_vm0, %v8428_v36 }
 0xc3d   : > { %v4296_v60 = vpop.permute.xlu0 %4295 }
 0xc3e   : > { %4301 = vst.msk [vmem:[%s7820_s9 + $0x10] sm:$0xff] %vm4299_vm15, %v4296_v60  ;;  %v4294_v13 = vpop.permute.xlu1 %4293 }
 0xc3f   : > { %4300 = vst.msk [vmem:[%s7820_s9] sm:$0xff] %vm4299_vm15, %v4294_v13 }
 0xcb0   : > { %v6484_v53 = vpop.f32.mrb[36].mxu1 }
 0xcb1   : > { %v4508_v3 = vadd.f32 %v8294_v0, %v6484_v53  ;;  %v4502_v62 = vpop.f32.mrb[37].mxu1 }
 0xcb2   : > { %v4503_v24 = vadd.f32 %v8294_v0, %v4502_v62  ;;  %v5741_v62 = vld [vmem:[%s8669_s4 + $0xf] ss:$0 sm:$0xff] }
 0xcb3   : > { %v4512_v33 = vmax.f32 %v4508_v3, 0.0 }
 0xcb4   : > { %v4511_v58 = vmax.f32 %v4503_v24, 0.0  ;;  %v6489_v55 = vpop.f32.mrb[38].mxu1 }
 0xcb5   : > { %v4514_v10 = vadd.f32 %v8301_v52, %v4512_v33  ;;  %v4599_v29 = vadd.f32 %v8307_v56, %v6489_v55  ;;  %v4593_v23 = vpop.f32.mrb[39].mxu1 }
 0xcb6   : > { %v4513_v30 = vadd.f32 %v8301_v52, %v4511_v58  ;;  %v4594_v11 = vadd.f32 %v8307_v56, %v4593_v23 }
 0xcb7   : > { %v4603_v15 = vadd.f32 %v4599_v29, %v4514_v10  ;;  %v5247_v10 = vld [vmem:[%s8666_s1 + $0x8] sm:$0xff]  ;;  %v5248_v29 = vld [vmem:[%s8666_s1 + $0x18] sm:$0xff] }
 0xcb8   : > { %v4602_v16 = vadd.f32 %v4594_v11, %v4513_v30  ;;  %v6839_v11 = vpack.c.bf16 %v5248_v29, %v5247_v10 }
 0xcb9   : > { %v4605_v14 = vmax.f32 %v4603_v15, 0.0  ;;  %v5249_v15 = vld [vmem:[%s8666_s1 + $0x28] sm:$0xff] }
 0xcba   : > { %v4604_v31 = vmax.f32 %v4602_v16, 0.0  ;;  %v5250_v16 = vld [vmem:[%s8666_s1 + $0x38] sm:$0xff] }
 0xcbb   : > { %4610 = vrot.lane.b32.xlu0 %v4605_v14, %s8777_s13  ;;  %v8786_v14 = vld [vmem:[#allocation38_spill] sm:$0xff] }
 0xcbc   : > { %4608 = vrot.lane.b32.xlu1 %v4604_v31, %s8777_s13  ;;  %v6843_v31 = vpack.c.bf16 %v5250_v16, %v5249_v15 }
 0xcc6   : > { %v6510_v59 = vpop.f32.mrb[40].mxu1 }
 0xcc7   : > { %v4740_v21 = vadd.f32 %v6510_v59, %v5732_v18  ;;  %v4734_v27 = vpop.f32.mrb[41].mxu1  ;;  %v5252_v59 = vld [vmem:[%s8666_s1 + $0x58] sm:$0xff] }
 0xcc8   : > { %v4735_v22 = vadd.f32 %v5732_v18, %v4734_v27  ;;  %v5251_v18 = vld [vmem:[%s8666_s1 + $0x48] sm:$0xff] }
 0xcc9   : > { %v4744_v39 = vmax.f32 %v4740_v21, 0.0  ;;  %v6847_v19 = vpack.c.bf16 %v5252_v59, %v5251_v18  ;;  %v5254_v21 = vld [vmem:[%s8666_s1 + $0x78] sm:$0xff] }
 0xcca   : > { %v4743_v26 = vmax.f32 %v4735_v22, 0.0  ;;  %v6851_v27 = vpack.c.bf16 %v5254_v21, %v5253_v4 }
 0xccc   : > { %6513 = vmatprep.mubr.msk.f32.mxu0 %vm339_vm3, %v4743_v26 }
 0xccd   : > { %6514 = vmatmul.mubr.msk.f32.vlgmr.msra.gmra.mrb[44].mxu0 %vm339_vm3, %v4744_v39 }
 0xcce   : > { %6517 = vmatpush3.msk.msra.mxu0 %vm254_vm0, %v8428_v36  ;;  %6518 = vmatprep.mubr.msk.f32.mxu0 %vm433_vm2, %v8780_v20 }
 0xccf   : > { %6824 = vmatprep.subr.bf16.mxu0 %v6823_v25 }
 0xcd1   : > { %6519 = vmatmul.mubr.msk.f32.vlgmr.msra.gmra.mrb[46].mxu0 %vm433_vm2, %v8782_v38 }
 0xcd2   : > { %6826 = vmatpush3.bf16.msra.mxu0 %v6823_v25  ;;  %6539 = vmatprep.mubr.msk.f32.mxu0 %vm247_vm1, %v8460_v9 }
 0xcd3   : > { %6828 = vmatprep.subr.bf16.mxu0 %v6827_v40 }
 0xcd6   : > { %6830 = vmatpush3.bf16.msra.mxu0 %v6827_v40 }
 0xcd7   : > { %6832 = vmatprep.subr.bf16.mxu0 %v6831_v48 }
 0xcda   : > { %6834 = vmatpush3.bf16.msra.mxu0 %v6831_v48 }
 0xcdb   : > { %6836 = vmatprep.subr.bf16.mxu0 %v6835_v8 }
 0xcde   : > { %6838 = vmatpush3.bf16.msra.mxu0 %v6835_v8  ;;  %v5750_v8 = vld [vmem:[%s8669_s4 + $0x10] ss:$0 sm:$0xff] }
 0xcdf   : > { %6537 = vmatprep.subr.msk.mxu0 %vm254_vm0, %v8784_v6 }
 0xce2   : > { %6538 = vmatpush3.msk.msra.mxu0 %vm254_vm0, %v8784_v6 }
 0xce3   : > { %6540 = vmatmul.mubr.msk.f32.vlgmr.msra.gmra.mrb[48].mxu0 %vm247_vm1, %v8471_v51  ;;  %6573 = vmatprep.subr.mxu0 %v8478_v57 }
 0xce4   : > { %6574 = vmatpush3.msra.mxu0 %v8478_v57 }
 0xce5   : > { %6578 = vmatprep.subr.msk.mxu0 %vm254_vm0, %v8428_v36 }
 0xd2d   : > { %v4611_v49 = vpop.permute.xlu0 %4610 }
 0xd2e   : > { %4616 = vst.msk [vmem:[%s7820_s9 + $0x10] sm:$0xff] %vm4614_vm4, %v4611_v49  ;;  %v4609_v35 = vpop.permute.xlu1 %4608 }
 0xd2f   : > { %4615 = vst.msk [vmem:[%s7820_s9] sm:$0xff] %vm4614_vm4, %v4609_v35 }
 0xda0   : > { %v6515_v61 = vpop.f32.mrb[44].mxu0 }
 0xda1   : > { %v4823_v34 = vadd.f32 %v8294_v0, %v6515_v61  ;;  %v4817_v50 = vpop.f32.mrb[45].mxu0 }
 0xda2   : > { %v4818_v2 = vadd.f32 %v8294_v0, %v4817_v50 }
 0xda3   : > { %v4827_v54 = vmax.f32 %v4823_v34, 0.0 }
 0xda4   : > { %v4826_v1 = vmax.f32 %v4818_v2, 0.0  ;;  %v6520_v63 = vpop.f32.mrb[46].mxu0  ;;  %v8789_v2 = vld [vmem:[#allocation40_spill] sm:$0xff] }
 0xda5   : > { %v4829_v7 = vadd.f32 %v8301_v52, %v4827_v54  ;;  %v4914_v28 = vadd.f32 %v8307_v56, %v6520_v63  ;;  %v4908_v41 = vpop.f32.mrb[47].mxu0  ;;  %v8790_v54 = vld [vmem:[#allocation39_spill] sm:$0xff] }
 0xda6   : > { %v4828_v12 = vadd.f32 %v8301_v52, %v4826_v1  ;;  %v4909_v57 = vadd.f32 %v8307_v56, %v4908_v41 }
 0xda7   : > { %v4918_v60 = vadd.f32 %v4914_v28, %v4829_v7 }
 0xda8   : > { %v4917_v13 = vadd.f32 %v4909_v57, %v4828_v12 }
 0xda9   : > { %v4920_v53 = vmax.f32 %v4918_v60, 0.0 }
 0xdaa   : > { %v4919_v3 = vmax.f32 %v4917_v13, 0.0 }
 0xdab   : > { %4925 = vrot.lane.b32.xlu0 %v4920_v53, %s8785_s12 }
 0xdac   : > { %4923 = vrot.lane.b32.xlu1 %v4919_v3, %s8785_s12 }
 0xdb6   : > { %v6541_v24 = vpop.f32.mrb[48].mxu0 }
 0xdb7   : > { %v5055_v33 = vadd.f32 %v6541_v24, %v5741_v62  ;;  %v5049_v58 = vpop.f32.mrb[49].mxu0 }
 0xdb8   : > { %v5050_v55 = vadd.f32 %v5741_v62, %v5049_v58 }
 0xdb9   : > { %v5059_v30 = vmax.f32 %v5055_v33, 0.0 }
 0xdba   : > { %v5058_v23 = vmax.f32 %v5050_v55, 0.0 }
 0xdbc   : > { %6544 = vmatprep.mubr.msk.f32.mxu1 %vm339_vm3, %v5058_v23 }
 0xdbd   : > { %6545 = vmatmul.mubr.msk.f32.vlgmr.msra.gmra.mrb[42].mxu1 %vm339_vm3, %v5059_v30 }
 0xdbe   : > { %6548 = vmatpush3.msk.msra.mxu1 %vm254_vm0, %v8428_v36  ;;  %6549 = vmatprep.mubr.msk.f32.mxu1 %vm433_vm2, %v8786_v14 }
 0xdbf   : > { %6840 = vmatprep.subr.bf16.mxu1 %v6839_v11 }
 0xdc1   : > { %6550 = vmatmul.mubr.msk.f32.vlgmr.msra.gmra.mrb[44].mxu1 %vm433_vm2, %v8787_v32 }
 0xdc2   : > { %6842 = vmatpush3.bf16.msra.mxu1 %v6839_v11  ;;  %6570 = vmatprep.mubr.msk.f32.mxu1 %vm247_vm1, %v8460_v9  ;;  %v5255_v9 = vld [vmem:[%s8666_s1 + $0x88] sm:$0xf] }
 0xdc3   : > { %6844 = vmatprep.subr.bf16.mxu1 %v6843_v31 }
 0xdc6   : > { %6846 = vmatpush3.bf16.msra.mxu1 %v6843_v31 }
 0xdc7   : > { %6848 = vmatprep.subr.bf16.mxu1 %v6847_v19 }
 0xdca   : > { %6850 = vmatpush3.bf16.msra.mxu1 %v6847_v19 }
 0xdcb   : > { %6852 = vmatprep.subr.bf16.mxu1 %v6851_v27 }
 0xdce   : > { %6854 = vmatpush3.bf16.msra.mxu1 %v6851_v27 }
 0xdcf   : > { %6568 = vmatprep.subr.msk.mxu1 %vm254_vm0, %v5255_v9 }
 0xdd2   : > { %6569 = vmatpush3.msk.msra.mxu1 %vm254_vm0, %v5255_v9 }
 0xdd3   : > { %6571 = vmatmul.mubr.msk.f32.vlgmr.msra.gmra.mrb[46].mxu1 %vm247_vm1, %v8471_v51  ;;  %vm5244_vm1 = vcmask 1048512  }
 0xe1d   : > { %v4926_v22 = vpop.permute.xlu0 %4925 }
 0xe1e   : > { %4931 = vst.msk [vmem:[%s7820_s9 + $0x10] sm:$0xff] %vm4929_vm5, %v4926_v22  ;;  %v4924_v26 = vpop.permute.xlu1 %4923 }
 0xe1f   : > { %4930 = vst.msk [vmem:[%s7820_s9] sm:$0xff] %vm4929_vm5, %v4924_v26 }
 0xe90   : > { %v6546_v25 = vpop.f32.mrb[42].mxu1 }
 0xe91   : > { %v5138_v37 = vadd.f32 %v8294_v0, %v6546_v25  ;;  %v5132_v17 = vpop.f32.mrb[43].mxu1 }
 0xe92   : > { %v5133_v44 = vadd.f32 %v8294_v0, %v5132_v17 }
 0xe93   : > { %v5142_v39 = vmax.f32 %v5138_v37, 0.0 }
 0xe94   : > { %v5141_v20 = vmax.f32 %v5133_v44, 0.0  ;;  %v6551_v45 = vpop.f32.mrb[44].mxu1 }
 0xe95   : > { %v5144_v42 = vadd.f32 %v8301_v52, %v5142_v39  ;;  %v5229_v43 = vadd.f32 %v8307_v56, %v6551_v45  ;;  %v5223_v40 = vpop.f32.mrb[45].mxu1 }
 0xe96   : > { %v5143_v51 = vadd.f32 %v8301_v52, %v5141_v20  ;;  %v5224_v38 = vadd.f32 %v8307_v56, %v5223_v40 }
 0xe97   : > { %v5233_v48 = vadd.f32 %v5229_v43, %v5144_v42 }
 0xe98   : > { %v5232_v46 = vadd.f32 %v5224_v38, %v5143_v51 }
 0xe99   : > { %v5235_v47 = vmax.f32 %v5233_v48, 0.0 }
 0xe9a   : > { %v5234_v5 = vmax.f32 %v5232_v46, 0.0 }
 0xe9b   : > { %5240 = vrot.lane.b32.xlu0 %v5235_v47, %s8788_s6 }
 0xe9c   : > { %5238 = vrot.lane.b32.xlu1 %v5234_v5, %s8788_s6 }
 0xea6   : > { %v6572_v6 = vpop.f32.mrb[46].mxu1 }
 0xea7   : > { %v5336_v49 = vadd.f32 %v6572_v6, %v5750_v8  ;;  %v5330_v35 = vpop.f32.mrb[47].mxu1 }
 0xea8   : > { %v5331_v61 = vadd.f32 %v5750_v8, %v5330_v35 }
 0xea9   : > { %v5340_v50 = vmax.f32 %v5336_v49, 0.0 }
 0xeaa   : > { %v5339_v34 = vmax.f32 %v5331_v61, 0.0 }
 0xeac   : > { %6575 = vmatprep.mubr.msk.f32.mxu0 %vm339_vm3, %v5339_v34 }
 0xead   : > { %6576 = vmatmul.mubr.msk.f32.vlgmr.msra.gmra.mrb[50].mxu0 %vm339_vm3, %v5340_v50 }
 0xeae   : > { %6579 = vmatpush3.msk.msra.mxu0 %vm254_vm0, %v8428_v36  ;;  %6580 = vmatprep.mubr.msk.f32.mxu0 %vm433_vm2, %v8789_v2 }
 0xeb1   : > { %6581 = vmatmul.mubr.msk.f32.vlgmr.msra.gmra.mrb[52].mxu0 %vm433_vm2, %v8790_v54 }
 0xf0d   : > { %v5241_v1 = vpop.permute.xlu0 %5240 }
 0xf0e   : > { %5246 = vst.msk [vmem:[%s7820_s9 + $0x10] sm:$0xff] %vm5244_vm1, %v5241_v1  ;;  %v5239_v63 = vpop.permute.xlu1 %5238 }
 0xf0f   : > { %5245 = vst.msk [vmem:[%s7820_s9] sm:$0xff] %vm5244_vm1, %v5239_v63 }
 0xf80   : > { %v6577_v7 = vpop.f32.mrb[50].mxu0 }
 0xf81   : > { %v5419_v28 = vadd.f32 %v8294_v0, %v6577_v7  ;;  %v5413_v41 = vpop.f32.mrb[51].mxu0 }
 0xf82   : > { %v5414_v12 = vadd.f32 %v8294_v0, %v5413_v41 }
 0xf83   : > { %v5423_v36 = vmax.f32 %v5419_v28, 0.0 }
 0xf84   : > { %v5422_v57 = vmax.f32 %v5414_v12, 0.0  ;;  %v6582_v60 = vpop.f32.mrb[52].mxu0 }
 0xf85   : > { %v5425_v13 = vadd.f32 %v8301_v52, %v5423_v36  ;;  %v5510_v53 = vadd.f32 %v8307_v56, %v6582_v60  ;;  %v5504_v3 = vpop.f32.mrb[53].mxu0 }
 0xf86   : > { %v5424_v62 = vadd.f32 %v8301_v52, %v5422_v57  ;;  %v5505_v24 = vadd.f32 %v8307_v56, %v5504_v3 }
 0xf87   : > { %v5514_v33 = vadd.f32 %v5510_v53, %v5425_v13 }
 0xf88   : > { %v5513_v0 = vadd.f32 %v5505_v24, %v5424_v62 }
 0xf89   : > { %v5516_v58 = vmax.f32 %v5514_v33, 0.0 }
 0xf8a   : > { %v5515_v55 = vmax.f32 %v5513_v0, 0.0 }
 0xf8b   : > { %5518 = vst.msk [vmem:[%s7820_s9 + $0x18] sm:$0xff] %vm339_vm3, %v5516_v58 }
 0xf8c   : > { %5517 = vst.msk [vmem:[%s7820_s9 + $0x8] sm:$0xff] %vm339_vm3, %v5515_v55 }
 0xf8d   : > { %7242 = shalt.err (!%p7239_p3)
}
 0xf8e   : > { %s7243_s16 = scalar_lea.hbm %s8613_s23, 512  ;;  %s7247_s6 = scalar_lea.hbm %s8670_s5, 1024 }
 0xf8f   : > { %p7244_p4 = scmp.ne.s32.totalorder %s8613_s23, %s7243_s16  ;;  %p7248_p9 = scmp.lt.u32.totalorder %s8613_s23, %s8670_s5 }
 0xf90   : > { %p7249_p10 = scmp.lt.u32.totalorder %s7247_s6, %s7243_s16  ;;  %p7251_p12 = scmp.lt.u32.totalorder %s7243_s16, %s8613_s23 }
 0xf91   : > { %p7245_p7 = pnand %p7244_p4, %p7386_p5 }
 0xf92   : > { %p7250_p11 = por %p7249_p10, %p7248_p9 }
 0xf93   : > { %p7246_p8 = pneg %p7245_p7 }
 0xf94   : > { %p7252_p13 = por %p7251_p12, %p7250_p11 }
 0xf96   : > { %p7253_p0 = pnand %p7252_p13, %p7246_p8 }
 0xf98   : > { %7256 = shalt.err (!%p7253_p0)
}
 0xf99   : > { %s7317_s25 = smov 256  }
 0xf9a   : > { %6855 = dma.vmem_to_hbm [thread:$0]  (%p7386_p5), %s8615_s8, 512, %s8613_s23, %s8623_s22, %s7317_s25, %s7317_s25, %s7313_s15  }
 0xf9b PF: > { %p6861_p1 = scmp.ge.s32.totalorder %s7291_s21, 2  ;;  %s5549_s12 = sand.u32 1, %s7279_s18  }
 0xf9c   : > { %s5550_s26 = scalar_lea.sflag [#allocation3], %s5549_s12 }
 0xf9d   : > { %p6858_p2 = pnand %p6861_p1, %p7390_p6 }
 0xf9f   : > { %7274 = dma.done.wait (!%p6858_p2), %s5550_s26, 512  }
 0xfa0   : > { %7276 = vsyncadd (!%p6858_p2), %s5550_s26, 4294966784  ;;  %p15_p3 = scmp.ge.s32.totalorder %s7373_s24, 4   ;;  %s8791_s18 = smov %s7283_s19 }
 0xfa1   : > { %s8792_s19 = smov %s7287_s20  ;;  %s8793_s20 = smov %s7384_s27 }
 0xfa2   : > { %s8794_s21 = smov %s7373_s24  ;;  %17 = sbr.rel (!%p15_p3) target bundleno = 3 (0x3), region = 75 }
 0xfa9   :  { %5555 = vsyncpa [#allocation3], 1 }
 0xfaa   :  { %5557 = vsyncpa [#allocation3 + $0x1], 1 }

</bundles_post_ra>
